<compile_context>
chip_gen: v7x
topology: tpu7x:2x2x1
jax: 0.10.0
libtpu: 0.0.40
codegen_flags: <defaults>
</compile_context>

<pallas_src>
import functools

import jax
import jax.numpy as jnp
from jax import lax
from jax.experimental import pallas as pl
from jax.experimental.pallas import tpu as pltpu

EPS = 1e-3  # PyTorch BatchNorm2d eps=0.001
VMEM_LIMIT = 32 * 1024 * 1024


# --------------------------------------------------------------------------------------
# Small helpers
# --------------------------------------------------------------------------------------
def _round_up(x, m):
    return (x + m - 1) // m * m


def _pick_tile(dim, pref, unit=16, want_tiles=2):
    """Row-tile size (multiple of `unit`): prefer `pref`, but keep >= `want_tiles`
    grid steps when the dimension allows it (keeps both v7x TensorCores busy)."""
    t = min(pref, _round_up(dim, unit))
    if dim > unit and _round_up(dim, t) // t < want_tiles:
        t = max(unit, _round_up(-(-dim // want_tiles), unit))
    return t


# --------------------------------------------------------------------------------------
# Kernel 1: fused branch0 + branch1[0]  (one 896->256 matmul, two 128-wide outputs)
# --------------------------------------------------------------------------------------
def _dual_conv1x1_kernel(a_ref, w_ref, b_ref, o0_ref, o1_ref):
    y = jnp.dot(a_ref[...], w_ref[...], preferred_element_type=jnp.float32)
    y = jnp.maximum(y + b_ref[...], 0.0)
    c = o0_ref.shape[-1]
    o0_ref[...] = y[:, :c].astype(o0_ref.dtype)
    o1_ref[...] = y[:, c:].astype(o1_ref.dtype)


def dual_conv1x1(a, w, b, *, tm):
    """relu(a @ w + b), split column-wise into two (M, 128) outputs."""
    M_pad, K = a.shape
    N2 = w.shape[1]
    c = N2 // 2
    grid = (M_pad // tm,)
    return pl.pallas_call(
        _dual_conv1x1_kernel,
        out_shape=(jax.ShapeDtypeStruct((M_pad, c), jnp.bfloat16),
                   jax.ShapeDtypeStruct((M_pad, c), jnp.bfloat16)),
        grid=grid,
        in_specs=[pl.BlockSpec((tm, K), lambda i: (i, 0)),
                  pl.BlockSpec((K, N2), lambda i: (0, 0)),
                  pl.BlockSpec((1, N2), lambda i: (0, 0))],
        out_specs=(pl.BlockSpec((tm, c), lambda i: (i, 0)),
                   pl.BlockSpec((tm, c), lambda i: (i, 0))),
        compiler_params=pltpu.CompilerParams(
            dimension_semantics=("parallel",),
            vmem_limit_bytes=VMEM_LIMIT),
        cost_estimate=pl.CostEstimate(
            flops=2 * M_pad * K * N2, transcendentals=0,
            bytes_accessed=int(a.size * 2 + w.size * 2 + b.size * 4 + 2 * M_pad * c * 2)),
    )(a, w, b)


# --------------------------------------------------------------------------------------
# Kernel 2: 7-tap conv along the LEADING axis of a (S+6, R, 128) activation.
# Used for both the (1,7) conv (W leading) and the (7,1) conv (H leading).
# No im2col in HBM: the 7 taps are accumulated in-kernel with 2-D MXU dots.
# --------------------------------------------------------------------------------------
def _tap_conv_kernel(a_ref, w_ref, b_ref, o_ref, *, taps):
    # a_ref: (S_out + taps - 1, tr, C) bf16   w_ref: (taps, C, Cout) bf16
    # b_ref: (1, Cout) f32                    o_ref: (S_out, tr, Cout) bf16
    bias = b_ref[...]
    s_out = o_ref.shape[0]
    for s in range(s_out):
        acc = jnp.dot(a_ref[s], w_ref[0], preferred_element_type=jnp.float32)
        for j in range(1, taps):
            acc = acc + jnp.dot(a_ref[s + j], w_ref[j],
                                preferred_element_type=jnp.float32)
        o_ref[s] = jnp.maximum(acc + bias, 0.0).astype(o_ref.dtype)


def tap_conv(a, w, b, *, tr):
    """relu(conv_along_leading_axis(a, w) + b).  a: (S_in, R_pad, C) bf16."""
    S_in, R_pad, C = a.shape
    taps, _, Cout = w.shape
    S_out = S_in - taps + 1
    grid = (R_pad // tr,)
    return pl.pallas_call(
        functools.partial(_tap_conv_kernel, taps=taps),
        out_shape=jax.ShapeDtypeStruct((S_out, R_pad, Cout), jnp.bfloat16),
        grid=grid,
        in_specs=[pl.BlockSpec((S_in, tr, C), lambda i: (0, i, 0)),
                  pl.BlockSpec((taps, C, Cout), lambda i: (0, 0, 0)),
                  pl.BlockSpec((1, Cout), lambda i: (0, 0))],
        out_specs=pl.BlockSpec((S_out, tr, Cout), lambda i: (0, i, 0)),
        compiler_params=pltpu.CompilerParams(
            dimension_semantics=("parallel",),
            vmem_limit_bytes=VMEM_LIMIT),
        cost_estimate=pl.CostEstimate(
            flops=2 * S_out * R_pad * taps * C * Cout, transcendentals=0,
            bytes_accessed=int(a.size * 2 + w.size * 2 + b.size * 4
                               + S_out * R_pad * Cout * 2)),
    )(a, w, b)


# --------------------------------------------------------------------------------------
# Kernel 3: final 1x1 conv (256->896, bias) fused with "*scale + residual" and ReLU.
# Takes x0 and x1 separately (two accumulating dots), residual in bf16, output in bf16.
# --------------------------------------------------------------------------------------
def _residual_conv1x1_kernel(a0_ref, a1_ref, w0_ref, w1_ref, b_ref, r_ref, o_ref,
                             *, scale):
    y = jnp.dot(a0_ref[...], w0_ref[...], preferred_element_type=jnp.float32)
    y = y + jnp.dot(a1_ref[...], w1_ref[...], preferred_element_type=jnp.float32)
    y = (y + b_ref[...]) * scale + r_ref[...].astype(jnp.float32)
    o_ref[...] = jnp.maximum(y, 0.0).astype(o_ref.dtype)


def residual_conv1x1(a0, a1, w0, w1, b, resid, *, scale, tm, tn=128):
    M_pad, C0 = a0.shape
    Nout = w0.shape[1]
    grid = (M_pad // tm, Nout // tn)
    return pl.pallas_call(
        functools.partial(_residual_conv1x1_kernel, scale=float(scale)),
        out_shape=jax.ShapeDtypeStruct((M_pad, Nout), jnp.bfloat16),
        grid=grid,
        in_specs=[pl.BlockSpec((tm, C0), lambda i, j: (i, 0)),
                  pl.BlockSpec((tm, C0), lambda i, j: (i, 0)),
                  pl.BlockSpec((C0, tn), lambda i, j: (0, j)),
                  pl.BlockSpec((C0, tn), lambda i, j: (0, j)),
                  pl.BlockSpec((1, tn), lambda i, j: (0, j)),
                  pl.BlockSpec((tm, tn), lambda i, j: (i, j))],
        out_specs=pl.BlockSpec((tm, tn), lambda i, j: (i, j)),
        compiler_params=pltpu.CompilerParams(
            dimension_semantics=("parallel", "parallel"),
            vmem_limit_bytes=VMEM_LIMIT),
        cost_estimate=pl.CostEstimate(
            flops=2 * M_pad * (2 * C0) * Nout, transcendentals=0,
            bytes_accessed=int(a0.size * 2 + a1.size * 2 + w0.size * 2 + w1.size * 2
                               + b.size * 4 + resid.size * 2 + M_pad * Nout * 2)),
    )(a0, a1, w0, w1, b, resid)


# --------------------------------------------------------------------------------------
# Plain-JAX glue: BN fold + parameter setup
# --------------------------------------------------------------------------------------
def _fold_bn(p):
    """Fold eval-mode BN into a 1x1 conv: returns ((cin, cout) folded weight, bias)."""
    s = p["gamma"] / jnp.sqrt(p["var"] + EPS)
    cout = p["w"].shape[-1]
    w2d = p["w"].reshape(-1, cout) * s[None, :]
    b = p["beta"] - p["mean"] * s
    return w2d, b


def _fold_bn_tap(p):
    """Fold eval-mode BN into a (1,k)/(k,1) conv: (taps, cin, cout) weight + (1, cout) bias."""
    s = p["gamma"] / jnp.sqrt(p["var"] + EPS)
    kh, kw, cin, cout = p["w"].shape
    w = (p["w"] * s[None, None, None, :]).reshape(kh * kw, cin, cout)
    b = (p["beta"] - p["mean"] * s).reshape(1, cout)
    return w, b


def init_basic_conv_params(key, cin, cout, kernel):
    kh, kw = kernel
    k0, k1, k2, k3, k4 = jax.random.split(key, 5)
    return {
        # HWIO layout (kh, kw, Cin, Cout)
        "w": 0.05 * jax.random.normal(k0, (kh, kw, cin, cout), jnp.float32),
        "gamma": 1.0 + 0.1 * jax.random.normal(k1, (cout,), jnp.float32),
        "beta": 0.1 * jax.random.normal(k2, (cout,), jnp.float32),
        "mean": 0.1 * jax.random.normal(k3, (cout,), jnp.float32),
        "var": jax.random.uniform(k4, (cout,), jnp.float32, 0.5, 1.5),
    }


def init_block17_params(key):
    keys = jax.random.split(key, 6)
    return {
        "branch0": init_basic_conv_params(keys[0], 896, 128, (1, 1)),
        "branch1_0": init_basic_conv_params(keys[1], 896, 128, (1, 1)),
        "branch1_1": init_basic_conv_params(keys[2], 128, 128, (1, 7)),
        "branch1_2": init_basic_conv_params(keys[3], 128, 128, (7, 1)),
        "conv2d": {  # plain Conv2d(256, 896, 1) with bias
            "w": 0.05 * jax.random.normal(keys[4], (1, 1, 256, 896), jnp.float32),
            "b": 0.05 * jax.random.normal(keys[5], (896,), jnp.float32),
        },
    }


# --------------------------------------------------------------------------------------
# Block17 forward (Pallas path)
# --------------------------------------------------------------------------------------
def block17(x_nchw, params, *, scale=1.0):
    N, C, H, W = x_nchw.shape
    assert C == 896
    M = N * H * W

    # NCHW -> NHWC once, cast to bf16; the same padded (M_pad, 896) bf16 array is both
    # the first matmul's input AND the final kernel's residual (no extra copy).
    x_nhwc = jnp.transpose(x_nchw, (0, 2, 3, 1)).astype(jnp.bfloat16)
    tm = _pick_tile(M, 1024)
    M_pad = _round_up(M, tm)
    x2d = x_nhwc.reshape(M, 896)
    if M_pad != M:
        x2d = jnp.pad(x2d, ((0, M_pad - M), (0, 0)))

    # --- branch0 + branch1[0]: two 896->128 1x1 convs fused into one 896->256 matmul ---
    w0, b0 = _fold_bn(params["branch0"])
    w10, b10 = _fold_bn(params["branch1_0"])
    w_cat = jnp.concatenate([w0, w10], axis=1).astype(jnp.bfloat16)      # (896, 256)
    b_cat = jnp.concatenate([b0, b10], axis=0).reshape(1, 256)           # f32
    x0, t1 = dual_conv1x1(x2d, w_cat, b_cat, tm=tm)                      # (M_pad, 128) bf16 x2

    # --- branch1[1]: (1,7) conv, padding (0,3): tap accumulation, W as leading axis ---
    # TODO(synk): the layout shuffles between the two tap convs are still XLA copies of the
    #             128-ch bf16 intermediate; they could be folded into block-granular out
    #             index maps with more work.
    w11, b11 = _fold_bn_tap(params["branch1_1"])
    a = t1[:M].reshape(N, H, W, 128)
    a = jnp.pad(a, ((0, 0), (0, 0), (3, 3), (0, 0)))                     # pad W by 3/3
    a = jnp.transpose(a, (2, 0, 1, 3)).reshape(W + 6, N * H, 128)        # W leading
    R1 = N * H
    tr1 = _pick_tile(R1, 256)
    R1p = _round_up(R1, tr1)
    if R1p != R1:
        a = jnp.pad(a, ((0, 0), (0, R1p - R1), (0, 0)))
    t2 = tap_conv(a, w11.astype(jnp.bfloat16), b11, tr=tr1)              # (W, R1p, 128)

    # --- branch1[2]: (7,1) conv, padding (3,0): tap accumulation, H as leading axis ---
    w12, b12 = _fold_bn_tap(params["branch1_2"])
    a2 = t2[:, :R1, :].reshape(W, N, H, 128)
    a2 = jnp.pad(a2, ((0, 0), (0, 0), (3, 3), (0, 0)))                   # pad H by 3/3
    a2 = jnp.transpose(a2, (2, 1, 0, 3)).reshape(H + 6, N * W, 128)      # H leading
    R2 = N * W
    tr2 = _pick_tile(R2, 256)
    R2p = _round_up(R2, tr2)
    if R2p != R2:
        a2 = jnp.pad(a2, ((0, 0), (0, R2p - R2), (0, 0)))
    t3 = tap_conv(a2, w12.astype(jnp.bfloat16), b12, tr=tr2)             # (H, R2p, 128)

    # back to (N, H, W) row order, padded to the shared M_pad
    x1 = jnp.transpose(t3[:, :R2, :].reshape(H, N, W, 128), (1, 0, 2, 3)).reshape(M, 128)
    if M_pad != M:
        x1 = jnp.pad(x1, ((0, M_pad - M), (0, 0)))

    # --- conv2d (256->896, bias) fused with "* scale + residual" and the final ReLU ---
    w_f = params["conv2d"]["w"].reshape(256, 896).astype(jnp.bfloat16)
    b_f = params["conv2d"]["b"].reshape(1, 896)
    out2d = residual_conv1x1(x0, x1, w_f[:128], w_f[128:], b_f, x2d,
                             scale=scale, tm=tm)                         # (M_pad, 896) bf16

    out = out2d[:M].reshape(N, H, W, 896)
    return jnp.transpose(out, (0, 3, 1, 2)).astype(jnp.float32)          # NHWC -> NCHW, f32


# --------------------------------------------------------------------------------------
# Pure-JAX reference (f32, lax.conv) for a sanity check
# --------------------------------------------------------------------------------------
def _ref_basic_conv(x_nhwc, p, padding):
    y = lax.conv_general_dilated(
        x_nhwc, p["w"], window_strides=(1, 1),
        padding=[(padding[0], padding[0]), (padding[1], padding[1])],
        dimension_numbers=("NHWC", "HWIO", "NHWC"),
        precision=lax.Precision.HIGHEST,
    )
    s = p["gamma"] / jnp.sqrt(p["var"] + EPS)
    b = p["beta"] - p["mean"] * s
    return jnp.maximum(y * s + b, 0.0)


def block17_reference(x_nchw, params, *, scale=1.0):
    x = jnp.transpose(x_nchw, (0, 2, 3, 1))
    x0 = _ref_basic_conv(x, params["branch0"], (0, 0))
    x1 = _ref_basic_conv(x, params["branch1_0"], (0, 0))
    x1 = _ref_basic_conv(x1, params["branch1_1"], (0, 3))
    x1 = _ref_basic_conv(x1, params["branch1_2"], (3, 0))
    cat = jnp.concatenate([x0, x1], axis=-1)
    y = lax.conv_general_dilated(
        cat, params["conv2d"]["w"], (1, 1), [(0, 0), (0, 0)],
        dimension_numbers=("NHWC", "HWIO", "NHWC"),
        precision=lax.Precision.HIGHEST,
    ) + params["conv2d"]["b"]
    out = jnp.maximum(y * scale + x, 0.0)
    return jnp.transpose(out, (0, 3, 1, 2))


if __name__ == "__main__":
    key = jax.random.PRNGKey(0)
    k_params, k_x = jax.random.split(key)

    # Channels are fixed at 896 by the module; small spatial size, non-multiple-of-8 M
    # to exercise the padding / edge-tile paths.
    N, C, H, W = 2, 896, 9, 9
    x = jax.random.normal(k_x, (N, C, H, W), jnp.float32)
    params = init_block17_params(k_params)

    fwd = jax.jit(functools.partial(block17, scale=1.0))
    out = jax.block_until_ready(fwd(x, params))
    assert out.shape == (N, 896, H, W), out.shape

    ref = jax.block_until_ready(
        jax.jit(functools.partial(block17_reference, scale=1.0))(x, params))
    max_err = float(jnp.max(jnp.abs(out - ref)))
    # The whole pipeline (activations, weights, residual, output) runs in bf16 with f32 MXU
    # accumulation, while the reference is f32/HIGHEST -> allow a bf16-sized tolerance.
    assert jnp.allclose(out, ref, rtol=5e-2, atol=1e-1), max_err

    print("KERNEL_OK")
</pallas_src>

<mosaic_0001>
module attributes {stable_mosaic.version = 11 : i64} {
  func.func @_dual_conv1x1_kernel(%arg0: i32, %arg1: memref<96x896xbf16, #tpu.memory_space<vmem>>, %arg2: memref<896x256xbf16, #tpu.memory_space<vmem>>, %arg3: memref<1x256xf32, #tpu.memory_space<vmem>>, %arg4: memref<96x128xbf16, #tpu.memory_space<vmem>>, %arg5: memref<96x128xbf16, #tpu.memory_space<vmem>>) attributes {dimension_semantics = [#tpu.dimension_semantics<parallel>], iteration_bounds = array<i64: 2>, scalar_prefetch = 0 : i64, scratch_operands = 0 : i64, tpu.core_type = #tpu.core_type<tc>, window_params = [{transform_indices = @transform_0, window_bounds = array<i64: 96, 896>}, {pipeline_mode = #tpu.pipeline_mode<synchronous>, transform_indices = @transform_1, window_bounds = array<i64: 896, 256>}, {pipeline_mode = #tpu.pipeline_mode<synchronous>, transform_indices = @transform_2, window_bounds = array<i64: 1, 256>}, {transform_indices = @transform_3, window_bounds = array<i64: 96, 128>}, {transform_indices = @transform_4, window_bounds = array<i64: 96, 128>}]} {
    %c0 = arith.constant 0 : index
    %c0_0 = arith.constant 0 : index
    %0 = vector.load %arg1[%c0, %c0_0] : memref<96x896xbf16, #tpu.memory_space<vmem>>, vector<96x896xbf16>
    %c0_1 = arith.constant 0 : index
    %c0_2 = arith.constant 0 : index
    %1 = vector.load %arg2[%c0_1, %c0_2] : memref<896x256xbf16, #tpu.memory_space<vmem>>, vector<896x256xbf16>
    %cst = arith.constant dense<0.000000e+00> : vector<96x256xf32>
    %2 = tpu.matmul %0, %1, %cst {dimension_numbers = #tpu.dot_dimension_numbers<[1], [0], [0], [1], [0, 0, 1, 1], [], []>} : vector<96x896xbf16>, vector<896x256xbf16>, vector<96x256xf32> -> vector<96x256xf32>
    %c0_3 = arith.constant 0 : index
    %c0_4 = arith.constant 0 : index
    %3 = vector.load %arg3[%c0_3, %c0_4] : memref<1x256xf32, #tpu.memory_space<vmem>>, vector<1x256xf32>
    %4 = vector.broadcast %3 : vector<1x256xf32> to vector<96x256xf32>
    %5 = arith.addf %2, %4 : vector<96x256xf32>
    %cst_5 = arith.constant 0.000000e+00 : f32
    %6 = vector.broadcast %cst_5 : f32 to vector<96x256xf32>
    %7 = arith.maximumf %5, %6 : vector<96x256xf32>
    %8 = vector.extract_strided_slice %7 {offsets = [0, 0], sizes = [96, 128], strides = [1, 1]} : vector<96x256xf32> to vector<96x128xf32>
    %9 = arith.truncf %8 : vector<96x128xf32> to vector<96x128xbf16>
    %c0_6 = arith.constant 0 : index
    %c0_7 = arith.constant 0 : index
    %10 = vector.load %arg4[%c0_6, %c0_7] : memref<96x128xbf16, #tpu.memory_space<vmem>>, vector<96x128xbf16>
    tpu.vector_store %arg4[%c0_6, %c0_7], %9 {strides = array<i32>} : memref<96x128xbf16, #tpu.memory_space<vmem>>, vector<96x128xbf16>,
    %11 = vector.extract_strided_slice %7 {offsets = [0, 128], sizes = [96, 128], strides = [1, 1]} : vector<96x256xf32> to vector<96x128xf32>
    %12 = arith.truncf %11 : vector<96x128xf32> to vector<96x128xbf16>
    %c0_8 = arith.constant 0 : index
    %c0_9 = arith.constant 0 : index
    %13 = vector.load %arg5[%c0_8, %c0_9] : memref<96x128xbf16, #tpu.memory_space<vmem>>, vector<96x128xbf16>
    tpu.vector_store %arg5[%c0_8, %c0_9], %12 {strides = array<i32>} : memref<96x128xbf16, #tpu.memory_space<vmem>>, vector<96x128xbf16>,
    return
  }
  func.func @transform_0(%arg0: i32) -> (i32, i32) {
    %c0_i32 = arith.constant 0 : i32
    %c0_i32_0 = arith.constant 0 : i32
    return %arg0, %c0_i32 : i32, i32
  }
  func.func @transform_1(%arg0: i32) -> (i32, i32) {
    %c0_i32 = arith.constant 0 : i32
    %c0_i32_0 = arith.constant 0 : i32
    %c0_i32_1 = arith.constant 0 : i32
    return %c0_i32, %c0_i32_0 : i32, i32
  }
  func.func @transform_2(%arg0: i32) -> (i32, i32) {
    %c0_i32 = arith.constant 0 : i32
    %c0_i32_0 = arith.constant 0 : i32
    %c0_i32_1 = arith.constant 0 : i32
    return %c0_i32, %c0_i32_0 : i32, i32
  }
  func.func @transform_3(%arg0: i32) -> (i32, i32) {
    %c0_i32 = arith.constant 0 : i32
    %c0_i32_0 = arith.constant 0 : i32
    return %arg0, %c0_i32 : i32, i32
  }
  func.func @transform_4(%arg0: i32) -> (i32, i32) {
    %c0_i32 = arith.constant 0 : i32
    %c0_i32_0 = arith.constant 0 : i32
    return %arg0, %c0_i32 : i32, i32
  }
}

module attributes {stable_mosaic.version = 11 : i64} {
  func.func @_tap_conv_kernel(%arg0: i32, %arg1: memref<15x16x128xbf16, #tpu.memory_space<vmem>>, %arg2: memref<7x128x128xbf16, #tpu.memory_space<vmem>>, %arg3: memref<1x128xf32, #tpu.memory_space<vmem>>, %arg4: memref<9x16x128xbf16, #tpu.memory_space<vmem>>) attributes {dimension_semantics = [#tpu.dimension_semantics<parallel>], iteration_bounds = array<i64: 2>, scalar_prefetch = 0 : i64, scratch_operands = 0 : i64, tpu.core_type = #tpu.core_type<tc>, window_params = [{transform_indices = @transform_0, window_bounds = array<i64: 15, 16, 128>}, {pipeline_mode = #tpu.pipeline_mode<synchronous>, transform_indices = @transform_1, window_bounds = array<i64: 7, 128, 128>}, {pipeline_mode = #tpu.pipeline_mode<synchronous>, transform_indices = @transform_2, window_bounds = array<i64: 1, 128>}, {transform_indices = @transform_3, window_bounds = array<i64: 9, 16, 128>}]} {
    %c0 = arith.constant 0 : index
    %c0_0 = arith.constant 0 : index
    %0 = vector.load %arg3[%c0, %c0_0] : memref<1x128xf32, #tpu.memory_space<vmem>>, vector<1x128xf32>
    %c0_1 = arith.constant 0 : index
    %c0_2 = arith.constant 0 : index
    %c0_3 = arith.constant 0 : index
    %1 = vector.load %arg1[%c0_1, %c0_2, %c0_3] : memref<15x16x128xbf16, #tpu.memory_space<vmem>>, vector<1x16x128xbf16>
    %2 = vector.shape_cast %1 : vector<1x16x128xbf16> to vector<16x128xbf16>
    %c0_4 = arith.constant 0 : index
    %c0_5 = arith.constant 0 : index
    %c0_6 = arith.constant 0 : index
    %3 = vector.load %arg2[%c0_4, %c0_5, %c0_6] : memref<7x128x128xbf16, #tpu.memory_space<vmem>>, vector<1x128x128xbf16>
    %4 = vector.shape_cast %3 : vector<1x128x128xbf16> to vector<128x128xbf16>
    %cst = arith.constant dense<0.000000e+00> : vector<16x128xf32>
    %5 = tpu.matmul %2, %4, %cst {dimension_numbers = #tpu.dot_dimension_numbers<[1], [0], [0], [1], [0, 0, 1, 1], [], []>} : vector<16x128xbf16>, vector<128x128xbf16>, vector<16x128xf32> -> vector<16x128xf32>
    %c1 = arith.constant 1 : index
    %c0_7 = arith.constant 0 : index
    %c0_8 = arith.constant 0 : index
    %6 = vector.load %arg1[%c1, %c0_7, %c0_8] : memref<15x16x128xbf16, #tpu.memory_space<vmem>>, vector<1x16x128xbf16>
    %7 = vector.shape_cast %6 : vector<1x16x128xbf16> to vector<16x128xbf16>
    %c1_9 = arith.constant 1 : index
    %c0_10 = arith.constant 0 : index
    %c0_11 = arith.constant 0 : index
    %8 = vector.load %arg2[%c1_9, %c0_10, %c0_11] : memref<7x128x128xbf16, #tpu.memory_space<vmem>>, vector<1x128x128xbf16>
    %9 = vector.shape_cast %8 : vector<1x128x128xbf16> to vector<128x128xbf16>
    %cst_12 = arith.constant dense<0.000000e+00> : vector<16x128xf32>
    %10 = tpu.matmul %7, %9, %cst_12 {dimension_numbers = #tpu.dot_dimension_numbers<[1], [0], [0], [1], [0, 0, 1, 1], [], []>} : vector<16x128xbf16>, vector<128x128xbf16>, vector<16x128xf32> -> vector<16x128xf32>
    %11 = arith.addf %5, %10 : vector<16x128xf32>
    %c2 = arith.constant 2 : index
    %c0_13 = arith.constant 0 : index
    %c0_14 = arith.constant 0 : index
    %12 = vector.load %arg1[%c2, %c0_13, %c0_14] : memref<15x16x128xbf16, #tpu.memory_space<vmem>>, vector<1x16x128xbf16>
    %13 = vector.shape_cast %12 : vector<1x16x128xbf16> to vector<16x128xbf16>
    %c2_15 = arith.constant 2 : index
    %c0_16 = arith.constant 0 : index
    %c0_17 = arith.constant 0 : index
    %14 = vector.load %arg2[%c2_15, %c0_16, %c0_17] : memref<7x128x128xbf16, #tpu.memory_space<vmem>>, vector<1x128x128xbf16>
    %15 = vector.shape_cast %14 : vector<1x128x128xbf16> to vector<128x128xbf16>
    %cst_18 = arith.constant dense<0.000000e+00> : vector<16x128xf32>
    %16 = tpu.matmul %13, %15, %cst_18 {dimension_numbers = #tpu.dot_dimension_numbers<[1], [0], [0], [1], [0, 0, 1, 1], [], []>} : vector<16x128xbf16>, vector<128x128xbf16>, vector<16x128xf32> -> vector<16x128xf32>
    %17 = arith.addf %11, %16 : vector<16x128xf32>
    %c3 = arith.constant 3 : index
    %c0_19 = arith.constant 0 : index
    %c0_20 = arith.constant 0 : index
    %18 = vector.load %arg1[%c3, %c0_19, %c0_20] : memref<15x16x128xbf16, #tpu.memory_space<vmem>>, vector<1x16x128xbf16>
    %19 = vector.shape_cast %18 : vector<1x16x128xbf16> to vector<16x128xbf16>
    %c3_21 = arith.constant 3 : index
    %c0_22 = arith.constant 0 : index
    %c0_23 = arith.constant 0 : index
    %20 = vector.load %arg2[%c3_21, %c0_22, %c0_23] : memref<7x128x128xbf16, #tpu.memory_space<vmem>>, vector<1x128x128xbf16>
    %21 = vector.shape_cast %20 : vector<1x128x128xbf16> to vector<128x128xbf16>
    %cst_24 = arith.constant dense<0.000000e+00> : vector<16x128xf32>
    %22 = tpu.matmul %19, %21, %cst_24 {dimension_numbers = #tpu.dot_dimension_numbers<[1], [0], [0], [1], [0, 0, 1, 1], [], []>} : vector<16x128xbf16>, vector<128x128xbf16>, vector<16x128xf32> -> vector<16x128xf32>
    %23 = arith.addf %17, %22 : vector<16x128xf32>
    %c4 = arith.constant 4 : index
    %c0_25 = arith.constant 0 : index
    %c0_26 = arith.constant 0 : index
    %24 = vector.load %arg1[%c4, %c0_25, %c0_26] : memref<15x16x128xbf16, #tpu.memory_space<vmem>>, vector<1x16x128xbf16>
    %25 = vector.shape_cast %24 : vector<1x16x128xbf16> to vector<16x128xbf16>
    %c4_27 = arith.constant 4 : index
    %c0_28 = arith.constant 0 : index
    %c0_29 = arith.constant 0 : index
    %26 = vector.load %arg2[%c4_27, %c0_28, %c0_29] : memref<7x128x128xbf16, #tpu.memory_space<vmem>>, vector<1x128x128xbf16>
    %27 = vector.shape_cast %26 : vector<1x128x128xbf16> to vector<128x128xbf16>
    %cst_30 = arith.constant dense<0.000000e+00> : vector<16x128xf32>
    %28 = tpu.matmul %25, %27, %cst_30 {dimension_numbers = #tpu.dot_dimension_numbers<[1], [0], [0], [1], [0, 0, 1, 1], [], []>} : vector<16x128xbf16>, vector<128x128xbf16>, vector<16x128xf32> -> vector<16x128xf32>
    %29 = arith.addf %23, %28 : vector<16x128xf32>
    %c5 = arith.constant 5 : index
    %c0_31 = arith.constant 0 : index
    %c0_32 = arith.constant 0 : index
    %30 = vector.load %arg1[%c5, %c0_31, %c0_32] : memref<15x16x128xbf16, #tpu.memory_space<vmem>>, vector<1x16x128xbf16>
    %31 = vector.shape_cast %30 : vector<1x16x128xbf16> to vector<16x128xbf16>
    %c5_33 = arith.constant 5 : index
    %c0_34 = arith.constant 0 : index
    %c0_35 = arith.constant 0 : index
    %32 = vector.load %arg2[%c5_33, %c0_34, %c0_35] : memref<7x128x128xbf16, #tpu.memory_space<vmem>>, vector<1x128x128xbf16>
    %33 = vector.shape_cast %32 : vector<1x128x128xbf16> to vector<128x128xbf16>
    %cst_36 = arith.constant dense<0.000000e+00> : vector<16x128xf32>
    %34 = tpu.matmul %31, %33, %cst_36 {dimension_numbers = #tpu.dot_dimension_numbers<[1], [0], [0], [1], [0, 0, 1, 1], [], []>} : vector<16x128xbf16>, vector<128x128xbf16>, vector<16x128xf32> -> vector<16x128xf32>
    %35 = arith.addf %29, %34 : vector<16x128xf32>
    %c6 = arith.constant 6 : index
    %c0_37 = arith.constant 0 : index
    %c0_38 = arith.constant 0 : index
    %36 = vector.load %arg1[%c6, %c0_37, %c0_38] : memref<15x16x128xbf16, #tpu.memory_space<vmem>>, vector<1x16x128xbf16>
    %37 = vector.shape_cast %36 : vector<1x16x128xbf16> to vector<16x128xbf16>
    %c6_39 = arith.constant 6 : index
    %c0_40 = arith.constant 0 : index
    %c0_41 = arith.constant 0 : index
    %38 = vector.load %arg2[%c6_39, %c0_40, %c0_41] : memref<7x128x128xbf16, #tpu.memory_space<vmem>>, vector<1x128x128xbf16>
    %39 = vector.shape_cast %38 : vector<1x128x128xbf16> to vector<128x128xbf16>
    %cst_42 = arith.constant dense<0.000000e+00> : vector<16x128xf32>
    %40 = tpu.matmul %37, %39, %cst_42 {dimension_numbers = #tpu.dot_dimension_numbers<[1], [0], [0], [1], [0, 0, 1, 1], [], []>} : vector<16x128xbf16>, vector<128x128xbf16>, vector<16x128xf32> -> vector<16x128xf32>
    %41 = arith.addf %35, %40 : vector<16x128xf32>
    %42 = vector.broadcast %0 : vector<1x128xf32> to vector<16x128xf32>
    %43 = arith.addf %41, %42 : vector<16x128xf32>
    %cst_43 = arith.constant 0.000000e+00 : f32
    %44 = vector.broadcast %cst_43 : f32 to vector<16x128xf32>
    %45 = arith.maximumf %43, %44 : vector<16x128xf32>
    %46 = arith.truncf %45 : vector<16x128xf32> to vector<16x128xbf16>
    %c0_44 = arith.constant 0 : index
    %c0_45 = arith.constant 0 : index
    %c0_46 = arith.constant 0 : index
    %47 = vector.load %arg4[%c0_44, %c0_45, %c0_46] : memref<9x16x128xbf16, #tpu.memory_space<vmem>>, vector<1x16x128xbf16>
    %48 = vector.shape_cast %47 : vector<1x16x128xbf16> to vector<16x128xbf16>
    %49 = vector.shape_cast %46 : vector<16x128xbf16> to vector<1x16x128xbf16>
    tpu.vector_store %arg4[%c0_44, %c0_45, %c0_46], %49 {strides = array<i32>} : memref<9x16x128xbf16, #tpu.memory_space<vmem>>, vector<1x16x128xbf16>,
    %c1_47 = arith.constant 1 : index
    %c0_48 = arith.constant 0 : index
    %c0_49 = arith.constant 0 : index
    %50 = vector.load %arg1[%c1_47, %c0_48, %c0_49] : memref<15x16x128xbf16, #tpu.memory_space<vmem>>, vector<1x16x128xbf16>
    %51 = vector.shape_cast %50 : vector<1x16x128xbf16> to vector<16x128xbf16>
    %c0_50 = arith.constant 0 : index
    %c0_51 = arith.constant 0 : index
    %c0_52 = arith.constant 0 : index
    %52 = vector.load %arg2[%c0_50, %c0_51, %c0_52] : memref<7x128x128xbf16, #tpu.memory_space<vmem>>, vector<1x128x128xbf16>
    %53 = vector.shape_cast %52 : vector<1x128x128xbf16> to vector<128x128xbf16>
    %cst_53 = arith.constant dense<0.000000e+00> : vector<16x128xf32>
    %54 = tpu.matmul %51, %53, %cst_53 {dimension_numbers = #tpu.dot_dimension_numbers<[1], [0], [0], [1], [0, 0, 1, 1], [], []>} : vector<16x128xbf16>, vector<128x128xbf16>, vector<16x128xf32> -> vector<16x128xf32>
    %c2_54 = arith.constant 2 : index
    %c0_55 = arith.constant 0 : index
    %c0_56 = arith.constant 0 : index
    %55 = vector.load %arg1[%c2_54, %c0_55, %c0_56] : memref<15x16x128xbf16, #tpu.memory_space<vmem>>, vector<1x16x128xbf16>
    %56 = vector.shape_cast %55 : vector<1x16x128xbf16> to vector<16x128xbf16>
    %c1_57 = arith.constant 1 : index
    %c0_58 = arith.constant 0 : index
    %c0_59 = arith.constant 0 : index
    %57 = vector.load %arg2[%c1_57, %c0_58, %c0_59] : memref<7x128x128xbf16, #tpu.memory_space<vmem>>, vector<1x128x128xbf16>
    %58 = vector.shape_cast %57 : vector<1x128x128xbf16> to vector<128x128xbf16>
    %cst_60 = arith.constant dense<0.000000e+00> : vector<16x128xf32>
    %59 = tpu.matmul %56, %58, %cst_60 {dimension_numbers = #tpu.dot_dimension_numbers<[1], [0], [0], [1], [0, 0, 1, 1], [], []>} : vector<16x128xbf16>, vector<128x128xbf16>, vector<16x128xf32> -> vector<16x128xf32>
    %60 = arith.addf %54, %59 : vector<16x128xf32>
    %c3_61 = arith.constant 3 : index
    %c0_62 = arith.constant 0 : index
    %c0_63 = arith.constant 0 : index
    %61 = vector.load %arg1[%c3_61, %c0_62, %c0_63] : memref<15x16x128xbf16, #tpu.memory_space<vmem>>, vector<1x16x128xbf16>
    %62 = vector.shape_cast %61 : vector<1x16x128xbf16> to vector<16x128xbf16>
    %c2_64 = arith.constant 2 : index
    %c0_65 = arith.constant 0 : index
    %c0_66 = arith.constant 0 : index
    %63 = vector.load %arg2[%c2_64, %c0_65, %c0_66] : memref<7x128x128xbf16, #tpu.memory_space<vmem>>, vector<1x128x128xbf16>
    %64 = vector.shape_cast %63 : vector<1x128x128xbf16> to vector<128x128xbf16>
    %cst_67 = arith.constant dense<0.000000e+00> : vector<16x128xf32>
    %65 = tpu.matmul %62, %64, %cst_67 {dimension_numbers = #tpu.dot_dimension_numbers<[1], [0], [0], [1], [0, 0, 1, 1], [], []>} : vector<16x128xbf16>, vector<128x128xbf16>, vector<16x128xf32> -> vector<16x128xf32>
    %66 = arith.addf %60, %65 : vector<16x128xf32>
    %c4_68 = arith.constant 4 : index
    %c0_69 = arith.constant 0 : index
    %c0_70 = arith.constant 0 : index
    %67 = vector.load %arg1[%c4_68, %c0_69, %c0_70] : memref<15x16x128xbf16, #tpu.memory_space<vmem>>, vector<1x16x128xbf16>
    %68 = vector.shape_cast %67 : vector<1x16x128xbf16> to vector<16x128xbf16>
    %c3_71 = arith.constant 3 : index
    %c0_72 = arith.constant 0 : index
    %c0_73 = arith.constant 0 : index
    %69 = vector.load %arg2[%c3_71, %c0_72, %c0_73] : memref<7x128x128xbf16, #tpu.memory_space<vmem>>, vector<1x128x128xbf16>
    %70 = vector.shape_cast %69 : vector<1x128x128xbf16> to vector<128x128xbf16>
    %cst_74 = arith.constant dense<0.000000e+00> : vector<16x128xf32>
    %71 = tpu.matmul %68, %70, %cst_74 {dimension_numbers = #tpu.dot_dimension_numbers<[1], [0], [0], [1], [0, 0, 1, 1], [], []>} : vector<16x128xbf16>, vector<128x128xbf16>, vector<16x128xf32> -> vector<16x128xf32>
    %72 = arith.addf %66, %71 : vector<16x128xf32>
    %c5_75 = arith.constant 5 : index
    %c0_76 = arith.constant 0 : index
    %c0_77 = arith.constant 0 : index
    %73 = vector.load %arg1[%c5_75, %c0_76, %c0_77] : memref<15x16x128xbf16, #tpu.memory_space<vmem>>, vector<1x16x128xbf16>
    %74 = vector.shape_cast %73 : vector<1x16x128xbf16> to vector<16x128xbf16>
    %c4_78 = arith.constant 4 : index
    %c0_79 = arith.constant 0 : index
    %c0_80 = arith.constant 0 : index
    %75 = vector.load %arg2[%c4_78, %c0_79, %c0_80] : memref<7x128x128xbf16, #tpu.memory_space<vmem>>, vector<1x128x128xbf16>
    %76 = vector.shape_cast %75 : vector<1x128x128xbf16> to vector<128x128xbf16>
    %cst_81 = arith.constant dense<0.000000e+00> : vector<16x128xf32>
    %77 = tpu.matmul %74, %76, %cst_81 {dimension_numbers = #tpu.dot_dimension_numbers<[1], [0], [0], [1], [0, 0, 1, 1], [], []>} : vector<16x128xbf16>, vector<128x128xbf16>, vector<16x128xf32> -> vector<16x128xf32>
    %78 = arith.addf %72, %77 : vector<16x128xf32>
    %c6_82 = arith.constant 6 : index
    %c0_83 = arith.constant 0 : index
    %c0_84 = arith.constant 0 : index
    %79 = vector.load %arg1[%c6_82, %c0_83, %c0_84] : memref<15x16x128xbf16, #tpu.memory_space<vmem>>, vector<1x16x128xbf16>
    %80 = vector.shape_cast %79 : vector<1x16x128xbf16> to vector<16x128xbf16>
    %c5_85 = arith.constant 5 : index
    %c0_86 = arith.constant 0 : index
    %c0_87 = arith.constant 0 : index
    %81 = vector.load %arg2[%c5_85, %c0_86, %c0_87] : memref<7x128x128xbf16, #tpu.memory_space<vmem>>, vector<1x128x128xbf16>
    %82 = vector.shape_cast %81 : vector<1x128x128xbf16> to vector<128x128xbf16>
    %cst_88 = arith.constant dense<0.000000e+00> : vector<16x128xf32>
    %83 = tpu.matmul %80, %82, %cst_88 {dimension_numbers = #tpu.dot_dimension_numbers<[1], [0], [0], [1], [0, 0, 1, 1], [], []>} : vector<16x128xbf16>, vector<128x128xbf16>, vector<16x128xf32> -> vector<16x128xf32>
    %84 = arith.addf %78, %83 : vector<16x128xf32>
    %c7 = arith.constant 7 : index
    %c0_89 = arith.constant 0 : index
    %c0_90 = arith.constant 0 : index
    %85 = vector.load %arg1[%c7, %c0_89, %c0_90] : memref<15x16x128xbf16, #tpu.memory_space<vmem>>, vector<1x16x128xbf16>
    %86 = vector.shape_cast %85 : vector<1x16x128xbf16> to vector<16x128xbf16>
    %c6_91 = arith.constant 6 : index
    %c0_92 = arith.constant 0 : index
    %c0_93 = arith.constant 0 : index
    %87 = vector.load %arg2[%c6_91, %c0_92, %c0_93] : memref<7x128x128xbf16, #tpu.memory_space<vmem>>, vector<1x128x128xbf16>
    %88 = vector.shape_cast %87 : vector<1x128x128xbf16> to vector<128x128xbf16>
    %cst_94 = arith.constant dense<0.000000e+00> : vector<16x128xf32>
    %89 = tpu.matmul %86, %88, %cst_94 {dimension_numbers = #tpu.dot_dimension_numbers<[1], [0], [0], [1], [0, 0, 1, 1], [], []>} : vector<16x128xbf16>, vector<128x128xbf16>, vector<16x128xf32> -> vector<16x128xf32>
    %90 = arith.addf %84, %89 : vector<16x128xf32>
    %91 = vector.broadcast %0 : vector<1x128xf32> to vector<16x128xf32>
    %92 = arith.addf %90, %91 : vector<16x128xf32>
    %cst_95 = arith.constant 0.000000e+00 : f32
    %93 = vector.broadcast %cst_95 : f32 to vector<16x128xf32>
    %94 = arith.maximumf %92, %93 : vector<16x128xf32>
    %95 = arith.truncf %94 : vector<16x128xf32> to vector<16x128xbf16>
    %c1_96 = arith.constant 1 : index
    %c0_97 = arith.constant 0 : index
    %c0_98 = arith.constant 0 : index
    %96 = vector.load %arg4[%c1_96, %c0_97, %c0_98] : memref<9x16x128xbf16, #tpu.memory_space<vmem>>, vector<1x16x128xbf16>
    %97 = vector.shape_cast %96 : vector<1x16x128xbf16> to vector<16x128xbf16>
    %98 = vector.shape_cast %95 : vector<16x128xbf16> to vector<1x16x128xbf16>
    tpu.vector_store %arg4[%c1_96, %c0_97, %c0_98], %98 {strides = array<i32>} : memref<9x16x128xbf16, #tpu.memory_space<vmem>>, vector<1x16x128xbf16>,
    %c2_99 = arith.constant 2 : index
    %c0_100 = arith.constant 0 : index
    %c0_101 = arith.constant 0 : index
    %99 = vector.load %arg1[%c2_99, %c0_100, %c0_101] : memref<15x16x128xbf16, #tpu.memory_space<vmem>>, vector<1x16x128xbf16>
    %100 = vector.shape_cast %99 : vector<1x16x128xbf16> to vector<16x128xbf16>
    %c0_102 = arith.constant 0 : index
    %c0_103 = arith.constant 0 : index
    %c0_104 = arith.constant 0 : index
    %101 = vector.load %arg2[%c0_102, %c0_103, %c0_104] : memref<7x128x128xbf16, #tpu.memory_space<vmem>>, vector<1x128x128xbf16>
    %102 = vector.shape_cast %101 : vector<1x128x128xbf16> to vector<128x128xbf16>
    %cst_105 = arith.constant dense<0.000000e+00> : vector<16x128xf32>
    %103 = tpu.matmul %100, %102, %cst_105 {dimension_numbers = #tpu.dot_dimension_numbers<[1], [0], [0], [1], [0, 0, 1, 1], [], []>} : vector<16x128xbf16>, vector<128x128xbf16>, vector<16x128xf32> -> vector<16x128xf32>
    %c3_106 = arith.constant 3 : index
    %c0_107 = arith.constant 0 : index
    %c0_108 = arith.constant 0 : index
    %104 = vector.load %arg1[%c3_106, %c0_107, %c0_108] : memref<15x16x128xbf16, #tpu.memory_space<vmem>>, vector<1x16x128xbf16>
    %105 = vector.shape_cast %104 : vector<1x16x128xbf16> to vector<16x128xbf16>
    %c1_109 = arith.constant 1 : index
    %c0_110 = arith.constant 0 : index
    %c0_111 = arith.constant 0 : index
    %106 = vector.load %arg2[%c1_109, %c0_110, %c0_111] : memref<7x128x128xbf16, #tpu.memory_space<vmem>>, vector<1x128x128xbf16>
    %107 = vector.shape_cast %106 : vector<1x128x128xbf16> to vector<128x128xbf16>
    %cst_112 = arith.constant dense<0.000000e+00> : vector<16x128xf32>
    %108 = tpu.matmul %105, %107, %cst_112 {dimension_numbers = #tpu.dot_dimension_numbers<[1], [0], [0], [1], [0, 0, 1, 1], [], []>} : vector<16x128xbf16>, vector<128x128xbf16>, vector<16x128xf32> -> vector<16x128xf32>
    %109 = arith.addf %103, %108 : vector<16x128xf32>
    %c4_113 = arith.constant 4 : index
    %c0_114 = arith.constant 0 : index
    %c0_115 = arith.constant 0 : index
    %110 = vector.load %arg1[%c4_113, %c0_114, %c0_115] : memref<15x16x128xbf16, #tpu.memory_space<vmem>>, vector<1x16x128xbf16>
    %111 = vector.shape_cast %110 : vector<1x16x128xbf16> to vector<16x128xbf16>
    %c2_116 = arith.constant 2 : index
    %c0_117 = arith.constant 0 : index
    %c0_118 = arith.constant 0 : index
    %112 = vector.load %arg2[%c2_116, %c0_117, %c0_118] : memref<7x128x128xbf16, #tpu.memory_space<vmem>>, vector<1x128x128xbf16>
    %113 = vector.shape_cast %112 : vector<1x128x128xbf16> to vector<128x128xbf16>
    %cst_119 = arith.constant dense<0.000000e+00> : vector<16x128xf32>
    %114 = tpu.matmul %111, %113, %cst_119 {dimension_numbers = #tpu.dot_dimension_numbers<[1], [0], [0], [1], [0, 0, 1, 1], [], []>} : vector<16x128xbf16>, vector<128x128xbf16>, vector<16x128xf32> -> vector<16x128xf32>
    %115 = arith.addf %109, %114 : vector<16x128xf32>
    %c5_120 = arith.constant 5 : index
    %c0_121 = arith.constant 0 : index
    %c0_122 = arith.constant 0 : index
    %116 = vector.load %arg1[%c5_120, %c0_121, %c0_122] : memref<15x16x128xbf16, #tpu.memory_space<vmem>>, vector<1x16x128xbf16>
    %117 = vector.shape_cast %116 : vector<1x16x128xbf16> to vector<16x128xbf16>
    %c3_123 = arith.constant 3 : index
    %c0_124 = arith.constant 0 : index
    %c0_125 = arith.constant 0 : index
    %118 = vector.load %arg2[%c3_123, %c0_124, %c0_125] : memref<7x128x128xbf16, #tpu.memory_space<vmem>>, vector<1x128x128xbf16>
    %119 = vector.shape_cast %118 : vector<1x128x128xbf16> to vector<128x128xbf16>
    %cst_126 = arith.constant dense<0.000000e+00> : vector<16x128xf32>
    %120 = tpu.matmul %117, %119, %cst_126 {dimension_numbers = #tpu.dot_dimension_numbers<[1], [0], [0], [1], [0, 0, 1, 1], [], []>} : vector<16x128xbf16>, vector<128x128xbf16>, vector<16x128xf32> -> vector<16x128xf32>
    %121 = arith.addf %115, %120 : vector<16x128xf32>
    %c6_127 = arith.constant 6 : index
    %c0_128 = arith.constant 0 : index
    %c0_129 = arith.constant 0 : index
    %122 = vector.load %arg1[%c6_127, %c0_128, %c0_129] : memref<15x16x128xbf16, #tpu.memory_space<vmem>>, vector<1x16x128xbf16>
    %123 = vector.shape_cast %122 : vector<1x16x128xbf16> to vector<16x128xbf16>
    %c4_130 = arith.constant 4 : index
    %c0_131 = arith.constant 0 : index
    %c0_132 = arith.constant 0 : index
    %124 = vector.load %arg2[%c4_130, %c0_131, %c0_132] : memref<7x128x128xbf16, #tpu.memory_space<vmem>>, vector<1x128x128xbf16>
    %125 = vector.shape_cast %124 : vector<1x128x128xbf16> to vector<128x128xbf16>
    %cst_133 = arith.constant dense<0.000000e+00> : vector<16x128xf32>
    %126 = tpu.matmul %123, %125, %cst_133 {dimension_numbers = #tpu.dot_dimension_numbers<[1], [0], [0], [1], [0, 0, 1, 1], [], []>} : vector<16x128xbf16>, vector<128x128xbf16>, vector<16x128xf32> -> vector<16x128xf32>
    %127 = arith.addf %121, %126 : vector<16x128xf32>
    %c7_134 = arith.constant 7 : index
    %c0_135 = arith.constant 0 : index
    %c0_136 = arith.constant 0 : index
    %128 = vector.load %arg1[%c7_134, %c0_135, %c0_136] : memref<15x16x128xbf16, #tpu.memory_space<vmem>>, vector<1x16x128xbf16>
    %129 = vector.shape_cast %128 : vector<1x16x128xbf16> to vector<16x128xbf16>
    %c5_137 = arith.constant 5 : index
    %c0_138 = arith.constant 0 : index
    %c0_139 = arith.constant 0 : index
    %130 = vector.load %arg2[%c5_137, %c0_138, %c0_139] : memref<7x128x128xbf16, #tpu.memory_space<vmem>>, vector<1x128x128xbf16>
    %131 = vector.shape_cast %130 : vector<1x128x128xbf16> to vector<128x128xbf16>
    %cst_140 = arith.constant dense<0.000000e+00> : vector<16x128xf32>
    %132 = tpu.matmul %129, %131, %cst_140 {dimension_numbers = #tpu.dot_dimension_numbers<[1], [0], [0], [1], [0, 0, 1, 1], [], []>} : vector<16x128xbf16>, vector<128x128xbf16>, vector<16x128xf32> -> vector<16x128xf32>
    %133 = arith.addf %127, %132 : vector<16x128xf32>
    %c8 = arith.constant 8 : index
    %c0_141 = arith.constant 0 : index
    %c0_142 = arith.constant 0 : index
    %134 = vector.load %arg1[%c8, %c0_141, %c0_142] : memref<15x16x128xbf16, #tpu.memory_space<vmem>>, vector<1x16x128xbf16>
    %135 = vector.shape_cast %134 : vector<1x16x128xbf16> to vector<16x128xbf16>
    %c6_143 = arith.constant 6 : index
    %c0_144 = arith.constant 0 : index
    %c0_145 = arith.constant 0 : index
    %136 = vector.load %arg2[%c6_143, %c0_144, %c0_145] : memref<7x128x128xbf16, #tpu.memory_space<vmem>>, vector<1x128x128xbf16>
    %137 = vector.shape_cast %136 : vector<1x128x128xbf16> to vector<128x128xbf16>
    %cst_146 = arith.constant dense<0.000000e+00> : vector<16x128xf32>
    %138 = tpu.matmul %135, %137, %cst_146 {dimension_numbers = #tpu.dot_dimension_numbers<[1], [0], [0], [1], [0, 0, 1, 1], [], []>} : vector<16x128xbf16>, vector<128x128xbf16>, vector<16x128xf32> -> vector<16x128xf32>
    %139 = arith.addf %133, %138 : vector<16x128xf32>
    %140 = vector.broadcast %0 : vector<1x128xf32> to vector<16x128xf32>
    %141 = arith.addf %139, %140 : vector<16x128xf32>
    %cst_147 = arith.constant 0.000000e+00 : f32
    %142 = vector.broadcast %cst_147 : f32 to vector<16x128xf32>
    %143 = arith.maximumf %141, %142 : vector<16x128xf32>
    %144 = arith.truncf %143 : vector<16x128xf32> to vector<16x128xbf16>
    %c2_148 = arith.constant 2 : index
    %c0_149 = arith.constant 0 : index
    %c0_150 = arith.constant 0 : index
    %145 = vector.load %arg4[%c2_148, %c0_149, %c0_150] : memref<9x16x128xbf16, #tpu.memory_space<vmem>>, vector<1x16x128xbf16>
    %146 = vector.shape_cast %145 : vector<1x16x128xbf16> to vector<16x128xbf16>
    %147 = vector.shape_cast %144 : vector<16x128xbf16> to vector<1x16x128xbf16>
    tpu.vector_store %arg4[%c2_148, %c0_149, %c0_150], %147 {strides = array<i32>} : memref<9x16x128xbf16, #tpu.memory_space<vmem>>, vector<1x16x128xbf16>,
    %c3_151 = arith.constant 3 : index
    %c0_152 = arith.constant 0 : index
    %c0_153 = arith.constant 0 : index
    %148 = vector.load %arg1[%c3_151, %c0_152, %c0_153] : memref<15x16x128xbf16, #tpu.memory_space<vmem>>, vector<1x16x128xbf16>
    %149 = vector.shape_cast %148 : vector<1x16x128xbf16> to vector<16x128xbf16>
    %c0_154 = arith.constant 0 : index
    %c0_155 = arith.constant 0 : index
    %c0_156 = arith.constant 0 : index
    %150 = vector.load %arg2[%c0_154, %c0_155, %c0_156] : memref<7x128x128xbf16, #tpu.memory_space<vmem>>, vector<1x128x128xbf16>
    %151 = vector.shape_cast %150 : vector<1x128x128xbf16> to vector<128x128xbf16>
    %cst_157 = arith.constant dense<0.000000e+00> : vector<16x128xf32>
    %152 = tpu.matmul %149, %151, %cst_157 {dimension_numbers = #tpu.dot_dimension_numbers<[1], [0], [0], [1], [0, 0, 1, 1], [], []>} : vector<16x128xbf16>, vector<128x128xbf16>, vector<16x128xf32> -> vector<16x128xf32>
    %c4_158 = arith.constant 4 : index
    %c0_159 = arith.constant 0 : index
    %c0_160 = arith.constant 0 : index
    %153 = vector.load %arg1[%c4_158, %c0_159, %c0_160] : memref<15x16x128xbf16, #tpu.memory_space<vmem>>, vector<1x16x128xbf16>
    %154 = vector.shape_cast %153 : vector<1x16x128xbf16> to vector<16x128xbf16>
    %c1_161 = arith.constant 1 : index
    %c0_162 = arith.constant 0 : index
    %c0_163 = arith.constant 0 : index
    %155 = vector.load %arg2[%c1_161, %c0_162, %c0_163] : memref<7x128x128xbf16, #tpu.memory_space<vmem>>, vector<1x128x128xbf16>
    %156 = vector.shape_cast %155 : vector<1x128x128xbf16> to vector<128x128xbf16>
    %cst_164 = arith.constant dense<0.000000e+00> : vector<16x128xf32>
    %157 = tpu.matmul %154, %156, %cst_164 {dimension_numbers = #tpu.dot_dimension_numbers<[1], [0], [0], [1], [0, 0, 1, 1], [], []>} : vector<16x128xbf16>, vector<128x128xbf16>, vector<16x128xf32> -> vector<16x128xf32>
    %158 = arith.addf %152, %157 : vector<16x128xf32>
    %c5_165 = arith.constant 5 : index
    %c0_166 = arith.constant 0 : index
    %c0_167 = arith.constant 0 : index
    %159 = vector.load %arg1[%c5_165, %c0_166, %c0_167] : memref<15x16x128xbf16, #tpu.memory_space<vmem>>, vector<1x16x128xbf16>
    %160 = vector.shape_cast %159 : vector<1x16x128xbf16> to vector<16x128xbf16>
    %c2_168 = arith.constant 2 : index
    %c0_169 = arith.constant 0 : index
    %c0_170 = arith.constant 0 : index
    %161 = vector.load %arg2[%c2_168, %c0_169, %c0_170] : memref<7x128x128xbf16, #tpu.memory_space<vmem>>, vector<1x128x128xbf16>
    %162 = vector.shape_cast %161 : vector<1x128x128xbf16> to vector<128x128xbf16>
    %cst_171 = arith.constant dense<0.000000e+00> : vector<16x128xf32>
    %163 = tpu.matmul %160, %162, %cst_171 {dimension_numbers = #tpu.dot_dimension_numbers<[1], [0], [0], [1], [0, 0, 1, 1], [], []>} : vector<16x128xbf16>, vector<128x128xbf16>, vector<16x128xf32> -> vector<16x128xf32>
    %164 = arith.addf %158, %163 : vector<16x128xf32>
    %c6_172 = arith.constant 6 : index
    %c0_173 = arith.constant 0 : index
    %c0_174 = arith.constant 0 : index
    %165 = vector.load %arg1[%c6_172, %c0_173, %c0_174] : memref<15x16x128xbf16, #tpu.memory_space<vmem>>, vector<1x16x128xbf16>
    %166 = vector.shape_cast %165 : vector<1x16x128xbf16> to vector<16x128xbf16>
    %c3_175 = arith.constant 3 : index
    %c0_176 = arith.constant 0 : index
    %c0_177 = arith.constant 0 : index
    %167 = vector.load %arg2[%c3_175, %c0_176, %c0_177] : memref<7x128x128xbf16, #tpu.memory_space<vmem>>, vector<1x128x128xbf16>
    %168 = vector.shape_cast %167 : vector<1x128x128xbf16> to vector<128x128xbf16>
    %cst_178 = arith.constant dense<0.000000e+00> : vector<16x128xf32>
    %169 = tpu.matmul %166, %168, %cst_178 {dimension_numbers = #tpu.dot_dimension_numbers<[1], [0], [0], [1], [0, 0, 1, 1], [], []>} : vector<16x128xbf16>, vector<128x128xbf16>, vector<16x128xf32> -> vector<16x128xf32>
    %170 = arith.addf %164, %169 : vector<16x128xf32>
    %c7_179 = arith.constant 7 : index
    %c0_180 = arith.constant 0 : index
    %c0_181 = arith.constant 0 : index
    %171 = vector.load %arg1[%c7_179, %c0_180, %c0_181] : memref<15x16x128xbf16, #tpu.memory_space<vmem>>, vector<1x16x128xbf16>
    %172 = vector.shape_cast %171 : vector<1x16x128xbf16> to vector<16x128xbf16>
    %c4_182 = arith.constant 4 : index
    %c0_183 = arith.constant 0 : index
    %c0_184 = arith.constant 0 : index
    %173 = vector.load %arg2[%c4_182, %c0_183, %c0_184] : memref<7x128x128xbf16, #tpu.memory_space<vmem>>, vector<1x128x128xbf16>
    %174 = vector.shape_cast %173 : vector<1x128x128xbf16> to vector<128x128xbf16>
    %cst_185 = arith.constant dense<0.000000e+00> : vector<16x128xf32>
    %175 = tpu.matmul %172, %174, %cst_185 {dimension_numbers = #tpu.dot_dimension_numbers<[1], [0], [0], [1], [0, 0, 1, 1], [], []>} : vector<16x128xbf16>, vector<128x128xbf16>, vector<16x128xf32> -> vector<16x128xf32>
    %176 = arith.addf %170, %175 : vector<16x128xf32>
    %c8_186 = arith.constant 8 : index
    %c0_187 = arith.constant 0 : index
    %c0_188 = arith.constant 0 : index
    %177 = vector.load %arg1[%c8_186, %c0_187, %c0_188] : memref<15x16x128xbf16, #tpu.memory_space<vmem>>, vector<1x16x128xbf16>
    %178 = vector.shape_cast %177 : vector<1x16x128xbf16> to vector<16x128xbf16>
    %c5_189 = arith.constant 5 : index
    %c0_190 = arith.constant 0 : index
    %c0_191 = arith.constant 0 : index
    %179 = vector.load %arg2[%c5_189, %c0_190, %c0_191] : memref<7x128x128xbf16, #tpu.memory_space<vmem>>, vector<1x128x128xbf16>
    %180 = vector.shape_cast %179 : vector<1x128x128xbf16> to vector<128x128xbf16>
    %cst_192 = arith.constant dense<0.000000e+00> : vector<16x128xf32>
    %181 = tpu.matmul %178, %180, %cst_192 {dimension_numbers = #tpu.dot_dimension_numbers<[1], [0], [0], [1], [0, 0, 1, 1], [], []>} : vector<16x128xbf16>, vector<128x128xbf16>, vector<16x128xf32> -> vector<16x128xf32>
    %182 = arith.addf %176, %181 : vector<16x128xf32>
    %c9 = arith.constant 9 : index
    %c0_193 = arith.constant 0 : index
    %c0_194 = arith.constant 0 : index
    %183 = vector.load %arg1[%c9, %c0_193, %c0_194] : memref<15x16x128xbf16, #tpu.memory_space<vmem>>, vector<1x16x128xbf16>
    %184 = vector.shape_cast %183 : vector<1x16x128xbf16> to vector<16x128xbf16>
    %c6_195 = arith.constant 6 : index
    %c0_196 = arith.constant 0 : index
    %c0_197 = arith.constant 0 : index
    %185 = vector.load %arg2[%c6_195, %c0_196, %c0_197] : memref<7x128x128xbf16, #tpu.memory_space<vmem>>, vector<1x128x128xbf16>
    %186 = vector.shape_cast %185 : vector<1x128x128xbf16> to vector<128x128xbf16>
    %cst_198 = arith.constant dense<0.000000e+00> : vector<16x128xf32>
    %187 = tpu.matmul %184, %186, %cst_198 {dimension_numbers = #tpu.dot_dimension_numbers<[1], [0], [0], [1], [0, 0, 1, 1], [], []>} : vector<16x128xbf16>, vector<128x128xbf16>, vector<16x128xf32> -> vector<16x128xf32>
    %188 = arith.addf %182, %187 : vector<16x128xf32>
    %189 = vector.broadcast %0 : vector<1x128xf32> to vector<16x128xf32>
    %190 = arith.addf %188, %189 : vector<16x128xf32>
    %cst_199 = arith.constant 0.000000e+00 : f32
    %191 = vector.broadcast %cst_199 : f32 to vector<16x128xf32>
    %192 = arith.maximumf %190, %191 : vector<16x128xf32>
    %193 = arith.truncf %192 : vector<16x128xf32> to vector<16x128xbf16>
    %c3_200 = arith.constant 3 : index
    %c0_201 = arith.constant 0 : index
    %c0_202 = arith.constant 0 : index
    %194 = vector.load %arg4[%c3_200, %c0_201, %c0_202] : memref<9x16x128xbf16, #tpu.memory_space<vmem>>, vector<1x16x128xbf16>
    %195 = vector.shape_cast %194 : vector<1x16x128xbf16> to vector<16x128xbf16>
    %196 = vector.shape_cast %193 : vector<16x128xbf16> to vector<1x16x128xbf16>
    tpu.vector_store %arg4[%c3_200, %c0_201, %c0_202], %196 {strides = array<i32>} : memref<9x16x128xbf16, #tpu.memory_space<vmem>>, vector<1x16x128xbf16>,
    %c4_203 = arith.constant 4 : index
    %c0_204 = arith.constant 0 : index
    %c0_205 = arith.constant 0 : index
    %197 = vector.load %arg1[%c4_203, %c0_204, %c0_205] : memref<15x16x128xbf16, #tpu.memory_space<vmem>>, vector<1x16x128xbf16>
    %198 = vector.shape_cast %197 : vector<1x16x128xbf16> to vector<16x128xbf16>
    %c0_206 = arith.constant 0 : index
    %c0_207 = arith.constant 0 : index
    %c0_208 = arith.constant 0 : index
    %199 = vector.load %arg2[%c0_206, %c0_207, %c0_208] : memref<7x128x128xbf16, #tpu.memory_space<vmem>>, vector<1x128x128xbf16>
    %200 = vector.shape_cast %199 : vector<1x128x128xbf16> to vector<128x128xbf16>
    %cst_209 = arith.constant dense<0.000000e+00> : vector<16x128xf32>
    %201 = tpu.matmul %198, %200, %cst_209 {dimension_numbers = #tpu.dot_dimension_numbers<[1], [0], [0], [1], [0, 0, 1, 1], [], []>} : vector<16x128xbf16>, vector<128x128xbf16>, vector<16x128xf32> -> vector<16x128xf32>
    %c5_210 = arith.constant 5 : index
    %c0_211 = arith.constant 0 : index
    %c0_212 = arith.constant 0 : index
    %202 = vector.load %arg1[%c5_210, %c0_211, %c0_212] : memref<15x16x128xbf16, #tpu.memory_space<vmem>>, vector<1x16x128xbf16>
    %203 = vector.shape_cast %202 : vector<1x16x128xbf16> to vector<16x128xbf16>
    %c1_213 = arith.constant 1 : index
    %c0_214 = arith.constant 0 : index
    %c0_215 = arith.constant 0 : index
    %204 = vector.load %arg2[%c1_213, %c0_214, %c0_215] : memref<7x128x128xbf16, #tpu.memory_space<vmem>>, vector<1x128x128xbf16>
    %205 = vector.shape_cast %204 : vector<1x128x128xbf16> to vector<128x128xbf16>
    %cst_216 = arith.constant dense<0.000000e+00> : vector<16x128xf32>
    %206 = tpu.matmul %203, %205, %cst_216 {dimension_numbers = #tpu.dot_dimension_numbers<[1], [0], [0], [1], [0, 0, 1, 1], [], []>} : vector<16x128xbf16>, vector<128x128xbf16>, vector<16x128xf32> -> vector<16x128xf32>
    %207 = arith.addf %201, %206 : vector<16x128xf32>
    %c6_217 = arith.constant 6 : index
    %c0_218 = arith.constant 0 : index
    %c0_219 = arith.constant 0 : index
    %208 = vector.load %arg1[%c6_217, %c0_218, %c0_219] : memref<15x16x128xbf16, #tpu.memory_space<vmem>>, vector<1x16x128xbf16>
    %209 = vector.shape_cast %208 : vector<1x16x128xbf16> to vector<16x128xbf16>
    %c2_220 = arith.constant 2 : index
    %c0_221 = arith.constant 0 : index
    %c0_222 = arith.constant 0 : index
    %210 = vector.load %arg2[%c2_220, %c0_221, %c0_222] : memref<7x128x128xbf16, #tpu.memory_space<vmem>>, vector<1x128x128xbf16>
    %211 = vector.shape_cast %210 : vector<1x128x128xbf16> to vector<128x128xbf16>
    %cst_223 = arith.constant dense<0.000000e+00> : vector<16x128xf32>
    %212 = tpu.matmul %209, %211, %cst_223 {dimension_numbers = #tpu.dot_dimension_numbers<[1], [0], [0], [1], [0, 0, 1, 1], [], []>} : vector<16x128xbf16>, vector<128x128xbf16>, vector<16x128xf32> -> vector<16x128xf32>
    %213 = arith.addf %207, %212 : vector<16x128xf32>
    %c7_224 = arith.constant 7 : index
    %c0_225 = arith.constant 0 : index
    %c0_226 = arith.constant 0 : index
    %214 = vector.load %arg1[%c7_224, %c0_225, %c0_226] : memref<15x16x128xbf16, #tpu.memory_space<vmem>>, vector<1x16x128xbf16>
    %215 = vector.shape_cast %214 : vector<1x16x128xbf16> to vector<16x128xbf16>
    %c3_227 = arith.constant 3 : index
    %c0_228 = arith.constant 0 : index
    %c0_229 = arith.constant 0 : index
    %216 = vector.load %arg2[%c3_227, %c0_228, %c0_229] : memref<7x128x128xbf16, #tpu.memory_space<vmem>>, vector<1x128x128xbf16>
    %217 = vector.shape_cast %216 : vector<1x128x128xbf16> to vector<128x128xbf16>
    %cst_230 = arith.constant dense<0.000000e+00> : vector<16x128xf32>
    %218 = tpu.matmul %215, %217, %cst_230 {dimension_numbers = #tpu.dot_dimension_numbers<[1], [0], [0], [1], [0, 0, 1, 1], [], []>} : vector<16x128xbf16>, vector<128x128xbf16>, vector<16x128xf32> -> vector<16x128xf32>
    %219 = arith.addf %213, %218 : vector<16x128xf32>
    %c8_231 = arith.constant 8 : index
    %c0_232 = arith.constant 0 : index
    %c0_233 = arith.constant 0 : index
    %220 = vector.load %arg1[%c8_231, %c0_232, %c0_233] : memref<15x16x128xbf16, #tpu.memory_space<vmem>>, vector<1x16x128xbf16>
    %221 = vector.shape_cast %220 : vector<1x16x128xbf16> to vector<16x128xbf16>
    %c4_234 = arith.constant 4 : index
    %c0_235 = arith.constant 0 : index
    %c0_236 = arith.constant 0 : index
    %222 = vector.load %arg2[%c4_234, %c0_235, %c0_236] : memref<7x128x128xbf16, #tpu.memory_space<vmem>>, vector<1x128x128xbf16>
    %223 = vector.shape_cast %222 : vector<1x128x128xbf16> to vector<128x128xbf16>
    %cst_237 = arith.constant dense<0.000000e+00> : vector<16x128xf32>
    %224 = tpu.matmul %221, %223, %cst_237 {dimension_numbers = #tpu.dot_dimension_numbers<[1], [0], [0], [1], [0, 0, 1, 1], [], []>} : vector<16x128xbf16>, vector<128x128xbf16>, vector<16x128xf32> -> vector<16x128xf32>
    %225 = arith.addf %219, %224 : vector<16x128xf32>
    %c9_238 = arith.constant 9 : index
    %c0_239 = arith.constant 0 : index
    %c0_240 = arith.constant 0 : index
    %226 = vector.load %arg1[%c9_238, %c0_239, %c0_240] : memref<15x16x128xbf16, #tpu.memory_space<vmem>>, vector<1x16x128xbf16>
    %227 = vector.shape_cast %226 : vector<1x16x128xbf16> to vector<16x128xbf16>
    %c5_241 = arith.constant 5 : index
    %c0_242 = arith.constant 0 : index
    %c0_243 = arith.constant 0 : index
    %228 = vector.load %arg2[%c5_241, %c0_242, %c0_243] : memref<7x128x128xbf16, #tpu.memory_space<vmem>>, vector<1x128x128xbf16>
    %229 = vector.shape_cast %228 : vector<1x128x128xbf16> to vector<128x128xbf16>
    %cst_244 = arith.constant dense<0.000000e+00> : vector<16x128xf32>
    %230 = tpu.matmul %227, %229, %cst_244 {dimension_numbers = #tpu.dot_dimension_numbers<[1], [0], [0], [1], [0, 0, 1, 1], [], []>} : vector<16x128xbf16>, vector<128x128xbf16>, vector<16x128xf32> -> vector<16x128xf32>
    %231 = arith.addf %225, %230 : vector<16x128xf32>
    %c10 = arith.constant 10 : index
    %c0_245 = arith.constant 0 : index
    %c0_246 = arith.constant 0 : index
    %232 = vector.load %arg1[%c10, %c0_245, %c0_246] : memref<15x16x128xbf16, #tpu.memory_space<vmem>>, vector<1x16x128xbf16>
    %233 = vector.shape_cast %232 : vector<1x16x128xbf16> to vector<16x128xbf16>
    %c6_247 = arith.constant 6 : index
    %c0_248 = arith.constant 0 : index
    %c0_249 = arith.constant 0 : index
    %234 = vector.load %arg2[%c6_247, %c0_248, %c0_249] : memref<7x128x128xbf16, #tpu.memory_space<vmem>>, vector<1x128x128xbf16>
    %235 = vector.shape_cast %234 : vector<1x128x128xbf16> to vector<128x128xbf16>
    %cst_250 = arith.constant dense<0.000000e+00> : vector<16x128xf32>
    %236 = tpu.matmul %233, %235, %cst_250 {dimension_numbers = #tpu.dot_dimension_numbers<[1], [0], [0], [1], [0, 0, 1, 1], [], []>} : vector<16x128xbf16>, vector<128x128xbf16>, vector<16x128xf32> -> vector<16x128xf32>
    %237 = arith.addf %231, %236 : vector<16x128xf32>
    %238 = vector.broadcast %0 : vector<1x128xf32> to vector<16x128xf32>
    %239 = arith.addf %237, %238 : vector<16x128xf32>
    %cst_251 = arith.constant 0.000000e+00 : f32
    %240 = vector.broadcast %cst_251 : f32 to vector<16x128xf32>
    %241 = arith.maximumf %239, %240 : vector<16x128xf32>
    %242 = arith.truncf %241 : vector<16x128xf32> to vector<16x128xbf16>
    %c4_252 = arith.constant 4 : index
    %c0_253 = arith.constant 0 : index
    %c0_254 = arith.constant 0 : index
    %243 = vector.load %arg4[%c4_252, %c0_253, %c0_254] : memref<9x16x128xbf16, #tpu.memory_space<vmem>>, vector<1x16x128xbf16>
    %244 = vector.shape_cast %243 : vector<1x16x128xbf16> to vector<16x128xbf16>
    %245 = vector.shape_cast %242 : vector<16x128xbf16> to vector<1x16x128xbf16>
    tpu.vector_store %arg4[%c4_252, %c0_253, %c0_254], %245 {strides = array<i32>} : memref<9x16x128xbf16, #tpu.memory_space<vmem>>, vector<1x16x128xbf16>,
    %c5_255 = arith.constant 5 : index
    %c0_256 = arith.constant 0 : index
    %c0_257 = arith.constant 0 : index
    %246 = vector.load %arg1[%c5_255, %c0_256, %c0_257] : memref<15x16x128xbf16, #tpu.memory_space<vmem>>, vector<1x16x128xbf16>
    %247 = vector.shape_cast %246 : vector<1x16x128xbf16> to vector<16x128xbf16>
    %c0_258 = arith.constant 0 : index
    %c0_259 = arith.constant 0 : index
    %c0_260 = arith.constant 0 : index
    %248 = vector.load %arg2[%c0_258, %c0_259, %c0_260] : memref<7x128x128xbf16, #tpu.memory_space<vmem>>, vector<1x128x128xbf16>
    %249 = vector.shape_cast %248 : vector<1x128x128xbf16> to vector<128x128xbf16>
    %cst_261 = arith.constant dense<0.000000e+00> : vector<16x128xf32>
    %250 = tpu.matmul %247, %249, %cst_261 {dimension_numbers = #tpu.dot_dimension_numbers<[1], [0], [0], [1], [0, 0, 1, 1], [], []>} : vector<16x128xbf16>, vector<128x128xbf16>, vector<16x128xf32> -> vector<16x128xf32>
    %c6_262 = arith.constant 6 : index
    %c0_263 = arith.constant 0 : index
    %c0_264 = arith.constant 0 : index
    %251 = vector.load %arg1[%c6_262, %c0_263, %c0_264] : memref<15x16x128xbf16, #tpu.memory_space<vmem>>, vector<1x16x128xbf16>
    %252 = vector.shape_cast %251 : vector<1x16x128xbf16> to vector<16x128xbf16>
    %c1_265 = arith.constant 1 : index
    %c0_266 = arith.constant 0 : index
    %c0_267 = arith.constant 0 : index
    %253 = vector.load %arg2[%c1_265, %c0_266, %c0_267] : memref<7x128x128xbf16, #tpu.memory_space<vmem>>, vector<1x128x128xbf16>
    %254 = vector.shape_cast %253 : vector<1x128x128xbf16> to vector<128x128xbf16>
    %cst_268 = arith.constant dense<0.000000e+00> : vector<16x128xf32>
    %255 = tpu.matmul %252, %254, %cst_268 {dimension_numbers = #tpu.dot_dimension_numbers<[1], [0], [0], [1], [0, 0, 1, 1], [], []>} : vector<16x128xbf16>, vector<128x128xbf16>, vector<16x128xf32> -> vector<16x128xf32>
    %256 = arith.addf %250, %255 : vector<16x128xf32>
    %c7_269 = arith.constant 7 : index
    %c0_270 = arith.constant 0 : index
    %c0_271 = arith.constant 0 : index
    %257 = vector.load %arg1[%c7_269, %c0_270, %c0_271] : memref<15x16x128xbf16, #tpu.memory_space<vmem>>, vector<1x16x128xbf16>
    %258 = vector.shape_cast %257 : vector<1x16x128xbf16> to vector<16x128xbf16>
    %c2_272 = arith.constant 2 : index
    %c0_273 = arith.constant 0 : index
    %c0_274 = arith.constant 0 : index
    %259 = vector.load %arg2[%c2_272, %c0_273, %c0_274] : memref<7x128x128xbf16, #tpu.memory_space<vmem>>, vector<1x128x128xbf16>
    %260 = vector.shape_cast %259 : vector<1x128x128xbf16> to vector<128x128xbf16>
    %cst_275 = arith.constant dense<0.000000e+00> : vector<16x128xf32>
    %261 = tpu.matmul %258, %260, %cst_275 {dimension_numbers = #tpu.dot_dimension_numbers<[1], [0], [0], [1], [0, 0, 1, 1], [], []>} : vector<16x128xbf16>, vector<128x128xbf16>, vector<16x128xf32> -> vector<16x128xf32>
    %262 = arith.addf %256, %261 : vector<16x128xf32>
    %c8_276 = arith.constant 8 : index
    %c0_277 = arith.constant 0 : index
    %c0_278 = arith.constant 0 : index
    %263 = vector.load %arg1[%c8_276, %c0_277, %c0_278] : memref<15x16x128xbf16, #tpu.memory_space<vmem>>, vector<1x16x128xbf16>
    %264 = vector.shape_cast %263 : vector<1x16x128xbf16> to vector<16x128xbf16>
    %c3_279 = arith.constant 3 : index
    %c0_280 = arith.constant 0 : index
    %c0_281 = arith.constant 0 : index
    %265 = vector.load %arg2[%c3_279, %c0_280, %c0_281] : memref<7x128x128xbf16, #tpu.memory_space<vmem>>, vector<1x128x128xbf16>
    %266 = vector.shape_cast %265 : vector<1x128x128xbf16> to vector<128x128xbf16>
    %cst_282 = arith.constant dense<0.000000e+00> : vector<16x128xf32>
    %267 = tpu.matmul %264, %266, %cst_282 {dimension_numbers = #tpu.dot_dimension_numbers<[1], [0], [0], [1], [0, 0, 1, 1], [], []>} : vector<16x128xbf16>, vector<128x128xbf16>, vector<16x128xf32> -> vector<16x128xf32>
    %268 = arith.addf %262, %267 : vector<16x128xf32>
    %c9_283 = arith.constant 9 : index
    %c0_284 = arith.constant 0 : index
    %c0_285 = arith.constant 0 : index
    %269 = vector.load %arg1[%c9_283, %c0_284, %c0_285] : memref<15x16x128xbf16, #tpu.memory_space<vmem>>, vector<1x16x128xbf16>
    %270 = vector.shape_cast %269 : vector<1x16x128xbf16> to vector<16x128xbf16>
    %c4_286 = arith.constant 4 : index
    %c0_287 = arith.constant 0 : index
    %c0_288 = arith.constant 0 : index
    %271 = vector.load %arg2[%c4_286, %c0_287, %c0_288] : memref<7x128x128xbf16, #tpu.memory_space<vmem>>, vector<1x128x128xbf16>
    %272 = vector.shape_cast %271 : vector<1x128x128xbf16> to vector<128x128xbf16>
    %cst_289 = arith.constant dense<0.000000e+00> : vector<16x128xf32>
    %273 = tpu.matmul %270, %272, %cst_289 {dimension_numbers = #tpu.dot_dimension_numbers<[1], [0], [0], [1], [0, 0, 1, 1], [], []>} : vector<16x128xbf16>, vector<128x128xbf16>, vector<16x128xf32> -> vector<16x128xf32>
    %274 = arith.addf %268, %273 : vector<16x128xf32>
    %c10_290 = arith.constant 10 : index
    %c0_291 = arith.constant 0 : index
    %c0_292 = arith.constant 0 : index
    %275 = vector.load %arg1[%c10_290, %c0_291, %c0_292] : memref<15x16x128xbf16, #tpu.memory_space<vmem>>, vector<1x16x128xbf16>
    %276 = vector.shape_cast %275 : vector<1x16x128xbf16> to vector<16x128xbf16>
    %c5_293 = arith.constant 5 : index
    %c0_294 = arith.constant 0 : index
    %c0_295 = arith.constant 0 : index
    %277 = vector.load %arg2[%c5_293, %c0_294, %c0_295] : memref<7x128x128xbf16, #tpu.memory_space<vmem>>, vector<1x128x128xbf16>
    %278 = vector.shape_cast %277 : vector<1x128x128xbf16> to vector<128x128xbf16>
    %cst_296 = arith.constant dense<0.000000e+00> : vector<16x128xf32>
    %279 = tpu.matmul %276, %278, %cst_296 {dimension_numbers = #tpu.dot_dimension_numbers<[1], [0], [0], [1], [0, 0, 1, 1], [], []>} : vector<16x128xbf16>, vector<128x128xbf16>, vector<16x128xf32> -> vector<16x128xf32>
    %280 = arith.addf %274, %279 : vector<16x128xf32>
    %c11 = arith.constant 11 : index
    %c0_297 = arith.constant 0 : index
    %c0_298 = arith.constant 0 : index
    %281 = vector.load %arg1[%c11, %c0_297, %c0_298] : memref<15x16x128xbf16, #tpu.memory_space<vmem>>, vector<1x16x128xbf16>
    %282 = vector.shape_cast %281 : vector<1x16x128xbf16> to vector<16x128xbf16>
    %c6_299 = arith.constant 6 : index
    %c0_300 = arith.constant 0 : index
    %c0_301 = arith.constant 0 : index
    %283 = vector.load %arg2[%c6_299, %c0_300, %c0_301] : memref<7x128x128xbf16, #tpu.memory_space<vmem>>, vector<1x128x128xbf16>
    %284 = vector.shape_cast %283 : vector<1x128x128xbf16> to vector<128x128xbf16>
    %cst_302 = arith.constant dense<0.000000e+00> : vector<16x128xf32>
    %285 = tpu.matmul %282, %284, %cst_302 {dimension_numbers = #tpu.dot_dimension_numbers<[1], [0], [0], [1], [0, 0, 1, 1], [], []>} : vector<16x128xbf16>, vector<128x128xbf16>, vector<16x128xf32> -> vector<16x128xf32>
    %286 = arith.addf %280, %285 : vector<16x128xf32>
    %287 = vector.broadcast %0 : vector<1x128xf32> to vector<16x128xf32>
    %288 = arith.addf %286, %287 : vector<16x128xf32>
    %cst_303 = arith.constant 0.000000e+00 : f32
    %289 = vector.broadcast %cst_303 : f32 to vector<16x128xf32>
    %290 = arith.maximumf %288, %289 : vector<16x128xf32>
    %291 = arith.truncf %290 : vector<16x128xf32> to vector<16x128xbf16>
    %c5_304 = arith.constant 5 : index
    %c0_305 = arith.constant 0 : index
    %c0_306 = arith.constant 0 : index
    %292 = vector.load %arg4[%c5_304, %c0_305, %c0_306] : memref<9x16x128xbf16, #tpu.memory_space<vmem>>, vector<1x16x128xbf16>
    %293 = vector.shape_cast %292 : vector<1x16x128xbf16> to vector<16x128xbf16>
    %294 = vector.shape_cast %291 : vector<16x128xbf16> to vector<1x16x128xbf16>
    tpu.vector_store %arg4[%c5_304, %c0_305, %c0_306], %294 {strides = array<i32>} : memref<9x16x128xbf16, #tpu.memory_space<vmem>>, vector<1x16x128xbf16>,
    %c6_307 = arith.constant 6 : index
    %c0_308 = arith.constant 0 : index
    %c0_309 = arith.constant 0 : index
    %295 = vector.load %arg1[%c6_307, %c0_308, %c0_309] : memref<15x16x128xbf16, #tpu.memory_space<vmem>>, vector<1x16x128xbf16>
    %296 = vector.shape_cast %295 : vector<1x16x128xbf16> to vector<16x128xbf16>
    %c0_310 = arith.constant 0 : index
    %c0_311 = arith.constant 0 : index
    %c0_312 = arith.constant 0 : index
    %297 = vector.load %arg2[%c0_310, %c0_311, %c0_312] : memref<7x128x128xbf16, #tpu.memory_space<vmem>>, vector<1x128x128xbf16>
    %298 = vector.shape_cast %297 : vector<1x128x128xbf16> to vector<128x128xbf16>
    %cst_313 = arith.constant dense<0.000000e+00> : vector<16x128xf32>
    %299 = tpu.matmul %296, %298, %cst_313 {dimension_numbers = #tpu.dot_dimension_numbers<[1], [0], [0], [1], [0, 0, 1, 1], [], []>} : vector<16x128xbf16>, vector<128x128xbf16>, vector<16x128xf32> -> vector<16x128xf32>
    %c7_314 = arith.constant 7 : index
    %c0_315 = arith.constant 0 : index
    %c0_316 = arith.constant 0 : index
    %300 = vector.load %arg1[%c7_314, %c0_315, %c0_316] : memref<15x16x128xbf16, #tpu.memory_space<vmem>>, vector<1x16x128xbf16>
    %301 = vector.shape_cast %300 : vector<1x16x128xbf16> to vector<16x128xbf16>
    %c1_317 = arith.constant 1 : index
    %c0_318 = arith.constant 0 : index
    %c0_319 = arith.constant 0 : index
    %302 = vector.load %arg2[%c1_317, %c0_318, %c0_319] : memref<7x128x128xbf16, #tpu.memory_space<vmem>>, vector<1x128x128xbf16>
    %303 = vector.shape_cast %302 : vector<1x128x128xbf16> to vector<128x128xbf16>
    %cst_320 = arith.constant dense<0.000000e+00> : vector<16x128xf32>
    %304 = tpu.matmul %301, %303, %cst_320 {dimension_numbers = #tpu.dot_dimension_numbers<[1], [0], [0], [1], [0, 0, 1, 1], [], []>} : vector<16x128xbf16>, vector<128x128xbf16>, vector<16x128xf32> -> vector<16x128xf32>
    %305 = arith.addf %299, %304 : vector<16x128xf32>
    %c8_321 = arith.constant 8 : index
    %c0_322 = arith.constant 0 : index
    %c0_323 = arith.constant 0 : index
    %306 = vector.load %arg1[%c8_321, %c0_322, %c0_323] : memref<15x16x128xbf16, #tpu.memory_space<vmem>>, vector<1x16x128xbf16>
    %307 = vector.shape_cast %306 : vector<1x16x128xbf16> to vector<16x128xbf16>
    %c2_324 = arith.constant 2 : index
    %c0_325 = arith.constant 0 : index
    %c0_326 = arith.constant 0 : index
    %308 = vector.load %arg2[%c2_324, %c0_325, %c0_326] : memref<7x128x128xbf16, #tpu.memory_space<vmem>>, vector<1x128x128xbf16>
    %309 = vector.shape_cast %308 : vector<1x128x128xbf16> to vector<128x128xbf16>
    %cst_327 = arith.constant dense<0.000000e+00> : vector<16x128xf32>
    %310 = tpu.matmul %307, %309, %cst_327 {dimension_numbers = #tpu.dot_dimension_numbers<[1], [0], [0], [1], [0, 0, 1, 1], [], []>} : vector<16x128xbf16>, vector<128x128xbf16>, vector<16x128xf32> -> vector<16x128xf32>
    %311 = arith.addf %305, %310 : vector<16x128xf32>
    %c9_328 = arith.constant 9 : index
    %c0_329 = arith.constant 0 : index
    %c0_330 = arith.constant 0 : index
    %312 = vector.load %arg1[%c9_328, %c0_329, %c0_330] : memref<15x16x128xbf16, #tpu.memory_space<vmem>>, vector<1x16x128xbf16>
    %313 = vector.shape_cast %312 : vector<1x16x128xbf16> to vector<16x128xbf16>
    %c3_331 = arith.constant 3 : index
    %c0_332 = arith.constant 0 : index
    %c0_333 = arith.constant 0 : index
    %314 = vector.load %arg2[%c3_331, %c0_332, %c0_333] : memref<7x128x128xbf16, #tpu.memory_space<vmem>>, vector<1x128x128xbf16>
    %315 = vector.shape_cast %314 : vector<1x128x128xbf16> to vector<128x128xbf16>
    %cst_334 = arith.constant dense<0.000000e+00> : vector<16x128xf32>
    %316 = tpu.matmul %313, %315, %cst_334 {dimension_numbers = #tpu.dot_dimension_numbers<[1], [0], [0], [1], [0, 0, 1, 1], [], []>} : vector<16x128xbf16>, vector<128x128xbf16>, vector<16x128xf32> -> vector<16x128xf32>
    %317 = arith.addf %311, %316 : vector<16x128xf32>
    %c10_335 = arith.constant 10 : index
    %c0_336 = arith.constant 0 : index
    %c0_337 = arith.constant 0 : index
    %318 = vector.load %arg1[%c10_335, %c0_336, %c0_337] : memref<15x16x128xbf16, #tpu.memory_space<vmem>>, vector<1x16x128xbf16>
    %319 = vector.shape_cast %318 : vector<1x16x128xbf16> to vector<16x128xbf16>
    %c4_338 = arith.constant 4 : index
    %c0_339 = arith.constant 0 : index
    %c0_340 = arith.constant 0 : index
    %320 = vector.load %arg2[%c4_338, %c0_339, %c0_340] : memref<7x128x128xbf16, #tpu.memory_space<vmem>>, vector<1x128x128xbf16>
    %321 = vector.shape_cast %320 : vector<1x128x128xbf16> to vector<128x128xbf16>
    %cst_341 = arith.constant dense<0.000000e+00> : vector<16x128xf32>
    %322 = tpu.matmul %319, %321, %cst_341 {dimension_numbers = #tpu.dot_dimension_numbers<[1], [0], [0], [1], [0, 0, 1, 1], [], []>} : vector<16x128xbf16>, vector<128x128xbf16>, vector<16x128xf32> -> vector<16x128xf32>
    %323 = arith.addf %317, %322 : vector<16x128xf32>
    %c11_342 = arith.constant 11 : index
    %c0_343 = arith.constant 0 : index
    %c0_344 = arith.constant 0 : index
    %324 = vector.load %arg1[%c11_342, %c0_343, %c0_344] : memref<15x16x128xbf16, #tpu.memory_space<vmem>>, vector<1x16x128xbf16>
    %325 = vector.shape_cast %324 : vector<1x16x128xbf16> to vector<16x128xbf16>
    %c5_345 = arith.constant 5 : index
    %c0_346 = arith.constant 0 : index
    %c0_347 = arith.constant 0 : index
    %326 = vector.load %arg2[%c5_345, %c0_346, %c0_347] : memref<7x128x128xbf16, #tpu.memory_space<vmem>>, vector<1x128x128xbf16>
    %327 = vector.shape_cast %326 : vector<1x128x128xbf16> to vector<128x128xbf16>
    %cst_348 = arith.constant dense<0.000000e+00> : vector<16x128xf32>
    %328 = tpu.matmul %325, %327, %cst_348 {dimension_numbers = #tpu.dot_dimension_numbers<[1], [0], [0], [1], [0, 0, 1, 1], [], []>} : vector<16x128xbf16>, vector<128x128xbf16>, vector<16x128xf32> -> vector<16x128xf32>
    %329 = arith.addf %323, %328 : vector<16x128xf32>
    %c12 = arith.constant 12 : index
    %c0_349 = arith.constant 0 : index
    %c0_350 = arith.constant 0 : index
    %330 = vector.load %arg1[%c12, %c0_349, %c0_350] : memref<15x16x128xbf16, #tpu.memory_space<vmem>>, vector<1x16x128xbf16>
    %331 = vector.shape_cast %330 : vector<1x16x128xbf16> to vector<16x128xbf16>
    %c6_351 = arith.constant 6 : index
    %c0_352 = arith.constant 0 : index
    %c0_353 = arith.constant 0 : index
    %332 = vector.load %arg2[%c6_351, %c0_352, %c0_353] : memref<7x128x128xbf16, #tpu.memory_space<vmem>>, vector<1x128x128xbf16>
    %333 = vector.shape_cast %332 : vector<1x128x128xbf16> to vector<128x128xbf16>
    %cst_354 = arith.constant dense<0.000000e+00> : vector<16x128xf32>
    %334 = tpu.matmul %331, %333, %cst_354 {dimension_numbers = #tpu.dot_dimension_numbers<[1], [0], [0], [1], [0, 0, 1, 1], [], []>} : vector<16x128xbf16>, vector<128x128xbf16>, vector<16x128xf32> -> vector<16x128xf32>
    %335 = arith.addf %329, %334 : vector<16x128xf32>
    %336 = vector.broadcast %0 : vector<1x128xf32> to vector<16x128xf32>
    %337 = arith.addf %335, %336 : vector<16x128xf32>
    %cst_355 = arith.constant 0.000000e+00 : f32
    %338 = vector.broadcast %cst_355 : f32 to vector<16x128xf32>
    %339 = arith.maximumf %337, %338 : vector<16x128xf32>
    %340 = arith.truncf %339 : vector<16x128xf32> to vector<16x128xbf16>
    %c6_356 = arith.constant 6 : index
    %c0_357 = arith.constant 0 : index
    %c0_358 = arith.constant 0 : index
    %341 = vector.load %arg4[%c6_356, %c0_357, %c0_358] : memref<9x16x128xbf16, #tpu.memory_space<vmem>>, vector<1x16x128xbf16>
    %342 = vector.shape_cast %341 : vector<1x16x128xbf16> to vector<16x128xbf16>
    %343 = vector.shape_cast %340 : vector<16x128xbf16> to vector<1x16x128xbf16>
    tpu.vector_store %arg4[%c6_356, %c0_357, %c0_358], %343 {strides = array<i32>} : memref<9x16x128xbf16, #tpu.memory_space<vmem>>, vector<1x16x128xbf16>,
    %c7_359 = arith.constant 7 : index
    %c0_360 = arith.constant 0 : index
    %c0_361 = arith.constant 0 : index
    %344 = vector.load %arg1[%c7_359, %c0_360, %c0_361] : memref<15x16x128xbf16, #tpu.memory_space<vmem>>, vector<1x16x128xbf16>
    %345 = vector.shape_cast %344 : vector<1x16x128xbf16> to vector<16x128xbf16>
    %c0_362 = arith.constant 0 : index
    %c0_363 = arith.constant 0 : index
    %c0_364 = arith.constant 0 : index
    %346 = vector.load %arg2[%c0_362, %c0_363, %c0_364] : memref<7x128x128xbf16, #tpu.memory_space<vmem>>, vector<1x128x128xbf16>
    %347 = vector.shape_cast %346 : vector<1x128x128xbf16> to vector<128x128xbf16>
    %cst_365 = arith.constant dense<0.000000e+00> : vector<16x128xf32>
    %348 = tpu.matmul %345, %347, %cst_365 {dimension_numbers = #tpu.dot_dimension_numbers<[1], [0], [0], [1], [0, 0, 1, 1], [], []>} : vector<16x128xbf16>, vector<128x128xbf16>, vector<16x128xf32> -> vector<16x128xf32>
    %c8_366 = arith.constant 8 : index
    %c0_367 = arith.constant 0 : index
    %c0_368 = arith.constant 0 : index
    %349 = vector.load %arg1[%c8_366, %c0_367, %c0_368] : memref<15x16x128xbf16, #tpu.memory_space<vmem>>, vector<1x16x128xbf16>
    %350 = vector.shape_cast %349 : vector<1x16x128xbf16> to vector<16x128xbf16>
    %c1_369 = arith.constant 1 : index
    %c0_370 = arith.constant 0 : index
    %c0_371 = arith.constant 0 : index
    %351 = vector.load %arg2[%c1_369, %c0_370, %c0_371] : memref<7x128x128xbf16, #tpu.memory_space<vmem>>, vector<1x128x128xbf16>
    %352 = vector.shape_cast %351 : vector<1x128x128xbf16> to vector<128x128xbf16>
    %cst_372 = arith.constant dense<0.000000e+00> : vector<16x128xf32>
    %353 = tpu.matmul %350, %352, %cst_372 {dimension_numbers = #tpu.dot_dimension_numbers<[1], [0], [0], [1], [0, 0, 1, 1], [], []>} : vector<16x128xbf16>, vector<128x128xbf16>, vector<16x128xf32> -> vector<16x128xf32>
    %354 = arith.addf %348, %353 : vector<16x128xf32>
    %c9_373 = arith.constant 9 : index
    %c0_374 = arith.constant 0 : index
    %c0_375 = arith.constant 0 : index
    %355 = vector.load %arg1[%c9_373, %c0_374, %c0_375] : memref<15x16x128xbf16, #tpu.memory_space<vmem>>, vector<1x16x128xbf16>
    %356 = vector.shape_cast %355 : vector<1x16x128xbf16> to vector<16x128xbf16>
    %c2_376 = arith.constant 2 : index
    %c0_377 = arith.constant 0 : index
    %c0_378 = arith.constant 0 : index
    %357 = vector.load %arg2[%c2_376, %c0_377, %c0_378] : memref<7x128x128xbf16, #tpu.memory_space<vmem>>, vector<1x128x128xbf16>
    %358 = vector.shape_cast %357 : vector<1x128x128xbf16> to vector<128x128xbf16>
    %cst_379 = arith.constant dense<0.000000e+00> : vector<16x128xf32>
    %359 = tpu.matmul %356, %358, %cst_379 {dimension_numbers = #tpu.dot_dimension_numbers<[1], [0], [0], [1], [0, 0, 1, 1], [], []>} : vector<16x128xbf16>, vector<128x128xbf16>, vector<16x128xf32> -> vector<16x128xf32>
    %360 = arith.addf %354, %359 : vector<16x128xf32>
    %c10_380 = arith.constant 10 : index
    %c0_381 = arith.constant 0 : index
    %c0_382 = arith.constant 0 : index
    %361 = vector.load %arg1[%c10_380, %c0_381, %c0_382] : memref<15x16x128xbf16, #tpu.memory_space<vmem>>, vector<1x16x128xbf16>
    %362 = vector.shape_cast %361 : vector<1x16x128xbf16> to vector<16x128xbf16>
    %c3_383 = arith.constant 3 : index
    %c0_384 = arith.constant 0 : index
    %c0_385 = arith.constant 0 : index
    %363 = vector.load %arg2[%c3_383, %c0_384, %c0_385] : memref<7x128x128xbf16, #tpu.memory_space<vmem>>, vector<1x128x128xbf16>
    %364 = vector.shape_cast %363 : vector<1x128x128xbf16> to vector<128x128xbf16>
    %cst_386 = arith.constant dense<0.000000e+00> : vector<16x128xf32>
    %365 = tpu.matmul %362, %364, %cst_386 {dimension_numbers = #tpu.dot_dimension_numbers<[1], [0], [0], [1], [0, 0, 1, 1], [], []>} : vector<16x128xbf16>, vector<128x128xbf16>, vector<16x128xf32> -> vector<16x128xf32>
    %366 = arith.addf %360, %365 : vector<16x128xf32>
    %c11_387 = arith.constant 11 : index
    %c0_388 = arith.constant 0 : index
    %c0_389 = arith.constant 0 : index
    %367 = vector.load %arg1[%c11_387, %c0_388, %c0_389] : memref<15x16x128xbf16, #tpu.memory_space<vmem>>, vector<1x16x128xbf16>
    %368 = vector.shape_cast %367 : vector<1x16x128xbf16> to vector<16x128xbf16>
    %c4_390 = arith.constant 4 : index
    %c0_391 = arith.constant 0 : index
    %c0_392 = arith.constant 0 : index
    %369 = vector.load %arg2[%c4_390, %c0_391, %c0_392] : memref<7x128x128xbf16, #tpu.memory_space<vmem>>, vector<1x128x128xbf16>
    %370 = vector.shape_cast %369 : vector<1x128x128xbf16> to vector<128x128xbf16>
    %cst_393 = arith.constant dense<0.000000e+00> : vector<16x128xf32>
    %371 = tpu.matmul %368, %370, %cst_393 {dimension_numbers = #tpu.dot_dimension_numbers<[1], [0], [0], [1], [0, 0, 1, 1], [], []>} : vector<16x128xbf16>, vector<128x128xbf16>, vector<16x128xf32> -> vector<16x128xf32>
    %372 = arith.addf %366, %371 : vector<16x128xf32>
    %c12_394 = arith.constant 12 : index
    %c0_395 = arith.constant 0 : index
    %c0_396 = arith.constant 0 : index
    %373 = vector.load %arg1[%c12_394, %c0_395, %c0_396] : memref<15x16x128xbf16, #tpu.memory_space<vmem>>, vector<1x16x128xbf16>
    %374 = vector.shape_cast %373 : vector<1x16x128xbf16> to vector<16x128xbf16>
    %c5_397 = arith.constant 5 : index
    %c0_398 = arith.constant 0 : index
    %c0_399 = arith.constant 0 : index
    %375 = vector.load %arg2[%c5_397, %c0_398, %c0_399] : memref<7x128x128xbf16, #tpu.memory_space<vmem>>, vector<1x128x128xbf16>
    %376 = vector.shape_cast %375 : vector<1x128x128xbf16> to vector<128x128xbf16>
    %cst_400 = arith.constant dense<0.000000e+00> : vector<16x128xf32>
    %377 = tpu.matmul %374, %376, %cst_400 {dimension_numbers = #tpu.dot_dimension_numbers<[1], [0], [0], [1], [0, 0, 1, 1], [], []>} : vector<16x128xbf16>, vector<128x128xbf16>, vector<16x128xf32> -> vector<16x128xf32>
    %378 = arith.addf %372, %377 : vector<16x128xf32>
    %c13 = arith.constant 13 : index
    %c0_401 = arith.constant 0 : index
    %c0_402 = arith.constant 0 : index
    %379 = vector.load %arg1[%c13, %c0_401, %c0_402] : memref<15x16x128xbf16, #tpu.memory_space<vmem>>, vector<1x16x128xbf16>
    %380 = vector.shape_cast %379 : vector<1x16x128xbf16> to vector<16x128xbf16>
    %c6_403 = arith.constant 6 : index
    %c0_404 = arith.constant 0 : index
    %c0_405 = arith.constant 0 : index
    %381 = vector.load %arg2[%c6_403, %c0_404, %c0_405] : memref<7x128x128xbf16, #tpu.memory_space<vmem>>, vector<1x128x128xbf16>
    %382 = vector.shape_cast %381 : vector<1x128x128xbf16> to vector<128x128xbf16>
    %cst_406 = arith.constant dense<0.000000e+00> : vector<16x128xf32>
    %383 = tpu.matmul %380, %382, %cst_406 {dimension_numbers = #tpu.dot_dimension_numbers<[1], [0], [0], [1], [0, 0, 1, 1], [], []>} : vector<16x128xbf16>, vector<128x128xbf16>, vector<16x128xf32> -> vector<16x128xf32>
    %384 = arith.addf %378, %383 : vector<16x128xf32>
    %385 = vector.broadcast %0 : vector<1x128xf32> to vector<16x128xf32>
    %386 = arith.addf %384, %385 : vector<16x128xf32>
    %cst_407 = arith.constant 0.000000e+00 : f32
    %387 = vector.broadcast %cst_407 : f32 to vector<16x128xf32>
    %388 = arith.maximumf %386, %387 : vector<16x128xf32>
    %389 = arith.truncf %388 : vector<16x128xf32> to vector<16x128xbf16>
    %c7_408 = arith.constant 7 : index
    %c0_409 = arith.constant 0 : index
    %c0_410 = arith.constant 0 : index
    %390 = vector.load %arg4[%c7_408, %c0_409, %c0_410] : memref<9x16x128xbf16, #tpu.memory_space<vmem>>, vector<1x16x128xbf16>
    %391 = vector.shape_cast %390 : vector<1x16x128xbf16> to vector<16x128xbf16>
    %392 = vector.shape_cast %389 : vector<16x128xbf16> to vector<1x16x128xbf16>
    tpu.vector_store %arg4[%c7_408, %c0_409, %c0_410], %392 {strides = array<i32>} : memref<9x16x128xbf16, #tpu.memory_space<vmem>>, vector<1x16x128xbf16>,
    %c8_411 = arith.constant 8 : index
    %c0_412 = arith.constant 0 : index
    %c0_413 = arith.constant 0 : index
    %393 = vector.load %arg1[%c8_411, %c0_412, %c0_413] : memref<15x16x128xbf16, #tpu.memory_space<vmem>>, vector<1x16x128xbf16>
    %394 = vector.shape_cast %393 : vector<1x16x128xbf16> to vector<16x128xbf16>
    %c0_414 = arith.constant 0 : index
    %c0_415 = arith.constant 0 : index
    %c0_416 = arith.constant 0 : index
    %395 = vector.load %arg2[%c0_414, %c0_415, %c0_416] : memref<7x128x128xbf16, #tpu.memory_space<vmem>>, vector<1x128x128xbf16>
    %396 = vector.shape_cast %395 : vector<1x128x128xbf16> to vector<128x128xbf16>
    %cst_417 = arith.constant dense<0.000000e+00> : vector<16x128xf32>
    %397 = tpu.matmul %394, %396, %cst_417 {dimension_numbers = #tpu.dot_dimension_numbers<[1], [0], [0], [1], [0, 0, 1, 1], [], []>} : vector<16x128xbf16>, vector<128x128xbf16>, vector<16x128xf32> -> vector<16x128xf32>
    %c9_418 = arith.constant 9 : index
    %c0_419 = arith.constant 0 : index
    %c0_420 = arith.constant 0 : index
    %398 = vector.load %arg1[%c9_418, %c0_419, %c0_420] : memref<15x16x128xbf16, #tpu.memory_space<vmem>>, vector<1x16x128xbf16>
    %399 = vector.shape_cast %398 : vector<1x16x128xbf16> to vector<16x128xbf16>
    %c1_421 = arith.constant 1 : index
    %c0_422 = arith.constant 0 : index
    %c0_423 = arith.constant 0 : index
    %400 = vector.load %arg2[%c1_421, %c0_422, %c0_423] : memref<7x128x128xbf16, #tpu.memory_space<vmem>>, vector<1x128x128xbf16>
    %401 = vector.shape_cast %400 : vector<1x128x128xbf16> to vector<128x128xbf16>
    %cst_424 = arith.constant dense<0.000000e+00> : vector<16x128xf32>
    %402 = tpu.matmul %399, %401, %cst_424 {dimension_numbers = #tpu.dot_dimension_numbers<[1], [0], [0], [1], [0, 0, 1, 1], [], []>} : vector<16x128xbf16>, vector<128x128xbf16>, vector<16x128xf32> -> vector<16x128xf32>
    %403 = arith.addf %397, %402 : vector<16x128xf32>
    %c10_425 = arith.constant 10 : index
    %c0_426 = arith.constant 0 : index
    %c0_427 = arith.constant 0 : index
    %404 = vector.load %arg1[%c10_425, %c0_426, %c0_427] : memref<15x16x128xbf16, #tpu.memory_space<vmem>>, vector<1x16x128xbf16>
    %405 = vector.shape_cast %404 : vector<1x16x128xbf16> to vector<16x128xbf16>
    %c2_428 = arith.constant 2 : index
    %c0_429 = arith.constant 0 : index
    %c0_430 = arith.constant 0 : index
    %406 = vector.load %arg2[%c2_428, %c0_429, %c0_430] : memref<7x128x128xbf16, #tpu.memory_space<vmem>>, vector<1x128x128xbf16>
    %407 = vector.shape_cast %406 : vector<1x128x128xbf16> to vector<128x128xbf16>
    %cst_431 = arith.constant dense<0.000000e+00> : vector<16x128xf32>
    %408 = tpu.matmul %405, %407, %cst_431 {dimension_numbers = #tpu.dot_dimension_numbers<[1], [0], [0], [1], [0, 0, 1, 1], [], []>} : vector<16x128xbf16>, vector<128x128xbf16>, vector<16x128xf32> -> vector<16x128xf32>
    %409 = arith.addf %403, %408 : vector<16x128xf32>
    %c11_432 = arith.constant 11 : index
    %c0_433 = arith.constant 0 : index
    %c0_434 = arith.constant 0 : index
    %410 = vector.load %arg1[%c11_432, %c0_433, %c0_434] : memref<15x16x128xbf16, #tpu.memory_space<vmem>>, vector<1x16x128xbf16>
    %411 = vector.shape_cast %410 : vector<1x16x128xbf16> to vector<16x128xbf16>
    %c3_435 = arith.constant 3 : index
    %c0_436 = arith.constant 0 : index
    %c0_437 = arith.constant 0 : index
    %412 = vector.load %arg2[%c3_435, %c0_436, %c0_437] : memref<7x128x128xbf16, #tpu.memory_space<vmem>>, vector<1x128x128xbf16>
    %413 = vector.shape_cast %412 : vector<1x128x128xbf16> to vector<128x128xbf16>
    %cst_438 = arith.constant dense<0.000000e+00> : vector<16x128xf32>
    %414 = tpu.matmul %411, %413, %cst_438 {dimension_numbers = #tpu.dot_dimension_numbers<[1], [0], [0], [1], [0, 0, 1, 1], [], []>} : vector<16x128xbf16>, vector<128x128xbf16>, vector<16x128xf32> -> vector<16x128xf32>
    %415 = arith.addf %409, %414 : vector<16x128xf32>
    %c12_439 = arith.constant 12 : index
    %c0_440 = arith.constant 0 : index
    %c0_441 = arith.constant 0 : index
    %416 = vector.load %arg1[%c12_439, %c0_440, %c0_441] : memref<15x16x128xbf16, #tpu.memory_space<vmem>>, vector<1x16x128xbf16>
    %417 = vector.shape_cast %416 : vector<1x16x128xbf16> to vector<16x128xbf16>
    %c4_442 = arith.constant 4 : index
    %c0_443 = arith.constant 0 : index
    %c0_444 = arith.constant 0 : index
    %418 = vector.load %arg2[%c4_442, %c0_443, %c0_444] : memref<7x128x128xbf16, #tpu.memory_space<vmem>>, vector<1x128x128xbf16>
    %419 = vector.shape_cast %418 : vector<1x128x128xbf16> to vector<128x128xbf16>
    %cst_445 = arith.constant dense<0.000000e+00> : vector<16x128xf32>
    %420 = tpu.matmul %417, %419, %cst_445 {dimension_numbers = #tpu.dot_dimension_numbers<[1], [0], [0], [1], [0, 0, 1, 1], [], []>} : vector<16x128xbf16>, vector<128x128xbf16>, vector<16x128xf32> -> vector<16x128xf32>
    %421 = arith.addf %415, %420 : vector<16x128xf32>
    %c13_446 = arith.constant 13 : index
    %c0_447 = arith.constant 0 : index
    %c0_448 = arith.constant 0 : index
    %422 = vector.load %arg1[%c13_446, %c0_447, %c0_448] : memref<15x16x128xbf16, #tpu.memory_space<vmem>>, vector<1x16x128xbf16>
    %423 = vector.shape_cast %422 : vector<1x16x128xbf16> to vector<16x128xbf16>
    %c5_449 = arith.constant 5 : index
    %c0_450 = arith.constant 0 : index
    %c0_451 = arith.constant 0 : index
    %424 = vector.load %arg2[%c5_449, %c0_450, %c0_451] : memref<7x128x128xbf16, #tpu.memory_space<vmem>>, vector<1x128x128xbf16>
    %425 = vector.shape_cast %424 : vector<1x128x128xbf16> to vector<128x128xbf16>
    %cst_452 = arith.constant dense<0.000000e+00> : vector<16x128xf32>
    %426 = tpu.matmul %423, %425, %cst_452 {dimension_numbers = #tpu.dot_dimension_numbers<[1], [0], [0], [1], [0, 0, 1, 1], [], []>} : vector<16x128xbf16>, vector<128x128xbf16>, vector<16x128xf32> -> vector<16x128xf32>
    %427 = arith.addf %421, %426 : vector<16x128xf32>
    %c14 = arith.constant 14 : index
    %c0_453 = arith.constant 0 : index
    %c0_454 = arith.constant 0 : index
    %428 = vector.load %arg1[%c14, %c0_453, %c0_454] : memref<15x16x128xbf16, #tpu.memory_space<vmem>>, vector<1x16x128xbf16>
    %429 = vector.shape_cast %428 : vector<1x16x128xbf16> to vector<16x128xbf16>
    %c6_455 = arith.constant 6 : index
    %c0_456 = arith.constant 0 : index
    %c0_457 = arith.constant 0 : index
    %430 = vector.load %arg2[%c6_455, %c0_456, %c0_457] : memref<7x128x128xbf16, #tpu.memory_space<vmem>>, vector<1x128x128xbf16>
    %431 = vector.shape_cast %430 : vector<1x128x128xbf16> to vector<128x128xbf16>
    %cst_458 = arith.constant dense<0.000000e+00> : vector<16x128xf32>
    %432 = tpu.matmul %429, %431, %cst_458 {dimension_numbers = #tpu.dot_dimension_numbers<[1], [0], [0], [1], [0, 0, 1, 1], [], []>} : vector<16x128xbf16>, vector<128x128xbf16>, vector<16x128xf32> -> vector<16x128xf32>
    %433 = arith.addf %427, %432 : vector<16x128xf32>
    %434 = vector.broadcast %0 : vector<1x128xf32> to vector<16x128xf32>
    %435 = arith.addf %433, %434 : vector<16x128xf32>
    %cst_459 = arith.constant 0.000000e+00 : f32
    %436 = vector.broadcast %cst_459 : f32 to vector<16x128xf32>
    %437 = arith.maximumf %435, %436 : vector<16x128xf32>
    %438 = arith.truncf %437 : vector<16x128xf32> to vector<16x128xbf16>
    %c8_460 = arith.constant 8 : index
    %c0_461 = arith.constant 0 : index
    %c0_462 = arith.constant 0 : index
    %439 = vector.load %arg4[%c8_460, %c0_461, %c0_462] : memref<9x16x128xbf16, #tpu.memory_space<vmem>>, vector<1x16x128xbf16>
    %440 = vector.shape_cast %439 : vector<1x16x128xbf16> to vector<16x128xbf16>
    %441 = vector.shape_cast %438 : vector<16x128xbf16> to vector<1x16x128xbf16>
    tpu.vector_store %arg4[%c8_460, %c0_461, %c0_462], %441 {strides = array<i32>} : memref<9x16x128xbf16, #tpu.memory_space<vmem>>, vector<1x16x128xbf16>,
    return
  }
  func.func @transform_0(%arg0: i32) -> (i32, i32, i32) {
    %c0_i32 = arith.constant 0 : i32
    %c0_i32_0 = arith.constant 0 : i32
    %c0_i32_1 = arith.constant 0 : i32
    return %c0_i32, %arg0, %c0_i32_0 : i32, i32, i32
  }
  func.func @transform_1(%arg0: i32) -> (i32, i32, i32) {
    %c0_i32 = arith.constant 0 : i32
    %c0_i32_0 = arith.constant 0 : i32
    %c0_i32_1 = arith.constant 0 : i32
    %c0_i32_2 = arith.constant 0 : i32
    return %c0_i32, %c0_i32_0, %c0_i32_1 : i32, i32, i32
  }
  func.func @transform_2(%arg0: i32) -> (i32, i32) {
    %c0_i32 = arith.constant 0 : i32
    %c0_i32_0 = arith.constant 0 : i32
    %c0_i32_1 = arith.constant 0 : i32
    return %c0_i32, %c0_i32_0 : i32, i32
  }
  func.func @transform_3(%arg0: i32) -> (i32, i32, i32) {
    %c0_i32 = arith.constant 0 : i32
    %c0_i32_0 = arith.constant 0 : i32
    %c0_i32_1 = arith.constant 0 : i32
    return %c0_i32, %arg0, %c0_i32_0 : i32, i32, i32
  }
}

module attributes {stable_mosaic.version = 11 : i64} {
  func.func @_residual_conv1x1_kernel(%arg0: i32, %arg1: i32, %arg2: memref<96x128xbf16, #tpu.memory_space<vmem>>, %arg3: memref<96x128xbf16, #tpu.memory_space<vmem>>, %arg4: memref<128x128xbf16, #tpu.memory_space<vmem>>, %arg5: memref<128x128xbf16, #tpu.memory_space<vmem>>, %arg6: memref<1x128xf32, #tpu.memory_space<vmem>>, %arg7: memref<96x128xbf16, #tpu.memory_space<vmem>>, %arg8: memref<96x128xbf16, #tpu.memory_space<vmem>>) attributes {dimension_semantics = [#tpu.dimension_semantics<parallel>, #tpu.dimension_semantics<parallel>], iteration_bounds = array<i64: 2, 7>, scalar_prefetch = 0 : i64, scratch_operands = 0 : i64, tpu.core_type = #tpu.core_type<tc>, window_params = [{transform_indices = @transform_0, window_bounds = array<i64: 96, 128>}, {transform_indices = @transform_1, window_bounds = array<i64: 96, 128>}, {transform_indices = @transform_2, window_bounds = array<i64: 128, 128>}, {transform_indices = @transform_3, window_bounds = array<i64: 128, 128>}, {transform_indices = @transform_4, window_bounds = array<i64: 1, 128>}, {transform_indices = @transform_5, window_bounds = array<i64: 96, 128>}, {transform_indices = @transform_6, window_bounds = array<i64: 96, 128>}]} {
    %c0 = arith.constant 0 : index
    %c0_0 = arith.constant 0 : index
    %0 = vector.load %arg2[%c0, %c0_0] : memref<96x128xbf16, #tpu.memory_space<vmem>>, vector<96x128xbf16>
    %c0_1 = arith.constant 0 : index
    %c0_2 = arith.constant 0 : index
    %1 = vector.load %arg4[%c0_1, %c0_2] : memref<128x128xbf16, #tpu.memory_space<vmem>>, vector<128x128xbf16>
    %cst = arith.constant dense<0.000000e+00> : vector<96x128xf32>
    %2 = tpu.matmul %0, %1, %cst {dimension_numbers = #tpu.dot_dimension_numbers<[1], [0], [0], [1], [0, 0, 1, 1], [], []>} : vector<96x128xbf16>, vector<128x128xbf16>, vector<96x128xf32> -> vector<96x128xf32>
    %c0_3 = arith.constant 0 : index
    %c0_4 = arith.constant 0 : index
    %3 = vector.load %arg3[%c0_3, %c0_4] : memref<96x128xbf16, #tpu.memory_space<vmem>>, vector<96x128xbf16>
    %c0_5 = arith.constant 0 : index
    %c0_6 = arith.constant 0 : index
    %4 = vector.load %arg5[%c0_5, %c0_6] : memref<128x128xbf16, #tpu.memory_space<vmem>>, vector<128x128xbf16>
    %cst_7 = arith.constant dense<0.000000e+00> : vector<96x128xf32>
    %5 = tpu.matmul %3, %4, %cst_7 {dimension_numbers = #tpu.dot_dimension_numbers<[1], [0], [0], [1], [0, 0, 1, 1], [], []>} : vector<96x128xbf16>, vector<128x128xbf16>, vector<96x128xf32> -> vector<96x128xf32>
    %6 = arith.addf %2, %5 : vector<96x128xf32>
    %c0_8 = arith.constant 0 : index
    %c0_9 = arith.constant 0 : index
    %7 = vector.load %arg6[%c0_8, %c0_9] : memref<1x128xf32, #tpu.memory_space<vmem>>, vector<1x128xf32>
    %8 = vector.broadcast %7 : vector<1x128xf32> to vector<96x128xf32>
    %9 = arith.addf %6, %8 : vector<96x128xf32>
    %cst_10 = arith.constant 1.000000e+00 : f32
    %10 = vector.broadcast %cst_10 : f32 to vector<96x128xf32>
    %11 = arith.mulf %9, %10 : vector<96x128xf32>
    %c0_11 = arith.constant 0 : index
    %c0_12 = arith.constant 0 : index
    %12 = vector.load %arg7[%c0_11, %c0_12] : memref<96x128xbf16, #tpu.memory_space<vmem>>, vector<96x128xbf16>
    %13 = arith.extf %12 : vector<96x128xbf16> to vector<96x128xf32>
    %14 = arith.addf %11, %13 : vector<96x128xf32>
    %cst_13 = arith.constant 0.000000e+00 : f32
    %15 = vector.broadcast %cst_13 : f32 to vector<96x128xf32>
    %16 = arith.maximumf %14, %15 : vector<96x128xf32>
    %17 = arith.truncf %16 : vector<96x128xf32> to vector<96x128xbf16>
    %c0_14 = arith.constant 0 : index
    %c0_15 = arith.constant 0 : index
    %18 = vector.load %arg8[%c0_14, %c0_15] : memref<96x128xbf16, #tpu.memory_space<vmem>>, vector<96x128xbf16>
    tpu.vector_store %arg8[%c0_14, %c0_15], %17 {strides = array<i32>} : memref<96x128xbf16, #tpu.memory_space<vmem>>, vector<96x128xbf16>,
    return
  }
  func.func @transform_0(%arg0: i32, %arg1: i32) -> (i32, i32) {
    %c0_i32 = arith.constant 0 : i32
    %c0_i32_0 = arith.constant 0 : i32
    return %arg0, %c0_i32 : i32, i32
  }
  func.func @transform_1(%arg0: i32, %arg1: i32) -> (i32, i32) {
    %c0_i32 = arith.constant 0 : i32
    %c0_i32_0 = arith.constant 0 : i32
    return %arg0, %c0_i32 : i32, i32
  }
  func.func @transform_2(%arg0: i32, %arg1: i32) -> (i32, i32) {
    %c0_i32 = arith.constant 0 : i32
    %c0_i32_0 = arith.constant 0 : i32
    return %c0_i32, %arg1 : i32, i32
  }
  func.func @transform_3(%arg0: i32, %arg1: i32) -> (i32, i32) {
    %c0_i32 = arith.constant 0 : i32
    %c0_i32_0 = arith.constant 0 : i32
    return %c0_i32, %arg1 : i32, i32
  }
  func.func @transform_4(%arg0: i32, %arg1: i32) -> (i32, i32) {
    %c0_i32 = arith.constant 0 : i32
    %c0_i32_0 = arith.constant 0 : i32
    return %c0_i32, %arg1 : i32, i32
  }
  func.func @transform_5(%arg0: i32, %arg1: i32) -> (i32, i32) {
    %c0_i32 = arith.constant 0 : i32
    return %arg0, %arg1 : i32, i32
  }
  func.func @transform_6(%arg0: i32, %arg1: i32) -> (i32, i32) {
    %c0_i32 = arith.constant 0 : i32
    return %arg0, %arg1 : i32, i32
  }
}

</mosaic_0001>

<bundles_post_ra>
// kernel: block17.4
= control target key start
LH: loop header
LB: loop body
LE: loop exit
PB: predicated region body
PF: predicated region fallthrough
CT: control target
= control target key end

     0   :  { %s2423_s15 = smov 0   ;;  %s2876_s0 = inlined_call_operand.vmem [shape: bf16[192,896], index: 0, kind: input, shape index: {}]   ;;  %s2877_s1 = inlined_call_operand.vmem [shape: bf16[896,256], index: 1, kind: input, shape index: {}]   ;;  %s2878_s2 = inlined_call_operand.vmem [shape: f32[1,256], index: 2, kind: input, shape index: {}]   ;;  %s2879_s3 = inlined_call_operand.vmem [shape: bf16[192,128], index: 3, kind: output, shape index: {0}]   ;;  %s2880_s4 = inlined_call_operand.vmem [shape: bf16[192,128], index: 4, kind: output, shape index: {1}]  }
   0x1 LB: > { %s1773_s16 = sadd.s32 4294967295, %s2395_s15   ;;  %p1777_p0 = scmp.ge.s32.totalorder %s2395_s15, 1  ;;  %s2395_s15 = sphi %s2423_s15, %s15_s15  }
   0x2   : > { %p167_p1 = scmp.lt.s32.totalorder %s2395_s15, 3 }
   0x4   : > { %p168_p2 = pnand %p1777_p0, %p167_p1 }
   0x5   : > { %v2161_v0 = vld [vmem:[%s2877_s1 + $0x4] ss:$8 sps:$4 sm:$0xff] (!%p168_p2)   ;;  %v2165_v2 = vld [vmem:[%s2877_s1] ss:$8 sps:$4 sm:$0xff] (!%p168_p2)   ;;  %v2167_v4 = vld [vmem:[%s2877_s1 + $0x14] ss:$8 sps:$4 sm:$0xff] (!%p168_p2)  }
   0x6   : > { %171 = sbr.rel (%p168_p2) target bundleno = 398 (0x18e), region = 32  ;;  %v2163_v1 = vld [vmem:[%s2877_s1 + $0x204] ss:$8 sps:$4 sm:$0xff] (!%p168_p2)   ;;  %1167 = vmatprep.subr.bf16.mxu1 (!%p168_p2), %v2161_v0  ;;  %v2166_v3 = vld [vmem:[%s2877_s1 + $0x200] ss:$8 sps:$4 sm:$0xff] (!%p168_p2)  }
   0x7   : > { %1353 = vmatprep.subr.bf16.mxu0 (!%p168_p2), %v2163_v1  ;;  %1168 = vmatpush1.bf16.msra.mxu1 (!%p168_p2), %v2165_v2  ;;  %v2169_v5 = vld [vmem:[%s2877_s1 + $0x214] ss:$8 sps:$4 sm:$0xff] (!%p168_p2)   ;;  %v2171_v6 = vld [vmem:[%s2877_s1 + $0x10] ss:$8 sps:$4 sm:$0xff] (!%p168_p2)   ;;  %v2173_v8 = vld [vmem:[%s2877_s1 + $0x24] ss:$8 sps:$4 sm:$0xff] (!%p168_p2)  }
   0x8   : > { %1354 = vmatpush1.bf16.msra.mxu0 (!%p168_p2), %v2166_v3  ;;  %1169 = vmatprep.subr.bf16.mxu1 (!%p168_p2), %v2167_v4  ;;  %v2172_v7 = vld [vmem:[%s2877_s1 + $0x210] ss:$8 sps:$4 sm:$0xff] (!%p168_p2)   ;;  %v2175_v9 = vld [vmem:[%s2877_s1 + $0x224] ss:$8 sps:$4 sm:$0xff] (!%p168_p2)   ;;  %v2177_v10 = vld [vmem:[%s2877_s1 + $0x20] ss:$8 sps:$4 sm:$0xff] (!%p168_p2)  }
   0x9   : > { %1355 = vmatprep.subr.bf16.mxu0 (!%p168_p2), %v2169_v5  ;;  %v2178_v11 = vld [vmem:[%s2877_s1 + $0x220] ss:$8 sps:$4 sm:$0xff] (!%p168_p2)   ;;  %v2179_v12 = vld [vmem:[%s2877_s1 + $0x34] ss:$8 sps:$4 sm:$0xff] (!%p168_p2)   ;;  %v2183_v14 = vld [vmem:[%s2877_s1 + $0x30] ss:$8 sps:$4 sm:$0xff] (!%p168_p2)  }
   0xa   : > { %v2181_v13 = vld [vmem:[%s2877_s1 + $0x234] ss:$8 sps:$4 sm:$0xff] (!%p168_p2)   ;;  %v2184_v15 = vld [vmem:[%s2877_s1 + $0x230] ss:$8 sps:$4 sm:$0xff] (!%p168_p2)   ;;  %v2185_v16 = vld [vmem:[%s2877_s1 + $0x44] ss:$8 sps:$4 sm:$0xff] (!%p168_p2)  }
   0xb   : > { %1170 = vmatpush1.bf16.msra.mxu1 (!%p168_p2), %v2171_v6  ;;  %v2187_v17 = vld [vmem:[%s2877_s1 + $0x244] ss:$8 sps:$4 sm:$0xff] (!%p168_p2)   ;;  %v2189_v18 = vld [vmem:[%s2877_s1 + $0x40] ss:$8 sps:$4 sm:$0xff] (!%p168_p2)   ;;  %v2191_v20 = vld [vmem:[%s2877_s1 + $0x54] ss:$8 sps:$4 sm:$0xff] (!%p168_p2)  }
   0xc   : > { %1356 = vmatpush1.bf16.msra.mxu0 (!%p168_p2), %v2172_v7  ;;  %1171 = vmatprep.subr.bf16.mxu1 (!%p168_p2), %v2173_v8  ;;  %v2190_v19 = vld [vmem:[%s2877_s1 + $0x240] ss:$8 sps:$4 sm:$0xff] (!%p168_p2)   ;;  %v2193_v21 = vld [vmem:[%s2877_s1 + $0x254] ss:$8 sps:$4 sm:$0xff] (!%p168_p2)   ;;  %v2195_v22 = vld [vmem:[%s2877_s1 + $0x50] ss:$8 sps:$4 sm:$0xff] (!%p168_p2)  }
   0xd   : > { %1357 = vmatprep.subr.bf16.mxu0 %v2175_v9  ;;  %v2196_v23 = vld [vmem:[%s2877_s1 + $0x250] ss:$8 sps:$4 sm:$0xff]   ;;  %v2197_v24 = vld [vmem:[%s2877_s1 + $0x64] ss:$8 sps:$4 sm:$0xff]   ;;  %v2201_v26 = vld [vmem:[%s2877_s1 + $0x60] ss:$8 sps:$4 sm:$0xff]  }
   0xe   : > { %v2199_v25 = vld [vmem:[%s2877_s1 + $0x264] ss:$8 sps:$4 sm:$0xff]   ;;  %v2202_v27 = vld [vmem:[%s2877_s1 + $0x260] ss:$8 sps:$4 sm:$0xff]   ;;  %v2203_v28 = vld [vmem:[%s2877_s1 + $0x74] ss:$8 sps:$4 sm:$0xff]  }
   0xf   : > { %1172 = vmatpush1.bf16.msra.mxu1 %v2177_v10  ;;  %s199_s27 = smul.u32 12, %s1773_s16  ;;  %v2205_v29 = vld [vmem:[%s2877_s1 + $0x274] ss:$8 sps:$4 sm:$0xff]   ;;  %v2207_v30 = vld [vmem:[%s2877_s1 + $0x70] ss:$8 sps:$4 sm:$0xff]  }
  0x10   : > { %1358 = vmatpush1.bf16.msra.mxu0 %v2178_v11  ;;  %1173 = vmatprep.subr.bf16.mxu1 %v2179_v12  ;;  %v2208_v31 = vld [vmem:[%s2877_s1 + $0x270] ss:$8 sps:$4 sm:$0xff]   ;;  %v2209_v32 = vld [vmem:[%s2877_s1 + $0x84] ss:$8 sps:$4 sm:$0xff]   ;;  %v2213_v34 = vld [vmem:[%s2877_s1 + $0x80] ss:$8 sps:$4 sm:$0xff]  }
  0x11   : > { %1359 = vmatprep.subr.bf16.mxu0 %v2181_v13  ;;  %p200_p3 = scmp.lt.s32.totalorder %s199_s27, 23  ;;  %v2211_v33 = vld [vmem:[%s2877_s1 + $0x284] ss:$8 sps:$4 sm:$0xff]   ;;  %v2214_v35 = vld [vmem:[%s2877_s1 + $0x280] ss:$8 sps:$4 sm:$0xff]  }
  0x12   : > { %v2215_v36 = vld [vmem:[%s2877_s1 + $0x94] ss:$8 sps:$4 sm:$0xff]   ;;  %v2219_v38 = vld [vmem:[%s2877_s1 + $0x90] ss:$8 sps:$4 sm:$0xff]   ;;  %v2221_v40 = vld [vmem:[%s2877_s1 + $0xa4] ss:$8 sps:$4 sm:$0xff]  }
  0x13   : > { %1174 = vmatpush1.bf16.msra.mxu1 %v2183_v14  ;;  %s2882_s27 = smov (!%p200_p3, %s199_s27), 23  ;;  %v2217_v37 = vld [vmem:[%s2877_s1 + $0x294] ss:$8 sps:$4 sm:$0xff]   ;;  %v2220_v39 = vld [vmem:[%s2877_s1 + $0x290] ss:$8 sps:$4 sm:$0xff]  }
  0x14   : > { %1360 = vmatpush1.bf16.msra.mxu0 %v2184_v15  ;;  %1175 = vmatprep.subr.bf16.mxu1 %v2185_v16  ;;  %s2151_s28 = smul.u32 28, %s2882_s27  ;;  %v2223_v41 = vld [vmem:[%s2877_s1 + $0x2a4] ss:$8 sps:$4 sm:$0xff]   ;;  %v2225_v42 = vld [vmem:[%s2877_s1 + $0xa0] ss:$8 sps:$4 sm:$0xff]  }
  0x15   : > { %1361 = vmatprep.subr.bf16.mxu0 %v2187_v17  ;;  %v2226_v43 = vld [vmem:[%s2877_s1 + $0x2a0] ss:$8 sps:$4 sm:$0xff]   ;;  %v2227_v44 = vld [vmem:[%s2877_s1 + $0xb4] ss:$8 sps:$4 sm:$0xff]   ;;  %v2231_v46 = vld [vmem:[%s2877_s1 + $0xb0] ss:$8 sps:$4 sm:$0xff]  }
  0x16   : > { %s2574_s12 = scalar_lea.vmem %s2876_s0, %s2151_s28  ;;  %v2229_v45 = vld [vmem:[%s2877_s1 + $0x2b4] ss:$8 sps:$4 sm:$0xff]   ;;  %v2232_v47 = vld [vmem:[%s2877_s1 + $0x2b0] ss:$8 sps:$4 sm:$0xff]   ;;  %v2233_v48 = vld [vmem:[%s2877_s1 + $0xc4] ss:$8 sps:$4 sm:$0xff]  }
  0x17   : > { %1176 = vmatpush1.bf16.msra.mxu1 %v2189_v18  ;;  %v2259_v49 = vld [vmem:[%s2574_s12 + $0x14] ss:$28 sps:$4 sm:$0xff]   ;;  %v2235_v50 = vld [vmem:[%s2877_s1 + $0x2c4] ss:$8 sps:$4 sm:$0xff]   ;;  %v2237_v52 = vld [vmem:[%s2877_s1 + $0xc0] ss:$8 sps:$4 sm:$0xff]  }
  0x18   : > { %1362 = vmatpush1.bf16.msra.mxu0 %v2190_v19  ;;  %1177 = vmatprep.subr.bf16.mxu1 %v2191_v20  ;;  %v2262_v51 = vld [vmem:[%s2574_s12 + $0x4] ss:$28 sps:$4 sm:$0xff]   ;;  %v2239_v54 = vld [vmem:[%s2877_s1 + $0xd4] ss:$8 sps:$4 sm:$0xff]   ;;  %v2243_v56 = vld [vmem:[%s2877_s1 + $0xd0] ss:$8 sps:$4 sm:$0xff]  }
  0x19   : > { %1363 = vmatprep.subr.bf16.mxu0 %v2193_v21  ;;  %1385 = vmatprep.mubr.bf16.mxu0 %v2259_v49  ;;  %v2238_v53 = vld [vmem:[%s2877_s1 + $0x2c0] ss:$8 sps:$4 sm:$0xff]   ;;  %v2241_v55 = vld [vmem:[%s2877_s1 + $0x2d4] ss:$8 sps:$4 sm:$0xff]   ;;  %v2244_v57 = vld [vmem:[%s2877_s1 + $0x2d0] ss:$8 sps:$4 sm:$0xff]  }
  0x1a   : > { %1199 = vmatprep.mubr.bf16.mxu1 %v2262_v51  ;;  %v2245_v58 = vld [vmem:[%s2877_s1 + $0xe4] ss:$8 sps:$4 sm:$0xff]   ;;  %v2249_v60 = vld [vmem:[%s2877_s1 + $0xe0] ss:$8 sps:$4 sm:$0xff]   ;;  %v2251_v62 = vld [vmem:[%s2877_s1 + $0xf4] ss:$8 sps:$4 sm:$0xff]  }
  0x1b   : > { %1178 = vmatpush1.bf16.msra.mxu1 %v2195_v22  ;;  %v2247_v59 = vld [vmem:[%s2877_s1 + $0x2e4] ss:$8 sps:$4 sm:$0xff]   ;;  %v2250_v61 = vld [vmem:[%s2877_s1 + $0x2e0] ss:$8 sps:$4 sm:$0xff]   ;;  %v2253_v63 = vld [vmem:[%s2877_s1 + $0x2f4] ss:$8 sps:$4 sm:$0xff]  }
  0x1c   : > { %1364 = vmatpush1.bf16.msra.mxu0 %v2196_v23  ;;  %1179 = vmatprep.subr.bf16.mxu1 %v2197_v24  ;;  %v2255_v0 = vld [vmem:[%s2877_s1 + $0xf0] ss:$8 sps:$4 sm:$0xff]   ;;  %v2265_v2 = vld [vmem:[%s2877_s1 + $0x104] ss:$8 sps:$4 sm:$0xff]   ;;  %v2260_v5 = vld [vmem:[%s2574_s12] ss:$28 sps:$4 sm:$0xff]  }
  0x1d   : > { %1365 = vmatprep.subr.bf16.mxu0 %v2199_v25  ;;  %v2256_v1 = vld [vmem:[%s2877_s1 + $0x2f0] ss:$8 sps:$4 sm:$0xff]   ;;  %v2286_v3 = vld [vmem:[%s2877_s1 + $0x304] ss:$8 sps:$4 sm:$0xff]   ;;  %v2263_v6 = vld [vmem:[%s2877_s1 + $0x100] ss:$8 sps:$4 sm:$0xff]  }
  0x1e   : > { %v2257_v4 = vld [vmem:[%s2574_s12 + $0x10] ss:$28 sps:$4 sm:$0xff]   ;;  %v2268_v7 = vld [vmem:[%s2877_s1 + $0x114] ss:$8 sps:$4 sm:$0xff]   ;;  %v2284_v9 = vld [vmem:[%s2877_s1 + $0x300] ss:$8 sps:$4 sm:$0xff]  }
  0x1f   : > { %1180 = vmatpush1.bf16.msra.mxu1 %v2201_v26  ;;  %v2269_v8 = vld [vmem:[%s2574_s12 + $0x4c] ss:$28 sps:$4 sm:$0xff]   ;;  %v2292_v10 = vld [vmem:[%s2877_s1 + $0x314] ss:$8 sps:$4 sm:$0xff]   ;;  %v2266_v12 = vld [vmem:[%s2877_s1 + $0x110] ss:$8 sps:$4 sm:$0xff]  }
  0x20   : > { %1366 = vmatpush1.bf16.msra.mxu0 %v2202_v27  ;;  %1181 = vmatprep.subr.bf16.mxu1 %v2203_v28  ;;  %v2293_v11 = vld [vmem:[%s2574_s12 + $0x3c] ss:$28 sps:$4 sm:$0xff]   ;;  %v2273_v13 = vld [vmem:[%s2877_s1 + $0x124] ss:$8 sps:$4 sm:$0xff]   ;;  %v2271_v15 = vld [vmem:[%s2877_s1 + $0x120] ss:$8 sps:$4 sm:$0xff]  }
  0x21   : > { %1367 = vmatprep.subr.bf16.mxu0 %v2205_v29  ;;  %v2290_v14 = vld [vmem:[%s2877_s1 + $0x310] ss:$8 sps:$4 sm:$0xff]   ;;  %v2274_v16 = vld [vmem:[%s2574_s12 + $0x48] ss:$28 sps:$4 sm:$0xff]   ;;  %v2277_v18 = vld [vmem:[%s2877_s1 + $0x134] ss:$8 sps:$4 sm:$0xff]  }
  0x22   : > { %v2304_v17 = vld [vmem:[%s2877_s1 + $0x324] ss:$8 sps:$4 sm:$0xff]   ;;  %v2297_v19 = vld [vmem:[%s2574_s12 + $0x38] ss:$28 sps:$4 sm:$0xff]   ;;  %v2302_v21 = vld [vmem:[%s2877_s1 + $0x320] ss:$8 sps:$4 sm:$0xff]  }
  0x23   : > { %1182 = vmatpush1.bf16.msra.mxu1 %v2207_v30  ;;  %v2278_v20 = vld [vmem:[%s2574_s12 + $0x84] ss:$28 sps:$4 sm:$0xff]   ;;  %v2310_v22 = vld [vmem:[%s2877_s1 + $0x334] ss:$8 sps:$4 sm:$0xff]   ;;  %v2275_v24 = vld [vmem:[%s2877_s1 + $0x130] ss:$8 sps:$4 sm:$0xff]  }
  0x24   : > { %1368 = vmatpush1.bf16.msra.mxu0 %v2208_v31  ;;  %1183 = vmatprep.subr.bf16.mxu1 %v2209_v32  ;;  %v2311_v23 = vld [vmem:[%s2574_s12 + $0x74] ss:$28 sps:$4 sm:$0xff]   ;;  %v2282_v25 = vld [vmem:[%s2877_s1 + $0x144] ss:$8 sps:$4 sm:$0xff]   ;;  %v2280_v27 = vld [vmem:[%s2877_s1 + $0x140] ss:$8 sps:$4 sm:$0xff]  }
  0x25   : > { %1369 = vmatprep.subr.bf16.mxu0 %v2211_v33  ;;  %v2308_v26 = vld [vmem:[%s2877_s1 + $0x330] ss:$8 sps:$4 sm:$0xff]   ;;  %v2283_v28 = vld [vmem:[%s2574_s12 + $0x80] ss:$28 sps:$4 sm:$0xff]   ;;  %v2322_v29 = vld [vmem:[%s2877_s1 + $0x344] ss:$8 sps:$4 sm:$0xff]  }
  0x26   : > { %v2289_v30 = vld [vmem:[%s2877_s1 + $0x154] ss:$8 sps:$4 sm:$0xff]   ;;  %v2315_v31 = vld [vmem:[%s2574_s12 + $0x70] ss:$28 sps:$4 sm:$0xff]   ;;  %v2320_v33 = vld [vmem:[%s2877_s1 + $0x340] ss:$8 sps:$4 sm:$0xff]  }
  0x27   : > { %1184 = vmatpush1.bf16.msra.mxu1 %v2213_v34  ;;  %v2295_v32 = vld [vmem:[%s2574_s12 + $0xbc] ss:$28 sps:$4 sm:$0xff]   ;;  %v2318_v49 = vld [vmem:[%s2877_s1 + $0x184] ss:$8 sps:$4 sm:$0xff]   ;;  %v2316_v51 = vld [vmem:[%s2877_s1 + $0x180] ss:$8 sps:$4 sm:$0xff]  }
  0x28   : > { %1370 = vmatpush1.bf16.msra.mxu0 %v2214_v35  ;;  %1185 = vmatprep.subr.bf16.mxu1 %v2215_v36  ;;  %v2328_v34 = vld [vmem:[%s2877_s1 + $0x354] ss:$8 sps:$4 sm:$0xff]   ;;  %v2329_v35 = vld [vmem:[%s2574_s12 + $0xac] ss:$28 sps:$4 sm:$0xff]   ;;  %v2287_v36 = vld [vmem:[%s2877_s1 + $0x150] ss:$8 sps:$4 sm:$0xff]  }
  0x29   : > { %1371 = vmatprep.subr.bf16.mxu0 %v2217_v37  ;;  %v2300_v37 = vld [vmem:[%s2877_s1 + $0x164] ss:$8 sps:$4 sm:$0xff]  }
  0x2b   : > { %1186 = vmatpush1.bf16.msra.mxu1 %v2219_v38  ;;  %v2301_v38 = vld [vmem:[%s2574_s12 + $0xb8] ss:$28 sps:$4 sm:$0xff]  }
  0x2c   : > { %1372 = vmatpush1.bf16.msra.mxu0 %v2220_v39  ;;  %1187 = vmatprep.subr.bf16.mxu1 %v2221_v40  ;;  %v2326_v39 = vld [vmem:[%s2877_s1 + $0x350] ss:$8 sps:$4 sm:$0xff]   ;;  %v2298_v40 = vld [vmem:[%s2877_s1 + $0x160] ss:$8 sps:$4 sm:$0xff]  }
  0x2d   : > { %1373 = vmatprep.subr.bf16.mxu0 %v2223_v41  ;;  %v2340_v41 = vld [vmem:[%s2877_s1 + $0x364] ss:$8 sps:$4 sm:$0xff]  }
  0x2f   : > { %1188 = vmatpush1.bf16.msra.mxu1 %v2225_v42  ;;  %v2307_v42 = vld [vmem:[%s2877_s1 + $0x174] ss:$8 sps:$4 sm:$0xff]  }
  0x30   : > { %1374 = vmatpush1.bf16.msra.mxu0 %v2226_v43  ;;  %1189 = vmatprep.subr.bf16.mxu1 %v2227_v44  ;;  %v2333_v43 = vld [vmem:[%s2574_s12 + $0xa8] ss:$28 sps:$4 sm:$0xff]   ;;  %v2313_v44 = vld [vmem:[%s2574_s12 + $0xf4] ss:$28 sps:$4 sm:$0xff]  }
  0x31   : > { %1375 = vmatprep.subr.bf16.mxu0 %v2229_v45  ;;  %v2338_v45 = vld [vmem:[%s2877_s1 + $0x360] ss:$8 sps:$4 sm:$0xff]  }
  0x33   : > { %1190 = vmatpush1.bf16.msra.mxu1 %v2231_v46  ;;  %v2346_v46 = vld [vmem:[%s2877_s1 + $0x374] ss:$8 sps:$4 sm:$0xff]  }
  0x34   : > { %1376 = vmatpush1.bf16.msra.mxu0 %v2232_v47  ;;  %1191 = vmatprep.subr.bf16.mxu1 %v2233_v48  ;;  %v2347_v47 = vld [vmem:[%s2574_s12 + $0xe4] ss:$28 sps:$4 sm:$0xff]   ;;  %v2305_v48 = vld [vmem:[%s2877_s1 + $0x170] ss:$8 sps:$4 sm:$0xff]  }
  0x35   : > { %1377 = vmatprep.subr.bf16.mxu0 %v2235_v50  ;;  %v2344_v50 = vld [vmem:[%s2877_s1 + $0x370] ss:$8 sps:$4 sm:$0xff]  }
  0x37   : > { %1192 = vmatpush1.bf16.msra.mxu1 %v2237_v52  ;;  %v2319_v52 = vld [vmem:[%s2574_s12 + $0xf0] ss:$28 sps:$4 sm:$0xff]  }
  0x38   : > { %1378 = vmatpush1.bf16.msra.mxu0 %v2238_v53  ;;  %1193 = vmatprep.subr.bf16.mxu1 %v2239_v54  ;;  %v2325_v53 = vld [vmem:[%s2877_s1 + $0x194] ss:$8 sps:$4 sm:$0xff]  }
  0x39   : > { %1379 = vmatprep.subr.bf16.mxu0 %v2241_v55  ;;  %v2349_v54 = vld [vmem:[%s2574_s12 + $0xe0] ss:$28 sps:$4 sm:$0xff]   ;;  %v2331_v55 = vld [vmem:[%s2574_s12 + $0x12c] ss:$28 sps:$4 sm:$0xff]  }
  0x3b   : > { %1194 = vmatpush1.bf16.msra.mxu1 %v2243_v56  ;;  %v2357_v56 = vld [vmem:[%s2574_s12 + $0x11c] ss:$28 sps:$4 sm:$0xff]  }
  0x3c   : > { %1380 = vmatpush1.bf16.msra.mxu0 %v2244_v57  ;;  %1195 = vmatprep.subr.bf16.mxu1 %v2245_v58  ;;  %v2323_v57 = vld [vmem:[%s2877_s1 + $0x190] ss:$8 sps:$4 sm:$0xff]   ;;  %v2336_v58 = vld [vmem:[%s2877_s1 + $0x1a4] ss:$8 sps:$4 sm:$0xff]  }
  0x3d   : > { %1381 = vmatprep.subr.bf16.mxu0 %v2247_v59  ;;  %v2337_v59 = vld [vmem:[%s2574_s12 + $0x128] ss:$28 sps:$4 sm:$0xff]  }
  0x3f   : > { %1196 = vmatpush1.bf16.msra.mxu1 %v2249_v60  ;;  %v2359_v60 = vld [vmem:[%s2574_s12 + $0x118] ss:$28 sps:$4 sm:$0xff]  }
  0x40   : > { %1382 = vmatpush1.bf16.msra.mxu0 %v2250_v61  ;;  %1197 = vmatprep.subr.bf16.mxu1 %v2251_v62  ;;  %v2334_v61 = vld [vmem:[%s2877_s1 + $0x1a0] ss:$8 sps:$4 sm:$0xff]   ;;  %v2343_v62 = vld [vmem:[%s2877_s1 + $0x1b4] ss:$8 sps:$4 sm:$0xff]  }
  0x41   : > { %1383 = vmatprep.subr.bf16.mxu0 %v2253_v63  ;;  %v2369_v63 = vld [vmem:[%s2574_s12 + $0xc] ss:$28 sps:$4 sm:$0xff]  }
  0x43   : > { %1198 = vmatpush1.bf16.msra.mxu1 %v2255_v0  ;;  %v2341_v0 = vld [vmem:[%s2877_s1 + $0x1b0] ss:$8 sps:$4 sm:$0xff]  }
  0x44   : > { %1384 = vmatpush1.bf16.msra.mxu0 %v2256_v1  ;;  %1260 = vmatprep.subr.bf16.mxu1 %v2265_v2  ;;  %v2397_v1 = vmov 0   ;;  %v2352_v2 = vld [vmem:[%s2877_s1 + $0x1c4] ss:$8 sps:$4 sm:$0xff]  }
  0x45   : > { %1446 = vmatprep.subr.bf16.mxu0 %v2286_v3  ;;  %v2353_v3 = vld [vmem:[%s2574_s12 + $0x18] ss:$28 sps:$4 sm:$0xff]  }
  0x46   : > { %1200 = vmatmul.mubr.bf16.vlgmr.msra.gmra.mrb[0].mxu1 %v2260_v5  ;;  %v2356_v5 = vld [vmem:[%s2877_s1 + $0x1d4] ss:$8 sps:$4 sm:$0xff]  }
  0x47   : > { %1386 = vmatmul.mubr.bf16.vlgmr.msra.gmra.mrb[0].mxu0 %v2257_v4  ;;  %1261 = vmatpush1.bf16.msra.mxu1 %v2263_v6  ;;  %v2350_v4 = vld [vmem:[%s2877_s1 + $0x1c0] ss:$8 sps:$4 sm:$0xff]   ;;  %v2354_v6 = vld [vmem:[%s2877_s1 + $0x1d0] ss:$8 sps:$4 sm:$0xff]  }
  0x48   : > { %1395 = vmatprep.mubr.bf16.mxu0 %v2269_v8  ;;  %1262 = vmatprep.subr.bf16.mxu1 %v2268_v7  ;;  %v2362_v7 = vld [vmem:[%s2877_s1 + $0x1e4] ss:$8 sps:$4 sm:$0xff]  }
  0x49   : > { %1447 = vmatpush1.bf16.msra.mxu0 %v2284_v9  ;;  %1209 = vmatprep.mubr.bf16.mxu1 %v2293_v11  ;;  %v2363_v8 = vld [vmem:[%s2574_s12 + $0x50] ss:$28 sps:$4 sm:$0xff]   ;;  %v2360_v9 = vld [vmem:[%s2877_s1 + $0x1e0] ss:$8 sps:$4 sm:$0xff]  }
  0x4a   : > { %1448 = vmatprep.subr.bf16.mxu0 %v2292_v10  ;;  %v2366_v10 = vld [vmem:[%s2877_s1 + $0x1f4] ss:$8 sps:$4 sm:$0xff]   ;;  %v2364_v11 = vld [vmem:[%s2877_s1 + $0x1f0] ss:$8 sps:$4 sm:$0xff]  }
  0x4b   : > { %1263 = vmatpush1.bf16.msra.mxu1 %v2266_v12  ;;  %v2367_v12 = vld [vmem:[%s2574_s12 + $0x8] ss:$28 sps:$4 sm:$0xff]  }
  0x4c   : > { %1264 = vmatprep.subr.bf16.mxu1 %v2273_v13  ;;  %v2370_v13 = vld [vmem:[%s2574_s12 + $0x88] ss:$28 sps:$4 sm:$0xff]  }
  0x4d   : > { %1449 = vmatpush1.bf16.msra.mxu0 %v2290_v14  ;;  %v2371_v14 = vld [vmem:[%s2574_s12 + $0x44] ss:$28 sps:$4 sm:$0xff]  }
  0x4e   : > { %1450 = vmatprep.subr.bf16.mxu0 %v2304_v17  ;;  %1210 = vmatmul.mubr.bf16.gmra.mrb[4].mxu1 %v2297_v19  ;;  %v2375_v17 = vld [vmem:[%s2574_s12 + $0x7c] ss:$28 sps:$4 sm:$0xff]  }
  0x4f   : > { %1396 = vmatmul.mubr.bf16.gmra.mrb[4].mxu0 %v2274_v16  ;;  %1265 = vmatpush1.bf16.msra.mxu1 %v2271_v15  ;;  %v2373_v15 = vld [vmem:[%s2574_s12 + $0x40] ss:$28 sps:$4 sm:$0xff]   ;;  %v2378_v19 = vld [vmem:[%s2574_s12 + $0xf8] ss:$28 sps:$4 sm:$0xff]  }
  0x50   : > { %1405 = vmatprep.mubr.bf16.mxu0 %v2278_v20  ;;  %1266 = vmatprep.subr.bf16.mxu1 %v2277_v18  ;;  %v2374_v16 = vld [vmem:[%s2574_s12 + $0xc0] ss:$28 sps:$4 sm:$0xff]   ;;  %v2377_v18 = vld [vmem:[%s2574_s12 + $0x78] ss:$28 sps:$4 sm:$0xff]  }
  0x51   : > { %1451 = vmatpush1.bf16.msra.mxu0 %v2302_v21  ;;  %1219 = vmatprep.mubr.bf16.mxu1 %v2311_v23  ;;  %v2379_v20 = vld [vmem:[%s2574_s12 + $0xb4] ss:$28 sps:$4 sm:$0xff]   ;;  %v2383_v23 = vld [vmem:[%s2574_s12 + $0xec] ss:$28 sps:$4 sm:$0xff]  }
  0x52   : > { %1452 = vmatprep.subr.bf16.mxu0 %v2310_v22  ;;  %v2381_v21 = vld [vmem:[%s2574_s12 + $0xb0] ss:$28 sps:$4 sm:$0xff]  }
  0x53   : > { %1267 = vmatpush1.bf16.msra.mxu1 %v2275_v24  ;;  %v2382_v22 = vld [vmem:[%s2574_s12 + $0x130] ss:$28 sps:$4 sm:$0xff]   ;;  %v2385_v24 = vld [vmem:[%s2574_s12 + $0xe8] ss:$28 sps:$4 sm:$0xff]  }
  0x54   : > { %1268 = vmatprep.subr.bf16.mxu1 %v2282_v25  ;;  %v2386_v25 = vld [vmem:[%s2574_s12 + $0x124] ss:$28 sps:$4 sm:$0xff]  }
  0x55   : > { %1453 = vmatpush1.bf16.msra.mxu0 %v2308_v26  ;;  %v2388_v26 = vld [vmem:[%s2574_s12 + $0x120] ss:$28 sps:$4 sm:$0xff]   ;;  %s1779_s12 = sshll.u32 %s2882_s27, 2 }
  0x56   : > { %1454 = vmatprep.subr.bf16.mxu0 %v2322_v29  ;;  %1220 = vmatmul.mubr.bf16.gmra.mrb[8].mxu1 %v2315_v31  ;;  %v381_v29 = vlaneseq  ;;  %s2834_s13 = scalar_lea.vmem %s2879_s3, %s1779_s12  ;;  %s2839_s18 = scalar_lea.vmem %s2880_s4, %s1779_s12 }
  0x57   : > { %1406 = vmatmul.mubr.bf16.gmra.mrb[8].mxu0 %v2283_v28  ;;  %1269 = vmatpush1.bf16.msra.mxu1 %v2280_v27 }
  0x58   : > { %1415 = vmatprep.mubr.bf16.mxu0 %v2295_v32  ;;  %1270 = vmatprep.subr.bf16.mxu1 %v2289_v30  ;;  %v382_v32 = vshrl.u32 %v381_v29, 7 }
  0x59   : > { %1455 = vmatpush1.bf16.msra.mxu0 %v2320_v33  ;;  %1229 = vmatprep.mubr.bf16.mxu1 %v2329_v35 }
  0x5a   : > { %1456 = vmatprep.subr.bf16.mxu0 %v2328_v34  ;;  %v383_v35 = vsub.s32 0, %v382_v32 }
  0x5b   : > { %1271 = vmatpush1.bf16.msra.mxu1 %v2287_v36 }
  0x5c   : > { %1272 = vmatprep.subr.bf16.mxu1 %v2300_v37  ;;  %v379_v37 = vld [vmem:[%s2878_s2] sm:$0x3] }
  0x5d   : > { %1457 = vmatpush1.bf16.msra.mxu0 %v2326_v39 }
  0x5e   : > { %1458 = vmatprep.subr.bf16.mxu0 %v2340_v41  ;;  %1230 = vmatmul.mubr.bf16.gmra.mrb[12].mxu1 %v2333_v43 }
  0x5f   : > { %1416 = vmatmul.mubr.bf16.gmra.mrb[12].mxu0 %v2301_v38  ;;  %1273 = vmatpush1.bf16.msra.mxu1 %v2298_v40  ;;  %v387_v38 = vsub.s32 1, %v382_v32  ;;  %v2822_v40 = vrot.slane %v379_v37, %v383_v35 }
  0x60   : > { %1425 = vmatprep.mubr.bf16.mxu0 %v2313_v44  ;;  %1274 = vmatprep.subr.bf16.mxu1 %v2307_v42 }
  0x61   : > { %1459 = vmatpush1.bf16.msra.mxu0 %v2338_v45  ;;  %1239 = vmatprep.mubr.bf16.mxu1 %v2347_v47  ;;  %v2824_v41 = vrot.slane %v379_v37, %v387_v38 }
  0x62   : > { %1460 = vmatprep.subr.bf16.mxu0 %v2346_v46 }
  0x63   : > { %1275 = vmatpush1.bf16.msra.mxu1 %v2305_v48 }
  0x64   : > { %1276 = vmatprep.subr.bf16.mxu1 %v2318_v49 }
  0x65   : > { %1461 = vmatpush1.bf16.msra.mxu0 %v2344_v50 }
  0x66   : > { %1240 = vmatmul.mubr.bf16.gmra.mrb[16].mxu1 %v2349_v54 }
  0x67   : > { %1426 = vmatmul.mubr.bf16.gmra.mrb[16].mxu0 %v2319_v52  ;;  %1277 = vmatpush1.bf16.msra.mxu1 %v2316_v51 }
  0x68   : > { %1435 = vmatprep.mubr.bf16.mxu0 %v2331_v55  ;;  %1278 = vmatprep.subr.bf16.mxu1 %v2325_v53 }
  0x69   : > { %1249 = vmatprep.mubr.bf16.mxu1 %v2357_v56 }
  0x6b   : > { %1279 = vmatpush1.bf16.msra.mxu1 %v2323_v57 }
  0x6c   : > { %1280 = vmatprep.subr.bf16.mxu1 %v2336_v58 }
  0x6e   : > { %1250 = vmatmul.mubr.bf16.gmra.mrb[20].mxu1 %v2359_v60 }
  0x6f   : > { %1436 = vmatmul.mubr.bf16.gmra.mrb[20].mxu0 %v2337_v59  ;;  %1281 = vmatpush1.bf16.msra.mxu1 %v2334_v61 }
  0x70   : > { %1478 = vmatprep.mubr.bf16.mxu0 %v2397_v1  ;;  %1282 = vmatprep.subr.bf16.mxu1 %v2343_v62 }
  0x71   : > { %1292 = vmatprep.mubr.bf16.mxu1 %v2369_v63 }
  0x73   : > { %1283 = vmatpush1.bf16.msra.mxu1 %v2341_v0 }
  0x74   : > { %1284 = vmatprep.subr.bf16.mxu1 %v2352_v2 }
  0x77   : > { %1479 = vmatmul.mubr.bf16.vlgmr.msra.gmra.mrb[0].mxu0 %v2353_v3  ;;  %1285 = vmatpush1.bf16.msra.mxu1 %v2350_v4 }
  0x78   : > { %1488 = vmatprep.mubr.bf16.mxu0 %v2397_v1  ;;  %1286 = vmatprep.subr.bf16.mxu1 %v2356_v5 }
  0x7b   : > { %1287 = vmatpush1.bf16.msra.mxu1 %v2354_v6 }
  0x7c   : > { %1288 = vmatprep.subr.bf16.mxu1 %v2362_v7 }
  0x7f   : > { %1489 = vmatmul.mubr.bf16.gmra.mrb[4].mxu0 %v2363_v8  ;;  %1289 = vmatpush1.bf16.msra.mxu1 %v2360_v9 }
  0x80   : > { %1498 = vmatprep.mubr.bf16.mxu0 %v2397_v1  ;;  %1290 = vmatprep.subr.bf16.mxu1 %v2366_v10 }
  0x83   : > { %1291 = vmatpush1.bf16.msra.mxu1 %v2364_v11 }
  0x86   : > { %1293 = vmatmul.mubr.bf16.vlgmr.msra.gmra.mrb[0].mxu1 %v2367_v12 }
  0x87   : > { %1499 = vmatmul.mubr.bf16.gmra.mrb[8].mxu0 %v2370_v13  ;;  %1302 = vmatprep.mubr.bf16.mxu1 %v2371_v14 }
  0x88   : > { %1508 = vmatprep.mubr.bf16.mxu0 %v2397_v1 }
  0x8e   : > { %1303 = vmatmul.mubr.bf16.gmra.mrb[4].mxu1 %v2373_v15 }
  0x8f   : > { %1509 = vmatmul.mubr.bf16.gmra.mrb[12].mxu0 %v2374_v16  ;;  %1312 = vmatprep.mubr.bf16.mxu1 %v2375_v17 }
  0x90   : > { %1518 = vmatprep.mubr.bf16.mxu0 %v2397_v1 }
  0x96   : > { %1313 = vmatmul.mubr.bf16.gmra.mrb[8].mxu1 %v2377_v18 }
  0x97   : > { %1519 = vmatmul.mubr.bf16.gmra.mrb[16].mxu0 %v2378_v19  ;;  %1322 = vmatprep.mubr.bf16.mxu1 %v2379_v20 }
  0x98   : > { %1528 = vmatprep.mubr.bf16.mxu0 %v2397_v1 }
  0x9e   : > { %1323 = vmatmul.mubr.bf16.gmra.mrb[12].mxu1 %v2381_v21 }
  0x9f   : > { %1529 = vmatmul.mubr.bf16.gmra.mrb[20].mxu0 %v2382_v22  ;;  %1332 = vmatprep.mubr.bf16.mxu1 %v2383_v23 }
  0xa6   : > { %1333 = vmatmul.mubr.bf16.gmra.mrb[16].mxu1 %v2385_v24 }
  0xa7   : > { %1342 = vmatprep.mubr.bf16.mxu1 %v2386_v25 }
  0xae   : > { %1343 = vmatmul.mubr.bf16.gmra.mrb[20].mxu1 %v2388_v26 }
 0x14a   : > { %v1480_v27 = vpop.f32.mrb[0].mxu0 }
 0x14b   : > { %v1482_v28 = vpop.f32.mrb[1].mxu0 }
 0x14c   : > { %v1484_v30 = vpop.f32.mrb[2].mxu0 }
 0x14d   : > { %v1486_v31 = vpop.f32.mrb[3].mxu0 }
 0x152   : > { %v1490_v33 = vpop.f32.mrb[4].mxu0 }
 0x153   : > { %v1492_v34 = vpop.f32.mrb[5].mxu0 }
 0x154   : > { %v1494_v36 = vpop.f32.mrb[6].mxu0 }
 0x155   : > { %v1496_v39 = vpop.f32.mrb[7].mxu0 }
 0x159   : > { %v1294_v42 = vpop.f32.mrb[0].mxu1 }
 0x15a   : > { %v1500_v43 = vpop.f32.mrb[8].mxu0  ;;  %v2055_v44 = vadd.f32 %v1294_v42, %v2822_v40  ;;  %v1296_v45 = vpop.f32.mrb[1].mxu1 }
 0x15b   : > { %v1502_v46 = vpop.f32.mrb[9].mxu0  ;;  %v2057_v47 = vadd.f32 %v1296_v45, %v2824_v41  ;;  %v1298_v48 = vpop.f32.mrb[2].mxu1 }
 0x15c   : > { %v1504_v49 = vpop.f32.mrb[10].mxu0  ;;  %v2056_v50 = vadd.f32 %v2055_v44, %v1480_v27  ;;  %v2059_v51 = vadd.f32 %v1298_v48, %v2822_v40  ;;  %v1300_v52 = vpop.f32.mrb[3].mxu1 }
 0x15d   : > { %v1506_v53 = vpop.f32.mrb[11].mxu0  ;;  %v2058_v54 = vadd.f32 %v2057_v47, %v1482_v28  ;;  %v2061_v55 = vadd.f32 %v1300_v52, %v2824_v41 }
 0x15e   : > { %v2060_v56 = vadd.f32 %v2059_v51, %v1484_v30  ;;  %v1539_v58 = vmax.f32 %v2056_v50, 0.0 }
 0x15f   : > { %v2062_v57 = vadd.f32 %v2061_v55, %v1486_v31  ;;  %v1540_v60 = vmax.f32 %v2058_v54, 0.0 }
 0x160   : > { %v1541_v59 = vmax.f32 %v2060_v56, 0.0 }
 0x161   : > { %v1542_v61 = vmax.f32 %v2062_v57, 0.0  ;;  %v1304_v62 = vpop.f32.mrb[4].mxu1 }
 0x162   : > { %v1510_v63 = vpop.f32.mrb[12].mxu0  ;;  %v1988_v0 = vpack.c.bf16 %v1541_v59, %v1539_v58  ;;  %v2063_v1 = vadd.f32 %v1304_v62, %v2822_v40  ;;  %v1306_v2 = vpop.f32.mrb[5].mxu1 }
 0x163   : > { %v1512_v3 = vpop.f32.mrb[13].mxu0  ;;  %v2018_v4 = vpack.c.bf16 %v1542_v61, %v1540_v60  ;;  %v2065_v5 = vadd.f32 %v1306_v2, %v2824_v41  ;;  %v1308_v6 = vpop.f32.mrb[6].mxu1 }
 0x164   : > { %v1514_v7 = vpop.f32.mrb[14].mxu0  ;;  %1989 = vst [vmem:[%s2834_s13] sm:$0xff] %v1988_v0   ;;  %v2064_v8 = vadd.f32 %v2063_v1, %v1490_v33  ;;  %v2067_v9 = vadd.f32 %v1308_v6, %v2822_v40  ;;  %v1310_v10 = vpop.f32.mrb[7].mxu1 }
 0x165   : > { %v1516_v11 = vpop.f32.mrb[15].mxu0  ;;  %2019 = vst [vmem:[%s2839_s18] sm:$0xff] %v2018_v4   ;;  %v2066_v12 = vadd.f32 %v2065_v5, %v1492_v34  ;;  %v2069_v13 = vadd.f32 %v1310_v10, %v2824_v41 }
 0x166   : > { %v2068_v14 = vadd.f32 %v2067_v9, %v1494_v36  ;;  %v1543_v16 = vmax.f32 %v2064_v8, 0.0 }
 0x167   : > { %v2070_v15 = vadd.f32 %v2069_v13, %v1496_v39  ;;  %v1544_v18 = vmax.f32 %v2066_v12, 0.0 }
 0x168   : > { %v1545_v17 = vmax.f32 %v2068_v14, 0.0 }
 0x169   : > { %v1546_v19 = vmax.f32 %v2070_v15, 0.0  ;;  %v1314_v20 = vpop.f32.mrb[8].mxu1 }
 0x16a   : > { %v1520_v21 = vpop.f32.mrb[16].mxu0  ;;  %v1993_v22 = vpack.c.bf16 %v1545_v17, %v1543_v16  ;;  %v2071_v23 = vadd.f32 %v1314_v20, %v2822_v40  ;;  %v1316_v24 = vpop.f32.mrb[9].mxu1 }
 0x16b   : > { %v1522_v25 = vpop.f32.mrb[17].mxu0  ;;  %v2023_v26 = vpack.c.bf16 %v1546_v19, %v1544_v18  ;;  %v2073_v27 = vadd.f32 %v1316_v24, %v2824_v41  ;;  %v1318_v28 = vpop.f32.mrb[10].mxu1 }
 0x16c   : > { %v1524_v29 = vpop.f32.mrb[18].mxu0  ;;  %2045 = vst [vmem:[%s2834_s13 + $0x8] sm:$0xff] %v1993_v22   ;;  %v2072_v30 = vadd.f32 %v2071_v23, %v1500_v43  ;;  %v2075_v31 = vadd.f32 %v1318_v28, %v2822_v40  ;;  %v1320_v32 = vpop.f32.mrb[11].mxu1 }
 0x16d   : > { %v1526_v33 = vpop.f32.mrb[19].mxu0  ;;  %2050 = vst [vmem:[%s2839_s18 + $0x8] sm:$0xff] %v2023_v26   ;;  %v2074_v34 = vadd.f32 %v2073_v27, %v1502_v46  ;;  %v2077_v35 = vadd.f32 %v1320_v32, %v2824_v41 }
 0x16e   : > { %v2076_v36 = vadd.f32 %v2075_v31, %v1504_v49  ;;  %v1547_v38 = vmax.f32 %v2072_v30, 0.0 }
 0x16f   : > { %v2078_v37 = vadd.f32 %v2077_v35, %v1506_v53  ;;  %v1548_v42 = vmax.f32 %v2074_v34, 0.0 }
 0x170   : > { %v1549_v39 = vmax.f32 %v2076_v36, 0.0 }
 0x171   : > { %v1550_v44 = vmax.f32 %v2078_v37, 0.0  ;;  %v1324_v45 = vpop.f32.mrb[12].mxu1 }
 0x172   : > { %v1530_v47 = vpop.f32.mrb[20].mxu0  ;;  %v1998_v48 = vpack.c.bf16 %v1549_v39, %v1547_v38  ;;  %v2079_v43 = vadd.f32 %v1324_v45, %v2822_v40  ;;  %v1326_v50 = vpop.f32.mrb[13].mxu1 }
 0x173   : > { %v1532_v51 = vpop.f32.mrb[21].mxu0  ;;  %v2028_v52 = vpack.c.bf16 %v1550_v44, %v1548_v42  ;;  %v2081_v46 = vadd.f32 %v1326_v50, %v2824_v41  ;;  %v1328_v54 = vpop.f32.mrb[14].mxu1 }
 0x174   : > { %v1534_v55 = vpop.f32.mrb[22].mxu0  ;;  %2046 = vst [vmem:[%s2834_s13 + $0x10] sm:$0xff] %v1998_v48   ;;  %v2080_v49 = vadd.f32 %v2079_v43, %v1510_v63  ;;  %v2083_v53 = vadd.f32 %v1328_v54, %v2822_v40  ;;  %v1330_v56 = vpop.f32.mrb[15].mxu1 }
 0x175   : > { %v1536_v57 = vpop.f32.mrb[23].mxu0  ;;  %2051 = vst [vmem:[%s2839_s18 + $0x10] sm:$0xff] %v2028_v52   ;;  %v2082_v58 = vadd.f32 %v2081_v46, %v1512_v3  ;;  %v2085_v59 = vadd.f32 %v1330_v56, %v2824_v41 }
 0x176   : > { %v2084_v60 = vadd.f32 %v2083_v53, %v1514_v7  ;;  %v1551_v62 = vmax.f32 %v2080_v49, 0.0 }
 0x177   : > { %v2086_v61 = vadd.f32 %v2085_v59, %v1516_v11  ;;  %v1552_v1 = vmax.f32 %v2082_v58, 0.0 }
 0x178   : > { %v1553_v0 = vmax.f32 %v2084_v60, 0.0 }
 0x179   : > { %v1554_v2 = vmax.f32 %v2086_v61, 0.0  ;;  %v1334_v4 = vpop.f32.mrb[16].mxu1 }
 0x17a   : > { %v2003_v5 = vpack.c.bf16 %v1553_v0, %v1551_v62  ;;  %v2087_v63 = vadd.f32 %v1334_v4, %v2822_v40  ;;  %v1336_v6 = vpop.f32.mrb[17].mxu1 }
 0x17b   : > { %v2033_v8 = vpack.c.bf16 %v1554_v2, %v1552_v1  ;;  %v2089_v9 = vadd.f32 %v1336_v6, %v2824_v41  ;;  %v1338_v10 = vpop.f32.mrb[18].mxu1 }
 0x17c   : > { %2047 = vst [vmem:[%s2834_s13 + $0x18] sm:$0xff] %v2003_v5   ;;  %v2088_v3 = vadd.f32 %v2087_v63, %v1520_v21  ;;  %v2091_v12 = vadd.f32 %v1338_v10, %v2822_v40  ;;  %v1340_v7 = vpop.f32.mrb[19].mxu1 }
 0x17d   : > { %2052 = vst [vmem:[%s2839_s18 + $0x18] sm:$0xff] %v2033_v8   ;;  %v2090_v11 = vadd.f32 %v2089_v9, %v1522_v25  ;;  %v2093_v13 = vadd.f32 %v1340_v7, %v2824_v41 }
 0x17e   : > { %v2092_v14 = vadd.f32 %v2091_v12, %v1524_v29  ;;  %v1555_v16 = vmax.f32 %v2088_v3, 0.0 }
 0x17f   : > { %v2094_v15 = vadd.f32 %v2093_v13, %v1526_v33  ;;  %v1556_v18 = vmax.f32 %v2090_v11, 0.0 }
 0x180   : > { %v1557_v17 = vmax.f32 %v2092_v14, 0.0 }
 0x181   : > { %v1558_v19 = vmax.f32 %v2094_v15, 0.0  ;;  %v1344_v20 = vpop.f32.mrb[20].mxu1 }
 0x182   : > { %v2008_v22 = vpack.c.bf16 %v1557_v17, %v1555_v16  ;;  %v2095_v23 = vadd.f32 %v1344_v20, %v2822_v40  ;;  %v1346_v21 = vpop.f32.mrb[21].mxu1 }
 0x183   : > { %v2038_v24 = vpack.c.bf16 %v1558_v19, %v1556_v18  ;;  %v2097_v26 = vadd.f32 %v1346_v21, %v2824_v41  ;;  %v1348_v27 = vpop.f32.mrb[22].mxu1 }
 0x184   : > { %2048 = vst [vmem:[%s2834_s13 + $0x20] sm:$0xff] %v2008_v22   ;;  %v2096_v25 = vadd.f32 %v2095_v23, %v1530_v47  ;;  %v2099_v28 = vadd.f32 %v1348_v27, %v2822_v40  ;;  %v1350_v29 = vpop.f32.mrb[23].mxu1 }
 0x185   : > { %2053 = vst [vmem:[%s2839_s18 + $0x20] sm:$0xff] %v2038_v24   ;;  %v2098_v30 = vadd.f32 %v2097_v26, %v1532_v51  ;;  %v2101_v31 = vadd.f32 %v1350_v29, %v2824_v41 }
 0x186   : > { %v2100_v32 = vadd.f32 %v2099_v28, %v1534_v55  ;;  %v1559_v34 = vmax.f32 %v2096_v25, 0.0 }
 0x187   : > { %v2102_v33 = vadd.f32 %v2101_v31, %v1536_v57  ;;  %v1560_v36 = vmax.f32 %v2098_v30, 0.0 }
 0x188   : > { %v1561_v35 = vmax.f32 %v2100_v32, 0.0 }
 0x189   : > { %v1562_v37 = vmax.f32 %v2102_v33, 0.0 }
 0x18a   : > { %v2013_v38 = vpack.c.bf16 %v1561_v35, %v1559_v34 }
 0x18b   : > { %v2043_v39 = vpack.c.bf16 %v1562_v37, %v1560_v36 }
 0x18c   : > { %2049 = vst [vmem:[%s2834_s13 + $0x28] sm:$0xff] %v2013_v38  }
 0x18d   : > { %2054 = vst [vmem:[%s2839_s18 + $0x28] sm:$0xff] %v2043_v39  }
 0x18e PF: > { %s15_s15 = sadd.s32 1, %s2395_s15  }
 0x18f   : > { %p12_p4 = scmp.ge.s32.totalorder %s15_s15, 4  }
 0x191   :  { %14 = sbr.rel (!%p12_p4) target bundleno = 1 (0x1), region = 74 }

// kernel: block17.7
= control target key start
LH: loop header
LB: loop body
LE: loop exit
PB: predicated region body
PF: predicated region fallthrough
CT: control target
= control target key end

     0   :  { %s2118_s0 = inlined_call_operand.vmem [shape: bf16[192,128], index: 0, kind: input, shape index: {}]   ;;  %s2119_s1 = inlined_call_operand.vmem [shape: bf16[192,128], index: 1, kind: input, shape index: {}]   ;;  %s2120_s2 = inlined_call_operand.vmem [shape: bf16[128,896], index: 2, kind: input, shape index: {}]   ;;  %s2121_s3 = inlined_call_operand.vmem [shape: bf16[128,896], index: 3, kind: input, shape index: {}]   ;;  %s2122_s4 = inlined_call_operand.vmem [shape: f32[1,896], index: 4, kind: input, shape index: {}]   ;;  %s2123_s5 = inlined_call_operand.vmem [shape: bf16[192,896], index: 5, kind: input, shape index: {}]   ;;  %s2124_s6 = inlined_call_operand.vmem [shape: bf16[192,896], index: 6, kind: output, shape index: {}]  }
   0x1   :  { %2125 = sst [smem:[#allocation6_spill]] %s2120_s2 }
   0x2   :  { %s1845_s21 = smov 0   ;;  %s1847_s22 = smov 0  }
   0x3   :  { %s1849_s23 = smov 0   ;;  %s1851_s24 = smov 0  }
   0x4   :  { %s1853_s25 = smov 0   ;;  %s1855_s26 = smov 0  }
   0x5   :  { %s1857_s27 = smov 0   ;;  %s1859_s28 = smov 0  }
   0x6   :  { %s1861_s29 = smov 0  }
   0x7 LB: > { %s1402_s30 = sadd.s32 4294967295, %s1808_s29   ;;  %s25_s7 = sadd.s32 1, %s1800_s27  ;;  %s1808_s29 = sphi %s1861_s29, %s16_s29   ;;  %s1804_s28 = sphi %s1859_s28, %s2137_s28   ;;  %s1800_s27 = sphi %s1857_s27, %s2136_s27   ;;  %s1796_s26 = sphi %s1855_s26, %s2135_s26   ;;  %s1792_s25 = sphi %s1853_s25, %s2134_s25   ;;  %s1788_s24 = sphi %s1851_s24, %s2133_s24   ;;  %s1784_s23 = sphi %s1849_s23, %s2132_s23   ;;  %s1780_s22 = sphi %s1847_s22, %s2131_s22   ;;  %s1776_s21 = sphi %s1845_s21, %s2130_s21  }
   0x8   : > { %p26_p0 = scmp.ge.s32.totalorder %s25_s7, 7  ;;  %s28_s8 = sadd.s32 1, %s1804_s28 }
   0x9   : > { %s87_s9 = sadd.s32 1, %s1788_s24  ;;  %p94_p1 = scmp.ne.s32.totalorder %s1788_s24, %s1784_s23 }
   0xa   : > { %s2139_s7 = smov (%p26_p0, %s25_s7), 0  ;;  %s2141_s8 = smov (!%p26_p0, %s28_s8), %s1804_s28 }
   0xb   : > { %s84_s10 = ssub.s32 %s1800_s27, %s2139_s7  ;;  %p95_p2 = scmp.eq.s32.totalorder %s1808_s29, 0 }
   0xc   : > { %p30_p3 = scmp.ge.s32.totalorder %s2141_s8, 2  ;;  %p85_p4 = scmp.eq.s32.totalorder %s84_s10, 0 }
   0xd   : > { %p1902_p5 = por %p95_p2, %p94_p1  ;;  %s167_s12 = sadd.s32 1, %s1780_s22 }
   0xe   : > { %s2143_s8 = smov (%p30_p3, %s2141_s8), 0  ;;  %p174_p6 = scmp.ne.s32.totalorder %s1780_s22, %s1776_s21 }
   0xf   : > { %s1910_s13 = scalar_select %p85_p4, %s1788_s24, %s87_s9  }
  0x10   : > { %s162_s14 = ssub.s32 %s1804_s28, %s2143_s8  ;;  %p206_p7 = scmp.eq.s32.totalorder %s1402_s30, 13 }
  0x11   : > { %s164_s15 = sor.u32 %s162_s14, %s84_s10  ;;  %p1916_p9 = por %p174_p6, %p95_p2 }
  0x12   : > { %p165_p8 = scmp.eq.s32.totalorder %s164_s15, 0  ;;  %p1920_p10 = por %p206_p7, %p174_p6 }
  0x13   : > { %p1405_p11 = scmp.ge.s32.totalorder %s1808_s29, 14 }
  0x14   : > { %s1925_s18 = scalar_select %p165_p8, %s1780_s22, %s167_s12  }
  0x15   : > { %228 = sbr.rel (%p1405_p11) target bundleno = 78 (0x4e), region = 16 }
  0x1c   : > { %249 = sbr.rel (!%p1902_p5) target bundleno = 48 (0x30), region = 28  ;;  %s251_s19 = sand.u32 (%p1902_p5), 1, %s1788_s24  }
  0x1d   : > { %s1407_s20 = sshll.u32 (%p1902_p5), %s1800_s27, 2  ;;  %s1406_s30 = sshll.u32 (%p1902_p5), %s251_s19, 6 }
  0x1e   : > { %s2129_s2 = sld [smem:[#allocation6_spill]] (%p1902_p5)  ;;  %s253_s12 = scalar_lea.vmem (%p1902_p5), [#allocation2], %s1406_s30 }
  0x24   : > { %s1935_s14 = scalar_lea.vmem %s2129_s2, %s1407_s20 }
  0x25   : > { %v271_v0 = vld [vmem:[%s1935_s14] sm:$0xf]  ;;  %v273_v1 = vld [vmem:[%s1935_s14 + $0x1c] sm:$0xf]  ;;  %v275_v2 = vld [vmem:[%s1935_s14 + $0x38] sm:$0xf] }
  0x26   : > { %272 = vst [vmem:[%s253_s12] sm:$0xf] %v271_v0  ;;  %274 = vst [vmem:[%s253_s12 + $0x4] sm:$0xf] %v273_v1  ;;  %v277_v3 = vld [vmem:[%s1935_s14 + $0x54] sm:$0xf] }
  0x27   : > { %v279_v4 = vld [vmem:[%s1935_s14 + $0x70] sm:$0xf]  ;;  %276 = vst [vmem:[%s253_s12 + $0x8] sm:$0xf] %v275_v2  ;;  %278 = vst [vmem:[%s253_s12 + $0xc] sm:$0xf] %v277_v3 }
  0x28   : > { %280 = vst [vmem:[%s253_s12 + $0x10] sm:$0xf] %v279_v4  ;;  %v281_v5 = vld [vmem:[%s1935_s14 + $0x8c] sm:$0xf]  ;;  %v283_v6 = vld [vmem:[%s1935_s14 + $0xa8] sm:$0xf] }
  0x29   : > { %v285_v7 = vld [vmem:[%s1935_s14 + $0xc4] sm:$0xf]  ;;  %282 = vst [vmem:[%s253_s12 + $0x14] sm:$0xf] %v281_v5  ;;  %284 = vst [vmem:[%s253_s12 + $0x18] sm:$0xf] %v283_v6 }
  0x2a   : > { %286 = vst [vmem:[%s253_s12 + $0x1c] sm:$0xf] %v285_v7  ;;  %v287_v8 = vld [vmem:[%s1935_s14 + $0xe0] sm:$0xf]  ;;  %v289_v9 = vld [vmem:[%s1935_s14 + $0xfc] sm:$0xf] }
  0x2b   : > { %v291_v10 = vld [vmem:[%s1935_s14 + $0x118] sm:$0xf]  ;;  %288 = vst [vmem:[%s253_s12 + $0x20] sm:$0xf] %v287_v8  ;;  %290 = vst [vmem:[%s253_s12 + $0x24] sm:$0xf] %v289_v9 }
  0x2c   : > { %292 = vst [vmem:[%s253_s12 + $0x28] sm:$0xf] %v291_v10  ;;  %v293_v11 = vld [vmem:[%s1935_s14 + $0x134] sm:$0xf]  ;;  %v295_v12 = vld [vmem:[%s1935_s14 + $0x150] sm:$0xf] }
  0x2d   : > { %v297_v13 = vld [vmem:[%s1935_s14 + $0x16c] sm:$0xf]  ;;  %294 = vst [vmem:[%s253_s12 + $0x2c] sm:$0xf] %v293_v11  ;;  %296 = vst [vmem:[%s253_s12 + $0x30] sm:$0xf] %v295_v12 }
  0x2e   : > { %298 = vst [vmem:[%s253_s12 + $0x34] sm:$0xf] %v297_v13  ;;  %v299_v14 = vld [vmem:[%s1935_s14 + $0x188] sm:$0xf]  ;;  %v301_v15 = vld [vmem:[%s1935_s14 + $0x1a4] sm:$0xf] }
  0x2f   : > { %300 = vst [vmem:[%s253_s12 + $0x38] sm:$0xf] %v299_v14  ;;  %302 = vst [vmem:[%s253_s12 + $0x3c] sm:$0xf] %v301_v15 }
  0x30 PF: > { %357 = sbr.rel (!%p1902_p5) target bundleno = 62 (0x3e), region = 69  ;;  %s359_s15 = sand.u32 (%p1902_p5), 1, %s1788_s24  }
  0x31   : > { %s1409_s19 = sshll.u32 (%p1902_p5), %s1800_s27, 2  ;;  %s1408_s20 = sshll.u32 (%p1902_p5), %s359_s15, 6 }
  0x32   : > { %s1960_s10 = scalar_lea.vmem (%p1902_p5), %s2121_s3, %s1409_s19  ;;  %s361_s11 = scalar_lea.vmem (%p1902_p5), [#allocation3], %s1408_s20 }
  0x33   : > { %v379_v16 = vld [vmem:[%s1960_s10] sm:$0xf] (%p1902_p5)  ;;  %v381_v17 = vld [vmem:[%s1960_s10 + $0x1c] sm:$0xf] (%p1902_p5)  ;;  %v383_v18 = vld [vmem:[%s1960_s10 + $0x38] sm:$0xf] (%p1902_p5) }
  0x34   : > { %380 = vst [vmem:[%s361_s11] sm:$0xf] (%p1902_p5), %v379_v16  ;;  %382 = vst [vmem:[%s361_s11 + $0x4] sm:$0xf] (%p1902_p5), %v381_v17  ;;  %v385_v19 = vld [vmem:[%s1960_s10 + $0x54] sm:$0xf] (%p1902_p5) }
  0x35   : > { %v387_v20 = vld [vmem:[%s1960_s10 + $0x70] sm:$0xf] (%p1902_p5)  ;;  %384 = vst [vmem:[%s361_s11 + $0x8] sm:$0xf] (%p1902_p5), %v383_v18  ;;  %386 = vst [vmem:[%s361_s11 + $0xc] sm:$0xf] (%p1902_p5), %v385_v19 }
  0x36   : > { %388 = vst [vmem:[%s361_s11 + $0x10] sm:$0xf] (%p1902_p5), %v387_v20  ;;  %v389_v21 = vld [vmem:[%s1960_s10 + $0x8c] sm:$0xf] (%p1902_p5)  ;;  %v391_v22 = vld [vmem:[%s1960_s10 + $0xa8] sm:$0xf] (%p1902_p5) }
  0x37   : > { %v393_v23 = vld [vmem:[%s1960_s10 + $0xc4] sm:$0xf]  ;;  %390 = vst [vmem:[%s361_s11 + $0x14] sm:$0xf] %v389_v21  ;;  %392 = vst [vmem:[%s361_s11 + $0x18] sm:$0xf] %v391_v22 }
  0x38   : > { %394 = vst [vmem:[%s361_s11 + $0x1c] sm:$0xf] %v393_v23  ;;  %v395_v24 = vld [vmem:[%s1960_s10 + $0xe0] sm:$0xf]  ;;  %v397_v25 = vld [vmem:[%s1960_s10 + $0xfc] sm:$0xf] }
  0x39   : > { %v399_v26 = vld [vmem:[%s1960_s10 + $0x118] sm:$0xf]  ;;  %396 = vst [vmem:[%s361_s11 + $0x20] sm:$0xf] %v395_v24  ;;  %398 = vst [vmem:[%s361_s11 + $0x24] sm:$0xf] %v397_v25 }
  0x3a   : > { %400 = vst [vmem:[%s361_s11 + $0x28] sm:$0xf] %v399_v26  ;;  %v401_v27 = vld [vmem:[%s1960_s10 + $0x134] sm:$0xf]  ;;  %v403_v28 = vld [vmem:[%s1960_s10 + $0x150] sm:$0xf] }
  0x3b   : > { %v405_v29 = vld [vmem:[%s1960_s10 + $0x16c] sm:$0xf]  ;;  %402 = vst [vmem:[%s361_s11 + $0x2c] sm:$0xf] %v401_v27  ;;  %404 = vst [vmem:[%s361_s11 + $0x30] sm:$0xf] %v403_v28 }
  0x3c   : > { %406 = vst [vmem:[%s361_s11 + $0x34] sm:$0xf] %v405_v29  ;;  %v407_v30 = vld [vmem:[%s1960_s10 + $0x188] sm:$0xf]  ;;  %v409_v31 = vld [vmem:[%s1960_s10 + $0x1a4] sm:$0xf] }
  0x3d   : > { %408 = vst [vmem:[%s361_s11 + $0x38] sm:$0xf] %v407_v30  ;;  %410 = vst [vmem:[%s361_s11 + $0x3c] sm:$0xf] %v409_v31 }
  0x3e PF: > { %471 = sbr.rel (!%p1916_p9) target bundleno = 78 (0x4e), region = 114  ;;  %s473_s14 = sand.u32 (%p1916_p9), 1, %s1780_s22  }
  0x3f   : > { %s1632_s12 = smul.u32 (%p1916_p9), 48, %s473_s14 }
  0x40   : > { %s1636_s15 = smul.u32 (%p1916_p9), 84, %s1804_s28 }
  0x41   : > { %s475_s10 = scalar_lea.vmem (%p1916_p9), [#allocation4], %s1632_s12 }
  0x42   : > { %s478_s19 = sadd.s32 (%p1916_p9), %s1800_s27, %s1636_s15 }
  0x43   : > { %s1410_s20 = sshll.u32 (%p1916_p9), %s478_s19, 2 }
  0x44   : > { %s480_s2 = scalar_lea.vmem (%p1916_p9), %s2123_s5, %s1410_s20 }
  0x45   : > { %v496_v32 = vld [vmem:[%s480_s2] sm:$0xf]  ;;  %v498_v33 = vld [vmem:[%s480_s2 + $0x1c] sm:$0xf]  ;;  %v500_v34 = vld [vmem:[%s480_s2 + $0x38] sm:$0xf] }
  0x46   : > { %497 = vst [vmem:[%s475_s10] sm:$0xf] %v496_v32  ;;  %499 = vst [vmem:[%s475_s10 + $0x4] sm:$0xf] %v498_v33  ;;  %v502_v35 = vld [vmem:[%s480_s2 + $0x54] sm:$0xf] }
  0x47   : > { %501 = vst [vmem:[%s475_s10 + $0x8] sm:$0xf] %v500_v34  ;;  %v504_v36 = vld [vmem:[%s480_s2 + $0x70] sm:$0xf]  ;;  %v506_v37 = vld [vmem:[%s480_s2 + $0x8c] sm:$0xf] }
  0x48   : > { %503 = vst [vmem:[%s475_s10 + $0xc] sm:$0xf] %v502_v35  ;;  %505 = vst [vmem:[%s475_s10 + $0x10] sm:$0xf] %v504_v36  ;;  %v508_v38 = vld [vmem:[%s480_s2 + $0xa8] sm:$0xf] }
  0x49   : > { %507 = vst [vmem:[%s475_s10 + $0x14] sm:$0xf] %v506_v37  ;;  %v510_v39 = vld [vmem:[%s480_s2 + $0xc4] sm:$0xf]  ;;  %v512_v40 = vld [vmem:[%s480_s2 + $0xe0] sm:$0xf] }
  0x4a   : > { %509 = vst [vmem:[%s475_s10 + $0x18] sm:$0xf] %v508_v38  ;;  %511 = vst [vmem:[%s475_s10 + $0x1c] sm:$0xf] %v510_v39  ;;  %v514_v41 = vld [vmem:[%s480_s2 + $0xfc] sm:$0xf] }
  0x4b   : > { %513 = vst [vmem:[%s475_s10 + $0x20] sm:$0xf] %v512_v40  ;;  %v516_v42 = vld [vmem:[%s480_s2 + $0x118] sm:$0xf]  ;;  %v518_v43 = vld [vmem:[%s480_s2 + $0x134] sm:$0xf] }
  0x4c   : > { %515 = vst [vmem:[%s475_s10 + $0x24] sm:$0xf] %v514_v41  ;;  %517 = vst [vmem:[%s475_s10 + $0x28] sm:$0xf] %v516_v42 }
  0x4d   : > { %519 = vst [vmem:[%s475_s10 + $0x2c] sm:$0xf] %v518_v43 }
  0x4e PF: > { %p1411_p12 = scmp.ge.s32.totalorder %s1808_s29, 1  ;;  %p565_p13 = scmp.lt.s32.totalorder %s1808_s29, 15 }
  0x50   : > { %p566_p0 = pnand %p1411_p12, %p565_p13 }
  0x51   : > { %s572_s16 = sand.u32 (!%p566_p0), 1, %s1784_s23   ;;  %s635_s14 = smul.u32 (!%p566_p0), 12, %s1796_s26 }
  0x52   : > { %569 = sbr.rel (%p566_p0) target bundleno = 369 (0x171), region = 155  ;;  %s1412_s11 = sshll.u32 (!%p566_p0), %s572_s16, 6 }
  0x53   : > { %s1990_s12 = scalar_lea.vmem (!%p566_p0), [#allocation3], %s1412_s11  ;;  %s1993_s2 = scalar_lea.vmem (!%p566_p0), [#allocation2], %s1412_s11 }
  0x54   : > { %v1710_v44 = vld [vmem:[%s1990_s12] sm:$0xff] (!%p566_p0)   ;;  %v1712_v46 = vld [vmem:[%s1990_s12 + $0x8] sm:$0xff] (!%p566_p0)   ;;  %p636_p1 = scmp.lt.s32.totalorder (!%p566_p0), %s635_s14, 23  ;;  %v1714_v48 = vld [vmem:[%s1990_s12 + $0x10] sm:$0xff] (!%p566_p0)   ;;  %s586_s16 = sand.u32 (!%p566_p0), 1, %s1776_s21  }
  0x55   : > { %v1711_v45 = vld [vmem:[%s1993_s2] sm:$0xff] (!%p566_p0)   ;;  %1564 = vmatprep.subr.bf16.mxu1 (!%p566_p0), %v1710_v44  ;;  %v1713_v47 = vld [vmem:[%s1993_s2 + $0x8] sm:$0xff] (!%p566_p0)   ;;  %v1715_v49 = vld [vmem:[%s1993_s2 + $0x10] sm:$0xff] (!%p566_p0)   ;;  %p647_p2 = scmp.lt.s32.totalorder (!%p566_p0), %s1792_s25, 6  ;;  %s2034_s11 = smul.u32 (!%p566_p0), 48, %s586_s16 }
  0x56   : > { %1592 = vmatprep.subr.bf16.mxu0 (!%p566_p0), %v1711_v45  ;;  %1565 = vmatpush3.bf16.msra.mxu1 (!%p566_p0), %v1710_v44  ;;  %v1716_v50 = vld [vmem:[%s1990_s12 + $0x18] sm:$0xff] (!%p566_p0)   ;;  %v1718_v52 = vld [vmem:[%s1990_s12 + $0x20] sm:$0xff] (!%p566_p0)   ;;  %v1720_v54 = vld [vmem:[%s1990_s12 + $0x28] sm:$0xff] (!%p566_p0)  }
  0x57   : > { %1593 = vmatpush3.bf16.msra.mxu0 (!%p566_p0), %v1711_v45  ;;  %1566 = vmatprep.subr.bf16.mxu1 (!%p566_p0), %v1712_v46  ;;  %v1717_v51 = vld [vmem:[%s1993_s2 + $0x18] sm:$0xff] (!%p566_p0)   ;;  %v1719_v53 = vld [vmem:[%s1993_s2 + $0x20] sm:$0xff] (!%p566_p0)   ;;  %v1721_v55 = vld [vmem:[%s1993_s2 + $0x28] sm:$0xff] (!%p566_p0)   ;;  %s2041_s15 = scalar_lea.vmem (!%p566_p0), [#allocation4], %s2034_s11  ;;  %s2056_s21 = scalar_lea.vmem (!%p566_p0), [#allocation5], %s2034_s11 }
  0x58   : > { %1594 = vmatprep.subr.bf16.mxu0 (!%p566_p0), %v1713_v47  ;;  %v1722_v58 = vld [vmem:[%s1990_s12 + $0x30] sm:$0xff] (!%p566_p0)   ;;  %v1724_v60 = vld [vmem:[%s1990_s12 + $0x38] sm:$0xff] (!%p566_p0)  }
  0x59   : > { %s2145_s14 = smov (!%p636_p1, %s635_s14), 23  ;;  %v1723_v59 = vld [vmem:[%s1993_s2 + $0x30] sm:$0xff]   ;;  %v1725_v61 = vld [vmem:[%s1993_s2 + $0x38] sm:$0xff]   ;;  %s1637_s19 = smul.u32 (%p1920_p10), 84, %s1796_s26 }
  0x5a   : > { %1567 = vmatpush3.bf16.msra.mxu1 %v1712_v46  ;;  %s1414_s23 = sshll.u32 %s2145_s14, 2  ;;  %v1526_v8 = vld [vmem:[%s2041_s15 + $0x8] sm:$0xff]   ;;  %v1473_v10 = vld [vmem:[%s2041_s15] sm:$0xff]   ;;  %v1528_v33 = vld [vmem:[%s2041_s15 + $0x18] sm:$0xff]  }
  0x5b   : > { %1595 = vmatpush3.bf16.msra.mxu0 %v1713_v47  ;;  %1568 = vmatprep.subr.bf16.mxu1 %v1714_v48  ;;  %s2007_s20 = scalar_lea.vmem %s2119_s1, %s1414_s23  ;;  %s2013_s10 = scalar_lea.vmem %s2118_s0, %s1414_s23  ;;  %v1478_v15 = vunpack.c.l.bf16 %v1526_v8  ;;  %v1474_v19 = vunpack.c.l.bf16 %v1473_v10  ;;  %v1479_v24 = vunpack.c.h.bf16 %v1526_v8  ;;  %v1475_v28 = vunpack.c.h.bf16 %v1473_v10  ;;  %v1527_v36 = vld [vmem:[%s2041_s15 + $0x10] sm:$0xff]  }
  0x5c   : > { %1596 = vmatprep.subr.bf16.mxu0 %v1715_v49  ;;  %v1726_v56 = vld [vmem:[%s2007_s20] sm:$0xff]   ;;  %v1728_v62 = vld [vmem:[%s2007_s20 + $0x8] sm:$0xff]   ;;  %v1730_v0 = vld [vmem:[%s2007_s20 + $0x10] sm:$0xff]   ;;  %s648_s14 = scalar_select %p647_p2, %s1792_s25, 6  ;;  %v1486_v43 = vunpack.c.l.bf16 %v1528_v33 }
  0x5d   : > { %v1727_v57 = vld [vmem:[%s2013_s10] sm:$0xff]   ;;  %1580 = vmatprep.mubr.bf16.mxu1 %v1726_v56  ;;  %v1729_v63 = vld [vmem:[%s2013_s10 + $0x8] sm:$0xff]   ;;  %v1731_v1 = vld [vmem:[%s2013_s10 + $0x10] sm:$0xff]   ;;  %s1175_s17 = sadd.s32 (%p1920_p10), %s1792_s25, %s1637_s19 }
  0x5e   : > { %1569 = vmatpush3.bf16.msra.mxu1 %v1714_v48  ;;  %1608 = vmatprep.mubr.bf16.mxu0 %v1727_v57  ;;  %v1732_v2 = vld [vmem:[%s2007_s20 + $0x18] sm:$0xff]   ;;  %v1734_v4 = vld [vmem:[%s2007_s20 + $0x20] sm:$0xff]   ;;  %v1736_v6 = vld [vmem:[%s2007_s20 + $0x28] sm:$0xff]   ;;  %s649_s23 = scalar_lea.vmem %s2122_s4, %s648_s14  ;;  %s1457_s20 = sshll.u32 (%p1920_p10), %s1175_s17, 2 }
  0x5f   : > { %1597 = vmatpush3.bf16.msra.mxu0 %v1715_v49  ;;  %1570 = vmatprep.subr.bf16.mxu1 %v1716_v50  ;;  %v1733_v3 = vld [vmem:[%s2013_s10 + $0x18] sm:$0xff]   ;;  %v1735_v5 = vld [vmem:[%s2013_s10 + $0x20] sm:$0xff]   ;;  %v1737_v7 = vld [vmem:[%s2013_s10 + $0x28] sm:$0xff]   ;;  %v1482_v49 = vunpack.c.l.bf16 %v1527_v36  ;;  %s1177_s10 = scalar_lea.vmem (%p1920_p10), %s2124_s6, %s1457_s20 }
  0x60   : > { %1598 = vmatprep.subr.bf16.mxu0 %v1717_v51  ;;  %v2045_v12 = vld [vmem:[%s649_s23] ss:$0 sm:$0xff] }
  0x62   : > { %1571 = vmatpush3.bf16.msra.mxu1 %v1716_v50 }
  0x63   : > { %1599 = vmatpush3.bf16.msra.mxu0 %v1717_v51  ;;  %1572 = vmatprep.subr.bf16.mxu1 %v1718_v52 }
  0x64   : > { %1600 = vmatprep.subr.bf16.mxu0 %v1719_v53 }
  0x66   : > { %1573 = vmatpush3.bf16.msra.mxu1 %v1718_v52 }
  0x67   : > { %1601 = vmatpush3.bf16.msra.mxu0 %v1719_v53  ;;  %1574 = vmatprep.subr.bf16.mxu1 %v1720_v54 }
  0x68   : > { %1602 = vmatprep.subr.bf16.mxu0 %v1721_v55 }
  0x6a   : > { %1575 = vmatpush3.bf16.msra.mxu1 %v1720_v54 }
  0x6b   : > { %1603 = vmatpush3.bf16.msra.mxu0 %v1721_v55  ;;  %1576 = vmatprep.subr.bf16.mxu1 %v1722_v58  ;;  %v1487_v55 = vunpack.c.h.bf16 %v1528_v33 }
  0x6c   : > { %1604 = vmatprep.subr.bf16.mxu0 %v1723_v59 }
  0x6e   : > { %1577 = vmatpush3.bf16.msra.mxu1 %v1722_v58 }
  0x6f   : > { %1605 = vmatpush3.bf16.msra.mxu0 %v1723_v59  ;;  %1578 = vmatprep.subr.bf16.mxu1 %v1724_v60 }
  0x70   : > { %1606 = vmatprep.subr.bf16.mxu0 %v1725_v61 }
  0x72   : > { %1579 = vmatpush3.bf16.msra.mxu1 %v1724_v60  ;;  %v1483_v60 = vunpack.c.h.bf16 %v1527_v36 }
  0x73   : > { %1607 = vmatpush3.bf16.msra.mxu0 %v1725_v61 }
  0x75   : > { %1581 = vmatmul.mubr.bf16.vlgmr.msra.gmra.mrb[0].mxu1 %v1728_v62 }
  0x76   : > { %1609 = vmatmul.mubr.bf16.vlgmr.msra.gmra.mrb[0].mxu0 %v1729_v63  ;;  %1584 = vmatprep.mubr.bf16.mxu1 %v1730_v0 }
  0x77   : > { %1612 = vmatprep.mubr.bf16.mxu0 %v1731_v1  ;;  %v1530_v1 = vld [vmem:[%s2041_s15 + $0x28] sm:$0xff]  }
  0x7d   : > { %1585 = vmatmul.mubr.bf16.gmra.mrb[4].mxu1 %v1732_v2 }
  0x7e   : > { %1613 = vmatmul.mubr.bf16.gmra.mrb[4].mxu0 %v1733_v3  ;;  %1588 = vmatprep.mubr.bf16.mxu1 %v1734_v4  ;;  %v1529_v4 = vld [vmem:[%s2041_s15 + $0x20] sm:$0xff]  }
  0x7f   : > { %1616 = vmatprep.mubr.bf16.mxu0 %v1735_v5 }
  0x85   : > { %1589 = vmatmul.mubr.bf16.gmra.mrb[8].mxu1 %v1736_v6 }
  0x86   : > { %1617 = vmatmul.mubr.bf16.gmra.mrb[8].mxu0 %v1737_v7 }
 0x148   : > { %v1582_v9 = vpop.f32.mrb[0].mxu1 }
 0x149   : > { %v1610_v11 = vpop.f32.mrb[0].mxu0  ;;  %v827_v13 = vpop.f32.mrb[1].mxu1 }
 0x14a   : > { %v1001_v14 = vadd.f32 %v1610_v11, %v1582_v9  ;;  %v992_v16 = vpop.f32.mrb[1].mxu0  ;;  %v1583_v17 = vpop.f32.mrb[2].mxu1  ;;  %v1494_v11 = vunpack.c.l.bf16 %v1530_v1 }
 0x14b   : > { %v993_v18 = vadd.f32 %v992_v16, %v827_v13  ;;  %v1611_v20 = vpop.f32.mrb[2].mxu0  ;;  %v830_v21 = vpop.f32.mrb[3].mxu1 }
 0x14c   : > { %v1048_v22 = vadd.f32 %v2045_v12, %v1001_v14  ;;  %v1004_v23 = vadd.f32 %v1611_v20, %v1583_v17  ;;  %v995_v25 = vpop.f32.mrb[3].mxu0 }
 0x14d   : > { %v1046_v26 = vadd.f32 %v2045_v12, %v993_v18  ;;  %v996_v27 = vadd.f32 %v995_v25, %v830_v21  ;;  %v1490_v18 = vunpack.c.l.bf16 %v1529_v4 }
 0x14e   : > { %v1084_v29 = vadd.f32 %v1478_v15, %v1048_v22  ;;  %v1049_v30 = vadd.f32 %v2045_v12, %v1004_v23 }
 0x14f   : > { %v1082_v31 = vadd.f32 %v1474_v19, %v1046_v26  ;;  %v1047_v32 = vadd.f32 %v2045_v12, %v996_v27 }
 0x150   : > { %v1085_v34 = vadd.f32 %v1479_v24, %v1049_v30  ;;  %v1586_v35 = vpop.f32.mrb[4].mxu1  ;;  %v1096_v40 = vmax.f32 %v1084_v29, 0.0  ;;  %v1495_v24 = vunpack.c.h.bf16 %v1530_v1  ;;  %v1491_v29 = vunpack.c.h.bf16 %v1529_v4 }
 0x151   : > { %v1083_v37 = vadd.f32 %v1475_v28, %v1047_v32  ;;  %v1614_v38 = vpop.f32.mrb[4].mxu0  ;;  %v843_v39 = vpop.f32.mrb[5].mxu1  ;;  %v1094_v46 = vmax.f32 %v1082_v31, 0.0 }
 0x152   : > { %v1097_v41 = vmax.f32 %v1085_v34, 0.0  ;;  %v1017_v42 = vadd.f32 %v1614_v38, %v1586_v35  ;;  %v1008_v44 = vpop.f32.mrb[5].mxu0  ;;  %v1587_v45 = vpop.f32.mrb[6].mxu1 }
 0x153   : > { %v1095_v47 = vmax.f32 %v1083_v37, 0.0  ;;  %v1009_v48 = vadd.f32 %v1008_v44, %v843_v39  ;;  %v1615_v50 = vpop.f32.mrb[6].mxu0  ;;  %v846_v51 = vpop.f32.mrb[7].mxu1 }
 0x154   : > { %v1504_v52 = vpack.c.bf16 %v1097_v41, %v1096_v40  ;;  %v1052_v53 = vadd.f32 %v2045_v12, %v1017_v42  ;;  %v1020_v54 = vadd.f32 %v1615_v50, %v1587_v45  ;;  %v1011_v56 = vpop.f32.mrb[7].mxu0 }
 0x155   : > { %v1499_v57 = vpack.c.bf16 %v1095_v47, %v1094_v46  ;;  %v1050_v58 = vadd.f32 %v2045_v12, %v1009_v48  ;;  %v1012_v59 = vadd.f32 %v1011_v56, %v846_v51 }
 0x156   : > { %1531 = vst [vmem:[%s2056_s21 + $0x8] sm:$0xff] %v1504_v52   ;;  %v1088_v61 = vadd.f32 %v1486_v43, %v1052_v53  ;;  %v1053_v62 = vadd.f32 %v2045_v12, %v1020_v54 }
 0x157   : > { %1500 = vst [vmem:[%s2056_s21] sm:$0xff] %v1499_v57   ;;  %v1086_v63 = vadd.f32 %v1482_v49, %v1050_v58  ;;  %v1051_v0 = vadd.f32 %v2045_v12, %v1012_v59 }
 0x158   : > { %v1089_v2 = vadd.f32 %v1487_v55, %v1053_v62  ;;  %v1590_v3 = vpop.f32.mrb[8].mxu1  ;;  %v1100_v8 = vmax.f32 %v1088_v61, 0.0 }
 0x159   : > { %v1087_v5 = vadd.f32 %v1483_v60, %v1051_v0  ;;  %v1618_v6 = vpop.f32.mrb[8].mxu0  ;;  %v859_v7 = vpop.f32.mrb[9].mxu1  ;;  %v1098_v15 = vmax.f32 %v1086_v63, 0.0 }
 0x15a   : > { %v1101_v9 = vmax.f32 %v1089_v2, 0.0  ;;  %v1033_v10 = vadd.f32 %v1618_v6, %v1590_v3  ;;  %v1024_v13 = vpop.f32.mrb[9].mxu0  ;;  %v1591_v14 = vpop.f32.mrb[10].mxu1 }
 0x15b   : > { %v1099_v16 = vmax.f32 %v1087_v5, 0.0  ;;  %v1025_v17 = vadd.f32 %v1024_v13, %v859_v7  ;;  %v1619_v19 = vpop.f32.mrb[10].mxu0  ;;  %v862_v20 = vpop.f32.mrb[11].mxu1 }
 0x15c   : > { %v1514_v21 = vpack.c.bf16 %v1101_v9, %v1100_v8  ;;  %v1056_v22 = vadd.f32 %v2045_v12, %v1033_v10  ;;  %v1036_v23 = vadd.f32 %v1619_v19, %v1591_v14  ;;  %v1027_v25 = vpop.f32.mrb[11].mxu0 }
 0x15d   : > { %v1509_v26 = vpack.c.bf16 %v1099_v16, %v1098_v15  ;;  %v1054_v27 = vadd.f32 %v2045_v12, %v1025_v17  ;;  %v1028_v28 = vadd.f32 %v1027_v25, %v862_v20  ;;  %v1197_v43 = vld [vmem:[%s2056_s21 + $0x8] sm:$0xf] (%p1920_p10)  ;;  %v1199_v44 = vld [vmem:[%s2056_s21 + $0xc] sm:$0xf] (%p1920_p10) }
 0x15e   : > { %1533 = vst [vmem:[%s2056_s21 + $0x18] sm:$0xff] %v1514_v21   ;;  %v1092_v30 = vadd.f32 %v1494_v11, %v1056_v22  ;;  %v1057_v31 = vadd.f32 %v2045_v12, %v1036_v23  ;;  %v1195_v42 = vld [vmem:[%s2056_s21 + $0x4] sm:$0xf] (%p1920_p10)  ;;  %1198 = vst [vmem:[%s1177_s10 + $0x38] sm:$0xf] (%p1920_p10), %v1197_v43 }
 0x15f   : > { %1532 = vst [vmem:[%s2056_s21 + $0x10] sm:$0xff] %v1509_v26   ;;  %v1090_v32 = vadd.f32 %v1490_v18, %v1054_v27  ;;  %v1055_v33 = vadd.f32 %v2045_v12, %v1028_v28  ;;  %v1193_v12 = vld [vmem:[%s2056_s21] sm:$0xf] (%p1920_p10)  ;;  %1196 = vst [vmem:[%s1177_s10 + $0x1c] sm:$0xf] (%p1920_p10), %v1195_v42 }
 0x160   : > { %v1093_v34 = vadd.f32 %v1495_v24, %v1057_v31  ;;  %v1104_v36 = vmax.f32 %v1092_v30, 0.0  ;;  %1194 = vst [vmem:[%s1177_s10] sm:$0xf] (%p1920_p10), %v1193_v12  ;;  %1200 = vst [vmem:[%s1177_s10 + $0x54] sm:$0xf] (%p1920_p10), %v1199_v44 }
 0x161   : > { %v1091_v35 = vadd.f32 %v1491_v29, %v1055_v33  ;;  %v1102_v38 = vmax.f32 %v1090_v32, 0.0  ;;  %1172 = sbr.rel (!%p1920_p10) target bundleno = 369 (0x171), region = 171 }
 0x162   : > { %v1105_v37 = vmax.f32 %v1093_v34, 0.0 }
 0x163   : > { %v1103_v39 = vmax.f32 %v1091_v35, 0.0 }
 0x164   : > { %v1524_v40 = vpack.c.bf16 %v1105_v37, %v1104_v36 }
 0x165   : > { %v1519_v41 = vpack.c.bf16 %v1103_v39, %v1102_v38  ;;  %v1205_v47 = vld [vmem:[%s2056_s21 + $0x18] sm:$0xf] (%p1920_p10)  ;;  %v1207_v48 = vld [vmem:[%s2056_s21 + $0x1c] sm:$0xf] (%p1920_p10) }
 0x166   : > { %1535 = vst [vmem:[%s2056_s21 + $0x28] sm:$0xff] %v1524_v40   ;;  %v1201_v45 = vld [vmem:[%s2056_s21 + $0x10] sm:$0xf] (%p1920_p10)  ;;  %v1203_v46 = vld [vmem:[%s2056_s21 + $0x14] sm:$0xf] (%p1920_p10) }
 0x167   : > { %1534 = vst [vmem:[%s2056_s21 + $0x20] sm:$0xff] %v1519_v41   ;;  %1202 = vst [vmem:[%s1177_s10 + $0x70] sm:$0xf] (%p1920_p10), %v1201_v45 }
 0x168   : > { %1204 = vst [vmem:[%s1177_s10 + $0x8c] sm:$0xf] %v1203_v46  ;;  %1206 = vst [vmem:[%s1177_s10 + $0xa8] sm:$0xf] %v1205_v47 }
 0x169   : > { %1208 = vst [vmem:[%s1177_s10 + $0xc4] sm:$0xf] %v1207_v48 }
 0x16d   : > { %v1213_v51 = vld [vmem:[%s2056_s21 + $0x28] sm:$0xf]  ;;  %v1215_v52 = vld [vmem:[%s2056_s21 + $0x2c] sm:$0xf] }
 0x16e   : > { %v1209_v49 = vld [vmem:[%s2056_s21 + $0x20] sm:$0xf]  ;;  %v1211_v50 = vld [vmem:[%s2056_s21 + $0x24] sm:$0xf]  ;;  %1214 = vst [vmem:[%s1177_s10 + $0x118] sm:$0xf] %v1213_v51 }
 0x16f   : > { %1210 = vst [vmem:[%s1177_s10 + $0xe0] sm:$0xf] %v1209_v49  ;;  %1212 = vst [vmem:[%s1177_s10 + $0xfc] sm:$0xf] %v1211_v50 }
 0x170   : > { %1216 = vst [vmem:[%s1177_s10 + $0x134] sm:$0xf] %v1215_v52 }
 0x171 PF: > { %s16_s29 = sadd.s32 1, %s1808_s29   ;;  %s2130_s21 = smov %s1780_s22 }
 0x172   : > { %p13_p3 = scmp.ge.s32.totalorder %s16_s29, 16   ;;  %s2131_s22 = smov %s1925_s18 }
 0x173   : > { %s2132_s23 = smov %s1788_s24  ;;  %s2133_s24 = smov %s1910_s13 }
 0x174   : > { %s2134_s25 = smov %s1800_s27  ;;  %s2135_s26 = smov %s1804_s28 }
 0x175   : > { %s2136_s27 = smov %s2139_s7  ;;  %s2137_s28 = smov %s2143_s8 }
 0x176   :  { %15 = sbr.rel (!%p13_p3) target bundleno = 7 (0x7), region = 268 }

// kernel: block17.5
= control target key start
LH: loop header
LB: loop body
LE: loop exit
PB: predicated region body
PF: predicated region fallthrough
CT: control target
= control target key end

     0   :  { %s12014_s12 = smov 0   ;;  %s12016_s13 = smov 0   ;;  %s14359_s0 = inlined_call_operand.vmem [shape: bf16[15,32,128], index: 0, kind: input, shape index: {}]   ;;  %s14360_s1 = inlined_call_operand.vmem [shape: bf16[7,128,128], index: 1, kind: input, shape index: {}]   ;;  %s14361_s2 = inlined_call_operand.vmem [shape: f32[1,128], index: 2, kind: input, shape index: {}]   ;;  %s14362_s3 = inlined_call_operand.vmem [shape: bf16[9,32,128], index: 3, kind: output, shape index: {}]  }
   0x1   :  { %s12018_s14 = smov 0  }
   0x2 LB: > { %s7869_s15 = sadd.s32 4294967295, %s11990_s14   ;;  %s12031_s16 = sadd.s32 1, %s11990_s14   ;;  %s11990_s14 = sphi %s12018_s14, %s14366_s14   ;;  %s11986_s13 = sphi %s12016_s13, %s14365_s13   ;;  %s11982_s12 = sphi %s12014_s12, %s14364_s12  }
   0x3   : > { %s17_s17 = ssub.s32 %s11990_s14, %s12031_s16  ;;  %s20_s18 = sadd.s32 1, %s11986_s13 }
   0x4   : > { %p18_p0 = scmp.eq.s32.totalorder %s17_s17, 0  ;;  %p27_p1 = scmp.ne.s32.totalorder %s11986_s13, %s11982_s12 }
   0x5   : > { %p28_p2 = scmp.eq.s32.totalorder %s11990_s14, 0  ;;  %p99_p3 = scmp.eq.s32.totalorder %s7869_s15, 1 }
   0x6   : > { %s12042_s19 = scalar_select %p18_p0, %s11986_s13, %s20_s18  }
   0x7   : > { %p29_p4 = por %p28_p2, %p27_p1  ;;  %p12044_p5 = por %p99_p3, %p27_p1 }
   0x8   : > { %p7872_p6 = scmp.ge.s32.totalorder %s11990_s14, 2 }
   0xa   : > { %127 = sbr.rel (%p7872_p6) target bundleno = 29 (0x1d), region = 24 }
  0x11   : > { %130 = sbr.rel (!%p29_p4) target bundleno = 29 (0x1d), region = 28  ;;  %s132_s21 = sand.u32 (%p29_p4), 1, %s11986_s13  }
  0x12   : > { %s9470_s22 = sshll.u32 (%p29_p4), %s11990_s14, 3  ;;  %s11370_s23 = smul.u32 (%p29_p4), 120, %s132_s21 }
  0x13   : > { %s137_s26 = scalar_lea.vmem (%p29_p4), %s14359_s0, %s9470_s22 }
  0x14   : > { %v153_v0 = vld [vmem:[%s137_s26] sm:$0xff] (%p29_p4)   ;;  %v157_v1 = vld [vmem:[%s137_s26 + $0x10] sm:$0xff] (%p29_p4)   ;;  %s134_s27 = scalar_lea.vmem (%p29_p4), [#allocation2], %s11370_s23 }
  0x15   : > { %v161_v2 = vld [vmem:[%s137_s26 + $0x20] sm:$0xff] (%p29_p4)   ;;  %v165_v3 = vld [vmem:[%s137_s26 + $0x30] sm:$0xff] (%p29_p4)   ;;  %154 = vst [vmem:[%s134_s27] sm:$0xff] (%p29_p4), %v153_v0   ;;  %158 = vst [vmem:[%s134_s27 + $0x8] sm:$0xff] (%p29_p4), %v157_v1  }
  0x16   : > { %v169_v4 = vld [vmem:[%s137_s26 + $0x40] sm:$0xff] (%p29_p4)   ;;  %v173_v5 = vld [vmem:[%s137_s26 + $0x50] sm:$0xff] (%p29_p4)   ;;  %162 = vst [vmem:[%s134_s27 + $0x10] sm:$0xff] (%p29_p4), %v161_v2   ;;  %166 = vst [vmem:[%s134_s27 + $0x18] sm:$0xff] (%p29_p4), %v165_v3  }
  0x17   : > { %170 = vst [vmem:[%s134_s27 + $0x20] sm:$0xff] (%p29_p4), %v169_v4   ;;  %174 = vst [vmem:[%s134_s27 + $0x28] sm:$0xff] (%p29_p4), %v173_v5   ;;  %v177_v6 = vld [vmem:[%s137_s26 + $0x60] sm:$0xff] (%p29_p4)   ;;  %v181_v7 = vld [vmem:[%s137_s26 + $0x70] sm:$0xff] (%p29_p4)  }
  0x18   : > { %v185_v8 = vld [vmem:[%s137_s26 + $0x80] sm:$0xff]   ;;  %178 = vst [vmem:[%s134_s27 + $0x30] sm:$0xff] %v177_v6   ;;  %182 = vst [vmem:[%s134_s27 + $0x38] sm:$0xff] %v181_v7   ;;  %v189_v9 = vld [vmem:[%s137_s26 + $0x90] sm:$0xff]  }
  0x19   : > { %186 = vst [vmem:[%s134_s27 + $0x40] sm:$0xff] %v185_v8   ;;  %v193_v10 = vld [vmem:[%s137_s26 + $0xa0] sm:$0xff]   ;;  %v197_v11 = vld [vmem:[%s137_s26 + $0xb0] sm:$0xff]   ;;  %190 = vst [vmem:[%s134_s27 + $0x48] sm:$0xff] %v189_v9  }
  0x1a   : > { %194 = vst [vmem:[%s134_s27 + $0x50] sm:$0xff] %v193_v10   ;;  %198 = vst [vmem:[%s134_s27 + $0x58] sm:$0xff] %v197_v11   ;;  %v201_v12 = vld [vmem:[%s137_s26 + $0xc0] sm:$0xff]   ;;  %v205_v13 = vld [vmem:[%s137_s26 + $0xd0] sm:$0xff]  }
  0x1b   : > { %v209_v14 = vld [vmem:[%s137_s26 + $0xe0] sm:$0xff]   ;;  %202 = vst [vmem:[%s134_s27 + $0x60] sm:$0xff] %v201_v12   ;;  %206 = vst [vmem:[%s134_s27 + $0x68] sm:$0xff] %v205_v13  }
  0x1c   : > { %210 = vst [vmem:[%s134_s27 + $0x70] sm:$0xff] %v209_v14  }
  0x1d PF: > { %p7875_p7 = scmp.ge.s32.totalorder %s11990_s14, 1  ;;  %p294_p8 = scmp.lt.s32.totalorder %s11990_s14, 3 }
  0x1f   : > { %p295_p9 = pnand %p7875_p7, %p294_p8 }
  0x20   : > { %v11399_v15 = vld [vmem:[%s14360_s1 + $0x40] sm:$0xff] (!%p295_p9)   ;;  %v11992_v16 = vmov (!%p295_p9), 0.0   ;;  %v11401_v18 = vld [vmem:[%s14360_s1 + $0x48] sm:$0xff] (!%p295_p9)   ;;  %vm11993_vm0 = vmmov (!%p295_p9), 0   ;;  %v11403_v20 = vld [vmem:[%s14360_s1 + $0x50] sm:$0xff] (!%p295_p9)   ;;  %s301_s18 = sand.u32 (!%p295_p9), 1, %s11982_s12  }
  0x21   : > { %298 = sbr.rel (%p295_p9) target bundleno = 1288 (0x508), region = 69  ;;  %10110 = vmatprep.subr.bf16.mxu0 (!%p295_p9), %v11992_v16  ;;  %10130 = vmatprep.subr.bf16.mxu1 (!%p295_p9), %v11992_v16  ;;  %v11400_v17 = vld [vmem:[%s14360_s1] sm:$0xff] (!%p295_p9)   ;;  %v11402_v19 = vld [vmem:[%s14360_s1 + $0x8] sm:$0xff] (!%p295_p9)   ;;  %v11404_v21 = vld [vmem:[%s14360_s1 + $0x10] sm:$0xff] (!%p295_p9)  }
  0x22   : > { %10111 = vmatpush3.bf16.msra.mxu0 (!%p295_p9), %v11399_v15  ;;  %10126 = vmatprep.mubr.msk.bf16.mxu0 (!%p295_p9), %vm11993_vm0, %v11992_v16  ;;  %v11405_v22 = vld [vmem:[%s14360_s1 + $0x58] sm:$0xff] (!%p295_p9)   ;;  %s11371_s25 = smul.u32 (!%p295_p9), 120, %s301_s18  ;;  %v11407_v24 = vld [vmem:[%s14360_s1 + $0x60] sm:$0xff] (!%p295_p9)   ;;  %v11409_v26 = vld [vmem:[%s14360_s1 + $0x68] sm:$0xff] (!%p295_p9)  }
  0x23   : > { %10131 = vmatpush3.bf16.msra.mxu1 (!%p295_p9), %v11400_v17  ;;  %10112 = vmatprep.subr.bf16.mxu0 (!%p295_p9), %v11992_v16  ;;  %v11406_v23 = vld [vmem:[%s14360_s1 + $0x18] sm:$0xff] (!%p295_p9)   ;;  %v11408_v25 = vld [vmem:[%s14360_s1 + $0x20] sm:$0xff] (!%p295_p9)   ;;  %v11410_v27 = vld [vmem:[%s14360_s1 + $0x28] sm:$0xff] (!%p295_p9)   ;;  %s12820_s6 = smul.u32 (!%p295_p9), 72, %s301_s18 }
  0x24   : > { %10132 = vmatprep.subr.bf16.mxu1 (!%p295_p9), %v11992_v16  ;;  %10146 = vmatprep.mubr.msk.bf16.mxu1 (!%p295_p9), %vm11993_vm0, %v11992_v16  ;;  %s12103_s30 = scalar_lea.vmem (!%p295_p9), [#allocation2], %s11371_s25  ;;  %v11411_v28 = vld [vmem:[%s14360_s1 + $0x70] sm:$0xff] (!%p295_p9)   ;;  %v11413_v30 = vld [vmem:[%s14360_s1 + $0x78] sm:$0xff] (!%p295_p9)   ;;  %v11417_v34 = vld [vmem:[%s14360_s1 + $0x80] sm:$0xff] (!%p295_p9)  }
  0x25   : > { %v11412_v29 = vld [vmem:[%s14360_s1 + $0x30] sm:$0xff] (!%p295_p9)   ;;  %v11414_v31 = vld [vmem:[%s14360_s1 + $0x38] sm:$0xff] (!%p295_p9)   ;;  %v11415_v32 = vld [vmem:[%s12103_s30 + $0x8] sm:$0xff] (!%p295_p9)   ;;  %s12850_s23 = scalar_lea.vmem (!%p295_p9), [#allocation3], %s12820_s6 }
  0x26   : > { %10113 = vmatpush3.bf16.msra.mxu0 (!%p295_p9), %v11401_v18  ;;  %v11416_v33 = vld [vmem:[%s12103_s30] sm:$0xff] (!%p295_p9)   ;;  %v11419_v36 = vld [vmem:[%s14360_s1 + $0x88] sm:$0xff] (!%p295_p9)   ;;  %v11421_v38 = vld [vmem:[%s14360_s1 + $0x90] sm:$0xff] (!%p295_p9)  }
  0x27   : > { %10133 = vmatpush3.bf16.msra.mxu1 (!%p295_p9), %v11402_v19  ;;  %10114 = vmatprep.subr.bf16.mxu0 (!%p295_p9), %v11992_v16  ;;  %v11418_v35 = vld [vmem:[%s14360_s1 + $0xc0] sm:$0xff] (!%p295_p9)   ;;  %v11420_v37 = vld [vmem:[%s14360_s1 + $0xc8] sm:$0xff] (!%p295_p9)   ;;  %v11422_v39 = vld [vmem:[%s14360_s1 + $0xd0] sm:$0xff] (!%p295_p9)  }
  0x28   : > { %10134 = vmatprep.subr.bf16.mxu1 %v11992_v16  ;;  %v11423_v40 = vld [vmem:[%s14360_s1 + $0x98] sm:$0xff]   ;;  %v11425_v42 = vld [vmem:[%s14360_s1 + $0xa0] sm:$0xff]   ;;  %v11427_v44 = vld [vmem:[%s14360_s1 + $0xa8] sm:$0xff]  }
  0x29   : > { %v11424_v41 = vld [vmem:[%s14360_s1 + $0xd8] sm:$0xff]   ;;  %v11426_v43 = vld [vmem:[%s14360_s1 + $0xe0] sm:$0xff]   ;;  %v11428_v45 = vld [vmem:[%s14360_s1 + $0xe8] sm:$0xff]  }
  0x2a   : > { %10115 = vmatpush3.bf16.msra.mxu0 %v11403_v20  ;;  %v11429_v46 = vld [vmem:[%s14360_s1 + $0xb0] sm:$0xff]   ;;  %v11431_v48 = vld [vmem:[%s14360_s1 + $0xb8] sm:$0xff]   ;;  %v11435_v52 = vld [vmem:[%s14360_s1 + $0x100] sm:$0xff]  }
  0x2b   : > { %10135 = vmatpush3.bf16.msra.mxu1 %v11404_v21  ;;  %10116 = vmatprep.subr.bf16.mxu0 %v11992_v16  ;;  %v11430_v47 = vld [vmem:[%s14360_s1 + $0xf0] sm:$0xff]   ;;  %v11432_v49 = vld [vmem:[%s14360_s1 + $0xf8] sm:$0xff]   ;;  %v11436_v53 = vld [vmem:[%s14360_s1 + $0x140] sm:$0xff]  }
  0x2c   : > { %10136 = vmatprep.subr.bf16.mxu1 %v11992_v16  ;;  %v11433_v50 = vld [vmem:[%s12103_s30 + $0x10] sm:$0xff]   ;;  %v11434_v51 = vld [vmem:[%s12103_s30 + $0x18] sm:$0xff]   ;;  %v11443_v60 = vld [vmem:[%s14360_s1 + $0x120] sm:$0xff]  }
  0x2d   : > { %v11437_v54 = vld [vmem:[%s14360_s1 + $0x108] sm:$0xff]   ;;  %v11439_v56 = vld [vmem:[%s14360_s1 + $0x110] sm:$0xff]   ;;  %v11441_v58 = vld [vmem:[%s14360_s1 + $0x118] sm:$0xff]  }
  0x2e   : > { %10117 = vmatpush3.bf16.msra.mxu0 %v11405_v22  ;;  %v11438_v55 = vld [vmem:[%s14360_s1 + $0x148] sm:$0xff]   ;;  %v11440_v57 = vld [vmem:[%s14360_s1 + $0x150] sm:$0xff]   ;;  %v11442_v59 = vld [vmem:[%s14360_s1 + $0x158] sm:$0xff]  }
  0x2f   : > { %10137 = vmatpush3.bf16.msra.mxu1 %v11406_v23  ;;  %10118 = vmatprep.subr.bf16.mxu0 %v11992_v16  ;;  %v11444_v61 = vld [vmem:[%s14360_s1 + $0x160] sm:$0xff]   ;;  %v11445_v62 = vld [vmem:[%s14360_s1 + $0x128] sm:$0xff]   ;;  %v11447_v0 = vld [vmem:[%s14360_s1 + $0x130] sm:$0xff]  }
  0x30   : > { %10138 = vmatprep.subr.bf16.mxu1 %v11992_v16  ;;  %v11446_v63 = vld [vmem:[%s14360_s1 + $0x168] sm:$0xff]   ;;  %v11448_v1 = vld [vmem:[%s14360_s1 + $0x170] sm:$0xff]   ;;  %v11449_v2 = vld [vmem:[%s14360_s1 + $0x138] sm:$0xff]  }
  0x31   : > { %v11450_v3 = vld [vmem:[%s14360_s1 + $0x178] sm:$0xff]   ;;  %v11452_v5 = vld [vmem:[%s12103_s30 + $0x28] sm:$0xff]   ;;  %v11457_v10 = vld [vmem:[%s14360_s1 + $0x190] sm:$0xff]  }
  0x32   : > { %10119 = vmatpush3.bf16.msra.mxu0 %v11407_v24  ;;  %v11451_v4 = vld [vmem:[%s12103_s30 + $0x20] sm:$0xff]   ;;  %v11455_v8 = vld [vmem:[%s14360_s1 + $0x188] sm:$0xff]   ;;  %v11458_v11 = vld [vmem:[%s14360_s1 + $0x50] sm:$0xff]  }
  0x33   : > { %10139 = vmatpush3.bf16.msra.mxu1 %v11408_v25  ;;  %10120 = vmatprep.subr.bf16.mxu0 %v11992_v16  ;;  %v11453_v6 = vld [vmem:[%s14360_s1 + $0x180] sm:$0xff]   ;;  %v11456_v9 = vld [vmem:[%s14360_s1 + $0x48] sm:$0xff]   ;;  %v11459_v12 = vld [vmem:[%s14360_s1 + $0x198] sm:$0xff]  }
  0x34   : > { %10140 = vmatprep.subr.bf16.mxu1 %v11992_v16  ;;  %v11454_v7 = vld [vmem:[%s14360_s1 + $0x40] sm:$0xff]   ;;  %v11460_v13 = vld [vmem:[%s14360_s1 + $0x58] sm:$0xff]   ;;  %v11463_v17 = vld [vmem:[%s14360_s1 + $0x1a8] sm:$0xff]  }
  0x35   : > { %v11461_v14 = vld [vmem:[%s14360_s1 + $0x1a0] sm:$0xff]   ;;  %v11464_v18 = vld [vmem:[%s14360_s1 + $0x68] sm:$0xff]   ;;  %v11465_v19 = vld [vmem:[%s14360_s1 + $0x1b0] sm:$0xff]  }
  0x36   : > { %10121 = vmatpush3.bf16.msra.mxu0 %v11409_v26  ;;  %v11462_v15 = vld [vmem:[%s14360_s1 + $0x60] sm:$0xff]   ;;  %v11466_v20 = vld [vmem:[%s14360_s1 + $0x70] sm:$0xff]   ;;  %v11467_v21 = vld [vmem:[%s14360_s1 + $0x1b8] sm:$0xff]  }
  0x37   : > { %10141 = vmatpush3.bf16.msra.mxu1 %v11410_v27  ;;  %10122 = vmatprep.subr.bf16.mxu0 %v11992_v16  ;;  %v11468_v22 = vld [vmem:[%s14360_s1 + $0x78] sm:$0xff]   ;;  %v11469_v23 = vld [vmem:[%s12103_s30 + $0x30] sm:$0xff]   ;;  %v11471_v25 = vld [vmem:[%s14360_s1] sm:$0xff]  }
  0x38   : > { %10142 = vmatprep.subr.bf16.mxu1 %v11992_v16  ;;  %v11470_v24 = vld [vmem:[%s12103_s30 + $0x10] sm:$0xff]   ;;  %v11472_v26 = vld [vmem:[%s14360_s1 + $0x80] sm:$0xff]  }
  0x39   : > { %v11473_v27 = vld [vmem:[%s14360_s1 + $0x8] sm:$0xff]  }
  0x3a   : > { %10123 = vmatpush3.bf16.msra.mxu0 %v11411_v28  ;;  %v11474_v28 = vld [vmem:[%s14360_s1 + $0x88] sm:$0xff]  }
  0x3b   : > { %10143 = vmatpush3.bf16.msra.mxu1 %v11412_v29  ;;  %10124 = vmatprep.subr.bf16.mxu0 %v11992_v16  ;;  %v11475_v29 = vld [vmem:[%s14360_s1 + $0x10] sm:$0xff]  }
  0x3c   : > { %10144 = vmatprep.subr.bf16.mxu1 %v11992_v16 }
  0x3e   : > { %10125 = vmatpush3.bf16.msra.mxu0 %v11413_v30  ;;  %v11476_v30 = vld [vmem:[%s14360_s1 + $0x90] sm:$0xff]  }
  0x3f   : > { %10145 = vmatpush3.bf16.msra.mxu1 %v11414_v31  ;;  %10150 = vmatprep.subr.bf16.mxu0 %v11992_v16  ;;  %v11477_v31 = vld [vmem:[%s14360_s1 + $0x18] sm:$0xff]  }
  0x40   : > { %10170 = vmatprep.subr.bf16.mxu1 %v11992_v16 }
  0x41   : > { %10127 = vmatmul.mubr.bf16.vlgmr.msra.gmra.mrb[0].mxu0 %v11415_v32  ;;  %v11478_v32 = vld [vmem:[%s14360_s1 + $0x98] sm:$0xff]  }
  0x42   : > { %10147 = vmatmul.mubr.bf16.vlgmr.msra.gmra.mrb[0].mxu1 %v11416_v33  ;;  %10151 = vmatpush3.bf16.msra.mxu0 %v11417_v34  ;;  %v11479_v33 = vld [vmem:[%s14360_s1 + $0x20] sm:$0xff]  }
  0x43   : > { %10171 = vmatpush3.bf16.msra.mxu1 %v11418_v35  ;;  %10152 = vmatprep.subr.bf16.mxu0 %v11992_v16  ;;  %v11480_v34 = vld [vmem:[%s14360_s1 + $0xa0] sm:$0xff]   ;;  %v11481_v35 = vld [vmem:[%s14360_s1 + $0x28] sm:$0xff]  }
  0x44   : > { %10172 = vmatprep.subr.bf16.mxu1 %v11992_v16  ;;  %10166 = vmatprep.mubr.msk.bf16.mxu0 %vm11993_vm0, %v11992_v16 }
  0x45   : > { %10186 = vmatprep.mubr.msk.bf16.mxu1 %vm11993_vm0, %v11992_v16 }
  0x46   : > { %10153 = vmatpush3.bf16.msra.mxu0 %v11419_v36  ;;  %v11482_v36 = vld [vmem:[%s14360_s1 + $0xa8] sm:$0xff]  }
  0x47   : > { %10173 = vmatpush3.bf16.msra.mxu1 %v11420_v37  ;;  %10154 = vmatprep.subr.bf16.mxu0 %v11992_v16  ;;  %v11483_v37 = vld [vmem:[%s14360_s1 + $0x30] sm:$0xff]  }
  0x48   : > { %10174 = vmatprep.subr.bf16.mxu1 %v11992_v16 }
  0x4a   : > { %10155 = vmatpush3.bf16.msra.mxu0 %v11421_v38  ;;  %v11484_v38 = vld [vmem:[%s14360_s1 + $0xb0] sm:$0xff]  }
  0x4b   : > { %10175 = vmatpush3.bf16.msra.mxu1 %v11422_v39  ;;  %10156 = vmatprep.subr.bf16.mxu0 %v11992_v16  ;;  %v11485_v39 = vld [vmem:[%s14360_s1 + $0x38] sm:$0xff]  }
  0x4c   : > { %10176 = vmatprep.subr.bf16.mxu1 %v11992_v16 }
  0x4e   : > { %10157 = vmatpush3.bf16.msra.mxu0 %v11423_v40  ;;  %v11486_v40 = vld [vmem:[%s14360_s1 + $0xb8] sm:$0xff]  }
  0x4f   : > { %10177 = vmatpush3.bf16.msra.mxu1 %v11424_v41  ;;  %10158 = vmatprep.subr.bf16.mxu0 %v11992_v16  ;;  %v11487_v41 = vld [vmem:[%s12103_s30 + $0x8] sm:$0xff]  }
  0x50   : > { %10178 = vmatprep.subr.bf16.mxu1 %v11992_v16 }
  0x52   : > { %10159 = vmatpush3.bf16.msra.mxu0 %v11425_v42  ;;  %v11488_v42 = vld [vmem:[%s12103_s30 + $0x18] sm:$0xff]  }
  0x53   : > { %10179 = vmatpush3.bf16.msra.mxu1 %v11426_v43  ;;  %10160 = vmatprep.subr.bf16.mxu0 %v11992_v16  ;;  %v11489_v43 = vld [vmem:[%s14360_s1 + $0xc0] sm:$0xff]  }
  0x54   : > { %10180 = vmatprep.subr.bf16.mxu1 %v11992_v16 }
  0x56   : > { %10161 = vmatpush3.bf16.msra.mxu0 %v11427_v44  ;;  %v11490_v44 = vld [vmem:[%s14360_s1 + $0x100] sm:$0xff]  }
  0x57   : > { %10181 = vmatpush3.bf16.msra.mxu1 %v11428_v45  ;;  %10162 = vmatprep.subr.bf16.mxu0 %v11992_v16  ;;  %v11491_v45 = vld [vmem:[%s14360_s1 + $0xc8] sm:$0xff]  }
  0x58   : > { %10182 = vmatprep.subr.bf16.mxu1 %v11992_v16 }
  0x5a   : > { %10163 = vmatpush3.bf16.msra.mxu0 %v11429_v46  ;;  %v11492_v46 = vld [vmem:[%s14360_s1 + $0x108] sm:$0xff]  }
  0x5b   : > { %10183 = vmatpush3.bf16.msra.mxu1 %v11430_v47  ;;  %10164 = vmatprep.subr.bf16.mxu0 %v11992_v16  ;;  %v11493_v47 = vld [vmem:[%s14360_s1 + $0xd0] sm:$0xff]  }
  0x5c   : > { %10184 = vmatprep.subr.bf16.mxu1 %v11992_v16 }
  0x5e   : > { %10165 = vmatpush3.bf16.msra.mxu0 %v11431_v48  ;;  %v11494_v48 = vld [vmem:[%s14360_s1 + $0x110] sm:$0xff]  }
  0x5f   : > { %10185 = vmatpush3.bf16.msra.mxu1 %v11432_v49  ;;  %10190 = vmatprep.subr.bf16.mxu0 %v11992_v16  ;;  %v11495_v49 = vld [vmem:[%s14360_s1 + $0xd8] sm:$0xff]  }
  0x60   : > { %10210 = vmatprep.subr.bf16.mxu1 %v11992_v16 }
  0x61   : > { %10167 = vmatmul.mubr.bf16.vlgmr.msra.gmra.mrb[4].mxu0 %v11433_v50  ;;  %v11496_v50 = vld [vmem:[%s14360_s1 + $0x118] sm:$0xff]  }
  0x62   : > { %10187 = vmatmul.mubr.bf16.vlgmr.msra.gmra.mrb[4].mxu1 %v11434_v51  ;;  %10191 = vmatpush3.bf16.msra.mxu0 %v11435_v52  ;;  %v11497_v51 = vld [vmem:[%s14360_s1 + $0xe0] sm:$0xff]  }
  0x63   : > { %10211 = vmatpush3.bf16.msra.mxu1 %v11436_v53  ;;  %10192 = vmatprep.subr.bf16.mxu0 %v11992_v16  ;;  %v11498_v52 = vld [vmem:[%s14360_s1 + $0x120] sm:$0xff]   ;;  %v11499_v53 = vld [vmem:[%s14360_s1 + $0xe8] sm:$0xff]  }
  0x64   : > { %10212 = vmatprep.subr.bf16.mxu1 %v11992_v16  ;;  %10206 = vmatprep.mubr.msk.bf16.mxu0 %vm11993_vm0, %v11992_v16 }
  0x65   : > { %10226 = vmatprep.mubr.msk.bf16.mxu1 %vm11993_vm0, %v11992_v16 }
  0x66   : > { %10193 = vmatpush3.bf16.msra.mxu0 %v11437_v54  ;;  %v11500_v54 = vld [vmem:[%s14360_s1 + $0x128] sm:$0xff]  }
  0x67   : > { %10213 = vmatpush3.bf16.msra.mxu1 %v11438_v55  ;;  %10194 = vmatprep.subr.bf16.mxu0 %v11992_v16  ;;  %v11501_v55 = vld [vmem:[%s14360_s1 + $0xf0] sm:$0xff]  }
  0x68   : > { %10214 = vmatprep.subr.bf16.mxu1 %v11992_v16 }
  0x6a   : > { %10195 = vmatpush3.bf16.msra.mxu0 %v11439_v56  ;;  %v11502_v56 = vld [vmem:[%s14360_s1 + $0x130] sm:$0xff]  }
  0x6b   : > { %10215 = vmatpush3.bf16.msra.mxu1 %v11440_v57  ;;  %10196 = vmatprep.subr.bf16.mxu0 %v11992_v16  ;;  %v11503_v57 = vld [vmem:[%s14360_s1 + $0xf8] sm:$0xff]  }
  0x6c   : > { %10216 = vmatprep.subr.bf16.mxu1 %v11992_v16 }
  0x6e   : > { %10197 = vmatpush3.bf16.msra.mxu0 %v11441_v58  ;;  %v11504_v58 = vld [vmem:[%s14360_s1 + $0x138] sm:$0xff]  }
  0x6f   : > { %10217 = vmatpush3.bf16.msra.mxu1 %v11442_v59  ;;  %10198 = vmatprep.subr.bf16.mxu0 %v11992_v16  ;;  %v11505_v59 = vld [vmem:[%s12103_s30 + $0x20] sm:$0xff]  }
  0x70   : > { %10218 = vmatprep.subr.bf16.mxu1 %v11992_v16 }
  0x72   : > { %10199 = vmatpush3.bf16.msra.mxu0 %v11443_v60  ;;  %v11506_v60 = vld [vmem:[%s12103_s30 + $0x28] sm:$0xff]  }
  0x73   : > { %10219 = vmatpush3.bf16.msra.mxu1 %v11444_v61  ;;  %10200 = vmatprep.subr.bf16.mxu0 %v11992_v16  ;;  %v11507_v61 = vld [vmem:[%s14360_s1 + $0x140] sm:$0xff]  }
  0x74   : > { %10220 = vmatprep.subr.bf16.mxu1 %v11992_v16 }
  0x76   : > { %10201 = vmatpush3.bf16.msra.mxu0 %v11445_v62  ;;  %v11508_v62 = vld [vmem:[%s14360_s1 + $0x180] sm:$0xff]  }
  0x77   : > { %10221 = vmatpush3.bf16.msra.mxu1 %v11446_v63  ;;  %10202 = vmatprep.subr.bf16.mxu0 %v11992_v16  ;;  %v11509_v63 = vld [vmem:[%s14360_s1 + $0x148] sm:$0xff]  }
  0x78   : > { %10222 = vmatprep.subr.bf16.mxu1 %v11992_v16 }
  0x7a   : > { %10203 = vmatpush3.bf16.msra.mxu0 %v11447_v0  ;;  %v11510_v0 = vld [vmem:[%s14360_s1 + $0x188] sm:$0xff]  }
  0x7b   : > { %10223 = vmatpush3.bf16.msra.mxu1 %v11448_v1  ;;  %10204 = vmatprep.subr.bf16.mxu0 %v11992_v16  ;;  %v11511_v1 = vld [vmem:[%s14360_s1 + $0x150] sm:$0xff]  }
  0x7c   : > { %10224 = vmatprep.subr.bf16.mxu1 %v11992_v16 }
  0x7e   : > { %10205 = vmatpush3.bf16.msra.mxu0 %v11449_v2  ;;  %v11512_v2 = vld [vmem:[%s14360_s1 + $0x190] sm:$0xff]  }
  0x7f   : > { %10225 = vmatpush3.bf16.msra.mxu1 %v11450_v3  ;;  %10230 = vmatprep.subr.bf16.mxu0 %v11992_v16  ;;  %v11513_v3 = vld [vmem:[%s14360_s1 + $0x158] sm:$0xff]  }
  0x80   : > { %10250 = vmatprep.subr.bf16.mxu1 %v11992_v16 }
  0x81   : > { %10207 = vmatmul.mubr.bf16.vlgmr.msra.gmra.mrb[8].mxu0 %v11451_v4  ;;  %v11514_v4 = vld [vmem:[%s14360_s1 + $0x198] sm:$0xff]  }
  0x82   : > { %10227 = vmatmul.mubr.bf16.vlgmr.msra.gmra.mrb[8].mxu1 %v11452_v5  ;;  %10231 = vmatpush3.bf16.msra.mxu0 %v11453_v6  ;;  %v11515_v5 = vld [vmem:[%s14360_s1 + $0x160] sm:$0xff]  }
  0x83   : > { %10251 = vmatpush3.bf16.msra.mxu1 %v11454_v7  ;;  %10232 = vmatprep.subr.bf16.mxu0 %v11992_v16  ;;  %v11516_v6 = vld [vmem:[%s14360_s1 + $0x1a0] sm:$0xff]   ;;  %v11517_v7 = vld [vmem:[%s14360_s1 + $0x168] sm:$0xff]  }
  0x84   : > { %10252 = vmatprep.subr.bf16.mxu1 %v11992_v16  ;;  %10246 = vmatprep.mubr.msk.bf16.mxu0 %vm11993_vm0, %v11992_v16 }
  0x85   : > { %10266 = vmatprep.mubr.msk.bf16.mxu1 %vm11993_vm0, %v11992_v16 }
  0x86   : > { %10233 = vmatpush3.bf16.msra.mxu0 %v11455_v8  ;;  %v11518_v8 = vld [vmem:[%s14360_s1 + $0x1a8] sm:$0xff]  }
  0x87   : > { %10253 = vmatpush3.bf16.msra.mxu1 %v11456_v9  ;;  %10234 = vmatprep.subr.bf16.mxu0 %v11992_v16  ;;  %v11519_v9 = vld [vmem:[%s14360_s1 + $0x170] sm:$0xff]  }
  0x88   : > { %10254 = vmatprep.subr.bf16.mxu1 %v11992_v16 }
  0x8a   : > { %10235 = vmatpush3.bf16.msra.mxu0 %v11457_v10  ;;  %v11520_v10 = vld [vmem:[%s14360_s1 + $0x1b0] sm:$0xff]  }
  0x8b   : > { %10255 = vmatpush3.bf16.msra.mxu1 %v11458_v11  ;;  %10236 = vmatprep.subr.bf16.mxu0 %v11992_v16  ;;  %v11521_v11 = vld [vmem:[%s14360_s1 + $0x178] sm:$0xff]  }
  0x8c   : > { %10256 = vmatprep.subr.bf16.mxu1 %v11992_v16 }
  0x8e   : > { %10237 = vmatpush3.bf16.msra.mxu0 %v11459_v12  ;;  %v11522_v12 = vld [vmem:[%s14360_s1 + $0x1b8] sm:$0xff]  }
  0x8f   : > { %10257 = vmatpush3.bf16.msra.mxu1 %v11460_v13  ;;  %10238 = vmatprep.subr.bf16.mxu0 %v11992_v16  ;;  %v11523_v13 = vld [vmem:[%s12103_s30 + $0x30] sm:$0xff]  }
  0x90   : > { %10258 = vmatprep.subr.bf16.mxu1 %v11992_v16 }
  0x92   : > { %10239 = vmatpush3.bf16.msra.mxu0 %v11461_v14  ;;  %v11524_v14 = vld [vmem:[%s12103_s30 + $0x38] sm:$0xff]  }
  0x93   : > { %10259 = vmatpush3.bf16.msra.mxu1 %v11462_v15  ;;  %10240 = vmatprep.subr.bf16.mxu0 %v11992_v16  ;;  %v11525_v15 = vld [vmem:[%s14360_s1 + $0x40] sm:$0xff]  }
  0x94   : > { %10260 = vmatprep.subr.bf16.mxu1 %v11992_v16 }
  0x96   : > { %10241 = vmatpush3.bf16.msra.mxu0 %v11463_v17  ;;  %v11526_v17 = vld [vmem:[%s14360_s1] sm:$0xff]  }
  0x97   : > { %10261 = vmatpush3.bf16.msra.mxu1 %v11464_v18  ;;  %10242 = vmatprep.subr.bf16.mxu0 %v11992_v16  ;;  %v11527_v18 = vld [vmem:[%s14360_s1 + $0x48] sm:$0xff]  }
  0x98   : > { %10262 = vmatprep.subr.bf16.mxu1 %v11992_v16 }
  0x9a   : > { %10243 = vmatpush3.bf16.msra.mxu0 %v11465_v19  ;;  %v11528_v19 = vld [vmem:[%s14360_s1 + $0x8] sm:$0xff]  }
  0x9b   : > { %10263 = vmatpush3.bf16.msra.mxu1 %v11466_v20  ;;  %10244 = vmatprep.subr.bf16.mxu0 %v11992_v16  ;;  %v11529_v20 = vld [vmem:[%s14360_s1 + $0x50] sm:$0xff]  }
  0x9c   : > { %10264 = vmatprep.subr.bf16.mxu1 %v11992_v16 }
  0x9e   : > { %10245 = vmatpush3.bf16.msra.mxu0 %v11467_v21  ;;  %v11530_v21 = vld [vmem:[%s14360_s1 + $0x10] sm:$0xff]  }
  0x9f   : > { %10265 = vmatpush3.bf16.msra.mxu1 %v11468_v22  ;;  %10270 = vmatprep.subr.bf16.mxu0 %v11992_v16  ;;  %v11531_v22 = vld [vmem:[%s14360_s1 + $0x58] sm:$0xff]  }
  0xa0   : > { %10290 = vmatprep.subr.bf16.mxu1 %v11992_v16 }
  0xa1   : > { %10247 = vmatmul.mubr.bf16.vlgmr.msra.gmra.mrb[12].mxu0 %v11469_v23  ;;  %v11532_v23 = vld [vmem:[%s14360_s1 + $0x18] sm:$0xff]  }
  0xa2   : > { %10267 = vmatmul.mubr.bf16.vlgmr.msra.gmra.mrb[12].mxu1 %v11470_v24  ;;  %10271 = vmatpush3.bf16.msra.mxu0 %v11471_v25  ;;  %v11533_v24 = vld [vmem:[%s14360_s1 + $0x60] sm:$0xff]  }
  0xa3   : > { %10291 = vmatpush3.bf16.msra.mxu1 %v11472_v26  ;;  %10272 = vmatprep.subr.bf16.mxu0 %v11992_v16  ;;  %v11534_v25 = vld [vmem:[%s14360_s1 + $0x20] sm:$0xff]   ;;  %v11535_v26 = vld [vmem:[%s14360_s1 + $0x68] sm:$0xff]  }
  0xa4   : > { %10292 = vmatprep.subr.bf16.mxu1 %v11992_v16  ;;  %10286 = vmatprep.mubr.msk.bf16.mxu0 %vm11993_vm0, %v11992_v16 }
  0xa5   : > { %10306 = vmatprep.mubr.msk.bf16.mxu1 %vm11993_vm0, %v11992_v16 }
  0xa6   : > { %10273 = vmatpush3.bf16.msra.mxu0 %v11473_v27  ;;  %v11536_v27 = vld [vmem:[%s14360_s1 + $0x28] sm:$0xff]  }
  0xa7   : > { %10293 = vmatpush3.bf16.msra.mxu1 %v11474_v28  ;;  %10274 = vmatprep.subr.bf16.mxu0 %v11992_v16 }
  0xa8   : > { %10294 = vmatprep.subr.bf16.mxu1 %v11992_v16 }
  0xaa   : > { %10275 = vmatpush3.bf16.msra.mxu0 %v11475_v29 }
  0xab   : > { %10295 = vmatpush3.bf16.msra.mxu1 %v11476_v30  ;;  %10276 = vmatprep.subr.bf16.mxu0 %v11992_v16 }
  0xac   : > { %10296 = vmatprep.subr.bf16.mxu1 %v11992_v16 }
  0xae   : > { %10277 = vmatpush3.bf16.msra.mxu0 %v11477_v31  ;;  %v11537_v31 = vld [vmem:[%s14360_s1 + $0x70] sm:$0xff]  }
  0xaf   : > { %10297 = vmatpush3.bf16.msra.mxu1 %v11478_v32  ;;  %10278 = vmatprep.subr.bf16.mxu0 %v11992_v16  ;;  %v11538_v32 = vld [vmem:[%s14360_s1 + $0x30] sm:$0xff]  }
  0xb0   : > { %10298 = vmatprep.subr.bf16.mxu1 %v11992_v16 }
  0xb2   : > { %10279 = vmatpush3.bf16.msra.mxu0 %v11479_v33 }
  0xb3   : > { %10299 = vmatpush3.bf16.msra.mxu1 %v11480_v34  ;;  %10280 = vmatprep.subr.bf16.mxu0 %v11992_v16 }
  0xb4   : > { %10300 = vmatprep.subr.bf16.mxu1 %v11992_v16 }
  0xb6   : > { %10281 = vmatpush3.bf16.msra.mxu0 %v11481_v35 }
  0xb7   : > { %10301 = vmatpush3.bf16.msra.mxu1 %v11482_v36  ;;  %10282 = vmatprep.subr.bf16.mxu0 %v11992_v16 }
  0xb8   : > { %10302 = vmatprep.subr.bf16.mxu1 %v11992_v16 }
  0xba   : > { %10283 = vmatpush3.bf16.msra.mxu0 %v11483_v37 }
  0xbb   : > { %10303 = vmatpush3.bf16.msra.mxu1 %v11484_v38  ;;  %10284 = vmatprep.subr.bf16.mxu0 %v11992_v16 }
  0xbc   : > { %10304 = vmatprep.subr.bf16.mxu1 %v11992_v16 }
  0xbe   : > { %10285 = vmatpush3.bf16.msra.mxu0 %v11485_v39 }
  0xbf   : > { %10305 = vmatpush3.bf16.msra.mxu1 %v11486_v40  ;;  %10310 = vmatprep.subr.bf16.mxu0 %v11992_v16  ;;  %v11539_v40 = vld [vmem:[%s14360_s1 + $0x78] sm:$0xff]  }
  0xc0   : > { %10330 = vmatprep.subr.bf16.mxu1 %v11992_v16 }
  0xc1   : > { %10287 = vmatmul.mubr.bf16.vlgmr.msra.gmra.mrb[16].mxu0 %v11487_v41  ;;  %v11540_v41 = vld [vmem:[%s14360_s1 + $0x38] sm:$0xff]  }
  0xc2   : > { %10307 = vmatmul.mubr.bf16.vlgmr.msra.gmra.mrb[16].mxu1 %v11488_v42  ;;  %10311 = vmatpush3.bf16.msra.mxu0 %v11489_v43  ;;  %v11541_v42 = vld [vmem:[%s12103_s30 + $0x18] sm:$0xff]   ;;  %v11542_v43 = vld [vmem:[%s12103_s30 + $0x10] sm:$0xff]  }
  0xc3   : > { %10331 = vmatpush3.bf16.msra.mxu1 %v11490_v44  ;;  %10312 = vmatprep.subr.bf16.mxu0 %v11992_v16  ;;  %v11543_v44 = vld [vmem:[%s14360_s1 + $0x80] sm:$0xff]  }
  0xc4   : > { %10332 = vmatprep.subr.bf16.mxu1 %v11992_v16  ;;  %10326 = vmatprep.mubr.msk.bf16.mxu0 %vm11993_vm0, %v11992_v16 }
  0xc5   : > { %10346 = vmatprep.mubr.msk.bf16.mxu1 %vm11993_vm0, %v11992_v16 }
  0xc6   : > { %10313 = vmatpush3.bf16.msra.mxu0 %v11491_v45  ;;  %v11544_v45 = vld [vmem:[%s14360_s1 + $0xc0] sm:$0xff]  }
  0xc7   : > { %10333 = vmatpush3.bf16.msra.mxu1 %v11492_v46  ;;  %10314 = vmatprep.subr.bf16.mxu0 %v11992_v16  ;;  %v11545_v46 = vld [vmem:[%s14360_s1 + $0x88] sm:$0xff]  }
  0xc8   : > { %10334 = vmatprep.subr.bf16.mxu1 %v11992_v16 }
  0xca   : > { %10315 = vmatpush3.bf16.msra.mxu0 %v11493_v47  ;;  %v11546_v47 = vld [vmem:[%s14360_s1 + $0xc8] sm:$0xff]  }
  0xcb   : > { %10335 = vmatpush3.bf16.msra.mxu1 %v11494_v48  ;;  %10316 = vmatprep.subr.bf16.mxu0 %v11992_v16  ;;  %v11547_v48 = vld [vmem:[%s14360_s1 + $0x90] sm:$0xff]  }
  0xcc   : > { %10336 = vmatprep.subr.bf16.mxu1 %v11992_v16 }
  0xce   : > { %10317 = vmatpush3.bf16.msra.mxu0 %v11495_v49  ;;  %v11548_v49 = vld [vmem:[%s14360_s1 + $0xd0] sm:$0xff]  }
  0xcf   : > { %10337 = vmatpush3.bf16.msra.mxu1 %v11496_v50  ;;  %10318 = vmatprep.subr.bf16.mxu0 %v11992_v16  ;;  %v11549_v50 = vld [vmem:[%s14360_s1 + $0x98] sm:$0xff]  }
  0xd0   : > { %10338 = vmatprep.subr.bf16.mxu1 %v11992_v16 }
  0xd2   : > { %10319 = vmatpush3.bf16.msra.mxu0 %v11497_v51  ;;  %v11550_v51 = vld [vmem:[%s14360_s1 + $0xd8] sm:$0xff]  }
  0xd3   : > { %10339 = vmatpush3.bf16.msra.mxu1 %v11498_v52  ;;  %10320 = vmatprep.subr.bf16.mxu0 %v11992_v16  ;;  %v11551_v52 = vld [vmem:[%s14360_s1 + $0xa0] sm:$0xff]  }
  0xd4   : > { %10340 = vmatprep.subr.bf16.mxu1 %v11992_v16 }
  0xd6   : > { %10321 = vmatpush3.bf16.msra.mxu0 %v11499_v53  ;;  %v11552_v53 = vld [vmem:[%s14360_s1 + $0xe0] sm:$0xff]  }
  0xd7   : > { %10341 = vmatpush3.bf16.msra.mxu1 %v11500_v54  ;;  %10322 = vmatprep.subr.bf16.mxu0 %v11992_v16  ;;  %v11553_v54 = vld [vmem:[%s14360_s1 + $0xa8] sm:$0xff]  }
  0xd8   : > { %10342 = vmatprep.subr.bf16.mxu1 %v11992_v16 }
  0xda   : > { %10323 = vmatpush3.bf16.msra.mxu0 %v11501_v55  ;;  %v11554_v55 = vld [vmem:[%s14360_s1 + $0xe8] sm:$0xff]  }
  0xdb   : > { %10343 = vmatpush3.bf16.msra.mxu1 %v11502_v56  ;;  %10324 = vmatprep.subr.bf16.mxu0 %v11992_v16 }
  0xdc   : > { %10344 = vmatprep.subr.bf16.mxu1 %v11992_v16 }
  0xde   : > { %10325 = vmatpush3.bf16.msra.mxu0 %v11503_v57 }
  0xdf   : > { %10345 = vmatpush3.bf16.msra.mxu1 %v11504_v58  ;;  %10350 = vmatprep.subr.bf16.mxu0 %v11992_v16 }
  0xe0   : > { %10370 = vmatprep.subr.bf16.mxu1 %v11992_v16 }
  0xe1   : > { %10327 = vmatmul.mubr.bf16.vlgmr.msra.gmra.mrb[20].mxu0 %v11505_v59 }
  0xe2   : > { %10347 = vmatmul.mubr.bf16.vlgmr.msra.gmra.mrb[20].mxu1 %v11506_v60  ;;  %10351 = vmatpush3.bf16.msra.mxu0 %v11507_v61  ;;  %v11555_v60 = vld [vmem:[%s14360_s1 + $0xb0] sm:$0xff]  }
  0xe3   : > { %10371 = vmatpush3.bf16.msra.mxu1 %v11508_v62  ;;  %10352 = vmatprep.subr.bf16.mxu0 %v11992_v16  ;;  %v11556_v61 = vld [vmem:[%s14360_s1 + $0xf0] sm:$0xff]  }
  0xe4   : > { %10372 = vmatprep.subr.bf16.mxu1 %v11992_v16  ;;  %10366 = vmatprep.mubr.msk.bf16.mxu0 %vm11993_vm0, %v11992_v16 }
  0xe5   : > { %10386 = vmatprep.mubr.msk.bf16.mxu1 %vm11993_vm0, %v11992_v16 }
  0xe6   : > { %10353 = vmatpush3.bf16.msra.mxu0 %v11509_v63 }
  0xe7   : > { %10373 = vmatpush3.bf16.msra.mxu1 %v11510_v0  ;;  %10354 = vmatprep.subr.bf16.mxu0 %v11992_v16 }
  0xe8   : > { %10374 = vmatprep.subr.bf16.mxu1 %v11992_v16 }
  0xea   : > { %10355 = vmatpush3.bf16.msra.mxu0 %v11511_v1 }
  0xeb   : > { %10375 = vmatpush3.bf16.msra.mxu1 %v11512_v2  ;;  %10356 = vmatprep.subr.bf16.mxu0 %v11992_v16 }
  0xec   : > { %10376 = vmatprep.subr.bf16.mxu1 %v11992_v16 }
  0xee   : > { %10357 = vmatpush3.bf16.msra.mxu0 %v11513_v3 }
  0xef   : > { %10377 = vmatpush3.bf16.msra.mxu1 %v11514_v4  ;;  %10358 = vmatprep.subr.bf16.mxu0 %v11992_v16 }
  0xf0   : > { %10378 = vmatprep.subr.bf16.mxu1 %v11992_v16 }
  0xf2   : > { %10359 = vmatpush3.bf16.msra.mxu0 %v11515_v5 }
  0xf3   : > { %10379 = vmatpush3.bf16.msra.mxu1 %v11516_v6  ;;  %10360 = vmatprep.subr.bf16.mxu0 %v11992_v16  ;;  %v11557_v6 = vld [vmem:[%s14360_s1 + $0xb8] sm:$0xff]  }
  0xf4   : > { %10380 = vmatprep.subr.bf16.mxu1 %v11992_v16 }
  0xf6   : > { %10361 = vmatpush3.bf16.msra.mxu0 %v11517_v7  ;;  %v11558_v7 = vld [vmem:[%s14360_s1 + $0xf8] sm:$0xff]  }
  0xf7   : > { %10381 = vmatpush3.bf16.msra.mxu1 %v11518_v8  ;;  %10362 = vmatprep.subr.bf16.mxu0 %v11992_v16  ;;  %v11559_v8 = vld [vmem:[%s12103_s30 + $0x20] sm:$0xff]  }
  0xf8   : > { %10382 = vmatprep.subr.bf16.mxu1 %v11992_v16 }
  0xfa   : > { %10363 = vmatpush3.bf16.msra.mxu0 %v11519_v9  ;;  %v11560_v9 = vld [vmem:[%s12103_s30 + $0x28] sm:$0xff]  }
  0xfb   : > { %10383 = vmatpush3.bf16.msra.mxu1 %v11520_v10  ;;  %10364 = vmatprep.subr.bf16.mxu0 %v11992_v16  ;;  %v11561_v10 = vld [vmem:[%s14360_s1 + $0x100] sm:$0xff]  }
  0xfc   : > { %10384 = vmatprep.subr.bf16.mxu1 %v11992_v16 }
  0xfe   : > { %10365 = vmatpush3.bf16.msra.mxu0 %v11521_v11  ;;  %v11562_v11 = vld [vmem:[%s14360_s1 + $0x140] sm:$0xff]  }
  0xff   : > { %10385 = vmatpush3.bf16.msra.mxu1 %v11522_v12  ;;  %10390 = vmatprep.subr.bf16.mxu0 %v11992_v16  ;;  %v11563_v12 = vld [vmem:[%s14360_s1 + $0x108] sm:$0xff]  }
 0x100   : > { %10410 = vmatprep.subr.bf16.mxu1 %v11992_v16 }
 0x101   : > { %10367 = vmatmul.mubr.bf16.vlgmr.msra.gmra.mrb[24].mxu0 %v11523_v13  ;;  %v11564_v13 = vld [vmem:[%s14360_s1 + $0x148] sm:$0xff]  }
 0x102   : > { %10387 = vmatmul.mubr.bf16.vlgmr.msra.gmra.mrb[24].mxu1 %v11524_v14  ;;  %10391 = vmatpush3.bf16.msra.mxu0 %v11525_v15  ;;  %v11565_v14 = vld [vmem:[%s14360_s1 + $0x110] sm:$0xff]  }
 0x103   : > { %10411 = vmatpush3.bf16.msra.mxu1 %v11526_v17  ;;  %10392 = vmatprep.subr.bf16.mxu0 %v11992_v16  ;;  %v11566_v15 = vld [vmem:[%s14360_s1 + $0x150] sm:$0xff]   ;;  %v11567_v17 = vld [vmem:[%s14360_s1 + $0x118] sm:$0xff]  }
 0x104   : > { %10412 = vmatprep.subr.bf16.mxu1 %v11992_v16  ;;  %10406 = vmatprep.mubr.msk.bf16.mxu0 %vm11993_vm0, %v11992_v16 }
 0x105   : > { %10426 = vmatprep.mubr.msk.bf16.mxu1 %vm11993_vm0, %v11992_v16 }
 0x106   : > { %10393 = vmatpush3.bf16.msra.mxu0 %v11527_v18  ;;  %v11568_v18 = vld [vmem:[%s14360_s1 + $0x158] sm:$0xff]  }
 0x107   : > { %10413 = vmatpush3.bf16.msra.mxu1 %v11528_v19  ;;  %10394 = vmatprep.subr.bf16.mxu0 %v11992_v16  ;;  %v11569_v19 = vld [vmem:[%s14360_s1 + $0x120] sm:$0xff]  }
 0x108   : > { %10414 = vmatprep.subr.bf16.mxu1 %v11992_v16 }
 0x10a   : > { %10395 = vmatpush3.bf16.msra.mxu0 %v11529_v20  ;;  %v11570_v20 = vld [vmem:[%s14360_s1 + $0x160] sm:$0xff]  }
 0x10b   : > { %10415 = vmatpush3.bf16.msra.mxu1 %v11530_v21  ;;  %10396 = vmatprep.subr.bf16.mxu0 %v11992_v16  ;;  %v11571_v21 = vld [vmem:[%s14360_s1 + $0x128] sm:$0xff]  }
 0x10c   : > { %10416 = vmatprep.subr.bf16.mxu1 %v11992_v16 }
 0x10e   : > { %10397 = vmatpush3.bf16.msra.mxu0 %v11531_v22  ;;  %v11572_v22 = vld [vmem:[%s14360_s1 + $0x168] sm:$0xff]  }
 0x10f   : > { %10417 = vmatpush3.bf16.msra.mxu1 %v11532_v23  ;;  %10398 = vmatprep.subr.bf16.mxu0 %v11992_v16 }
 0x110   : > { %10418 = vmatprep.subr.bf16.mxu1 %v11992_v16 }
 0x112   : > { %10399 = vmatpush3.bf16.msra.mxu0 %v11533_v24 }
 0x113   : > { %10419 = vmatpush3.bf16.msra.mxu1 %v11534_v25  ;;  %10400 = vmatprep.subr.bf16.mxu0 %v11992_v16 }
 0x114   : > { %v453_v28 = vpop.f32.mrb[0].mxu0  ;;  %10420 = vmatprep.subr.bf16.mxu1 %v11992_v16 }
 0x115   : > { %v548_v29 = vpop.f32.mrb[0].mxu1  ;;  %v10128_v30 = vpop.f32.mrb[1].mxu0 }
 0x116   : > { %v549_v33 = vadd.f32 %v548_v29, %v453_v28  ;;  %v10148_v34 = vpop.f32.mrb[1].mxu1  ;;  %v456_v35 = vpop.f32.mrb[2].mxu0  ;;  %10401 = vmatpush3.bf16.msra.mxu0 %v11535_v26  ;;  %v11574_v28 = vld [vmem:[%s14360_s1 + $0x170] sm:$0xff]  }
 0x117   : > { %v551_v36 = vpop.f32.mrb[2].mxu1  ;;  %10421 = vmatpush3.bf16.msra.mxu1 %v11536_v27  ;;  %v10129_v37 = vpop.f32.mrb[3].mxu0  ;;  %10402 = vmatprep.subr.bf16.mxu0 %v11992_v16  ;;  %v11573_v27 = vld [vmem:[%s14360_s1 + $0x130] sm:$0xff]  }
 0x118   : > { %v552_v38 = vadd.f32 %v551_v36, %v456_v35  ;;  %10422 = vmatprep.subr.bf16.mxu1 %v11992_v16  ;;  %v10149_v39 = vpop.f32.mrb[3].mxu1  ;;  %v11575_v37 = vld [vmem:[%s14360_s1 + $0x138] sm:$0xff]  }
 0x119   : > { %v11577_v39 = vld [vmem:[%s12103_s30 + $0x30] sm:$0xff]  }
 0x11a   : > { %10403 = vmatpush3.bf16.msra.mxu0 %v11537_v31 }
 0x11b   : > { %10423 = vmatpush3.bf16.msra.mxu1 %v11538_v32  ;;  %10404 = vmatprep.subr.bf16.mxu0 %v11992_v16 }
 0x11c   : > { %10424 = vmatprep.subr.bf16.mxu1 %v11992_v16 }
 0x11e   : > { %10405 = vmatpush3.bf16.msra.mxu0 %v11539_v40  ;;  %v11578_v40 = vld [vmem:[%s12103_s30 + $0x38] sm:$0xff]  }
 0x11f   : > { %10425 = vmatpush3.bf16.msra.mxu1 %v11540_v41  ;;  %10430 = vmatprep.subr.bf16.mxu0 %v11992_v16  ;;  %v11579_v41 = vld [vmem:[%s14360_s1 + $0x180] sm:$0xff]  }
 0x120   : > { %10450 = vmatprep.subr.bf16.mxu1 %v11992_v16 }
 0x121   : > { %10407 = vmatmul.mubr.bf16.vlgmr.msra.gmra.mrb[28].mxu0 %v11541_v42  ;;  %v11580_v42 = vld [vmem:[%s14360_s1 + $0x40] sm:$0xff]  }
 0x122   : > { %10427 = vmatmul.mubr.bf16.vlgmr.msra.gmra.mrb[28].mxu1 %v11542_v43  ;;  %10431 = vmatpush3.bf16.msra.mxu0 %v11543_v44  ;;  %v11581_v43 = vld [vmem:[%s14360_s1 + $0x188] sm:$0xff]  }
 0x123   : > { %10451 = vmatpush3.bf16.msra.mxu1 %v11544_v45  ;;  %10432 = vmatprep.subr.bf16.mxu0 %v11992_v16  ;;  %v11582_v44 = vld [vmem:[%s14360_s1 + $0x48] sm:$0xff]   ;;  %v11583_v45 = vld [vmem:[%s14360_s1 + $0x190] sm:$0xff]  }
 0x124   : > { %10452 = vmatprep.subr.bf16.mxu1 %v11992_v16  ;;  %10446 = vmatprep.mubr.msk.bf16.mxu0 %vm11993_vm0, %v11992_v16 }
 0x125   : > { %10466 = vmatprep.mubr.msk.bf16.mxu1 %vm11993_vm0, %v11992_v16 }
 0x126   : > { %10433 = vmatpush3.bf16.msra.mxu0 %v11545_v46  ;;  %v11584_v46 = vld [vmem:[%s14360_s1 + $0x50] sm:$0xff]  }
 0x127   : > { %10453 = vmatpush3.bf16.msra.mxu1 %v11546_v47  ;;  %10434 = vmatprep.subr.bf16.mxu0 %v11992_v16  ;;  %v11585_v47 = vld [vmem:[%s14360_s1 + $0x198] sm:$0xff]  }
 0x128   : > { %10454 = vmatprep.subr.bf16.mxu1 %v11992_v16 }
 0x12a   : > { %10435 = vmatpush3.bf16.msra.mxu0 %v11547_v48  ;;  %v11586_v48 = vld [vmem:[%s14360_s1 + $0x58] sm:$0xff]  }
 0x12b   : > { %10455 = vmatpush3.bf16.msra.mxu1 %v11548_v49  ;;  %10436 = vmatprep.subr.bf16.mxu0 %v11992_v16  ;;  %v11587_v49 = vld [vmem:[%s14360_s1 + $0x1a0] sm:$0xff]  }
 0x12c   : > { %10456 = vmatprep.subr.bf16.mxu1 %v11992_v16 }
 0x12e   : > { %10437 = vmatpush3.bf16.msra.mxu0 %v11549_v50  ;;  %v11588_v50 = vld [vmem:[%s14360_s1 + $0x60] sm:$0xff]  }
 0x12f   : > { %10457 = vmatpush3.bf16.msra.mxu1 %v11550_v51  ;;  %10438 = vmatprep.subr.bf16.mxu0 %v11992_v16  ;;  %v11589_v51 = vld [vmem:[%s14360_s1 + $0x1a8] sm:$0xff]  }
 0x130   : > { %10458 = vmatprep.subr.bf16.mxu1 %v11992_v16 }
 0x132   : > { %10439 = vmatpush3.bf16.msra.mxu0 %v11551_v52  ;;  %v11590_v52 = vld [vmem:[%s14360_s1 + $0x68] sm:$0xff]  }
 0x133   : > { %10459 = vmatpush3.bf16.msra.mxu1 %v11552_v53  ;;  %10440 = vmatprep.subr.bf16.mxu0 %v11992_v16  ;;  %v12814_v53 = vld [vmem:[%s14361_s2] ss:$0 sm:$0xff] }
 0x134   : > { %v663_v56 = vpop.f32.mrb[4].mxu0  ;;  %10460 = vmatprep.subr.bf16.mxu1 %v11992_v16 }
 0x135   : > { %v670_v57 = vadd.f32 %v663_v56, %v549_v33  ;;  %v10168_v58 = vpop.f32.mrb[5].mxu0  ;;  %v780_v59 = vpop.f32.mrb[4].mxu1 }
 0x136   : > { %v666_v62 = vpop.f32.mrb[6].mxu0  ;;  %10441 = vmatpush3.bf16.msra.mxu0 %v11553_v54  ;;  %v10188_v63 = vpop.f32.mrb[5].mxu1  ;;  %v11592_v58 = vld [vmem:[%s14360_s1 + $0x70] sm:$0xff]  }
 0x137   : > { %v671_v0 = vadd.f32 %v666_v62, %v552_v38  ;;  %v787_v1 = vadd.f32 %v780_v59, %v670_v57  ;;  %10461 = vmatpush3.bf16.msra.mxu1 %v11554_v55  ;;  %v10169_v2 = vpop.f32.mrb[7].mxu0  ;;  %v783_v3 = vpop.f32.mrb[6].mxu1  ;;  %10442 = vmatprep.subr.bf16.mxu0 %v11992_v16  ;;  %v11576_v38 = vld [vmem:[%s14360_s1 + $0x178] sm:$0xff]   ;;  %v11591_v57 = vld [vmem:[%s14360_s1 + $0x1b0] sm:$0xff]  }
 0x138   : > { %10462 = vmatprep.subr.bf16.mxu1 %v11992_v16  ;;  %v10189_v4 = vpop.f32.mrb[7].mxu1  ;;  %v11593_v2 = vld [vmem:[%s14360_s1 + $0x1b8] sm:$0xff]  }
 0x139   : > { %v788_v5 = vadd.f32 %v783_v3, %v671_v0 }
 0x13a   : > { %10443 = vmatpush3.bf16.msra.mxu0 %v11555_v60 }
 0x13b   : > { %10463 = vmatpush3.bf16.msra.mxu1 %v11556_v61  ;;  %10444 = vmatprep.subr.bf16.mxu0 %v11992_v16 }
 0x13c   : > { %10464 = vmatprep.subr.bf16.mxu1 %v11992_v16 }
 0x13e   : > { %10445 = vmatpush3.bf16.msra.mxu0 %v11557_v6 }
 0x13f   : > { %10465 = vmatpush3.bf16.msra.mxu1 %v11558_v7  ;;  %10470 = vmatprep.subr.bf16.mxu0 %v11992_v16 }
 0x140   : > { %10490 = vmatprep.subr.bf16.mxu1 %v11992_v16 }
 0x141   : > { %10447 = vmatmul.mubr.bf16.vlgmr.msra.gmra.mrb[32].mxu0 %v11559_v8  ;;  %v11595_v8 = vld [vmem:[%s12103_s30 + $0x40] sm:$0xff]  }
 0x142   : > { %10467 = vmatmul.mubr.bf16.vlgmr.msra.gmra.mrb[32].mxu1 %v11560_v9  ;;  %10471 = vmatpush3.bf16.msra.mxu0 %v11561_v10  ;;  %v11596_v9 = vld [vmem:[%s12103_s30 + $0x20] sm:$0xff]  }
 0x143   : > { %10491 = vmatpush3.bf16.msra.mxu1 %v11562_v11  ;;  %10472 = vmatprep.subr.bf16.mxu0 %v11992_v16  ;;  %v11597_v11 = vld [vmem:[%s14360_s1] sm:$0xff]  }
 0x144   : > { %10492 = vmatprep.subr.bf16.mxu1 %v11992_v16  ;;  %10486 = vmatprep.mubr.msk.bf16.mxu0 %vm11993_vm0, %v11992_v16 }
 0x145   : > { %10506 = vmatprep.mubr.msk.bf16.mxu1 %vm11993_vm0, %v11992_v16 }
 0x146   : > { %10473 = vmatpush3.bf16.msra.mxu0 %v11563_v12  ;;  %v11598_v12 = vld [vmem:[%s14360_s1 + $0x80] sm:$0xff]  }
 0x147   : > { %10493 = vmatpush3.bf16.msra.mxu1 %v11564_v13  ;;  %10474 = vmatprep.subr.bf16.mxu0 %v11992_v16  ;;  %v11599_v13 = vld [vmem:[%s14360_s1 + $0x8] sm:$0xff]  }
 0x148   : > { %10494 = vmatprep.subr.bf16.mxu1 %v11992_v16 }
 0x14a   : > { %10475 = vmatpush3.bf16.msra.mxu0 %v11565_v14  ;;  %v11600_v14 = vld [vmem:[%s14360_s1 + $0x88] sm:$0xff]  }
 0x14b   : > { %10495 = vmatpush3.bf16.msra.mxu1 %v11566_v15  ;;  %10476 = vmatprep.subr.bf16.mxu0 %v11992_v16  ;;  %v11601_v15 = vld [vmem:[%s14360_s1 + $0x10] sm:$0xff]  }
 0x14c   : > { %10496 = vmatprep.subr.bf16.mxu1 %v11992_v16 }
 0x14e   : > { %10477 = vmatpush3.bf16.msra.mxu0 %v11567_v17  ;;  %v11602_v17 = vld [vmem:[%s14360_s1 + $0x90] sm:$0xff]  }
 0x14f   : > { %10497 = vmatpush3.bf16.msra.mxu1 %v11568_v18  ;;  %10478 = vmatprep.subr.bf16.mxu0 %v11992_v16  ;;  %v11603_v18 = vld [vmem:[%s14360_s1 + $0x18] sm:$0xff]  }
 0x150   : > { %10498 = vmatprep.subr.bf16.mxu1 %v11992_v16 }
 0x152   : > { %10479 = vmatpush3.bf16.msra.mxu0 %v11569_v19  ;;  %v11604_v19 = vld [vmem:[%s14360_s1 + $0x98] sm:$0xff]  }
 0x153   : > { %10499 = vmatpush3.bf16.msra.mxu1 %v11570_v20  ;;  %10480 = vmatprep.subr.bf16.mxu0 %v11992_v16  ;;  %v11605_v20 = vld [vmem:[%s14360_s1 + $0x20] sm:$0xff]  }
 0x154   : > { %v897_v23 = vpop.f32.mrb[8].mxu0  ;;  %10500 = vmatprep.subr.bf16.mxu1 %v11992_v16 }
 0x155   : > { %v904_v24 = vadd.f32 %v897_v23, %v787_v1  ;;  %v10208_v25 = vpop.f32.mrb[9].mxu0  ;;  %v1014_v26 = vpop.f32.mrb[8].mxu1  ;;  %v11608_v23 = vld [vmem:[%s14360_s1 + $0xa8] sm:$0xff]  }
 0x156   : > { %v900_v29 = vpop.f32.mrb[10].mxu0  ;;  %10481 = vmatpush3.bf16.msra.mxu0 %v11571_v21  ;;  %v10228_v30 = vpop.f32.mrb[9].mxu1  ;;  %v11606_v21 = vld [vmem:[%s14360_s1 + $0xa0] sm:$0xff]  }
 0x157   : > { %v905_v31 = vadd.f32 %v900_v29, %v788_v5  ;;  %v1021_v32 = vadd.f32 %v1014_v26, %v904_v24  ;;  %10501 = vmatpush3.bf16.msra.mxu1 %v11572_v22  ;;  %v10209_v33 = vpop.f32.mrb[11].mxu0  ;;  %v1017_v34 = vpop.f32.mrb[10].mxu1  ;;  %10482 = vmatprep.subr.bf16.mxu0 %v11992_v16  ;;  %v11594_v5 = vld [vmem:[%s14360_s1 + $0x78] sm:$0xff]   ;;  %v11607_v22 = vld [vmem:[%s14360_s1 + $0x28] sm:$0xff]   ;;  %v11610_v29 = vld [vmem:[%s14360_s1 + $0xb0] sm:$0xff]  }
 0x158   : > { %10502 = vmatprep.subr.bf16.mxu1 %v11992_v16  ;;  %v10229_v35 = vpop.f32.mrb[11].mxu1 }
 0x159   : > { %v1022_v36 = vadd.f32 %v1017_v34, %v905_v31 }
 0x15a   : > { %10483 = vmatpush3.bf16.msra.mxu0 %v11573_v27 }
 0x15b   : > { %10503 = vmatpush3.bf16.msra.mxu1 %v11574_v28  ;;  %10484 = vmatprep.subr.bf16.mxu0 %v11992_v16  ;;  %v11609_v28 = vld [vmem:[%s14360_s1 + $0x30] sm:$0xff]  }
 0x15c   : > { %10504 = vmatprep.subr.bf16.mxu1 %v11992_v16 }
 0x15e   : > { %10485 = vmatpush3.bf16.msra.mxu0 %v11575_v37 }
 0x15f   : > { %10505 = vmatpush3.bf16.msra.mxu1 %v11576_v38  ;;  %10510 = vmatprep.subr.bf16.mxu0 %v11992_v16  ;;  %v11611_v38 = vld [vmem:[%s14360_s1 + $0x38] sm:$0xff]  }
 0x160   : > { %10530 = vmatprep.subr.bf16.mxu1 %v11992_v16 }
 0x161   : > { %10487 = vmatmul.mubr.bf16.vlgmr.msra.gmra.mrb[36].mxu0 %v11577_v39  ;;  %v11612_v39 = vld [vmem:[%s14360_s1 + $0xb8] sm:$0xff]  }
 0x162   : > { %10507 = vmatmul.mubr.bf16.vlgmr.msra.gmra.mrb[36].mxu1 %v11578_v40  ;;  %10511 = vmatpush3.bf16.msra.mxu0 %v11579_v41  ;;  %v11613_v40 = vld [vmem:[%s12103_s30 + $0x18] sm:$0xff]   ;;  %v11614_v41 = vld [vmem:[%s12103_s30 + $0x28] sm:$0xff]  }
 0x163   : > { %10531 = vmatpush3.bf16.msra.mxu1 %v11580_v42  ;;  %10512 = vmatprep.subr.bf16.mxu0 %v11992_v16  ;;  %v11615_v42 = vld [vmem:[%s14360_s1 + $0xc0] sm:$0xff]  }
 0x164   : > { %10532 = vmatprep.subr.bf16.mxu1 %v11992_v16  ;;  %10526 = vmatprep.mubr.msk.bf16.mxu0 %vm11993_vm0, %v11992_v16 }
 0x165   : > { %10546 = vmatprep.mubr.msk.bf16.mxu1 %vm11993_vm0, %v11992_v16 }
 0x166   : > { %10513 = vmatpush3.bf16.msra.mxu0 %v11581_v43  ;;  %v11616_v43 = vld [vmem:[%s14360_s1 + $0x100] sm:$0xff]  }
 0x167   : > { %10533 = vmatpush3.bf16.msra.mxu1 %v11582_v44  ;;  %10514 = vmatprep.subr.bf16.mxu0 %v11992_v16  ;;  %v11617_v44 = vld [vmem:[%s14360_s1 + $0xc8] sm:$0xff]  }
 0x168   : > { %10534 = vmatprep.subr.bf16.mxu1 %v11992_v16 }
 0x16a   : > { %10515 = vmatpush3.bf16.msra.mxu0 %v11583_v45  ;;  %v11618_v45 = vld [vmem:[%s14360_s1 + $0x108] sm:$0xff]  }
 0x16b   : > { %10535 = vmatpush3.bf16.msra.mxu1 %v11584_v46  ;;  %10516 = vmatprep.subr.bf16.mxu0 %v11992_v16  ;;  %v11619_v46 = vld [vmem:[%s14360_s1 + $0xd0] sm:$0xff]  }
 0x16c   : > { %10536 = vmatprep.subr.bf16.mxu1 %v11992_v16 }
 0x16e   : > { %10517 = vmatpush3.bf16.msra.mxu0 %v11585_v47  ;;  %v11620_v47 = vld [vmem:[%s14360_s1 + $0x110] sm:$0xff]  }
 0x16f   : > { %10537 = vmatpush3.bf16.msra.mxu1 %v11586_v48  ;;  %10518 = vmatprep.subr.bf16.mxu0 %v11992_v16  ;;  %v11621_v48 = vld [vmem:[%s14360_s1 + $0xd8] sm:$0xff]  }
 0x170   : > { %10538 = vmatprep.subr.bf16.mxu1 %v11992_v16 }
 0x172   : > { %10519 = vmatpush3.bf16.msra.mxu0 %v11587_v49  ;;  %v11622_v49 = vld [vmem:[%s14360_s1 + $0x118] sm:$0xff]  }
 0x173   : > { %10539 = vmatpush3.bf16.msra.mxu1 %v11588_v50  ;;  %10520 = vmatprep.subr.bf16.mxu0 %v11992_v16  ;;  %v11623_v50 = vld [vmem:[%s14360_s1 + $0xe0] sm:$0xff]  }
 0x174   : > { %v1131_v54 = vpop.f32.mrb[12].mxu0  ;;  %10540 = vmatprep.subr.bf16.mxu1 %v11992_v16 }
 0x175   : > { %v1138_v55 = vadd.f32 %v1131_v54, %v1021_v32  ;;  %v10248_v56 = vpop.f32.mrb[13].mxu0  ;;  %v12828_v59 = vpop.f32.mrb[12].mxu1  ;;  %v11626_v54 = vld [vmem:[%s14360_s1 + $0x128] sm:$0xff]  }
 0x176   : > { %v1134_v60 = vpop.f32.mrb[14].mxu0  ;;  %10521 = vmatpush3.bf16.msra.mxu0 %v11589_v51  ;;  %v10268_v61 = vpop.f32.mrb[13].mxu1  ;;  %v11624_v51 = vld [vmem:[%s14360_s1 + $0x120] sm:$0xff]  }
 0x177   : > { %v1146_v62 = vadd.f32 %v12814_v53, %v1138_v55  ;;  %v1139_v63 = vadd.f32 %v1134_v60, %v1022_v36  ;;  %10541 = vmatpush3.bf16.msra.mxu1 %v11590_v52  ;;  %v10249_v0 = vpop.f32.mrb[15].mxu0  ;;  %10522 = vmatprep.subr.bf16.mxu0 %v11992_v16  ;;  %v12832_v1 = vpop.f32.mrb[14].mxu1  ;;  %v11625_v52 = vld [vmem:[%s14360_s1 + $0xe8] sm:$0xff]   ;;  %v11628_v60 = vld [vmem:[%s14360_s1 + $0x130] sm:$0xff]  }
 0x178   : > { %10542 = vmatprep.subr.bf16.mxu1 %v11992_v16  ;;  %v10269_v3 = vpop.f32.mrb[15].mxu1 }
 0x179   : > { %v1147_v4 = vadd.f32 %v12814_v53, %v1139_v63  ;;  %v1148_v6 = vmax.f32 %v1146_v62, 0.0 }
 0x17a   : > { %10523 = vmatpush3.bf16.msra.mxu0 %v11591_v57 }
 0x17b   : > { %v1149_v7 = vmax.f32 %v1147_v4, 0.0  ;;  %10543 = vmatpush3.bf16.msra.mxu1 %v11592_v58  ;;  %10524 = vmatprep.subr.bf16.mxu0 %v11992_v16 }
 0x17c   : > { %10544 = vmatprep.subr.bf16.mxu1 %v11992_v16 }
 0x17d   : > { %v9493_v10 = vpack.c.bf16 %v1149_v7, %v1148_v6  ;;  %v11630_v6 = vld [vmem:[%s14360_s1 + $0x138] sm:$0xff]   ;;  %v11631_v7 = vld [vmem:[%s12103_s30 + $0x30] sm:$0xff]  }
 0x17e   : > { %10525 = vmatpush3.bf16.msra.mxu0 %v11593_v2 }
 0x17f   : > { %9494 = vst [vmem:[%s12850_s23] sm:$0xff] %v9493_v10   ;;  %10545 = vmatpush3.bf16.msra.mxu1 %v11594_v5  ;;  %10550 = vmatprep.subr.bf16.mxu0 %v11992_v16  ;;  %v11629_v5 = vld [vmem:[%s14360_s1 + $0xf8] sm:$0xff]   ;;  %v11634_v10 = vld [vmem:[%s14360_s1 + $0x180] sm:$0xff]  }
 0x180   : > { %10570 = vmatprep.subr.bf16.mxu1 %v11992_v16 }
 0x181   : > { %10527 = vmatmul.mubr.bf16.vlgmr.msra.gmra.mrb[40].mxu0 %v11595_v8  ;;  %v11632_v8 = vld [vmem:[%s12103_s30 + $0x38] sm:$0xff]  }
 0x182   : > { %10547 = vmatmul.mubr.bf16.vlgmr.msra.gmra.mrb[40].mxu1 %v11596_v9  ;;  %10551 = vmatpush3.bf16.msra.mxu0 %v11597_v11  ;;  %v11633_v9 = vld [vmem:[%s14360_s1 + $0x140] sm:$0xff]   ;;  %v11635_v11 = vld [vmem:[%s14360_s1 + $0x148] sm:$0xff]  }
 0x183   : > { %10571 = vmatpush3.bf16.msra.mxu1 %v11598_v12  ;;  %10552 = vmatprep.subr.bf16.mxu0 %v11992_v16  ;;  %v11636_v12 = vld [vmem:[%s14360_s1 + $0x188] sm:$0xff]  }
 0x184   : > { %10572 = vmatprep.subr.bf16.mxu1 %v11992_v16  ;;  %10566 = vmatprep.mubr.msk.bf16.mxu0 %vm11993_vm0, %v11992_v16 }
 0x185   : > { %10586 = vmatprep.mubr.msk.bf16.mxu1 %vm11993_vm0, %v11992_v16 }
 0x186   : > { %10553 = vmatpush3.bf16.msra.mxu0 %v11599_v13  ;;  %v11637_v13 = vld [vmem:[%s14360_s1 + $0x150] sm:$0xff]  }
 0x187   : > { %10573 = vmatpush3.bf16.msra.mxu1 %v11600_v14  ;;  %10554 = vmatprep.subr.bf16.mxu0 %v11992_v16  ;;  %v11638_v14 = vld [vmem:[%s14360_s1 + $0x190] sm:$0xff]  }
 0x188   : > { %10574 = vmatprep.subr.bf16.mxu1 %v11992_v16 }
 0x18a   : > { %10555 = vmatpush3.bf16.msra.mxu0 %v11601_v15  ;;  %v11639_v15 = vld [vmem:[%s14360_s1 + $0x158] sm:$0xff]  }
 0x18b   : > { %10575 = vmatpush3.bf16.msra.mxu1 %v11602_v17  ;;  %10556 = vmatprep.subr.bf16.mxu0 %v11992_v16  ;;  %v11640_v17 = vld [vmem:[%s14360_s1 + $0x198] sm:$0xff]  }
 0x18c   : > { %10576 = vmatprep.subr.bf16.mxu1 %v11992_v16 }
 0x18e   : > { %10557 = vmatpush3.bf16.msra.mxu0 %v11603_v18  ;;  %v11641_v18 = vld [vmem:[%s14360_s1 + $0x160] sm:$0xff]  }
 0x18f   : > { %10577 = vmatpush3.bf16.msra.mxu1 %v11604_v19  ;;  %10558 = vmatprep.subr.bf16.mxu0 %v11992_v16  ;;  %v11642_v19 = vld [vmem:[%s14360_s1 + $0x1a0] sm:$0xff]  }
 0x190   : > { %10578 = vmatprep.subr.bf16.mxu1 %v11992_v16 }
 0x192   : > { %10559 = vmatpush3.bf16.msra.mxu0 %v11605_v20  ;;  %v11643_v20 = vld [vmem:[%s14360_s1 + $0x168] sm:$0xff]  }
 0x193   : > { %10579 = vmatpush3.bf16.msra.mxu1 %v11606_v21  ;;  %10560 = vmatprep.subr.bf16.mxu0 %v11992_v16  ;;  %v11644_v21 = vld [vmem:[%s14360_s1 + $0x1a8] sm:$0xff]  }
 0x194   : > { %v1379_v24 = vpop.f32.mrb[16].mxu0  ;;  %10580 = vmatprep.subr.bf16.mxu1 %v11992_v16 }
 0x195   : > { %v1380_v25 = vadd.f32 %v1379_v24, %v12828_v59  ;;  %v10288_v26 = vpop.f32.mrb[17].mxu0  ;;  %v1492_v27 = vpop.f32.mrb[16].mxu1  ;;  %v11627_v59 = vld [vmem:[%s14360_s1 + $0xf0] sm:$0xff]  }
 0x196   : > { %v1382_v30 = vpop.f32.mrb[18].mxu0  ;;  %10561 = vmatpush3.bf16.msra.mxu0 %v11607_v22  ;;  %v10308_v31 = vpop.f32.mrb[17].mxu1  ;;  %v11645_v26 = vld [vmem:[%s14360_s1 + $0x170] sm:$0xff]  }
 0x197   : > { %v1383_v32 = vadd.f32 %v1382_v30, %v12832_v1  ;;  %v1499_v33 = vadd.f32 %v1492_v27, %v1380_v25  ;;  %10581 = vmatpush3.bf16.msra.mxu1 %v11608_v23  ;;  %v10289_v34 = vpop.f32.mrb[19].mxu0  ;;  %v1495_v35 = vpop.f32.mrb[18].mxu1  ;;  %10562 = vmatprep.subr.bf16.mxu0 %v11992_v16  ;;  %v11646_v27 = vld [vmem:[%s14360_s1 + $0x1b0] sm:$0xff]  }
 0x198   : > { %10582 = vmatprep.subr.bf16.mxu1 %v11992_v16  ;;  %v10309_v36 = vpop.f32.mrb[19].mxu1 }
 0x199   : > { %v1500_v37 = vadd.f32 %v1495_v35, %v1383_v32 }
 0x19a   : > { %10563 = vmatpush3.bf16.msra.mxu0 %v11609_v28 }
 0x19b   : > { %10583 = vmatpush3.bf16.msra.mxu1 %v11610_v29  ;;  %10564 = vmatprep.subr.bf16.mxu0 %v11992_v16 }
 0x19c   : > { %10584 = vmatprep.subr.bf16.mxu1 %v11992_v16 }
 0x19e   : > { %10565 = vmatpush3.bf16.msra.mxu0 %v11611_v38  ;;  %v11648_v38 = vld [vmem:[%s14360_s1 + $0x1b8] sm:$0xff]  }
 0x19f   : > { %10585 = vmatpush3.bf16.msra.mxu1 %v11612_v39  ;;  %10590 = vmatprep.subr.bf16.mxu0 %v11992_v16 }
 0x1a0   : > { %10610 = vmatprep.subr.bf16.mxu1 %v11992_v16 }
 0x1a1   : > { %10567 = vmatmul.mubr.bf16.vlgmr.msra.gmra.mrb[44].mxu0 %v11613_v40  ;;  %v11649_v40 = vld [vmem:[%s12103_s30 + $0x40] sm:$0xff]  }
 0x1a2   : > { %10587 = vmatmul.mubr.bf16.vlgmr.msra.gmra.mrb[44].mxu1 %v11614_v41  ;;  %10591 = vmatpush3.bf16.msra.mxu0 %v11615_v42 }
 0x1a3   : > { %10611 = vmatpush3.bf16.msra.mxu1 %v11616_v43  ;;  %10592 = vmatprep.subr.bf16.mxu0 %v11992_v16  ;;  %v11650_v43 = vld [vmem:[%s12103_s30 + $0x48] sm:$0xff]  }
 0x1a4   : > { %10612 = vmatprep.subr.bf16.mxu1 %v11992_v16  ;;  %10606 = vmatprep.mubr.msk.bf16.mxu0 %vm11993_vm0, %v11992_v16 }
 0x1a5   : > { %10626 = vmatprep.mubr.msk.bf16.mxu1 %vm11993_vm0, %v11992_v16 }
 0x1a6   : > { %10593 = vmatpush3.bf16.msra.mxu0 %v11617_v44  ;;  %v11651_v44 = vld [vmem:[%s14360_s1 + $0x40] sm:$0xff]  }
 0x1a7   : > { %10613 = vmatpush3.bf16.msra.mxu1 %v11618_v45  ;;  %10594 = vmatprep.subr.bf16.mxu0 %v11992_v16 }
 0x1a8   : > { %10614 = vmatprep.subr.bf16.mxu1 %v11992_v16 }
 0x1aa   : > { %10595 = vmatpush3.bf16.msra.mxu0 %v11619_v46  ;;  %v11653_v46 = vld [vmem:[%s14360_s1 + $0x48] sm:$0xff]  }
 0x1ab   : > { %10615 = vmatpush3.bf16.msra.mxu1 %v11620_v47  ;;  %10596 = vmatprep.subr.bf16.mxu0 %v11992_v16  ;;  %v11654_v47 = vld [vmem:[%s14360_s1 + $0x8] sm:$0xff]  }
 0x1ac   : > { %10616 = vmatprep.subr.bf16.mxu1 %v11992_v16 }
 0x1ae   : > { %10597 = vmatpush3.bf16.msra.mxu0 %v11621_v48  ;;  %v11655_v48 = vld [vmem:[%s14360_s1 + $0x50] sm:$0xff]  }
 0x1af   : > { %10617 = vmatpush3.bf16.msra.mxu1 %v11622_v49  ;;  %10598 = vmatprep.subr.bf16.mxu0 %v11992_v16  ;;  %v11656_v49 = vld [vmem:[%s14360_s1 + $0x10] sm:$0xff]  }
 0x1b0   : > { %10618 = vmatprep.subr.bf16.mxu1 %v11992_v16 }
 0x1b2   : > { %10599 = vmatpush3.bf16.msra.mxu0 %v11623_v50  ;;  %v11657_v50 = vld [vmem:[%s14360_s1 + $0x58] sm:$0xff]  }
 0x1b3   : > { %10619 = vmatpush3.bf16.msra.mxu1 %v11624_v51  ;;  %10600 = vmatprep.subr.bf16.mxu0 %v11992_v16  ;;  %v11658_v51 = vld [vmem:[%s14360_s1 + $0x18] sm:$0xff]  }
 0x1b4   : > { %v1607_v55 = vpop.f32.mrb[20].mxu0  ;;  %10620 = vmatprep.subr.bf16.mxu1 %v11992_v16 }
 0x1b5   : > { %v1614_v56 = vadd.f32 %v1607_v55, %v1499_v33  ;;  %v10328_v57 = vpop.f32.mrb[21].mxu0  ;;  %v1722_v58 = vpop.f32.mrb[20].mxu1  ;;  %v11661_v55 = vld [vmem:[%s14360_s1 + $0x68] sm:$0xff]  }
 0x1b6   : > { %v1610_v61 = vpop.f32.mrb[22].mxu0  ;;  %10601 = vmatpush3.bf16.msra.mxu0 %v11625_v52  ;;  %v10348_v62 = vpop.f32.mrb[21].mxu1  ;;  %v11659_v52 = vld [vmem:[%s14360_s1 + $0x60] sm:$0xff]  }
 0x1b7   : > { %v1615_v63 = vadd.f32 %v1610_v61, %v1500_v37  ;;  %v1729_v0 = vadd.f32 %v1722_v58, %v1614_v56  ;;  %10621 = vmatpush3.bf16.msra.mxu1 %v11626_v54  ;;  %v10329_v1 = vpop.f32.mrb[23].mxu0  ;;  %v1725_v2 = vpop.f32.mrb[22].mxu1  ;;  %10602 = vmatprep.subr.bf16.mxu0 %v11992_v16  ;;  %v11647_v37 = vld [vmem:[%s14360_s1 + $0x178] sm:$0xff]   ;;  %v11660_v54 = vld [vmem:[%s14360_s1 + $0x20] sm:$0xff]   ;;  %v11662_v56 = vld [vmem:[%s14360_s1 + $0x28] sm:$0xff]  }
 0x1b8   : > { %10622 = vmatprep.subr.bf16.mxu1 %v11992_v16  ;;  %v10349_v3 = vpop.f32.mrb[23].mxu1  ;;  %v11664_v61 = vld [vmem:[%s14360_s1 + $0x30] sm:$0xff]  }
 0x1b9   : > { %v1730_v4 = vadd.f32 %v1725_v2, %v1615_v63 }
 0x1ba   : > { %10603 = vmatpush3.bf16.msra.mxu0 %v11627_v59 }
 0x1bb   : > { %10623 = vmatpush3.bf16.msra.mxu1 %v11628_v60  ;;  %10604 = vmatprep.subr.bf16.mxu0 %v11992_v16  ;;  %v11663_v60 = vld [vmem:[%s14360_s1 + $0x70] sm:$0xff]  }
 0x1bc   : > { %10624 = vmatprep.subr.bf16.mxu1 %v11992_v16 }
 0x1be   : > { %10605 = vmatpush3.bf16.msra.mxu0 %v11629_v5  ;;  %v11665_v5 = vld [vmem:[%s14360_s1 + $0x78] sm:$0xff]  }
 0x1bf   : > { %10625 = vmatpush3.bf16.msra.mxu1 %v11630_v6  ;;  %10630 = vmatprep.subr.bf16.mxu0 %v11992_v16  ;;  %v11666_v6 = vld [vmem:[%s14360_s1 + $0x38] sm:$0xff]  }
 0x1c0   : > { %10650 = vmatprep.subr.bf16.mxu1 %v11992_v16 }
 0x1c1   : > { %10607 = vmatmul.mubr.bf16.vlgmr.msra.gmra.mrb[48].mxu0 %v11631_v7  ;;  %v11667_v7 = vld [vmem:[%s12103_s30 + $0x28] sm:$0xff]  }
 0x1c2   : > { %10627 = vmatmul.mubr.bf16.vlgmr.msra.gmra.mrb[48].mxu1 %v11632_v8  ;;  %10631 = vmatpush3.bf16.msra.mxu0 %v11633_v9  ;;  %v11668_v8 = vld [vmem:[%s12103_s30 + $0x20] sm:$0xff]  }
 0x1c3   : > { %10651 = vmatpush3.bf16.msra.mxu1 %v11634_v10  ;;  %10632 = vmatprep.subr.bf16.mxu0 %v11992_v16  ;;  %v11669_v9 = vld [vmem:[%s14360_s1 + $0x80] sm:$0xff]  }
 0x1c4   : > { %10652 = vmatprep.subr.bf16.mxu1 %v11992_v16  ;;  %10646 = vmatprep.mubr.msk.bf16.mxu0 %vm11993_vm0, %v11992_v16  ;;  %v11670_v10 = vld [vmem:[%s14360_s1 + $0xc0] sm:$0xff]  }
 0x1c5   : > { %10666 = vmatprep.mubr.msk.bf16.mxu1 %vm11993_vm0, %v11992_v16 }
 0x1c6   : > { %10633 = vmatpush3.bf16.msra.mxu0 %v11635_v11  ;;  %v11671_v11 = vld [vmem:[%s14360_s1 + $0x88] sm:$0xff]  }
 0x1c7   : > { %10653 = vmatpush3.bf16.msra.mxu1 %v11636_v12  ;;  %10634 = vmatprep.subr.bf16.mxu0 %v11992_v16  ;;  %v11672_v12 = vld [vmem:[%s14360_s1 + $0xc8] sm:$0xff]  }
 0x1c8   : > { %10654 = vmatprep.subr.bf16.mxu1 %v11992_v16 }
 0x1ca   : > { %10635 = vmatpush3.bf16.msra.mxu0 %v11637_v13  ;;  %v11673_v13 = vld [vmem:[%s14360_s1 + $0x90] sm:$0xff]  }
 0x1cb   : > { %10655 = vmatpush3.bf16.msra.mxu1 %v11638_v14  ;;  %10636 = vmatprep.subr.bf16.mxu0 %v11992_v16  ;;  %v11674_v14 = vld [vmem:[%s14360_s1 + $0xd0] sm:$0xff]  }
 0x1cc   : > { %10656 = vmatprep.subr.bf16.mxu1 %v11992_v16 }
 0x1ce   : > { %10637 = vmatpush3.bf16.msra.mxu0 %v11639_v15  ;;  %v11675_v15 = vld [vmem:[%s14360_s1 + $0x98] sm:$0xff]  }
 0x1cf   : > { %10657 = vmatpush3.bf16.msra.mxu1 %v11640_v17  ;;  %10638 = vmatprep.subr.bf16.mxu0 %v11992_v16  ;;  %v11676_v17 = vld [vmem:[%s14360_s1 + $0xd8] sm:$0xff]  }
 0x1d0   : > { %10658 = vmatprep.subr.bf16.mxu1 %v11992_v16 }
 0x1d2   : > { %10639 = vmatpush3.bf16.msra.mxu0 %v11641_v18  ;;  %v11677_v18 = vld [vmem:[%s14360_s1 + $0xa0] sm:$0xff]  }
 0x1d3   : > { %10659 = vmatpush3.bf16.msra.mxu1 %v11642_v19  ;;  %10640 = vmatprep.subr.bf16.mxu0 %v11992_v16  ;;  %v11678_v19 = vld [vmem:[%s14360_s1 + $0xe0] sm:$0xff]  }
 0x1d4   : > { %v1837_v22 = vpop.f32.mrb[24].mxu0  ;;  %10660 = vmatprep.subr.bf16.mxu1 %v11992_v16 }
 0x1d5   : > { %v1844_v23 = vadd.f32 %v1837_v22, %v1729_v0  ;;  %v10368_v24 = vpop.f32.mrb[25].mxu0  ;;  %v1953_v25 = vpop.f32.mrb[24].mxu1 }
 0x1d6   : > { %v1840_v28 = vpop.f32.mrb[26].mxu0  ;;  %10641 = vmatpush3.bf16.msra.mxu0 %v11643_v20  ;;  %v10388_v29 = vpop.f32.mrb[25].mxu1  ;;  %v11679_v20 = vld [vmem:[%s14360_s1 + $0xa8] sm:$0xff]  }
 0x1d7   : > { %v1845_v30 = vadd.f32 %v1840_v28, %v1730_v4  ;;  %v1960_v31 = vadd.f32 %v1953_v25, %v1844_v23  ;;  %10661 = vmatpush3.bf16.msra.mxu1 %v11644_v21  ;;  %v10369_v32 = vpop.f32.mrb[27].mxu0  ;;  %v1956_v33 = vpop.f32.mrb[26].mxu1  ;;  %10642 = vmatprep.subr.bf16.mxu0 %v11992_v16  ;;  %v11680_v21 = vld [vmem:[%s14360_s1 + $0xe8] sm:$0xff]  }
 0x1d8   : > { %10662 = vmatprep.subr.bf16.mxu1 %v11992_v16  ;;  %v10389_v34 = vpop.f32.mrb[27].mxu1 }
 0x1d9   : > { %v1962_v35 = vadd.f32 %v12814_v53, %v1960_v31  ;;  %v1961_v36 = vadd.f32 %v1956_v33, %v1845_v30 }
 0x1da   : > { %10643 = vmatpush3.bf16.msra.mxu0 %v11645_v26  ;;  %v11681_v26 = vld [vmem:[%s14360_s1 + $0xb0] sm:$0xff]  }
 0x1db   : > { %v1963_v39 = vadd.f32 %v12814_v53, %v1961_v36  ;;  %10663 = vmatpush3.bf16.msra.mxu1 %v11646_v27  ;;  %10644 = vmatprep.subr.bf16.mxu0 %v11992_v16  ;;  %v1964_v41 = vmax.f32 %v1962_v35, 0.0  ;;  %v11652_v53 = vld [vmem:[%s14360_s1] sm:$0xff]   ;;  %v11682_v27 = vld [vmem:[%s14360_s1 + $0xf0] sm:$0xff]   ;;  %v11683_v36 = vld [vmem:[%s14360_s1 + $0xb8] sm:$0xff]  }
 0x1dc   : > { %10664 = vmatprep.subr.bf16.mxu1 %v11992_v16 }
 0x1dd   : > { %v1965_v42 = vmax.f32 %v1963_v39, 0.0  ;;  %v11686_v39 = vld [vmem:[%s12103_s30 + $0x38] sm:$0xff]  }
 0x1de   : > { %10645 = vmatpush3.bf16.msra.mxu0 %v11647_v37  ;;  %v11684_v37 = vld [vmem:[%s14360_s1 + $0xf8] sm:$0xff]  }
 0x1df   : > { %v9498_v45 = vpack.c.bf16 %v1965_v42, %v1964_v41  ;;  %10665 = vmatpush3.bf16.msra.mxu1 %v11648_v38  ;;  %10670 = vmatprep.subr.bf16.mxu0 %v11992_v16  ;;  %v11685_v38 = vld [vmem:[%s12103_s30 + $0x30] sm:$0xff]   ;;  %v11688_v41 = vld [vmem:[%s14360_s1 + $0x140] sm:$0xff]  }
 0x1e0   : > { %10690 = vmatprep.subr.bf16.mxu1 %v11992_v16  ;;  %v11689_v42 = vld [vmem:[%s14360_s1 + $0x108] sm:$0xff]  }
 0x1e1   : > { %9535 = vst [vmem:[%s12850_s23 + $0x8] sm:$0xff] %v9498_v45   ;;  %10647 = vmatmul.mubr.bf16.vlgmr.msra.gmra.mrb[52].mxu0 %v11649_v40  ;;  %v11687_v40 = vld [vmem:[%s14360_s1 + $0x100] sm:$0xff]   ;;  %v11692_v45 = vld [vmem:[%s14360_s1 + $0x150] sm:$0xff]  }
 0x1e2   : > { %10667 = vmatmul.mubr.bf16.vlgmr.msra.gmra.mrb[52].mxu1 %v11650_v43  ;;  %10671 = vmatpush3.bf16.msra.mxu0 %v11651_v44  ;;  %v11690_v43 = vld [vmem:[%s14360_s1 + $0x148] sm:$0xff]   ;;  %v11691_v44 = vld [vmem:[%s14360_s1 + $0x110] sm:$0xff]  }
 0x1e3   : > { %10691 = vmatpush3.bf16.msra.mxu1 %v11652_v53  ;;  %10672 = vmatprep.subr.bf16.mxu0 %v11992_v16  ;;  %v11693_v53 = vld [vmem:[%s14360_s1 + $0x118] sm:$0xff]  }
 0x1e4   : > { %10692 = vmatprep.subr.bf16.mxu1 %v11992_v16  ;;  %10686 = vmatprep.mubr.msk.bf16.mxu0 %vm11993_vm0, %v11992_v16 }
 0x1e5   : > { %10706 = vmatprep.mubr.msk.bf16.mxu1 %vm11993_vm0, %v11992_v16 }
 0x1e6   : > { %10673 = vmatpush3.bf16.msra.mxu0 %v11653_v46  ;;  %v11694_v46 = vld [vmem:[%s14360_s1 + $0x158] sm:$0xff]  }
 0x1e7   : > { %10693 = vmatpush3.bf16.msra.mxu1 %v11654_v47  ;;  %10674 = vmatprep.subr.bf16.mxu0 %v11992_v16  ;;  %v11695_v47 = vld [vmem:[%s14360_s1 + $0x120] sm:$0xff]  }
 0x1e8   : > { %10694 = vmatprep.subr.bf16.mxu1 %v11992_v16 }
 0x1ea   : > { %10675 = vmatpush3.bf16.msra.mxu0 %v11655_v48  ;;  %v11696_v48 = vld [vmem:[%s14360_s1 + $0x160] sm:$0xff]  }
 0x1eb   : > { %10695 = vmatpush3.bf16.msra.mxu1 %v11656_v49  ;;  %10676 = vmatprep.subr.bf16.mxu0 %v11992_v16  ;;  %v11697_v49 = vld [vmem:[%s14360_s1 + $0x128] sm:$0xff]  }
 0x1ec   : > { %10696 = vmatprep.subr.bf16.mxu1 %v11992_v16 }
 0x1ee   : > { %10677 = vmatpush3.bf16.msra.mxu0 %v11657_v50  ;;  %v11698_v50 = vld [vmem:[%s14360_s1 + $0x168] sm:$0xff]  }
 0x1ef   : > { %10697 = vmatpush3.bf16.msra.mxu1 %v11658_v51  ;;  %10678 = vmatprep.subr.bf16.mxu0 %v11992_v16 }
 0x1f0   : > { %10698 = vmatprep.subr.bf16.mxu1 %v11992_v16 }
 0x1f2   : > { %10679 = vmatpush3.bf16.msra.mxu0 %v11659_v52 }
 0x1f3   : > { %10699 = vmatpush3.bf16.msra.mxu1 %v11660_v54  ;;  %10680 = vmatprep.subr.bf16.mxu0 %v11992_v16 }
 0x1f4   : > { %v2101_v57 = vpop.f32.mrb[28].mxu0  ;;  %10700 = vmatprep.subr.bf16.mxu1 %v11992_v16 }
 0x1f5   : > { %v2196_v58 = vpop.f32.mrb[28].mxu1  ;;  %v10408_v59 = vpop.f32.mrb[29].mxu0 }
 0x1f6   : > { %v2197_v62 = vadd.f32 %v2196_v58, %v2101_v57  ;;  %v10428_v63 = vpop.f32.mrb[29].mxu1  ;;  %v2104_v0 = vpop.f32.mrb[30].mxu0  ;;  %10681 = vmatpush3.bf16.msra.mxu0 %v11661_v55  ;;  %v11699_v58 = vld [vmem:[%s14360_s1 + $0x130] sm:$0xff]  }
 0x1f7   : > { %v2199_v1 = vpop.f32.mrb[30].mxu1  ;;  %10701 = vmatpush3.bf16.msra.mxu1 %v11662_v56  ;;  %v10409_v2 = vpop.f32.mrb[31].mxu0  ;;  %10682 = vmatprep.subr.bf16.mxu0 %v11992_v16  ;;  %v11700_v63 = vld [vmem:[%s14360_s1 + $0x170] sm:$0xff]  }
 0x1f8   : > { %v2200_v3 = vadd.f32 %v2199_v1, %v2104_v0  ;;  %10702 = vmatprep.subr.bf16.mxu1 %v11992_v16  ;;  %v10429_v4 = vpop.f32.mrb[31].mxu1  ;;  %v11701_v2 = vld [vmem:[%s14360_s1 + $0x138] sm:$0xff]  }
 0x1f9   : > { %v11703_v4 = vld [vmem:[%s12103_s30 + $0x40] sm:$0xff]  }
 0x1fa   : > { %10683 = vmatpush3.bf16.msra.mxu0 %v11663_v60 }
 0x1fb   : > { %10703 = vmatpush3.bf16.msra.mxu1 %v11664_v61  ;;  %10684 = vmatprep.subr.bf16.mxu0 %v11992_v16 }
 0x1fc   : > { %10704 = vmatprep.subr.bf16.mxu1 %v11992_v16 }
 0x1fe   : > { %10685 = vmatpush3.bf16.msra.mxu0 %v11665_v5  ;;  %v11704_v5 = vld [vmem:[%s12103_s30 + $0x48] sm:$0xff]  }
 0x1ff   : > { %10705 = vmatpush3.bf16.msra.mxu1 %v11666_v6  ;;  %10710 = vmatprep.subr.bf16.mxu0 %v11992_v16  ;;  %v11705_v6 = vld [vmem:[%s14360_s1 + $0x180] sm:$0xff]  }
 0x200   : > { %10730 = vmatprep.subr.bf16.mxu1 %v11992_v16 }
 0x201   : > { %10687 = vmatmul.mubr.bf16.vlgmr.msra.gmra.mrb[56].mxu0 %v11667_v7  ;;  %v11706_v7 = vld [vmem:[%s14360_s1 + $0x40] sm:$0xff]  }
 0x202   : > { %10707 = vmatmul.mubr.bf16.vlgmr.msra.gmra.mrb[56].mxu1 %v11668_v8  ;;  %10711 = vmatpush3.bf16.msra.mxu0 %v11669_v9  ;;  %v11707_v8 = vld [vmem:[%s14360_s1 + $0x188] sm:$0xff]  }
 0x203   : > { %10731 = vmatpush3.bf16.msra.mxu1 %v11670_v10  ;;  %10712 = vmatprep.subr.bf16.mxu0 %v11992_v16  ;;  %v11708_v9 = vld [vmem:[%s14360_s1 + $0x48] sm:$0xff]   ;;  %v11709_v10 = vld [vmem:[%s14360_s1 + $0x190] sm:$0xff]  }
 0x204   : > { %10732 = vmatprep.subr.bf16.mxu1 %v11992_v16  ;;  %10726 = vmatprep.mubr.msk.bf16.mxu0 %vm11993_vm0, %v11992_v16 }
 0x205   : > { %10746 = vmatprep.mubr.msk.bf16.mxu1 %vm11993_vm0, %v11992_v16 }
 0x206   : > { %10713 = vmatpush3.bf16.msra.mxu0 %v11671_v11  ;;  %v11710_v11 = vld [vmem:[%s14360_s1 + $0x50] sm:$0xff]  }
 0x207   : > { %10733 = vmatpush3.bf16.msra.mxu1 %v11672_v12  ;;  %10714 = vmatprep.subr.bf16.mxu0 %v11992_v16  ;;  %v11711_v12 = vld [vmem:[%s14360_s1 + $0x198] sm:$0xff]  }
 0x208   : > { %10734 = vmatprep.subr.bf16.mxu1 %v11992_v16 }
 0x20a   : > { %10715 = vmatpush3.bf16.msra.mxu0 %v11673_v13  ;;  %v11712_v13 = vld [vmem:[%s14360_s1 + $0x58] sm:$0xff]  }
 0x20b   : > { %10735 = vmatpush3.bf16.msra.mxu1 %v11674_v14  ;;  %10716 = vmatprep.subr.bf16.mxu0 %v11992_v16  ;;  %v11713_v14 = vld [vmem:[%s14360_s1 + $0x1a0] sm:$0xff]  }
 0x20c   : > { %10736 = vmatprep.subr.bf16.mxu1 %v11992_v16 }
 0x20e   : > { %10717 = vmatpush3.bf16.msra.mxu0 %v11675_v15  ;;  %v11714_v15 = vld [vmem:[%s14360_s1 + $0x60] sm:$0xff]  }
 0x20f   : > { %10737 = vmatpush3.bf16.msra.mxu1 %v11676_v17  ;;  %10718 = vmatprep.subr.bf16.mxu0 %v11992_v16  ;;  %v11715_v17 = vld [vmem:[%s14360_s1 + $0x1a8] sm:$0xff]  }
 0x210   : > { %10738 = vmatprep.subr.bf16.mxu1 %v11992_v16 }
 0x212   : > { %10719 = vmatpush3.bf16.msra.mxu0 %v11677_v18  ;;  %v11716_v18 = vld [vmem:[%s14360_s1 + $0x68] sm:$0xff]  }
 0x213   : > { %10739 = vmatpush3.bf16.msra.mxu1 %v11678_v19  ;;  %10720 = vmatprep.subr.bf16.mxu0 %v11992_v16 }
 0x214   : > { %v2309_v22 = vpop.f32.mrb[32].mxu0  ;;  %10740 = vmatprep.subr.bf16.mxu1 %v11992_v16 }
 0x215   : > { %v2316_v23 = vadd.f32 %v2309_v22, %v2197_v62  ;;  %v10448_v24 = vpop.f32.mrb[33].mxu0  ;;  %v2424_v25 = vpop.f32.mrb[32].mxu1 }
 0x216   : > { %v2312_v28 = vpop.f32.mrb[34].mxu0  ;;  %10721 = vmatpush3.bf16.msra.mxu0 %v11679_v20  ;;  %v10468_v29 = vpop.f32.mrb[33].mxu1  ;;  %v11717_v24 = vld [vmem:[%s14360_s1 + $0x1b0] sm:$0xff]  }
 0x217   : > { %v2317_v30 = vadd.f32 %v2312_v28, %v2200_v3  ;;  %v2431_v31 = vadd.f32 %v2424_v25, %v2316_v23  ;;  %10741 = vmatpush3.bf16.msra.mxu1 %v11680_v21  ;;  %v10449_v32 = vpop.f32.mrb[35].mxu0  ;;  %v2427_v33 = vpop.f32.mrb[34].mxu1  ;;  %10722 = vmatprep.subr.bf16.mxu0 %v11992_v16  ;;  %v11702_v3 = vld [vmem:[%s14360_s1 + $0x178] sm:$0xff]  }
 0x218   : > { %10742 = vmatprep.subr.bf16.mxu1 %v11992_v16  ;;  %v10469_v34 = vpop.f32.mrb[35].mxu1 }
 0x219   : > { %v2432_v35 = vadd.f32 %v2427_v33, %v2317_v30  ;;  %v11718_v30 = vld [vmem:[%s14360_s1 + $0x70] sm:$0xff]   ;;  %v11719_v34 = vld [vmem:[%s14360_s1 + $0x1b8] sm:$0xff]  }
 0x21a   : > { %10723 = vmatpush3.bf16.msra.mxu0 %v11681_v26  ;;  %v13335_v26 = vld [vmem:[%s14361_s2] ss:$0 sm:$0xff] }
 0x21b   : > { %10743 = vmatpush3.bf16.msra.mxu1 %v11682_v27  ;;  %10724 = vmatprep.subr.bf16.mxu0 %v11992_v16 }
 0x21c   : > { %10744 = vmatprep.subr.bf16.mxu1 %v11992_v16 }
 0x21e   : > { %10725 = vmatpush3.bf16.msra.mxu0 %v11683_v36 }
 0x21f   : > { %10745 = vmatpush3.bf16.msra.mxu1 %v11684_v37  ;;  %10750 = vmatprep.subr.bf16.mxu0 %v11992_v16  ;;  %v11720_v37 = vld [vmem:[%s14360_s1 + $0x78] sm:$0xff]  }
 0x220   : > { %10770 = vmatprep.subr.bf16.mxu1 %v11992_v16 }
 0x221   : > { %10727 = vmatmul.mubr.bf16.vlgmr.msra.gmra.mrb[60].mxu0 %v11685_v38 }
 0x222   : > { %10747 = vmatmul.mubr.bf16.vlgmr.msra.gmra.mrb[60].mxu1 %v11686_v39  ;;  %10751 = vmatpush3.bf16.msra.mxu0 %v11687_v40  ;;  %v11721_v39 = vld [vmem:[%s12103_s30 + $0x50] sm:$0xff]  }
 0x223   : > { %10771 = vmatpush3.bf16.msra.mxu1 %v11688_v41  ;;  %10752 = vmatprep.subr.bf16.mxu0 %v11992_v16  ;;  %v11722_v40 = vld [vmem:[%s12103_s30 + $0x30] sm:$0xff]   ;;  %v11723_v41 = vld [vmem:[%s14360_s1] sm:$0xff]  }
 0x224   : > { %10772 = vmatprep.subr.bf16.mxu1 %v11992_v16  ;;  %10766 = vmatprep.mubr.msk.bf16.mxu0 %vm11993_vm0, %v11992_v16 }
 0x225   : > { %10786 = vmatprep.mubr.msk.bf16.mxu1 %vm11993_vm0, %v11992_v16 }
 0x226   : > { %10753 = vmatpush3.bf16.msra.mxu0 %v11689_v42  ;;  %v11724_v42 = vld [vmem:[%s14360_s1 + $0x80] sm:$0xff]  }
 0x227   : > { %10773 = vmatpush3.bf16.msra.mxu1 %v11690_v43  ;;  %10754 = vmatprep.subr.bf16.mxu0 %v11992_v16  ;;  %v11725_v43 = vld [vmem:[%s14360_s1 + $0x8] sm:$0xff]  }
 0x228   : > { %10774 = vmatprep.subr.bf16.mxu1 %v11992_v16 }
 0x22a   : > { %10755 = vmatpush3.bf16.msra.mxu0 %v11691_v44  ;;  %v11726_v44 = vld [vmem:[%s14360_s1 + $0x88] sm:$0xff]  }
 0x22b   : > { %10775 = vmatpush3.bf16.msra.mxu1 %v11692_v45  ;;  %10756 = vmatprep.subr.bf16.mxu0 %v11992_v16  ;;  %v11727_v45 = vld [vmem:[%s14360_s1 + $0x10] sm:$0xff]  }
 0x22c   : > { %10776 = vmatprep.subr.bf16.mxu1 %v11992_v16 }
 0x22e   : > { %10757 = vmatpush3.bf16.msra.mxu0 %v11693_v53  ;;  %v11728_v53 = vld [vmem:[%s14360_s1 + $0x90] sm:$0xff]  }
 0x22f   : > { %10777 = vmatpush3.bf16.msra.mxu1 %v11694_v46  ;;  %10758 = vmatprep.subr.bf16.mxu0 %v11992_v16  ;;  %v11729_v46 = vld [vmem:[%s14360_s1 + $0x18] sm:$0xff]  }
 0x230   : > { %10778 = vmatprep.subr.bf16.mxu1 %v11992_v16 }
 0x232   : > { %10759 = vmatpush3.bf16.msra.mxu0 %v11695_v47  ;;  %v11730_v47 = vld [vmem:[%s14360_s1 + $0x98] sm:$0xff]  }
 0x233   : > { %10779 = vmatpush3.bf16.msra.mxu1 %v11696_v48  ;;  %10760 = vmatprep.subr.bf16.mxu0 %v11992_v16  ;;  %v11731_v48 = vld [vmem:[%s14360_s1 + $0x20] sm:$0xff]  }
 0x234   : > { %v2539_v51 = vpop.f32.mrb[36].mxu0  ;;  %10780 = vmatprep.subr.bf16.mxu1 %v11992_v16 }
 0x235   : > { %v2546_v52 = vadd.f32 %v2539_v51, %v2431_v31  ;;  %v10488_v54 = vpop.f32.mrb[37].mxu0  ;;  %v2654_v55 = vpop.f32.mrb[36].mxu1  ;;  %v11734_v51 = vld [vmem:[%s14360_s1 + $0xa8] sm:$0xff]  }
 0x236   : > { %v2542_v56 = vpop.f32.mrb[38].mxu0  ;;  %10761 = vmatpush3.bf16.msra.mxu0 %v11697_v49  ;;  %v10508_v57 = vpop.f32.mrb[37].mxu1  ;;  %v11732_v49 = vld [vmem:[%s14360_s1 + $0xa0] sm:$0xff]  }
 0x237   : > { %v2547_v59 = vadd.f32 %v2542_v56, %v2432_v35  ;;  %v2661_v60 = vadd.f32 %v2654_v55, %v2546_v52  ;;  %10781 = vmatpush3.bf16.msra.mxu1 %v11698_v50  ;;  %v10489_v61 = vpop.f32.mrb[39].mxu0  ;;  %v2657_v62 = vpop.f32.mrb[38].mxu1  ;;  %10762 = vmatprep.subr.bf16.mxu0 %v11992_v16  ;;  %v11733_v50 = vld [vmem:[%s14360_s1 + $0x28] sm:$0xff]  }
 0x238   : > { %10782 = vmatprep.subr.bf16.mxu1 %v11992_v16  ;;  %v10509_v0 = vpop.f32.mrb[39].mxu1 }
 0x239   : > { %v2662_v1 = vadd.f32 %v2657_v62, %v2547_v59  ;;  %v11735_v59 = vld [vmem:[%s14360_s1 + $0x30] sm:$0xff]  }
 0x23a   : > { %10763 = vmatpush3.bf16.msra.mxu0 %v11699_v58  ;;  %v11736_v0 = vld [vmem:[%s14360_s1 + $0xb0] sm:$0xff]  }
 0x23b   : > { %10783 = vmatpush3.bf16.msra.mxu1 %v11700_v63  ;;  %10764 = vmatprep.subr.bf16.mxu0 %v11992_v16 }
 0x23c   : > { %10784 = vmatprep.subr.bf16.mxu1 %v11992_v16 }
 0x23e   : > { %10765 = vmatpush3.bf16.msra.mxu0 %v11701_v2 }
 0x23f   : > { %10785 = vmatpush3.bf16.msra.mxu1 %v11702_v3  ;;  %10790 = vmatprep.subr.bf16.mxu0 %v11992_v16  ;;  %v11737_v3 = vld [vmem:[%s14360_s1 + $0x38] sm:$0xff]  }
 0x240   : > { %10810 = vmatprep.subr.bf16.mxu1 %v11992_v16 }
 0x241   : > { %10767 = vmatmul.mubr.bf16.vlgmr.msra.gmra.mrb[64].mxu0 %v11703_v4  ;;  %v11738_v4 = vld [vmem:[%s14360_s1 + $0xb8] sm:$0xff]  }
 0x242   : > { %10787 = vmatmul.mubr.bf16.vlgmr.msra.gmra.mrb[64].mxu1 %v11704_v5  ;;  %10791 = vmatpush3.bf16.msra.mxu0 %v11705_v6  ;;  %v11739_v5 = vld [vmem:[%s12103_s30 + $0x28] sm:$0xff]   ;;  %v11740_v6 = vld [vmem:[%s12103_s30 + $0x38] sm:$0xff]  }
 0x243   : > { %10811 = vmatpush3.bf16.msra.mxu1 %v11706_v7  ;;  %10792 = vmatprep.subr.bf16.mxu0 %v11992_v16  ;;  %v11741_v7 = vld [vmem:[%s14360_s1 + $0xc0] sm:$0xff]  }
 0x244   : > { %10812 = vmatprep.subr.bf16.mxu1 %v11992_v16  ;;  %10806 = vmatprep.mubr.msk.bf16.mxu0 %vm11993_vm0, %v11992_v16 }
 0x245   : > { %10826 = vmatprep.mubr.msk.bf16.mxu1 %vm11993_vm0, %v11992_v16 }
 0x246   : > { %10793 = vmatpush3.bf16.msra.mxu0 %v11707_v8  ;;  %v11742_v8 = vld [vmem:[%s14360_s1 + $0x100] sm:$0xff]  }
 0x247   : > { %10813 = vmatpush3.bf16.msra.mxu1 %v11708_v9  ;;  %10794 = vmatprep.subr.bf16.mxu0 %v11992_v16  ;;  %v11743_v9 = vld [vmem:[%s14360_s1 + $0xc8] sm:$0xff]  }
 0x248   : > { %10814 = vmatprep.subr.bf16.mxu1 %v11992_v16 }
 0x24a   : > { %10795 = vmatpush3.bf16.msra.mxu0 %v11709_v10  ;;  %v11744_v10 = vld [vmem:[%s14360_s1 + $0x108] sm:$0xff]  }
 0x24b   : > { %10815 = vmatpush3.bf16.msra.mxu1 %v11710_v11  ;;  %10796 = vmatprep.subr.bf16.mxu0 %v11992_v16  ;;  %v11745_v11 = vld [vmem:[%s14360_s1 + $0xd0] sm:$0xff]  }
 0x24c   : > { %10816 = vmatprep.subr.bf16.mxu1 %v11992_v16 }
 0x24e   : > { %10797 = vmatpush3.bf16.msra.mxu0 %v11711_v12  ;;  %v11746_v12 = vld [vmem:[%s14360_s1 + $0x110] sm:$0xff]  }
 0x24f   : > { %10817 = vmatpush3.bf16.msra.mxu1 %v11712_v13  ;;  %10798 = vmatprep.subr.bf16.mxu0 %v11992_v16  ;;  %v11747_v13 = vld [vmem:[%s14360_s1 + $0xd8] sm:$0xff]  }
 0x250   : > { %10818 = vmatprep.subr.bf16.mxu1 %v11992_v16 }
 0x252   : > { %10799 = vmatpush3.bf16.msra.mxu0 %v11713_v14  ;;  %v11748_v14 = vld [vmem:[%s14360_s1 + $0x118] sm:$0xff]  }
 0x253   : > { %10819 = vmatpush3.bf16.msra.mxu1 %v11714_v15  ;;  %10800 = vmatprep.subr.bf16.mxu0 %v11992_v16  ;;  %v11749_v15 = vld [vmem:[%s14360_s1 + $0xe0] sm:$0xff]  }
 0x254   : > { %v2770_v19 = vpop.f32.mrb[40].mxu0  ;;  %10820 = vmatprep.subr.bf16.mxu1 %v11992_v16 }
 0x255   : > { %v2777_v20 = vadd.f32 %v2770_v19, %v2661_v60  ;;  %v10528_v21 = vpop.f32.mrb[41].mxu0  ;;  %v13327_v22 = vpop.f32.mrb[40].mxu1  ;;  %v11752_v19 = vld [vmem:[%s14360_s1 + $0x128] sm:$0xff]  }
 0x256   : > { %v2773_v23 = vpop.f32.mrb[42].mxu0  ;;  %10801 = vmatpush3.bf16.msra.mxu0 %v11715_v17  ;;  %v10548_v25 = vpop.f32.mrb[41].mxu1  ;;  %v11750_v17 = vld [vmem:[%s14360_s1 + $0x120] sm:$0xff]  }
 0x257   : > { %v2779_v27 = vadd.f32 %v13335_v26, %v2777_v20  ;;  %v2778_v28 = vadd.f32 %v2773_v23, %v2662_v1  ;;  %10821 = vmatpush3.bf16.msra.mxu1 %v11716_v18  ;;  %v10529_v29 = vpop.f32.mrb[43].mxu0  ;;  %10802 = vmatprep.subr.bf16.mxu0 %v11992_v16  ;;  %v13342_v31 = vpop.f32.mrb[42].mxu1  ;;  %v11751_v18 = vld [vmem:[%s14360_s1 + $0xe8] sm:$0xff]  }
 0x258   : > { %10822 = vmatprep.subr.bf16.mxu1 %v11992_v16  ;;  %v10549_v32 = vpop.f32.mrb[43].mxu1 }
 0x259   : > { %v2780_v33 = vadd.f32 %v13335_v26, %v2778_v28  ;;  %v2781_v35 = vmax.f32 %v2779_v27, 0.0  ;;  %v11753_v27 = vld [vmem:[%s14360_s1 + $0xf0] sm:$0xff]  }
 0x25a   : > { %10803 = vmatpush3.bf16.msra.mxu0 %v11717_v24  ;;  %v11754_v32 = vld [vmem:[%s14360_s1 + $0x130] sm:$0xff]  }
 0x25b   : > { %v2782_v36 = vmax.f32 %v2780_v33, 0.0  ;;  %10823 = vmatpush3.bf16.msra.mxu1 %v11718_v30  ;;  %10804 = vmatprep.subr.bf16.mxu0 %v11992_v16 }
 0x25c   : > { %10824 = vmatprep.subr.bf16.mxu1 %v11992_v16 }
 0x25d   : > { %v9503_v38 = vpack.c.bf16 %v2782_v36, %v2781_v35  ;;  %v11755_v35 = vld [vmem:[%s14360_s1 + $0xf8] sm:$0xff]  }
 0x25e   : > { %10805 = vmatpush3.bf16.msra.mxu0 %v11719_v34  ;;  %v11756_v36 = vld [vmem:[%s14360_s1 + $0x138] sm:$0xff]  }
 0x25f   : > { %9536 = vst [vmem:[%s12850_s23 + $0x10] sm:$0xff] %v9503_v38   ;;  %10825 = vmatpush3.bf16.msra.mxu1 %v11720_v37  ;;  %10830 = vmatprep.subr.bf16.mxu0 %v11992_v16  ;;  %v11757_v37 = vld [vmem:[%s12103_s30 + $0x40] sm:$0xff]   ;;  %v11758_v38 = vld [vmem:[%s12103_s30 + $0x48] sm:$0xff]  }
 0x260   : > { %10850 = vmatprep.subr.bf16.mxu1 %v11992_v16 }
 0x261   : > { %10807 = vmatmul.mubr.bf16.vlgmr.msra.gmra.mrb[68].mxu0 %v11721_v39  ;;  %v11759_v39 = vld [vmem:[%s14360_s1 + $0x140] sm:$0xff]  }
 0x262   : > { %10827 = vmatmul.mubr.bf16.vlgmr.msra.gmra.mrb[68].mxu1 %v11722_v40  ;;  %10831 = vmatpush3.bf16.msra.mxu0 %v11723_v41  ;;  %v11760_v40 = vld [vmem:[%s14360_s1 + $0x180] sm:$0xff]   ;;  %v11761_v41 = vld [vmem:[%s14360_s1 + $0x148] sm:$0xff]  }
 0x263   : > { %10851 = vmatpush3.bf16.msra.mxu1 %v11724_v42  ;;  %10832 = vmatprep.subr.bf16.mxu0 %v11992_v16  ;;  %v11762_v42 = vld [vmem:[%s14360_s1 + $0x188] sm:$0xff]  }
 0x264   : > { %10852 = vmatprep.subr.bf16.mxu1 %v11992_v16  ;;  %10846 = vmatprep.mubr.msk.bf16.mxu0 %vm11993_vm0, %v11992_v16 }
 0x265   : > { %10866 = vmatprep.mubr.msk.bf16.mxu1 %vm11993_vm0, %v11992_v16 }
 0x266   : > { %10833 = vmatpush3.bf16.msra.mxu0 %v11725_v43  ;;  %v11763_v43 = vld [vmem:[%s14360_s1 + $0x150] sm:$0xff]  }
 0x267   : > { %10853 = vmatpush3.bf16.msra.mxu1 %v11726_v44  ;;  %10834 = vmatprep.subr.bf16.mxu0 %v11992_v16  ;;  %v11764_v44 = vld [vmem:[%s14360_s1 + $0x190] sm:$0xff]  }
 0x268   : > { %10854 = vmatprep.subr.bf16.mxu1 %v11992_v16 }
 0x26a   : > { %10835 = vmatpush3.bf16.msra.mxu0 %v11727_v45  ;;  %v11765_v45 = vld [vmem:[%s14360_s1 + $0x158] sm:$0xff]  }
 0x26b   : > { %10855 = vmatpush3.bf16.msra.mxu1 %v11728_v53  ;;  %10836 = vmatprep.subr.bf16.mxu0 %v11992_v16  ;;  %v11766_v53 = vld [vmem:[%s14360_s1 + $0x198] sm:$0xff]  }
 0x26c   : > { %10856 = vmatprep.subr.bf16.mxu1 %v11992_v16 }
 0x26e   : > { %10837 = vmatpush3.bf16.msra.mxu0 %v11729_v46  ;;  %v11767_v46 = vld [vmem:[%s14360_s1 + $0x160] sm:$0xff]  }
 0x26f   : > { %10857 = vmatpush3.bf16.msra.mxu1 %v11730_v47  ;;  %10838 = vmatprep.subr.bf16.mxu0 %v11992_v16  ;;  %v11768_v47 = vld [vmem:[%s14360_s1 + $0x1a0] sm:$0xff]  }
 0x270   : > { %10858 = vmatprep.subr.bf16.mxu1 %v11992_v16 }
 0x272   : > { %10839 = vmatpush3.bf16.msra.mxu0 %v11731_v48  ;;  %v11769_v48 = vld [vmem:[%s14360_s1 + $0x168] sm:$0xff]  }
 0x273   : > { %10859 = vmatpush3.bf16.msra.mxu1 %v11732_v49  ;;  %10840 = vmatprep.subr.bf16.mxu0 %v11992_v16  ;;  %v11770_v49 = vld [vmem:[%s14360_s1 + $0x1a8] sm:$0xff]  }
 0x274   : > { %v3013_v52 = vpop.f32.mrb[44].mxu0  ;;  %10860 = vmatprep.subr.bf16.mxu1 %v11992_v16 }
 0x275   : > { %v3014_v54 = vadd.f32 %v3013_v52, %v13327_v22  ;;  %v10568_v55 = vpop.f32.mrb[45].mxu0  ;;  %v3126_v56 = vpop.f32.mrb[44].mxu1 }
 0x276   : > { %v3016_v57 = vpop.f32.mrb[46].mxu0  ;;  %10841 = vmatpush3.bf16.msra.mxu0 %v11733_v50  ;;  %v10588_v58 = vpop.f32.mrb[45].mxu1 }
 0x277   : > { %v3017_v60 = vadd.f32 %v3016_v57, %v13342_v31  ;;  %v3133_v61 = vadd.f32 %v3126_v56, %v3014_v54  ;;  %10861 = vmatpush3.bf16.msra.mxu1 %v11734_v51  ;;  %v10569_v62 = vpop.f32.mrb[47].mxu0  ;;  %v3129_v63 = vpop.f32.mrb[46].mxu1  ;;  %10842 = vmatprep.subr.bf16.mxu0 %v11992_v16  ;;  %v11771_v57 = vld [vmem:[%s14360_s1 + $0x170] sm:$0xff]  }
 0x278   : > { %10862 = vmatprep.subr.bf16.mxu1 %v11992_v16  ;;  %v10589_v1 = vpop.f32.mrb[47].mxu1  ;;  %v11772_v62 = vld [vmem:[%s14360_s1 + $0x1b0] sm:$0xff]  }
 0x279   : > { %v3134_v2 = vadd.f32 %v3129_v63, %v3017_v60 }
 0x27a   : > { %10843 = vmatpush3.bf16.msra.mxu0 %v11735_v59 }
 0x27b   : > { %10863 = vmatpush3.bf16.msra.mxu1 %v11736_v0  ;;  %10844 = vmatprep.subr.bf16.mxu0 %v11992_v16 }
 0x27c   : > { %10864 = vmatprep.subr.bf16.mxu1 %v11992_v16 }
 0x27e   : > { %10845 = vmatpush3.bf16.msra.mxu0 %v11737_v3 }
 0x27f   : > { %10865 = vmatpush3.bf16.msra.mxu1 %v11738_v4  ;;  %10870 = vmatprep.subr.bf16.mxu0 %v11992_v16  ;;  %v11774_v4 = vld [vmem:[%s14360_s1 + $0x1b8] sm:$0xff]  }
 0x280   : > { %10890 = vmatprep.subr.bf16.mxu1 %v11992_v16 }
 0x281   : > { %10847 = vmatmul.mubr.bf16.vlgmr.msra.gmra.mrb[72].mxu0 %v11739_v5 }
 0x282   : > { %10867 = vmatmul.mubr.bf16.vlgmr.msra.gmra.mrb[72].mxu1 %v11740_v6  ;;  %10871 = vmatpush3.bf16.msra.mxu0 %v11741_v7  ;;  %v11775_v7 = vld [vmem:[%s12103_s30 + $0x50] sm:$0xff]  }
 0x283   : > { %10891 = vmatpush3.bf16.msra.mxu1 %v11742_v8  ;;  %10872 = vmatprep.subr.bf16.mxu0 %v11992_v16  ;;  %v11776_v8 = vld [vmem:[%s12103_s30 + $0x58] sm:$0xff]  }
 0x284   : > { %10892 = vmatprep.subr.bf16.mxu1 %v11992_v16  ;;  %10886 = vmatprep.mubr.msk.bf16.mxu0 %vm11993_vm0, %v11992_v16 }
 0x285   : > { %10906 = vmatprep.mubr.msk.bf16.mxu1 %vm11993_vm0, %v11992_v16 }
 0x286   : > { %10873 = vmatpush3.bf16.msra.mxu0 %v11743_v9  ;;  %v11777_v9 = vld [vmem:[%s14360_s1 + $0x40] sm:$0xff]  }
 0x287   : > { %10893 = vmatpush3.bf16.msra.mxu1 %v11744_v10  ;;  %10874 = vmatprep.subr.bf16.mxu0 %v11992_v16 }
 0x288   : > { %10894 = vmatprep.subr.bf16.mxu1 %v11992_v16 }
 0x28a   : > { %10875 = vmatpush3.bf16.msra.mxu0 %v11745_v11  ;;  %v11778_v11 = vld [vmem:[%s14360_s1] sm:$0xff]  }
 0x28b   : > { %10895 = vmatpush3.bf16.msra.mxu1 %v11746_v12  ;;  %10876 = vmatprep.subr.bf16.mxu0 %v11992_v16  ;;  %v11779_v12 = vld [vmem:[%s14360_s1 + $0x48] sm:$0xff]  }
 0x28c   : > { %10896 = vmatprep.subr.bf16.mxu1 %v11992_v16 }
 0x28e   : > { %10877 = vmatpush3.bf16.msra.mxu0 %v11747_v13  ;;  %v11780_v13 = vld [vmem:[%s14360_s1 + $0x8] sm:$0xff]  }
 0x28f   : > { %10897 = vmatpush3.bf16.msra.mxu1 %v11748_v14  ;;  %10878 = vmatprep.subr.bf16.mxu0 %v11992_v16  ;;  %v11781_v14 = vld [vmem:[%s14360_s1 + $0x50] sm:$0xff]  }
 0x290   : > { %10898 = vmatprep.subr.bf16.mxu1 %v11992_v16 }
 0x292   : > { %10879 = vmatpush3.bf16.msra.mxu0 %v11749_v15  ;;  %v11782_v15 = vld [vmem:[%s14360_s1 + $0x10] sm:$0xff]  }
 0x293   : > { %10899 = vmatpush3.bf16.msra.mxu1 %v11750_v17  ;;  %10880 = vmatprep.subr.bf16.mxu0 %v11992_v16  ;;  %v11783_v17 = vld [vmem:[%s14360_s1 + $0x58] sm:$0xff]  }
 0x294   : > { %v3241_v20 = vpop.f32.mrb[48].mxu0  ;;  %10900 = vmatprep.subr.bf16.mxu1 %v11992_v16 }
 0x295   : > { %v3248_v21 = vadd.f32 %v3241_v20, %v3133_v61  ;;  %v10608_v22 = vpop.f32.mrb[49].mxu0  ;;  %v3356_v23 = vpop.f32.mrb[48].mxu1  ;;  %v11786_v20 = vld [vmem:[%s14360_s1 + $0x20] sm:$0xff]  }
 0x296   : > { %v3244_v24 = vpop.f32.mrb[50].mxu0  ;;  %10881 = vmatpush3.bf16.msra.mxu0 %v11751_v18  ;;  %v10628_v25 = vpop.f32.mrb[49].mxu1  ;;  %v11784_v18 = vld [vmem:[%s14360_s1 + $0x18] sm:$0xff]   ;;  %v11788_v22 = vld [vmem:[%s14360_s1 + $0x28] sm:$0xff]  }
 0x297   : > { %v3249_v28 = vadd.f32 %v3244_v24, %v3134_v2  ;;  %v3363_v29 = vadd.f32 %v3356_v23, %v3248_v21  ;;  %10901 = vmatpush3.bf16.msra.mxu1 %v11752_v19  ;;  %v10609_v30 = vpop.f32.mrb[51].mxu0  ;;  %v3359_v31 = vpop.f32.mrb[50].mxu1  ;;  %10882 = vmatprep.subr.bf16.mxu0 %v11992_v16  ;;  %v11773_v2 = vld [vmem:[%s14360_s1 + $0x178] sm:$0xff]   ;;  %v11785_v19 = vld [vmem:[%s14360_s1 + $0x60] sm:$0xff]   ;;  %v11787_v21 = vld [vmem:[%s14360_s1 + $0x68] sm:$0xff]  }
 0x298   : > { %10902 = vmatprep.subr.bf16.mxu1 %v11992_v16  ;;  %v10629_v33 = vpop.f32.mrb[51].mxu1  ;;  %v11789_v30 = vld [vmem:[%s14360_s1 + $0x70] sm:$0xff]  }
 0x299   : > { %v3364_v34 = vadd.f32 %v3359_v31, %v3249_v28  ;;  %v11790_v33 = vld [vmem:[%s14360_s1 + $0x30] sm:$0xff]  }
 0x29a   : > { %10883 = vmatpush3.bf16.msra.mxu0 %v11753_v27 }
 0x29b   : > { %10903 = vmatpush3.bf16.msra.mxu1 %v11754_v32  ;;  %10884 = vmatprep.subr.bf16.mxu0 %v11992_v16 }
 0x29c   : > { %10904 = vmatprep.subr.bf16.mxu1 %v11992_v16 }
 0x29e   : > { %10885 = vmatpush3.bf16.msra.mxu0 %v11755_v35 }
 0x29f   : > { %10905 = vmatpush3.bf16.msra.mxu1 %v11756_v36  ;;  %10910 = vmatprep.subr.bf16.mxu0 %v11992_v16  ;;  %v11791_v36 = vld [vmem:[%s14360_s1 + $0x78] sm:$0xff]  }
 0x2a0   : > { %10930 = vmatprep.subr.bf16.mxu1 %v11992_v16 }
 0x2a1   : > { %10887 = vmatmul.mubr.bf16.vlgmr.msra.gmra.mrb[76].mxu0 %v11757_v37  ;;  %v11792_v37 = vld [vmem:[%s14360_s1 + $0x38] sm:$0xff]  }
 0x2a2   : > { %10907 = vmatmul.mubr.bf16.vlgmr.msra.gmra.mrb[76].mxu1 %v11758_v38  ;;  %10911 = vmatpush3.bf16.msra.mxu0 %v11759_v39  ;;  %v11793_v38 = vld [vmem:[%s12103_s30 + $0x38] sm:$0xff]   ;;  %v11794_v39 = vld [vmem:[%s12103_s30 + $0x30] sm:$0xff]  }
 0x2a3   : > { %10931 = vmatpush3.bf16.msra.mxu1 %v11760_v40  ;;  %10912 = vmatprep.subr.bf16.mxu0 %v11992_v16  ;;  %v11795_v40 = vld [vmem:[%s14360_s1 + $0x80] sm:$0xff]  }
 0x2a4   : > { %10932 = vmatprep.subr.bf16.mxu1 %v11992_v16  ;;  %10926 = vmatprep.mubr.msk.bf16.mxu0 %vm11993_vm0, %v11992_v16 }
 0x2a5   : > { %10946 = vmatprep.mubr.msk.bf16.mxu1 %vm11993_vm0, %v11992_v16 }
 0x2a6   : > { %10913 = vmatpush3.bf16.msra.mxu0 %v11761_v41  ;;  %v11796_v41 = vld [vmem:[%s14360_s1 + $0xc0] sm:$0xff]  }
 0x2a7   : > { %10933 = vmatpush3.bf16.msra.mxu1 %v11762_v42  ;;  %10914 = vmatprep.subr.bf16.mxu0 %v11992_v16  ;;  %v11797_v42 = vld [vmem:[%s14360_s1 + $0x88] sm:$0xff]  }
 0x2a8   : > { %10934 = vmatprep.subr.bf16.mxu1 %v11992_v16 }
 0x2aa   : > { %10915 = vmatpush3.bf16.msra.mxu0 %v11763_v43  ;;  %v11798_v43 = vld [vmem:[%s14360_s1 + $0xc8] sm:$0xff]  }
 0x2ab   : > { %10935 = vmatpush3.bf16.msra.mxu1 %v11764_v44  ;;  %10916 = vmatprep.subr.bf16.mxu0 %v11992_v16  ;;  %v11799_v44 = vld [vmem:[%s14360_s1 + $0x90] sm:$0xff]  }
 0x2ac   : > { %10936 = vmatprep.subr.bf16.mxu1 %v11992_v16 }
 0x2ae   : > { %10917 = vmatpush3.bf16.msra.mxu0 %v11765_v45  ;;  %v11800_v45 = vld [vmem:[%s14360_s1 + $0xd0] sm:$0xff]  }
 0x2af   : > { %10937 = vmatpush3.bf16.msra.mxu1 %v11766_v53  ;;  %10918 = vmatprep.subr.bf16.mxu0 %v11992_v16  ;;  %v11801_v53 = vld [vmem:[%s14360_s1 + $0x98] sm:$0xff]  }
 0x2b0   : > { %10938 = vmatprep.subr.bf16.mxu1 %v11992_v16 }
 0x2b2   : > { %10919 = vmatpush3.bf16.msra.mxu0 %v11767_v46  ;;  %v11802_v46 = vld [vmem:[%s14360_s1 + $0xd8] sm:$0xff]  }
 0x2b3   : > { %10939 = vmatpush3.bf16.msra.mxu1 %v11768_v47  ;;  %10920 = vmatprep.subr.bf16.mxu0 %v11992_v16  ;;  %v11803_v47 = vld [vmem:[%s14360_s1 + $0xa0] sm:$0xff]  }
 0x2b4   : > { %v3471_v50 = vpop.f32.mrb[52].mxu0  ;;  %10940 = vmatprep.subr.bf16.mxu1 %v11992_v16 }
 0x2b5   : > { %v3478_v51 = vadd.f32 %v3471_v50, %v3363_v29  ;;  %v10648_v52 = vpop.f32.mrb[53].mxu0  ;;  %v3587_v54 = vpop.f32.mrb[52].mxu1  ;;  %v11806_v50 = vld [vmem:[%s14360_s1 + $0xe8] sm:$0xff]  }
 0x2b6   : > { %v3474_v55 = vpop.f32.mrb[54].mxu0  ;;  %10921 = vmatpush3.bf16.msra.mxu0 %v11769_v48  ;;  %v10668_v56 = vpop.f32.mrb[53].mxu1  ;;  %v11804_v48 = vld [vmem:[%s14360_s1 + $0xe0] sm:$0xff]  }
 0x2b7   : > { %v3479_v58 = vadd.f32 %v3474_v55, %v3364_v34  ;;  %v3594_v59 = vadd.f32 %v3587_v54, %v3478_v51  ;;  %10941 = vmatpush3.bf16.msra.mxu1 %v11770_v49  ;;  %v10649_v60 = vpop.f32.mrb[55].mxu0  ;;  %v3590_v61 = vpop.f32.mrb[54].mxu1  ;;  %10922 = vmatprep.subr.bf16.mxu0 %v11992_v16  ;;  %v11805_v49 = vld [vmem:[%s14360_s1 + $0xa8] sm:$0xff]  }
 0x2b8   : > { %10942 = vmatprep.subr.bf16.mxu1 %v11992_v16  ;;  %v10669_v63 = vpop.f32.mrb[55].mxu1 }
 0x2b9   : > { %v3596_v0 = vadd.f32 %v13335_v26, %v3594_v59  ;;  %v3595_v1 = vadd.f32 %v3590_v61, %v3479_v58  ;;  %v11807_v58 = vld [vmem:[%s14360_s1 + $0xb0] sm:$0xff]  }
 0x2ba   : > { %10923 = vmatpush3.bf16.msra.mxu0 %v11771_v57  ;;  %v11808_v63 = vld [vmem:[%s14360_s1 + $0xf0] sm:$0xff]  }
 0x2bb   : > { %v3597_v3 = vadd.f32 %v13335_v26, %v3595_v1  ;;  %10943 = vmatpush3.bf16.msra.mxu1 %v11772_v62  ;;  %10924 = vmatprep.subr.bf16.mxu0 %v11992_v16  ;;  %v3598_v5 = vmax.f32 %v3596_v0, 0.0 }
 0x2bc   : > { %10944 = vmatprep.subr.bf16.mxu1 %v11992_v16 }
 0x2bd   : > { %v3599_v6 = vmax.f32 %v3597_v3, 0.0  ;;  %v11810_v3 = vld [vmem:[%s14360_s1 + $0xf8] sm:$0xff]  }
 0x2be   : > { %10925 = vmatpush3.bf16.msra.mxu0 %v11773_v2  ;;  %v11809_v2 = vld [vmem:[%s14360_s1 + $0xb8] sm:$0xff]  }
 0x2bf   : > { %v9508_v10 = vpack.c.bf16 %v3599_v6, %v3598_v5  ;;  %10945 = vmatpush3.bf16.msra.mxu1 %v11774_v4  ;;  %10950 = vmatprep.subr.bf16.mxu0 %v11992_v16  ;;  %v11811_v4 = vld [vmem:[%s12103_s30 + $0x40] sm:$0xff]   ;;  %v11812_v5 = vld [vmem:[%s12103_s30 + $0x48] sm:$0xff]  }
 0x2c0   : > { %10970 = vmatprep.subr.bf16.mxu1 %v11992_v16  ;;  %v11813_v6 = vld [vmem:[%s14360_s1 + $0x100] sm:$0xff]  }
 0x2c1   : > { %9537 = vst [vmem:[%s12850_s23 + $0x18] sm:$0xff] %v9508_v10   ;;  %10927 = vmatmul.mubr.bf16.vlgmr.msra.gmra.mrb[80].mxu0 %v11775_v7  ;;  %v11814_v7 = vld [vmem:[%s14360_s1 + $0x140] sm:$0xff]   ;;  %v11817_v10 = vld [vmem:[%s14360_s1 + $0x110] sm:$0xff]  }
 0x2c2   : > { %10947 = vmatmul.mubr.bf16.vlgmr.msra.gmra.mrb[80].mxu1 %v11776_v8  ;;  %10951 = vmatpush3.bf16.msra.mxu0 %v11777_v9  ;;  %v11815_v8 = vld [vmem:[%s14360_s1 + $0x108] sm:$0xff]  }
 0x2c3   : > { %10971 = vmatpush3.bf16.msra.mxu1 %v11778_v11  ;;  %10952 = vmatprep.subr.bf16.mxu0 %v11992_v16  ;;  %v11816_v9 = vld [vmem:[%s14360_s1 + $0x148] sm:$0xff]   ;;  %v11818_v11 = vld [vmem:[%s14360_s1 + $0x150] sm:$0xff]  }
 0x2c4   : > { %10972 = vmatprep.subr.bf16.mxu1 %v11992_v16  ;;  %10966 = vmatprep.mubr.msk.bf16.mxu0 %vm11993_vm0, %v11992_v16 }
 0x2c5   : > { %10986 = vmatprep.mubr.msk.bf16.mxu1 %vm11993_vm0, %v11992_v16 }
 0x2c6   : > { %10953 = vmatpush3.bf16.msra.mxu0 %v11779_v12  ;;  %v11819_v12 = vld [vmem:[%s14360_s1 + $0x118] sm:$0xff]  }
 0x2c7   : > { %10973 = vmatpush3.bf16.msra.mxu1 %v11780_v13  ;;  %10954 = vmatprep.subr.bf16.mxu0 %v11992_v16  ;;  %v11820_v13 = vld [vmem:[%s14360_s1 + $0x158] sm:$0xff]  }
 0x2c8   : > { %10974 = vmatprep.subr.bf16.mxu1 %v11992_v16 }
 0x2ca   : > { %10955 = vmatpush3.bf16.msra.mxu0 %v11781_v14  ;;  %v11821_v14 = vld [vmem:[%s14360_s1 + $0x120] sm:$0xff]  }
 0x2cb   : > { %10975 = vmatpush3.bf16.msra.mxu1 %v11782_v15  ;;  %10956 = vmatprep.subr.bf16.mxu0 %v11992_v16  ;;  %v11822_v15 = vld [vmem:[%s14360_s1 + $0x160] sm:$0xff]  }
 0x2cc   : > { %10976 = vmatprep.subr.bf16.mxu1 %v11992_v16 }
 0x2ce   : > { %10957 = vmatpush3.bf16.msra.mxu0 %v11783_v17  ;;  %v11823_v17 = vld [vmem:[%s14360_s1 + $0x128] sm:$0xff]  }
 0x2cf   : > { %10977 = vmatpush3.bf16.msra.mxu1 %v11784_v18  ;;  %10958 = vmatprep.subr.bf16.mxu0 %v11992_v16  ;;  %v11824_v18 = vld [vmem:[%s14360_s1 + $0x168] sm:$0xff]  }
 0x2d0   : > { %10978 = vmatprep.subr.bf16.mxu1 %v11992_v16 }
 0x2d2   : > { %10959 = vmatpush3.bf16.msra.mxu0 %v11785_v19 }
 0x2d3   : > { %10979 = vmatpush3.bf16.msra.mxu1 %v11786_v20  ;;  %10960 = vmatprep.subr.bf16.mxu0 %v11992_v16 }
 0x2d4   : > { %v3735_v23 = vpop.f32.mrb[56].mxu0  ;;  %10980 = vmatprep.subr.bf16.mxu1 %v11992_v16 }
 0x2d5   : > { %v3830_v24 = vpop.f32.mrb[56].mxu1  ;;  %v10688_v25 = vpop.f32.mrb[57].mxu0 }
 0x2d6   : > { %v3831_v27 = vadd.f32 %v3830_v24, %v3735_v23  ;;  %v10708_v28 = vpop.f32.mrb[57].mxu1  ;;  %v3738_v29 = vpop.f32.mrb[58].mxu0  ;;  %10961 = vmatpush3.bf16.msra.mxu0 %v11787_v21  ;;  %v11825_v25 = vld [vmem:[%s14360_s1 + $0x130] sm:$0xff]  }
 0x2d7   : > { %v3833_v31 = vpop.f32.mrb[58].mxu1  ;;  %10981 = vmatpush3.bf16.msra.mxu1 %v11788_v22  ;;  %v10689_v32 = vpop.f32.mrb[59].mxu0  ;;  %10962 = vmatprep.subr.bf16.mxu0 %v11992_v16 }
 0x2d8   : > { %v3834_v34 = vadd.f32 %v3833_v31, %v3738_v29  ;;  %10982 = vmatprep.subr.bf16.mxu1 %v11992_v16  ;;  %v10709_v35 = vpop.f32.mrb[59].mxu1  ;;  %v11826_v31 = vld [vmem:[%s14360_s1 + $0x170] sm:$0xff]  }
 0x2d9   : > { %v11828_v35 = vld [vmem:[%s14360_s1 + $0x178] sm:$0xff]  }
 0x2da   : > { %10963 = vmatpush3.bf16.msra.mxu0 %v11789_v30 }
 0x2db   : > { %10983 = vmatpush3.bf16.msra.mxu1 %v11790_v33  ;;  %10964 = vmatprep.subr.bf16.mxu0 %v11992_v16 }
 0x2dc   : > { %10984 = vmatprep.subr.bf16.mxu1 %v11992_v16 }
 0x2de   : > { %10965 = vmatpush3.bf16.msra.mxu0 %v11791_v36  ;;  %v11829_v36 = vld [vmem:[%s12103_s30 + $0x50] sm:$0xff]  }
 0x2df   : > { %10985 = vmatpush3.bf16.msra.mxu1 %v11792_v37  ;;  %10990 = vmatprep.subr.bf16.mxu0 %v11992_v16  ;;  %v11830_v37 = vld [vmem:[%s12103_s30 + $0x58] sm:$0xff]  }
 0x2e0   : > { %11010 = vmatprep.subr.bf16.mxu1 %v11992_v16 }
 0x2e1   : > { %10967 = vmatmul.mubr.bf16.vlgmr.msra.gmra.mrb[84].mxu0 %v11793_v38  ;;  %v11831_v38 = vld [vmem:[%s14360_s1 + $0x180] sm:$0xff]  }
 0x2e2   : > { %10987 = vmatmul.mubr.bf16.vlgmr.msra.gmra.mrb[84].mxu1 %v11794_v39  ;;  %10991 = vmatpush3.bf16.msra.mxu0 %v11795_v40  ;;  %v11832_v39 = vld [vmem:[%s14360_s1 + $0x40] sm:$0xff]   ;;  %v11833_v40 = vld [vmem:[%s14360_s1 + $0x188] sm:$0xff]  }
 0x2e3   : > { %11011 = vmatpush3.bf16.msra.mxu1 %v11796_v41  ;;  %10992 = vmatprep.subr.bf16.mxu0 %v11992_v16  ;;  %v11834_v41 = vld [vmem:[%s14360_s1 + $0x48] sm:$0xff]  }
 0x2e4   : > { %11012 = vmatprep.subr.bf16.mxu1 %v11992_v16  ;;  %11006 = vmatprep.mubr.msk.bf16.mxu0 %vm11993_vm0, %v11992_v16 }
 0x2e5   : > { %11026 = vmatprep.mubr.msk.bf16.mxu1 %vm11993_vm0, %v11992_v16 }
 0x2e6   : > { %10993 = vmatpush3.bf16.msra.mxu0 %v11797_v42  ;;  %v11835_v42 = vld [vmem:[%s14360_s1 + $0x190] sm:$0xff]  }
 0x2e7   : > { %11013 = vmatpush3.bf16.msra.mxu1 %v11798_v43  ;;  %10994 = vmatprep.subr.bf16.mxu0 %v11992_v16  ;;  %v11836_v43 = vld [vmem:[%s14360_s1 + $0x50] sm:$0xff]  }
 0x2e8   : > { %11014 = vmatprep.subr.bf16.mxu1 %v11992_v16 }
 0x2ea   : > { %10995 = vmatpush3.bf16.msra.mxu0 %v11799_v44  ;;  %v11837_v44 = vld [vmem:[%s14360_s1 + $0x198] sm:$0xff]  }
 0x2eb   : > { %11015 = vmatpush3.bf16.msra.mxu1 %v11800_v45  ;;  %10996 = vmatprep.subr.bf16.mxu0 %v11992_v16  ;;  %v11838_v45 = vld [vmem:[%s14360_s1 + $0x58] sm:$0xff]  }
 0x2ec   : > { %11016 = vmatprep.subr.bf16.mxu1 %v11992_v16 }
 0x2ee   : > { %10997 = vmatpush3.bf16.msra.mxu0 %v11801_v53  ;;  %v11839_v53 = vld [vmem:[%s14360_s1 + $0x1a0] sm:$0xff]  }
 0x2ef   : > { %11017 = vmatpush3.bf16.msra.mxu1 %v11802_v46  ;;  %10998 = vmatprep.subr.bf16.mxu0 %v11992_v16  ;;  %v11840_v46 = vld [vmem:[%s14360_s1 + $0x60] sm:$0xff]  }
 0x2f0   : > { %11018 = vmatprep.subr.bf16.mxu1 %v11992_v16 }
 0x2f2   : > { %10999 = vmatpush3.bf16.msra.mxu0 %v11803_v47  ;;  %v11841_v47 = vld [vmem:[%s14360_s1 + $0x1a8] sm:$0xff]  }
 0x2f3   : > { %11019 = vmatpush3.bf16.msra.mxu1 %v11804_v48  ;;  %11000 = vmatprep.subr.bf16.mxu0 %v11992_v16  ;;  %v11842_v48 = vld [vmem:[%s14360_s1 + $0x68] sm:$0xff]  }
 0x2f4   : > { %v3943_v51 = vpop.f32.mrb[60].mxu0  ;;  %11020 = vmatprep.subr.bf16.mxu1 %v11992_v16 }
 0x2f5   : > { %v3950_v52 = vadd.f32 %v3943_v51, %v3831_v27  ;;  %v10728_v54 = vpop.f32.mrb[61].mxu0  ;;  %v4058_v55 = vpop.f32.mrb[60].mxu1 }
 0x2f6   : > { %v3946_v56 = vpop.f32.mrb[62].mxu0  ;;  %11001 = vmatpush3.bf16.msra.mxu0 %v11805_v49  ;;  %v10748_v57 = vpop.f32.mrb[61].mxu1 }
 0x2f7   : > { %v3951_v59 = vadd.f32 %v3946_v56, %v3834_v34  ;;  %v4065_v60 = vadd.f32 %v4058_v55, %v3950_v52  ;;  %11021 = vmatpush3.bf16.msra.mxu1 %v11806_v50  ;;  %v10729_v61 = vpop.f32.mrb[63].mxu0  ;;  %v4061_v62 = vpop.f32.mrb[62].mxu1  ;;  %11002 = vmatprep.subr.bf16.mxu0 %v11992_v16  ;;  %v11827_v34 = vld [vmem:[%s14360_s1 + $0x138] sm:$0xff]   ;;  %v11843_v55 = vld [vmem:[%s14360_s1 + $0x1b0] sm:$0xff]  }
 0x2f8   : > { %11022 = vmatprep.subr.bf16.mxu1 %v11992_v16  ;;  %v10749_v0 = vpop.f32.mrb[63].mxu1 }
 0x2f9   : > { %v4066_v1 = vadd.f32 %v4061_v62, %v3951_v59  ;;  %v11845_v0 = vld [vmem:[%s14360_s1 + $0x1b8] sm:$0xff]  }
 0x2fa   : > { %11003 = vmatpush3.bf16.msra.mxu0 %v11807_v58 }
 0x2fb   : > { %11023 = vmatpush3.bf16.msra.mxu1 %v11808_v63  ;;  %11004 = vmatprep.subr.bf16.mxu0 %v11992_v16 }
 0x2fc   : > { %11024 = vmatprep.subr.bf16.mxu1 %v11992_v16 }
 0x2fe   : > { %11005 = vmatpush3.bf16.msra.mxu0 %v11809_v2 }
 0x2ff   : > { %11025 = vmatpush3.bf16.msra.mxu1 %v11810_v3  ;;  %11030 = vmatprep.subr.bf16.mxu0 %v11992_v16  ;;  %v11846_v3 = vld [vmem:[%s14360_s1 + $0x78] sm:$0xff]  }
 0x300   : > { %11050 = vmatprep.subr.bf16.mxu1 %v11992_v16 }
 0x301   : > { %11007 = vmatmul.mubr.bf16.vlgmr.msra.gmra.mrb[88].mxu0 %v11811_v4 }
 0x302   : > { %11027 = vmatmul.mubr.bf16.vlgmr.msra.gmra.mrb[88].mxu1 %v11812_v5  ;;  %11031 = vmatpush3.bf16.msra.mxu0 %v11813_v6  ;;  %v11847_v5 = vld [vmem:[%s12103_s30 + $0x60] sm:$0xff]  }
 0x303   : > { %11051 = vmatpush3.bf16.msra.mxu1 %v11814_v7  ;;  %11032 = vmatprep.subr.bf16.mxu0 %v11992_v16  ;;  %v11849_v6 = vld [vmem:[%s14360_s1] sm:$0xff]  }
 0x304   : > { %11052 = vmatprep.subr.bf16.mxu1 %v11992_v16  ;;  %11046 = vmatprep.mubr.msk.bf16.mxu0 %vm11993_vm0, %v11992_v16  ;;  %v11850_v7 = vld [vmem:[%s14360_s1 + $0x80] sm:$0xff]  }
 0x305   : > { %11066 = vmatprep.mubr.msk.bf16.mxu1 %vm11993_vm0, %v11992_v16 }
 0x306   : > { %11033 = vmatpush3.bf16.msra.mxu0 %v11815_v8  ;;  %v11851_v8 = vld [vmem:[%s14360_s1 + $0x8] sm:$0xff]  }
 0x307   : > { %11053 = vmatpush3.bf16.msra.mxu1 %v11816_v9  ;;  %11034 = vmatprep.subr.bf16.mxu0 %v11992_v16  ;;  %v11852_v9 = vld [vmem:[%s14360_s1 + $0x88] sm:$0xff]  }
 0x308   : > { %11054 = vmatprep.subr.bf16.mxu1 %v11992_v16 }
 0x30a   : > { %11035 = vmatpush3.bf16.msra.mxu0 %v11817_v10  ;;  %v11853_v10 = vld [vmem:[%s14360_s1 + $0x10] sm:$0xff]  }
 0x30b   : > { %11055 = vmatpush3.bf16.msra.mxu1 %v11818_v11  ;;  %11036 = vmatprep.subr.bf16.mxu0 %v11992_v16  ;;  %v11854_v11 = vld [vmem:[%s14360_s1 + $0x90] sm:$0xff]  }
 0x30c   : > { %11056 = vmatprep.subr.bf16.mxu1 %v11992_v16 }
 0x30e   : > { %11037 = vmatpush3.bf16.msra.mxu0 %v11819_v12  ;;  %v11855_v12 = vld [vmem:[%s14360_s1 + $0x18] sm:$0xff]  }
 0x30f   : > { %11057 = vmatpush3.bf16.msra.mxu1 %v11820_v13  ;;  %11038 = vmatprep.subr.bf16.mxu0 %v11992_v16  ;;  %v11856_v13 = vld [vmem:[%s14360_s1 + $0x98] sm:$0xff]  }
 0x310   : > { %11058 = vmatprep.subr.bf16.mxu1 %v11992_v16 }
 0x312   : > { %11039 = vmatpush3.bf16.msra.mxu0 %v11821_v14  ;;  %v11857_v14 = vld [vmem:[%s14360_s1 + $0x20] sm:$0xff]  }
 0x313   : > { %11059 = vmatpush3.bf16.msra.mxu1 %v11822_v15  ;;  %11040 = vmatprep.subr.bf16.mxu0 %v11992_v16  ;;  %v11858_v15 = vld [vmem:[%s14360_s1 + $0xa0] sm:$0xff]  }
 0x314   : > { %v4173_v19 = vpop.f32.mrb[64].mxu0  ;;  %11060 = vmatprep.subr.bf16.mxu1 %v11992_v16 }
 0x315   : > { %v4180_v20 = vadd.f32 %v4173_v19, %v4065_v60  ;;  %v10768_v21 = vpop.f32.mrb[65].mxu0  ;;  %v4288_v22 = vpop.f32.mrb[64].mxu1  ;;  %v11844_v60 = vld [vmem:[%s14360_s1 + $0x70] sm:$0xff]  }
 0x316   : > { %v4176_v23 = vpop.f32.mrb[66].mxu0  ;;  %11041 = vmatpush3.bf16.msra.mxu0 %v11823_v17  ;;  %v10788_v24 = vpop.f32.mrb[65].mxu1  ;;  %v11859_v17 = vld [vmem:[%s14360_s1 + $0x28] sm:$0xff]  }
 0x317   : > { %v4181_v27 = vadd.f32 %v4176_v23, %v4066_v1  ;;  %v4295_v28 = vadd.f32 %v4288_v22, %v4180_v20  ;;  %11061 = vmatpush3.bf16.msra.mxu1 %v11824_v18  ;;  %v10769_v29 = vpop.f32.mrb[67].mxu0  ;;  %v4291_v30 = vpop.f32.mrb[66].mxu1  ;;  %11042 = vmatprep.subr.bf16.mxu0 %v11992_v16  ;;  %v11860_v18 = vld [vmem:[%s14360_s1 + $0xa8] sm:$0xff]  }
 0x318   : > { %11062 = vmatprep.subr.bf16.mxu1 %v11992_v16  ;;  %v10789_v32 = vpop.f32.mrb[67].mxu1 }
 0x319   : > { %v4296_v33 = vadd.f32 %v4291_v30, %v4181_v27 }
 0x31a   : > { %11043 = vmatpush3.bf16.msra.mxu0 %v11825_v25  ;;  %v11861_v25 = vld [vmem:[%s14360_s1 + $0x30] sm:$0xff]  }
 0x31b   : > { %11063 = vmatpush3.bf16.msra.mxu1 %v11826_v31  ;;  %11044 = vmatprep.subr.bf16.mxu0 %v11992_v16  ;;  %v11862_v31 = vld [vmem:[%s14360_s1 + $0xb0] sm:$0xff]  }
 0x31c   : > { %11064 = vmatprep.subr.bf16.mxu1 %v11992_v16 }
 0x31e   : > { %11045 = vmatpush3.bf16.msra.mxu0 %v11827_v34  ;;  %v11863_v34 = vld [vmem:[%s14360_s1 + $0x38] sm:$0xff]  }
 0x31f   : > { %11065 = vmatpush3.bf16.msra.mxu1 %v11828_v35  ;;  %11070 = vmatprep.subr.bf16.mxu0 %v11992_v16  ;;  %v11864_v35 = vld [vmem:[%s14360_s1 + $0xb8] sm:$0xff]  }
 0x320   : > { %11090 = vmatprep.subr.bf16.mxu1 %v11992_v16 }
 0x321   : > { %11047 = vmatmul.mubr.bf16.vlgmr.msra.gmra.mrb[92].mxu0 %v11829_v36  ;;  %v11865_v36 = vld [vmem:[%s12103_s30 + $0x38] sm:$0xff]  }
 0x322   : > { %11067 = vmatmul.mubr.bf16.vlgmr.msra.gmra.mrb[92].mxu1 %v11830_v37  ;;  %11071 = vmatpush3.bf16.msra.mxu0 %v11831_v38  ;;  %v11866_v37 = vld [vmem:[%s12103_s30 + $0x48] sm:$0xff]  }
 0x323   : > { %11091 = vmatpush3.bf16.msra.mxu1 %v11832_v39  ;;  %11072 = vmatprep.subr.bf16.mxu0 %v11992_v16  ;;  %v11867_v38 = vld [vmem:[%s14360_s1 + $0xc0] sm:$0xff]  }
 0x324   : > { %11092 = vmatprep.subr.bf16.mxu1 %v11992_v16  ;;  %11086 = vmatprep.mubr.msk.bf16.mxu0 %vm11993_vm0, %v11992_v16  ;;  %v11868_v39 = vld [vmem:[%s14360_s1 + $0x100] sm:$0xff]  }
 0x325   : > { %11106 = vmatprep.mubr.msk.bf16.mxu1 %vm11993_vm0, %v11992_v16 }
 0x326   : > { %11073 = vmatpush3.bf16.msra.mxu0 %v11833_v40  ;;  %v11869_v40 = vld [vmem:[%s14360_s1 + $0xc8] sm:$0xff]  }
 0x327   : > { %11093 = vmatpush3.bf16.msra.mxu1 %v11834_v41  ;;  %11074 = vmatprep.subr.bf16.mxu0 %v11992_v16  ;;  %v11870_v41 = vld [vmem:[%s14360_s1 + $0x108] sm:$0xff]  }
 0x328   : > { %11094 = vmatprep.subr.bf16.mxu1 %v11992_v16 }
 0x32a   : > { %11075 = vmatpush3.bf16.msra.mxu0 %v11835_v42  ;;  %v11871_v42 = vld [vmem:[%s14360_s1 + $0xd0] sm:$0xff]  }
 0x32b   : > { %11095 = vmatpush3.bf16.msra.mxu1 %v11836_v43  ;;  %11076 = vmatprep.subr.bf16.mxu0 %v11992_v16  ;;  %v11872_v43 = vld [vmem:[%s14360_s1 + $0x110] sm:$0xff]  }
 0x32c   : > { %11096 = vmatprep.subr.bf16.mxu1 %v11992_v16 }
 0x32e   : > { %11077 = vmatpush3.bf16.msra.mxu0 %v11837_v44  ;;  %v11873_v44 = vld [vmem:[%s14360_s1 + $0xd8] sm:$0xff]  }
 0x32f   : > { %11097 = vmatpush3.bf16.msra.mxu1 %v11838_v45  ;;  %11078 = vmatprep.subr.bf16.mxu0 %v11992_v16  ;;  %v11874_v45 = vld [vmem:[%s14360_s1 + $0x118] sm:$0xff]  }
 0x330   : > { %11098 = vmatprep.subr.bf16.mxu1 %v11992_v16 }
 0x332   : > { %11079 = vmatpush3.bf16.msra.mxu0 %v11839_v53  ;;  %v11875_v53 = vld [vmem:[%s14360_s1 + $0xe0] sm:$0xff]  }
 0x333   : > { %11099 = vmatpush3.bf16.msra.mxu1 %v11840_v46  ;;  %11080 = vmatprep.subr.bf16.mxu0 %v11992_v16  ;;  %v11876_v46 = vld [vmem:[%s14360_s1 + $0x120] sm:$0xff]  }
 0x334   : > { %v4404_v49 = vpop.f32.mrb[68].mxu0  ;;  %11100 = vmatprep.subr.bf16.mxu1 %v11992_v16 }
 0x335   : > { %v4411_v50 = vadd.f32 %v4404_v49, %v4295_v28  ;;  %v10808_v51 = vpop.f32.mrb[69].mxu0  ;;  %v13834_v52 = vpop.f32.mrb[68].mxu1 }
 0x336   : > { %v4407_v54 = vpop.f32.mrb[70].mxu0  ;;  %11081 = vmatpush3.bf16.msra.mxu0 %v11841_v47  ;;  %v10828_v56 = vpop.f32.mrb[69].mxu1  ;;  %v11877_v47 = vld [vmem:[%s14360_s1 + $0xe8] sm:$0xff]  }
 0x337   : > { %v4413_v57 = vadd.f32 %v13335_v26, %v4411_v50  ;;  %v4412_v58 = vadd.f32 %v4407_v54, %v4296_v33  ;;  %11101 = vmatpush3.bf16.msra.mxu1 %v11842_v48  ;;  %v10809_v59 = vpop.f32.mrb[71].mxu0  ;;  %11082 = vmatprep.subr.bf16.mxu0 %v11992_v16  ;;  %v13844_v61 = vpop.f32.mrb[70].mxu1  ;;  %v11878_v48 = vld [vmem:[%s14360_s1 + $0x128] sm:$0xff]   ;;  %v11879_v56 = vld [vmem:[%s14360_s1 + $0xf0] sm:$0xff]  }
 0x338   : > { %11102 = vmatprep.subr.bf16.mxu1 %v11992_v16  ;;  %v10829_v62 = vpop.f32.mrb[71].mxu1 }
 0x339   : > { %v4414_v63 = vadd.f32 %v13335_v26, %v4412_v58  ;;  %v4415_v1 = vmax.f32 %v4413_v57, 0.0  ;;  %v11848_v26 = vld [vmem:[%s12103_s30 + $0x40] sm:$0xff]  }
 0x33a   : > { %11083 = vmatpush3.bf16.msra.mxu0 %v11843_v55 }
 0x33b   : > { %v4416_v2 = vmax.f32 %v4414_v63, 0.0  ;;  %11103 = vmatpush3.bf16.msra.mxu1 %v11844_v60  ;;  %11084 = vmatprep.subr.bf16.mxu0 %v11992_v16 }
 0x33c   : > { %11104 = vmatprep.subr.bf16.mxu1 %v11992_v16 }
 0x33d   : > { %v9513_v4 = vpack.c.bf16 %v4416_v2, %v4415_v1  ;;  %v11882_v1 = vld [vmem:[%s14360_s1 + $0x138] sm:$0xff]   ;;  %v11883_v2 = vld [vmem:[%s12103_s30 + $0x50] sm:$0xff]  }
 0x33e   : > { %11085 = vmatpush3.bf16.msra.mxu0 %v11845_v0  ;;  %v11881_v0 = vld [vmem:[%s14360_s1 + $0xf8] sm:$0xff]  }
 0x33f   : > { %9538 = vst [vmem:[%s12850_s23 + $0x20] sm:$0xff] %v9513_v4   ;;  %11105 = vmatpush3.bf16.msra.mxu1 %v11846_v3  ;;  %11110 = vmatprep.subr.bf16.mxu0 %v11992_v16  ;;  %v11884_v3 = vld [vmem:[%s12103_s30 + $0x58] sm:$0xff]   ;;  %v11885_v4 = vld [vmem:[%s14360_s1 + $0x140] sm:$0xff]  }
 0x340   : > { %11130 = vmatprep.subr.bf16.mxu1 %v11992_v16 }
 0x341   : > { %11087 = vmatmul.mubr.bf16.vlgmr.msra.gmra.mrb[96].mxu0 %v11847_v5  ;;  %v11886_v5 = vld [vmem:[%s14360_s1 + $0x180] sm:$0xff]  }
 0x342   : > { %11107 = vmatmul.mubr.bf16.vlgmr.msra.gmra.mrb[96].mxu1 %v11848_v26  ;;  %11111 = vmatpush3.bf16.msra.mxu0 %v11849_v6  ;;  %v11887_v26 = vld [vmem:[%s14360_s1 + $0x148] sm:$0xff]  }
 0x343   : > { %11131 = vmatpush3.bf16.msra.mxu1 %v11850_v7  ;;  %11112 = vmatprep.subr.bf16.mxu0 %v11992_v16  ;;  %v11888_v6 = vld [vmem:[%s14360_s1 + $0x188] sm:$0xff]   ;;  %v11889_v7 = vld [vmem:[%s14360_s1 + $0x150] sm:$0xff]  }
 0x344   : > { %11132 = vmatprep.subr.bf16.mxu1 %v11992_v16  ;;  %11126 = vmatprep.mubr.msk.bf16.mxu0 %vm11993_vm0, %v11992_v16 }
 0x345   : > { %11146 = vmatprep.mubr.msk.bf16.mxu1 %vm11993_vm0, %v11992_v16 }
 0x346   : > { %11113 = vmatpush3.bf16.msra.mxu0 %v11851_v8  ;;  %v11890_v8 = vld [vmem:[%s14360_s1 + $0x190] sm:$0xff]  }
 0x347   : > { %11133 = vmatpush3.bf16.msra.mxu1 %v11852_v9  ;;  %11114 = vmatprep.subr.bf16.mxu0 %v11992_v16  ;;  %v11891_v9 = vld [vmem:[%s14360_s1 + $0x158] sm:$0xff]  }
 0x348   : > { %11134 = vmatprep.subr.bf16.mxu1 %v11992_v16 }
 0x34a   : > { %11115 = vmatpush3.bf16.msra.mxu0 %v11853_v10  ;;  %v11892_v10 = vld [vmem:[%s14360_s1 + $0x198] sm:$0xff]  }
 0x34b   : > { %11135 = vmatpush3.bf16.msra.mxu1 %v11854_v11  ;;  %11116 = vmatprep.subr.bf16.mxu0 %v11992_v16  ;;  %v11893_v11 = vld [vmem:[%s14360_s1 + $0x160] sm:$0xff]  }
 0x34c   : > { %11136 = vmatprep.subr.bf16.mxu1 %v11992_v16 }
 0x34e   : > { %11117 = vmatpush3.bf16.msra.mxu0 %v11855_v12  ;;  %v11894_v12 = vld [vmem:[%s14360_s1 + $0x1a0] sm:$0xff]  }
 0x34f   : > { %11137 = vmatpush3.bf16.msra.mxu1 %v11856_v13  ;;  %11118 = vmatprep.subr.bf16.mxu0 %v11992_v16  ;;  %v11895_v13 = vld [vmem:[%s14360_s1 + $0x168] sm:$0xff]  }
 0x350   : > { %11138 = vmatprep.subr.bf16.mxu1 %v11992_v16 }
 0x352   : > { %11119 = vmatpush3.bf16.msra.mxu0 %v11857_v14  ;;  %v11896_v14 = vld [vmem:[%s14360_s1 + $0x1a8] sm:$0xff]  }
 0x353   : > { %11139 = vmatpush3.bf16.msra.mxu1 %v11858_v15  ;;  %11120 = vmatprep.subr.bf16.mxu0 %v11992_v16 }
 0x354   : > { %v4647_v19 = vpop.f32.mrb[72].mxu0  ;;  %11140 = vmatprep.subr.bf16.mxu1 %v11992_v16 }
 0x355   : > { %v4648_v20 = vadd.f32 %v4647_v19, %v13834_v52  ;;  %v10848_v21 = vpop.f32.mrb[73].mxu0  ;;  %v4760_v22 = vpop.f32.mrb[72].mxu1 }
 0x356   : > { %v4650_v23 = vpop.f32.mrb[74].mxu0  ;;  %11121 = vmatpush3.bf16.msra.mxu0 %v11859_v17  ;;  %v10868_v24 = vpop.f32.mrb[73].mxu1 }
 0x357   : > { %v4651_v27 = vadd.f32 %v4650_v23, %v13844_v61  ;;  %v4767_v28 = vadd.f32 %v4760_v22, %v4648_v20  ;;  %11141 = vmatpush3.bf16.msra.mxu1 %v11860_v18  ;;  %v10849_v29 = vpop.f32.mrb[75].mxu0  ;;  %v4763_v30 = vpop.f32.mrb[74].mxu1  ;;  %11122 = vmatprep.subr.bf16.mxu0 %v11992_v16  ;;  %v11880_v61 = vld [vmem:[%s14360_s1 + $0x130] sm:$0xff]  }
 0x358   : > { %11142 = vmatprep.subr.bf16.mxu1 %v11992_v16  ;;  %v10869_v32 = vpop.f32.mrb[75].mxu1  ;;  %v11897_v22 = vld [vmem:[%s14360_s1 + $0x170] sm:$0xff]  }
 0x359   : > { %v4768_v33 = vadd.f32 %v4763_v30, %v4651_v27  ;;  %v14064_v30 = vld [vmem:[%s14361_s2] ss:$0 sm:$0xff] }
 0x35a   : > { %11123 = vmatpush3.bf16.msra.mxu0 %v11861_v25 }
 0x35b   : > { %11143 = vmatpush3.bf16.msra.mxu1 %v11862_v31  ;;  %11124 = vmatprep.subr.bf16.mxu0 %v11992_v16 }
 0x35c   : > { %11144 = vmatprep.subr.bf16.mxu1 %v11992_v16 }
 0x35e   : > { %11125 = vmatpush3.bf16.msra.mxu0 %v11863_v34 }
 0x35f   : > { %11145 = vmatpush3.bf16.msra.mxu1 %v11864_v35  ;;  %11150 = vmatprep.subr.bf16.mxu0 %v11992_v16  ;;  %v11900_v35 = vld [vmem:[%s14360_s1 + $0x1b8] sm:$0xff]  }
 0x360   : > { %11170 = vmatprep.subr.bf16.mxu1 %v11992_v16 }
 0x361   : > { %11127 = vmatmul.mubr.bf16.vlgmr.msra.gmra.mrb[100].mxu0 %v11865_v36 }
 0x362   : > { %11147 = vmatmul.mubr.bf16.vlgmr.msra.gmra.mrb[100].mxu1 %v11866_v37  ;;  %11151 = vmatpush3.bf16.msra.mxu0 %v11867_v38  ;;  %v11901_v38 = vld [vmem:[%s12103_s30 + $0x60] sm:$0xff]  }
 0x363   : > { %11171 = vmatpush3.bf16.msra.mxu1 %v11868_v39  ;;  %11152 = vmatprep.subr.bf16.mxu0 %v11992_v16  ;;  %v11902_v39 = vld [vmem:[%s12103_s30 + $0x68] sm:$0xff]  }
 0x364   : > { %11172 = vmatprep.subr.bf16.mxu1 %v11992_v16  ;;  %11166 = vmatprep.mubr.msk.bf16.mxu0 %vm11993_vm0, %v11992_v16 }
 0x365   : > { %11186 = vmatprep.mubr.msk.bf16.mxu1 %vm11993_vm0, %v11992_v16 }
 0x366   : > { %11153 = vmatpush3.bf16.msra.mxu0 %v11869_v40  ;;  %v11903_v40 = vld [vmem:[%s14360_s1 + $0x40] sm:$0xff]  }
 0x367   : > { %11173 = vmatpush3.bf16.msra.mxu1 %v11870_v41  ;;  %11154 = vmatprep.subr.bf16.mxu0 %v11992_v16 }
 0x368   : > { %11174 = vmatprep.subr.bf16.mxu1 %v11992_v16 }
 0x36a   : > { %11155 = vmatpush3.bf16.msra.mxu0 %v11871_v42  ;;  %v11904_v42 = vld [vmem:[%s14360_s1] sm:$0xff]  }
 0x36b   : > { %11175 = vmatpush3.bf16.msra.mxu1 %v11872_v43  ;;  %11156 = vmatprep.subr.bf16.mxu0 %v11992_v16  ;;  %v11905_v43 = vld [vmem:[%s14360_s1 + $0x48] sm:$0xff]  }
 0x36c   : > { %11176 = vmatprep.subr.bf16.mxu1 %v11992_v16 }
 0x36e   : > { %11157 = vmatpush3.bf16.msra.mxu0 %v11873_v44  ;;  %v11906_v44 = vld [vmem:[%s14360_s1 + $0x8] sm:$0xff]  }
 0x36f   : > { %11177 = vmatpush3.bf16.msra.mxu1 %v11874_v45  ;;  %11158 = vmatprep.subr.bf16.mxu0 %v11992_v16  ;;  %v11907_v45 = vld [vmem:[%s14360_s1 + $0x50] sm:$0xff]  }
 0x370   : > { %11178 = vmatprep.subr.bf16.mxu1 %v11992_v16 }
 0x372   : > { %11159 = vmatpush3.bf16.msra.mxu0 %v11875_v53  ;;  %v11908_v53 = vld [vmem:[%s14360_s1 + $0x10] sm:$0xff]  }
 0x373   : > { %11179 = vmatpush3.bf16.msra.mxu1 %v11876_v46  ;;  %11160 = vmatprep.subr.bf16.mxu0 %v11992_v16  ;;  %v11909_v46 = vld [vmem:[%s14360_s1 + $0x58] sm:$0xff]  }
 0x374   : > { %v4875_v49 = vpop.f32.mrb[76].mxu0  ;;  %11180 = vmatprep.subr.bf16.mxu1 %v11992_v16 }
 0x375   : > { %v4882_v50 = vadd.f32 %v4875_v49, %v4767_v28  ;;  %v10888_v51 = vpop.f32.mrb[77].mxu0  ;;  %v4990_v52 = vpop.f32.mrb[76].mxu1  ;;  %v11898_v28 = vld [vmem:[%s14360_s1 + $0x1b0] sm:$0xff]   ;;  %v11912_v49 = vld [vmem:[%s14360_s1 + $0x20] sm:$0xff]  }
 0x376   : > { %v4878_v54 = vpop.f32.mrb[78].mxu0  ;;  %11161 = vmatpush3.bf16.msra.mxu0 %v11877_v47  ;;  %v10908_v55 = vpop.f32.mrb[77].mxu1  ;;  %v11910_v47 = vld [vmem:[%s14360_s1 + $0x18] sm:$0xff]   ;;  %v11914_v51 = vld [vmem:[%s14360_s1 + $0x28] sm:$0xff]  }
 0x377   : > { %v4883_v57 = vadd.f32 %v4878_v54, %v4768_v33  ;;  %v4997_v58 = vadd.f32 %v4990_v52, %v4882_v50  ;;  %11181 = vmatpush3.bf16.msra.mxu1 %v11878_v48  ;;  %v10889_v59 = vpop.f32.mrb[79].mxu0  ;;  %v4993_v60 = vpop.f32.mrb[78].mxu1  ;;  %11162 = vmatprep.subr.bf16.mxu0 %v11992_v16  ;;  %v11899_v33 = vld [vmem:[%s14360_s1 + $0x178] sm:$0xff]   ;;  %v11911_v48 = vld [vmem:[%s14360_s1 + $0x60] sm:$0xff]   ;;  %v11913_v50 = vld [vmem:[%s14360_s1 + $0x68] sm:$0xff]  }
 0x378   : > { %11182 = vmatprep.subr.bf16.mxu1 %v11992_v16  ;;  %v10909_v62 = vpop.f32.mrb[79].mxu1  ;;  %v11915_v59 = vld [vmem:[%s14360_s1 + $0x70] sm:$0xff]  }
 0x379   : > { %v4998_v63 = vadd.f32 %v4993_v60, %v4883_v57  ;;  %v11916_v62 = vld [vmem:[%s14360_s1 + $0x30] sm:$0xff]  }
 0x37a   : > { %11163 = vmatpush3.bf16.msra.mxu0 %v11879_v56 }
 0x37b   : > { %11183 = vmatpush3.bf16.msra.mxu1 %v11880_v61  ;;  %11164 = vmatprep.subr.bf16.mxu0 %v11992_v16 }
 0x37c   : > { %11184 = vmatprep.subr.bf16.mxu1 %v11992_v16 }
 0x37e   : > { %11165 = vmatpush3.bf16.msra.mxu0 %v11881_v0 }
 0x37f   : > { %11185 = vmatpush3.bf16.msra.mxu1 %v11882_v1  ;;  %11190 = vmatprep.subr.bf16.mxu0 %v11992_v16  ;;  %v11917_v1 = vld [vmem:[%s14360_s1 + $0x78] sm:$0xff]  }
 0x380   : > { %11210 = vmatprep.subr.bf16.mxu1 %v11992_v16 }
 0x381   : > { %11167 = vmatmul.mubr.bf16.vlgmr.msra.gmra.mrb[104].mxu0 %v11883_v2  ;;  %v11918_v2 = vld [vmem:[%s14360_s1 + $0x38] sm:$0xff]  }
 0x382   : > { %11187 = vmatmul.mubr.bf16.vlgmr.msra.gmra.mrb[104].mxu1 %v11884_v3  ;;  %11191 = vmatpush3.bf16.msra.mxu0 %v11885_v4  ;;  %v11919_v3 = vld [vmem:[%s12103_s30 + $0x48] sm:$0xff]   ;;  %v11920_v4 = vld [vmem:[%s12103_s30 + $0x40] sm:$0xff]  }
 0x383   : > { %11211 = vmatpush3.bf16.msra.mxu1 %v11886_v5  ;;  %11192 = vmatprep.subr.bf16.mxu0 %v11992_v16  ;;  %v11921_v5 = vld [vmem:[%s14360_s1 + $0x80] sm:$0xff]  }
 0x384   : > { %11212 = vmatprep.subr.bf16.mxu1 %v11992_v16  ;;  %11206 = vmatprep.mubr.msk.bf16.mxu0 %vm11993_vm0, %v11992_v16 }
 0x385   : > { %11226 = vmatprep.mubr.msk.bf16.mxu1 %vm11993_vm0, %v11992_v16 }
 0x386   : > { %11193 = vmatpush3.bf16.msra.mxu0 %v11887_v26  ;;  %v11922_v26 = vld [vmem:[%s14360_s1 + $0xc0] sm:$0xff]  }
 0x387   : > { %11213 = vmatpush3.bf16.msra.mxu1 %v11888_v6  ;;  %11194 = vmatprep.subr.bf16.mxu0 %v11992_v16  ;;  %v11923_v6 = vld [vmem:[%s14360_s1 + $0x88] sm:$0xff]  }
 0x388   : > { %11214 = vmatprep.subr.bf16.mxu1 %v11992_v16 }
 0x38a   : > { %11195 = vmatpush3.bf16.msra.mxu0 %v11889_v7  ;;  %v11924_v7 = vld [vmem:[%s14360_s1 + $0xc8] sm:$0xff]  }
 0x38b   : > { %11215 = vmatpush3.bf16.msra.mxu1 %v11890_v8  ;;  %11196 = vmatprep.subr.bf16.mxu0 %v11992_v16  ;;  %v11925_v8 = vld [vmem:[%s14360_s1 + $0x90] sm:$0xff]  }
 0x38c   : > { %11216 = vmatprep.subr.bf16.mxu1 %v11992_v16 }
 0x38e   : > { %11197 = vmatpush3.bf16.msra.mxu0 %v11891_v9  ;;  %v11926_v9 = vld [vmem:[%s14360_s1 + $0xd0] sm:$0xff]  }
 0x38f   : > { %11217 = vmatpush3.bf16.msra.mxu1 %v11892_v10  ;;  %11198 = vmatprep.subr.bf16.mxu0 %v11992_v16  ;;  %v11927_v10 = vld [vmem:[%s14360_s1 + $0x98] sm:$0xff]  }
 0x390   : > { %11218 = vmatprep.subr.bf16.mxu1 %v11992_v16 }
 0x392   : > { %11199 = vmatpush3.bf16.msra.mxu0 %v11893_v11  ;;  %v11928_v11 = vld [vmem:[%s14360_s1 + $0xd8] sm:$0xff]  }
 0x393   : > { %11219 = vmatpush3.bf16.msra.mxu1 %v11894_v12  ;;  %11200 = vmatprep.subr.bf16.mxu0 %v11992_v16  ;;  %v11929_v12 = vld [vmem:[%s14360_s1 + $0xa0] sm:$0xff]  }
 0x394   : > { %v5105_v15 = vpop.f32.mrb[80].mxu0  ;;  %11220 = vmatprep.subr.bf16.mxu1 %v11992_v16 }
 0x395   : > { %v5112_v17 = vadd.f32 %v5105_v15, %v4997_v58  ;;  %v10928_v18 = vpop.f32.mrb[81].mxu0  ;;  %v5221_v19 = vpop.f32.mrb[80].mxu1  ;;  %v11932_v15 = vld [vmem:[%s14360_s1 + $0xe8] sm:$0xff]  }
 0x396   : > { %v5108_v20 = vpop.f32.mrb[82].mxu0  ;;  %11201 = vmatpush3.bf16.msra.mxu0 %v11895_v13  ;;  %v10948_v21 = vpop.f32.mrb[81].mxu1  ;;  %v11930_v13 = vld [vmem:[%s14360_s1 + $0xe0] sm:$0xff]  }
 0x397   : > { %v5113_v23 = vadd.f32 %v5108_v20, %v4998_v63  ;;  %v5228_v24 = vadd.f32 %v5221_v19, %v5112_v17  ;;  %11221 = vmatpush3.bf16.msra.mxu1 %v11896_v14  ;;  %v10929_v25 = vpop.f32.mrb[83].mxu0  ;;  %v5224_v27 = vpop.f32.mrb[82].mxu1  ;;  %11202 = vmatprep.subr.bf16.mxu0 %v11992_v16  ;;  %v11931_v14 = vld [vmem:[%s14360_s1 + $0xa8] sm:$0xff]  }
 0x398   : > { %11222 = vmatprep.subr.bf16.mxu1 %v11992_v16  ;;  %v10949_v29 = vpop.f32.mrb[83].mxu1 }
 0x399   : > { %v5230_v31 = vadd.f32 %v14064_v30, %v5228_v24  ;;  %v5229_v32 = vadd.f32 %v5224_v27, %v5113_v23  ;;  %v11933_v23 = vld [vmem:[%s14360_s1 + $0xb0] sm:$0xff]  }
 0x39a   : > { %11203 = vmatpush3.bf16.msra.mxu0 %v11897_v22  ;;  %v11934_v29 = vld [vmem:[%s14360_s1 + $0xf0] sm:$0xff]  }
 0x39b   : > { %v5231_v34 = vadd.f32 %v14064_v30, %v5229_v32  ;;  %11223 = vmatpush3.bf16.msra.mxu1 %v11898_v28  ;;  %11204 = vmatprep.subr.bf16.mxu0 %v11992_v16  ;;  %v5232_v36 = vmax.f32 %v5230_v31, 0.0 }
 0x39c   : > { %11224 = vmatprep.subr.bf16.mxu1 %v11992_v16 }
 0x39d   : > { %v5233_v37 = vmax.f32 %v5231_v34, 0.0  ;;  %v11936_v34 = vld [vmem:[%s14360_s1 + $0xf8] sm:$0xff]  }
 0x39e   : > { %11205 = vmatpush3.bf16.msra.mxu0 %v11899_v33  ;;  %v11935_v33 = vld [vmem:[%s14360_s1 + $0xb8] sm:$0xff]  }
 0x39f   : > { %v9518_v41 = vpack.c.bf16 %v5233_v37, %v5232_v36  ;;  %11225 = vmatpush3.bf16.msra.mxu1 %v11900_v35  ;;  %11230 = vmatprep.subr.bf16.mxu0 %v11992_v16  ;;  %v11937_v35 = vld [vmem:[%s12103_s30 + $0x50] sm:$0xff]   ;;  %v11938_v36 = vld [vmem:[%s14360_s1 + $0x100] sm:$0xff]   ;;  %v11939_v37 = vld [vmem:[%s12103_s30 + $0x58] sm:$0xff]  }
 0x3a0   : > { %11250 = vmatprep.subr.bf16.mxu1 %v11992_v16 }
 0x3a1   : > { %9539 = vst [vmem:[%s12850_s23 + $0x28] sm:$0xff] %v9518_v41   ;;  %11207 = vmatmul.mubr.bf16.vlgmr.msra.gmra.mrb[108].mxu0 %v11901_v38  ;;  %v11940_v38 = vld [vmem:[%s14360_s1 + $0x140] sm:$0xff]   ;;  %v11943_v41 = vld [vmem:[%s14360_s1 + $0x110] sm:$0xff]  }
 0x3a2   : > { %11227 = vmatmul.mubr.bf16.vlgmr.msra.gmra.mrb[108].mxu1 %v11902_v39  ;;  %11231 = vmatpush3.bf16.msra.mxu0 %v11903_v40  ;;  %v11941_v39 = vld [vmem:[%s14360_s1 + $0x108] sm:$0xff]  }
 0x3a3   : > { %11251 = vmatpush3.bf16.msra.mxu1 %v11904_v42  ;;  %11232 = vmatprep.subr.bf16.mxu0 %v11992_v16  ;;  %v11942_v40 = vld [vmem:[%s14360_s1 + $0x148] sm:$0xff]   ;;  %v11944_v42 = vld [vmem:[%s14360_s1 + $0x150] sm:$0xff]  }
 0x3a4   : > { %11252 = vmatprep.subr.bf16.mxu1 %v11992_v16  ;;  %11246 = vmatprep.mubr.msk.bf16.mxu0 %vm11993_vm0, %v11992_v16 }
 0x3a5   : > { %11266 = vmatprep.mubr.msk.bf16.mxu1 %vm11993_vm0, %v11992_v16 }
 0x3a6   : > { %11233 = vmatpush3.bf16.msra.mxu0 %v11905_v43  ;;  %v11945_v43 = vld [vmem:[%s14360_s1 + $0x118] sm:$0xff]  }
 0x3a7   : > { %11253 = vmatpush3.bf16.msra.mxu1 %v11906_v44  ;;  %11234 = vmatprep.subr.bf16.mxu0 %v11992_v16  ;;  %v11946_v44 = vld [vmem:[%s14360_s1 + $0x158] sm:$0xff]  }
 0x3a8   : > { %11254 = vmatprep.subr.bf16.mxu1 %v11992_v16 }
 0x3aa   : > { %11235 = vmatpush3.bf16.msra.mxu0 %v11907_v45  ;;  %v11947_v45 = vld [vmem:[%s14360_s1 + $0x120] sm:$0xff]  }
 0x3ab   : > { %11255 = vmatpush3.bf16.msra.mxu1 %v11908_v53  ;;  %11236 = vmatprep.subr.bf16.mxu0 %v11992_v16  ;;  %v11948_v53 = vld [vmem:[%s14360_s1 + $0x160] sm:$0xff]  }
 0x3ac   : > { %11256 = vmatprep.subr.bf16.mxu1 %v11992_v16 }
 0x3ae   : > { %11237 = vmatpush3.bf16.msra.mxu0 %v11909_v46  ;;  %v11949_v46 = vld [vmem:[%s14360_s1 + $0x128] sm:$0xff]  }
 0x3af   : > { %11257 = vmatpush3.bf16.msra.mxu1 %v11910_v47  ;;  %11238 = vmatprep.subr.bf16.mxu0 %v11992_v16  ;;  %v11950_v47 = vld [vmem:[%s14360_s1 + $0x168] sm:$0xff]  }
 0x3b0   : > { %11258 = vmatprep.subr.bf16.mxu1 %v11992_v16 }
 0x3b2   : > { %11239 = vmatpush3.bf16.msra.mxu0 %v11911_v48 }
 0x3b3   : > { %11259 = vmatpush3.bf16.msra.mxu1 %v11912_v49  ;;  %11240 = vmatprep.subr.bf16.mxu0 %v11992_v16 }
 0x3b4   : > { %v5369_v52 = vpop.f32.mrb[84].mxu0  ;;  %11260 = vmatprep.subr.bf16.mxu1 %v11992_v16 }
 0x3b5   : > { %v5464_v54 = vpop.f32.mrb[84].mxu1  ;;  %v10968_v55 = vpop.f32.mrb[85].mxu0 }
 0x3b6   : > { %v5465_v56 = vadd.f32 %v5464_v54, %v5369_v52  ;;  %v10988_v57 = vpop.f32.mrb[85].mxu1  ;;  %v5372_v58 = vpop.f32.mrb[86].mxu0  ;;  %11241 = vmatpush3.bf16.msra.mxu0 %v11913_v50  ;;  %v11951_v55 = vld [vmem:[%s14360_s1 + $0x130] sm:$0xff]  }
 0x3b7   : > { %v5467_v60 = vpop.f32.mrb[86].mxu1  ;;  %11261 = vmatpush3.bf16.msra.mxu1 %v11914_v51  ;;  %v10969_v61 = vpop.f32.mrb[87].mxu0  ;;  %11242 = vmatprep.subr.bf16.mxu0 %v11992_v16 }
 0x3b8   : > { %v5468_v63 = vadd.f32 %v5467_v60, %v5372_v58  ;;  %11262 = vmatprep.subr.bf16.mxu1 %v11992_v16  ;;  %v10989_v0 = vpop.f32.mrb[87].mxu1  ;;  %v11952_v60 = vld [vmem:[%s14360_s1 + $0x170] sm:$0xff]  }
 0x3b9   : > { %v11954_v0 = vld [vmem:[%s14360_s1 + $0x178] sm:$0xff]  }
 0x3ba   : > { %11243 = vmatpush3.bf16.msra.mxu0 %v11915_v59 }
 0x3bb   : > { %11263 = vmatpush3.bf16.msra.mxu1 %v11916_v62  ;;  %11244 = vmatprep.subr.bf16.mxu0 %v11992_v16 }
 0x3bc   : > { %11264 = vmatprep.subr.bf16.mxu1 %v11992_v16 }
 0x3be   : > { %11245 = vmatpush3.bf16.msra.mxu0 %v11917_v1  ;;  %v11955_v1 = vld [vmem:[%s12103_s30 + $0x60] sm:$0xff]  }
 0x3bf   : > { %11265 = vmatpush3.bf16.msra.mxu1 %v11918_v2  ;;  %11270 = vmatprep.subr.bf16.mxu0 %v11992_v16  ;;  %v11956_v2 = vld [vmem:[%s14360_s1 + $0x180] sm:$0xff]  }
 0x3c0   : > { %11290 = vmatprep.subr.bf16.mxu1 %v11992_v16 }
 0x3c1   : > { %11247 = vmatmul.mubr.bf16.vlgmr.msra.gmra.mrb[112].mxu0 %v11919_v3  ;;  %v11957_v3 = vld [vmem:[%s12103_s30 + $0x68] sm:$0xff]  }
 0x3c2   : > { %11267 = vmatmul.mubr.bf16.vlgmr.msra.gmra.mrb[112].mxu1 %v11920_v4  ;;  %11271 = vmatpush3.bf16.msra.mxu0 %v11921_v5  ;;  %v11958_v4 = vld [vmem:[%s14360_s1 + $0x188] sm:$0xff]   ;;  %v11959_v5 = vld [vmem:[%s14360_s1 + $0x190] sm:$0xff]  }
 0x3c3   : > { %11291 = vmatpush3.bf16.msra.mxu1 %v11922_v26  ;;  %11272 = vmatprep.subr.bf16.mxu0 %v11992_v16  ;;  %v11960_v26 = vld [vmem:[%s14360_s1 + $0x198] sm:$0xff]  }
 0x3c4   : > { %11292 = vmatprep.subr.bf16.mxu1 %v11992_v16  ;;  %11286 = vmatprep.mubr.msk.bf16.mxu0 %vm11993_vm0, %v11992_v16 }
 0x3c5   : > { %11306 = vmatprep.mubr.msk.bf16.mxu1 %vm11993_vm0, %v11992_v16 }
 0x3c6   : > { %11273 = vmatpush3.bf16.msra.mxu0 %v11923_v6  ;;  %v11961_v6 = vld [vmem:[%s14360_s1 + $0x1a0] sm:$0xff]  }
 0x3c7   : > { %11293 = vmatpush3.bf16.msra.mxu1 %v11924_v7  ;;  %11274 = vmatprep.subr.bf16.mxu0 %v11992_v16  ;;  %v11962_v7 = vld [vmem:[%s14360_s1 + $0x1a8] sm:$0xff]  }
 0x3c8   : > { %11294 = vmatprep.subr.bf16.mxu1 %v11992_v16 }
 0x3ca   : > { %11275 = vmatpush3.bf16.msra.mxu0 %v11925_v8 }
 0x3cb   : > { %11295 = vmatpush3.bf16.msra.mxu1 %v11926_v9  ;;  %11276 = vmatprep.subr.bf16.mxu0 %v11992_v16 }
 0x3cc   : > { %11296 = vmatprep.subr.bf16.mxu1 %v11992_v16 }
 0x3ce   : > { %11277 = vmatpush3.bf16.msra.mxu0 %v11927_v10 }
 0x3cf   : > { %11297 = vmatpush3.bf16.msra.mxu1 %v11928_v11  ;;  %11278 = vmatprep.subr.bf16.mxu0 %v11992_v16 }
 0x3d0   : > { %11298 = vmatprep.subr.bf16.mxu1 %v11992_v16 }
 0x3d2   : > { %11279 = vmatpush3.bf16.msra.mxu0 %v11929_v12 }
 0x3d3   : > { %11299 = vmatpush3.bf16.msra.mxu1 %v11930_v13  ;;  %11280 = vmatprep.subr.bf16.mxu0 %v11992_v16  ;;  %v11963_v13 = vld [vmem:[%s14360_s1 + $0x1b0] sm:$0xff]  }
 0x3d4   : > { %v5577_v17 = vpop.f32.mrb[88].mxu0  ;;  %11300 = vmatprep.subr.bf16.mxu1 %v11992_v16 }
 0x3d5   : > { %v5584_v18 = vadd.f32 %v5577_v17, %v5465_v56  ;;  %v11008_v19 = vpop.f32.mrb[89].mxu0  ;;  %v5692_v20 = vpop.f32.mrb[88].mxu1 }
 0x3d6   : > { %v5580_v21 = vpop.f32.mrb[90].mxu0  ;;  %11281 = vmatpush3.bf16.msra.mxu0 %v11931_v14  ;;  %v11028_v22 = vpop.f32.mrb[89].mxu1 }
 0x3d7   : > { %v5585_v24 = vadd.f32 %v5580_v21, %v5468_v63  ;;  %v5699_v25 = vadd.f32 %v5692_v20, %v5584_v18  ;;  %v11009_v27 = vpop.f32.mrb[91].mxu0  ;;  %v5695_v28 = vpop.f32.mrb[90].mxu1  ;;  %11301 = vmatpush3.bf16.msra.mxu1 %v11932_v15  ;;  %11282 = vmatprep.subr.bf16.mxu0 %v11992_v16  ;;  %v11953_v63 = vld [vmem:[%s14360_s1 + $0x138] sm:$0xff]  }
 0x3d8   : > { %11302 = vmatprep.subr.bf16.mxu1 %v11992_v16  ;;  %v11029_v31 = vpop.f32.mrb[91].mxu1  ;;  %v11964_v22 = vld [vmem:[%s14360_s1 + $0x1b8] sm:$0xff]   ;;  %v11965_v27 = vld [vmem:[%s12103_s30 + $0x70] sm:$0xff]   ;;  %s9489_s30 = sshll.u32 (%p12044_p5), %s7869_s15, 3 }
 0x3d9   : > { %v5700_v32 = vadd.f32 %v5695_v28, %v5585_v24  ;;  %s7705_s20 = scalar_lea.vmem (%p12044_p5), %s14362_s3, %s9489_s30 }
 0x3da   : > { %11283 = vmatpush3.bf16.msra.mxu0 %v11933_v23 }
 0x3db   : > { %11303 = vmatpush3.bf16.msra.mxu1 %v11934_v29  ;;  %11284 = vmatprep.subr.bf16.mxu0 %v11992_v16 }
 0x3dc   : > { %11304 = vmatprep.subr.bf16.mxu1 %v11992_v16 }
 0x3de   : > { %11285 = vmatpush3.bf16.msra.mxu0 %v11935_v33 }
 0x3df   : > { %11305 = vmatpush3.bf16.msra.mxu1 %v11936_v34  ;;  %11310 = vmatprep.subr.bf16.mxu0 %v11992_v16 }
 0x3e0   : > { %11330 = vmatprep.subr.bf16.mxu1 %v11992_v16 }
 0x3e1   : > { %11287 = vmatmul.mubr.bf16.vlgmr.msra.gmra.mrb[116].mxu0 %v11937_v35 }
 0x3e2   : > { %11311 = vmatpush3.bf16.msra.mxu0 %v11938_v36  ;;  %11307 = vmatmul.mubr.bf16.vlgmr.msra.gmra.mrb[116].mxu1 %v11939_v37 }
 0x3e3   : > { %11331 = vmatpush3.bf16.msra.mxu1 %v11940_v38  ;;  %11312 = vmatprep.subr.bf16.mxu0 %v11992_v16 }
 0x3e4   : > { %11332 = vmatprep.subr.bf16.mxu1 %v11992_v16  ;;  %11326 = vmatprep.mubr.msk.bf16.mxu0 %vm11993_vm0, %v11992_v16 }
 0x3e5   : > { %11346 = vmatprep.mubr.msk.bf16.mxu1 %vm11993_vm0, %v11992_v16 }
 0x3e6   : > { %11313 = vmatpush3.bf16.msra.mxu0 %v11941_v39 }
 0x3e7   : > { %11333 = vmatpush3.bf16.msra.mxu1 %v11942_v40  ;;  %11314 = vmatprep.subr.bf16.mxu0 %v11992_v16 }
 0x3e8   : > { %11334 = vmatprep.subr.bf16.mxu1 %v11992_v16 }
 0x3ea   : > { %11315 = vmatpush3.bf16.msra.mxu0 %v11943_v41 }
 0x3eb   : > { %11335 = vmatpush3.bf16.msra.mxu1 %v11944_v42  ;;  %11316 = vmatprep.subr.bf16.mxu0 %v11992_v16 }
 0x3ec   : > { %11336 = vmatprep.subr.bf16.mxu1 %v11992_v16 }
 0x3ee   : > { %11317 = vmatpush3.bf16.msra.mxu0 %v11945_v43 }
 0x3ef   : > { %11337 = vmatpush3.bf16.msra.mxu1 %v11946_v44  ;;  %11318 = vmatprep.subr.bf16.mxu0 %v11992_v16 }
 0x3f0   : > { %11338 = vmatprep.subr.bf16.mxu1 %v11992_v16 }
 0x3f2   : > { %11319 = vmatpush3.bf16.msra.mxu0 %v11947_v45 }
 0x3f3   : > { %11339 = vmatpush3.bf16.msra.mxu1 %v11948_v53  ;;  %11320 = vmatprep.subr.bf16.mxu0 %v11992_v16 }
 0x3f4   : > { %v5807_v48 = vpop.f32.mrb[92].mxu0  ;;  %11340 = vmatprep.subr.bf16.mxu1 %v11992_v16 }
 0x3f5   : > { %v5814_v49 = vadd.f32 %v5807_v48, %v5699_v25  ;;  %v11048_v50 = vpop.f32.mrb[93].mxu0  ;;  %v5922_v51 = vpop.f32.mrb[92].mxu1 }
 0x3f6   : > { %v5810_v52 = vpop.f32.mrb[94].mxu0  ;;  %11321 = vmatpush3.bf16.msra.mxu0 %v11949_v46  ;;  %v11068_v54 = vpop.f32.mrb[93].mxu1 }
 0x3f7   : > { %v5815_v56 = vadd.f32 %v5810_v52, %v5700_v32  ;;  %v5929_v57 = vadd.f32 %v5922_v51, %v5814_v49  ;;  %v11049_v58 = vpop.f32.mrb[95].mxu0  ;;  %v5925_v59 = vpop.f32.mrb[94].mxu1  ;;  %11341 = vmatpush3.bf16.msra.mxu1 %v11950_v47  ;;  %11322 = vmatprep.subr.bf16.mxu0 %v11992_v16 }
 0x3f8   : > { %11342 = vmatprep.subr.bf16.mxu1 %v11992_v16  ;;  %v11069_v61 = vpop.f32.mrb[95].mxu1 }
 0x3f9   : > { %v5930_v62 = vadd.f32 %v5925_v59, %v5815_v56 }
 0x3fa   : > { %11323 = vmatpush3.bf16.msra.mxu0 %v11951_v55 }
 0x3fb   : > { %11343 = vmatpush3.bf16.msra.mxu1 %v11952_v60  ;;  %11324 = vmatprep.subr.bf16.mxu0 %v11992_v16 }
 0x3fc   : > { %11344 = vmatprep.subr.bf16.mxu1 %v11992_v16 }
 0x3fe   : > { %11325 = vmatpush3.bf16.msra.mxu0 %v11953_v63 }
 0x3ff   : > { %11345 = vmatpush3.bf16.msra.mxu1 %v11954_v0  ;;  %11350 = vmatprep.subr.bf16.mxu0 %v11992_v16 }
 0x401   : > { %11327 = vmatmul.mubr.bf16.vlgmr.msra.gmra.mrb[120].mxu0 %v11955_v1 }
 0x402   : > { %11351 = vmatpush3.bf16.msra.mxu0 %v11956_v2  ;;  %11347 = vmatmul.mubr.bf16.vlgmr.msra.gmra.mrb[120].mxu1 %v11957_v3 }
 0x403   : > { %11352 = vmatprep.subr.bf16.mxu0 %v11992_v16  ;;  %11366 = vmatprep.mubr.msk.bf16.mxu0 %vm11993_vm0, %v11992_v16 }
 0x406   : > { %11353 = vmatpush3.bf16.msra.mxu0 %v11958_v4 }
 0x407   : > { %11354 = vmatprep.subr.bf16.mxu0 %v11992_v16 }
 0x40a   : > { %11355 = vmatpush3.bf16.msra.mxu0 %v11959_v5 }
 0x40b   : > { %11356 = vmatprep.subr.bf16.mxu0 %v11992_v16 }
 0x40e   : > { %11357 = vmatpush3.bf16.msra.mxu0 %v11960_v26 }
 0x40f   : > { %11358 = vmatprep.subr.bf16.mxu0 %v11992_v16 }
 0x412   : > { %11359 = vmatpush3.bf16.msra.mxu0 %v11961_v6 }
 0x413   : > { %11360 = vmatprep.subr.bf16.mxu0 %v11992_v16 }
 0x414   : > { %v6038_v8 = vpop.f32.mrb[96].mxu0 }
 0x415   : > { %v6045_v9 = vadd.f32 %v6038_v8, %v5929_v57  ;;  %v11088_v10 = vpop.f32.mrb[97].mxu0  ;;  %v6186_v11 = vpop.f32.mrb[96].mxu1 }
 0x416   : > { %v6041_v12 = vpop.f32.mrb[98].mxu0  ;;  %11361 = vmatpush3.bf16.msra.mxu0 %v11962_v7  ;;  %v11108_v14 = vpop.f32.mrb[97].mxu1 }
 0x417   : > { %v6047_v15 = vadd.f32 %v14064_v30, %v6045_v9  ;;  %v6046_v17 = vadd.f32 %v6041_v12, %v5930_v62  ;;  %v11089_v18 = vpop.f32.mrb[99].mxu0  ;;  %11362 = vmatprep.subr.bf16.mxu0 %v11992_v16  ;;  %v6189_v19 = vpop.f32.mrb[98].mxu1 }
 0x418   : > { %v11109_v20 = vpop.f32.mrb[99].mxu1 }
 0x419   : > { %v6048_v21 = vadd.f32 %v14064_v30, %v6046_v17  ;;  %v6049_v23 = vmax.f32 %v6047_v15, 0.0 }
 0x41a   : > { %11363 = vmatpush3.bf16.msra.mxu0 %v11963_v13 }
 0x41b   : > { %v6050_v24 = vmax.f32 %v6048_v21, 0.0  ;;  %11364 = vmatprep.subr.bf16.mxu0 %v11992_v16 }
 0x41d   : > { %v9523_v25 = vpack.c.bf16 %v6050_v24, %v6049_v23 }
 0x41e   : > { %11365 = vmatpush3.bf16.msra.mxu0 %v11964_v22 }
 0x41f   : > { %9540 = vst [vmem:[%s12850_s23 + $0x30] sm:$0xff] %v9523_v25  }
 0x421   : > { %11367 = vmatmul.mubr.bf16.vlgmr.msra.gmra.mrb[124].mxu0 %v11965_v27 }
 0x434   : > { %v6281_v28 = vpop.f32.mrb[100].mxu0 }
 0x435   : > { %v6282_v29 = vadd.f32 %v6281_v28, %v6186_v11  ;;  %v11128_v31 = vpop.f32.mrb[101].mxu0  ;;  %v6394_v32 = vpop.f32.mrb[100].mxu1 }
 0x436   : > { %v6284_v33 = vpop.f32.mrb[102].mxu0  ;;  %v11148_v34 = vpop.f32.mrb[101].mxu1 }
 0x437   : > { %v6285_v35 = vadd.f32 %v6284_v33, %v6189_v19  ;;  %v6401_v36 = vadd.f32 %v6394_v32, %v6282_v29  ;;  %v11129_v37 = vpop.f32.mrb[103].mxu0  ;;  %v6397_v38 = vpop.f32.mrb[102].mxu1 }
 0x438   : > { %v11149_v39 = vpop.f32.mrb[103].mxu1 }
 0x439   : > { %v6402_v40 = vadd.f32 %v6397_v38, %v6285_v35 }
 0x454   : > { %v6509_v41 = vpop.f32.mrb[104].mxu0 }
 0x455   : > { %v6516_v42 = vadd.f32 %v6509_v41, %v6401_v36  ;;  %v11168_v16 = vpop.f32.mrb[105].mxu0  ;;  %v6624_v43 = vpop.f32.mrb[104].mxu1 }
 0x456   : > { %v6512_v44 = vpop.f32.mrb[106].mxu0  ;;  %v11188_v45 = vpop.f32.mrb[105].mxu1 }
 0x457   : > { %v6517_v53 = vadd.f32 %v6512_v44, %v6402_v40  ;;  %v6631_v46 = vadd.f32 %v6624_v43, %v6516_v42  ;;  %v11169_v47 = vpop.f32.mrb[107].mxu0  ;;  %v6627_v48 = vpop.f32.mrb[106].mxu1 }
 0x458   : > { %v11189_v49 = vpop.f32.mrb[107].mxu1 }
 0x459   : > { %v6632_v50 = vadd.f32 %v6627_v48, %v6517_v53 }
 0x474   : > { %v6739_v51 = vpop.f32.mrb[108].mxu0 }
 0x475   : > { %v6746_v52 = vadd.f32 %v6739_v51, %v6631_v46  ;;  %v11208_v54 = vpop.f32.mrb[109].mxu0  ;;  %v6855_v55 = vpop.f32.mrb[108].mxu1  ;;  %v7729_v51 = vld [vmem:[%s12850_s23 + $0x10] sm:$0xff] (%p12044_p5)  }
 0x476   : > { %v6742_v56 = vpop.f32.mrb[110].mxu0  ;;  %v11228_v57 = vpop.f32.mrb[109].mxu1  ;;  %v7737_v54 = vld [vmem:[%s12850_s23 + $0x20] sm:$0xff] (%p12044_p5)   ;;  %7730 = vst [vmem:[%s7705_s20 + $0x20] sm:$0xff] (%p12044_p5), %v7729_v51  }
 0x477   : > { %v6747_v58 = vadd.f32 %v6742_v56, %v6632_v50  ;;  %v6862_v59 = vadd.f32 %v6855_v55, %v6746_v52  ;;  %v11209_v60 = vpop.f32.mrb[111].mxu0  ;;  %v6858_v61 = vpop.f32.mrb[110].mxu1  ;;  %v7725_v50 = vld [vmem:[%s12850_s23 + $0x8] sm:$0xff] (%p12044_p5)   ;;  %v7733_v52 = vld [vmem:[%s12850_s23 + $0x18] sm:$0xff] (%p12044_p5)   ;;  %7738 = vst [vmem:[%s7705_s20 + $0x40] sm:$0xff] (%p12044_p5), %v7737_v54   ;;  %v7745_v56 = vld [vmem:[%s12850_s23 + $0x30] sm:$0xff] (%p12044_p5)  }
 0x478   : > { %v11229_v62 = vpop.f32.mrb[111].mxu1  ;;  %v7741_v55 = vld [vmem:[%s12850_s23 + $0x28] sm:$0xff] (%p12044_p5)   ;;  %7726 = vst [vmem:[%s7705_s20 + $0x10] sm:$0xff] (%p12044_p5), %v7725_v50   ;;  %7734 = vst [vmem:[%s7705_s20 + $0x30] sm:$0xff] (%p12044_p5), %v7733_v52  }
 0x479   : > { %v6864_v63 = vadd.f32 %v14064_v30, %v6862_v59  ;;  %v6863_v0 = vadd.f32 %v6858_v61, %v6747_v58  ;;  %7742 = vst [vmem:[%s7705_s20 + $0x50] sm:$0xff] (%p12044_p5), %v7741_v55   ;;  %7746 = vst [vmem:[%s7705_s20 + $0x60] sm:$0xff] (%p12044_p5), %v7745_v56  }
 0x47b   : > { %v6865_v1 = vadd.f32 %v14064_v30, %v6863_v0  ;;  %v6866_v2 = vmax.f32 %v6864_v63, 0.0 }
 0x47d   : > { %v6867_v3 = vmax.f32 %v6865_v1, 0.0 }
 0x47f   : > { %v9528_v4 = vpack.c.bf16 %v6867_v3, %v6866_v2 }
 0x481   : > { %9541 = vst [vmem:[%s12850_s23 + $0x38] sm:$0xff] %v9528_v4  }
 0x488   : > { %v7749_v57 = vld [vmem:[%s12850_s23 + $0x38] sm:$0xff] (%p12044_p5)  }
 0x489   : > { %7750 = vst [vmem:[%s7705_s20 + $0x70] sm:$0xff] (%p12044_p5), %v7749_v57  }
 0x494   : > { %v7003_v5 = vpop.f32.mrb[112].mxu0 }
 0x495   : > { %v7098_v26 = vpop.f32.mrb[112].mxu1  ;;  %v11248_v6 = vpop.f32.mrb[113].mxu0 }
 0x496   : > { %v7099_v7 = vadd.f32 %v7098_v26, %v7003_v5  ;;  %v11268_v8 = vpop.f32.mrb[113].mxu1  ;;  %v7006_v9 = vpop.f32.mrb[114].mxu0 }
 0x497   : > { %v7101_v10 = vpop.f32.mrb[114].mxu1  ;;  %v11249_v11 = vpop.f32.mrb[115].mxu0 }
 0x498   : > { %v7102_v12 = vadd.f32 %v7101_v10, %v7006_v9  ;;  %v11269_v13 = vpop.f32.mrb[115].mxu1 }
 0x4b4   : > { %v7211_v14 = vpop.f32.mrb[116].mxu0 }
 0x4b5   : > { %v7218_v15 = vadd.f32 %v7211_v14, %v7099_v7  ;;  %v11288_v17 = vpop.f32.mrb[117].mxu0  ;;  %v7326_v18 = vpop.f32.mrb[116].mxu1 }
 0x4b6   : > { %v7214_v19 = vpop.f32.mrb[118].mxu0  ;;  %v11308_v20 = vpop.f32.mrb[117].mxu1 }
 0x4b7   : > { %v7219_v21 = vadd.f32 %v7214_v19, %v7102_v12  ;;  %v7333_v22 = vadd.f32 %v7326_v18, %v7218_v15  ;;  %v11289_v23 = vpop.f32.mrb[119].mxu0  ;;  %v7329_v24 = vpop.f32.mrb[118].mxu1 }
 0x4b8   : > { %v11309_v25 = vpop.f32.mrb[119].mxu1 }
 0x4b9   : > { %v7334_v27 = vadd.f32 %v7329_v24, %v7219_v21 }
 0x4d4   : > { %v7441_v28 = vpop.f32.mrb[120].mxu0 }
 0x4d5   : > { %v7448_v29 = vadd.f32 %v7441_v28, %v7333_v22  ;;  %v11328_v31 = vpop.f32.mrb[121].mxu0  ;;  %v7556_v32 = vpop.f32.mrb[120].mxu1 }
 0x4d6   : > { %v7444_v33 = vpop.f32.mrb[122].mxu0  ;;  %v11348_v34 = vpop.f32.mrb[121].mxu1 }
 0x4d7   : > { %v7449_v35 = vadd.f32 %v7444_v33, %v7334_v27  ;;  %v7563_v36 = vadd.f32 %v7556_v32, %v7448_v29  ;;  %v11329_v37 = vpop.f32.mrb[123].mxu0  ;;  %v7559_v38 = vpop.f32.mrb[122].mxu1 }
 0x4d8   : > { %v11349_v39 = vpop.f32.mrb[123].mxu1 }
 0x4d9   : > { %v7564_v40 = vadd.f32 %v7559_v38, %v7449_v35 }
 0x4f4   : > { %v7672_v41 = vpop.f32.mrb[124].mxu0 }
 0x4f5   : > { %v7679_v42 = vadd.f32 %v7672_v41, %v7563_v36  ;;  %v11368_v16 = vpop.f32.mrb[125].mxu0 }
 0x4f6   : > { %v7675_v43 = vpop.f32.mrb[126].mxu0 }
 0x4f7   : > { %v7681_v44 = vadd.f32 %v14064_v30, %v7679_v42  ;;  %v7680_v45 = vadd.f32 %v7675_v43, %v7564_v40  ;;  %v11369_v53 = vpop.f32.mrb[127].mxu0 }
 0x4f9   : > { %v7682_v46 = vadd.f32 %v14064_v30, %v7680_v45  ;;  %v7683_v47 = vmax.f32 %v7681_v44, 0.0  ;;  %7702 = sbr.rel (!%p12044_p5) target bundleno = 1288 (0x508), region = 77  ;;  %v7721_v30 = vld [vmem:[%s12850_s23] sm:$0xff] (%p12044_p5)  }
 0x4fa   : > { %7722 = vst [vmem:[%s7705_s20] sm:$0xff] (%p12044_p5), %v7721_v30  }
 0x4fb   : > { %v7684_v48 = vmax.f32 %v7682_v46, 0.0 }
 0x4fd   : > { %v9533_v49 = vpack.c.bf16 %v7684_v48, %v7683_v47 }
 0x4ff   : > { %9542 = vst [vmem:[%s12850_s23 + $0x40] sm:$0xff] %v9533_v49  }
 0x506   : > { %v7753_v58 = vld [vmem:[%s12850_s23 + $0x40] sm:$0xff]  }
 0x507   : > { %7754 = vst [vmem:[%s7705_s20 + $0x80] sm:$0xff] %v7753_v58  }
 0x508 PF: > { %p10_p10 = scmp.ge.s32.totalorder %s12031_s16, 4   ;;  %s14364_s12 = smov %s11986_s13 }
 0x509   : > { %s14365_s13 = smov %s12042_s19  ;;  %s14366_s14 = smov %s12031_s16 }
 0x50a   :  { %12 = sbr.rel (!%p10_p10) target bundleno = 2 (0x2), region = 177 }

</bundles_post_ra>
